<compile_context>
chip_gen: v7x
topology: tpu7x:2x2x1
jax: 0.10.0
libtpu: 0.0.40
codegen_flags: <defaults>
</compile_context>

<pallas_src>
import functools
import math

import jax
import jax.numpy as jnp
from jax.experimental import pallas as pl
from jax.experimental.pallas import tpu as pltpu

LANE = 128
ROW_ALIGN = 16                    # sublane tile for bf16 blocks
ROW_TILE = 512                    # row-tile target for the streaming 1x1 stages
MATMUL_DTYPE = jnp.bfloat16       # MXU operand dtype; accumulation stays f32
ACT_DTYPE = jnp.bfloat16          # storage dtype of the y1 / y2 intermediates
_ITEMSIZE = {jnp.float32: 4, jnp.bfloat16: 2}

try:  # 3/4 of physical VMEM: ~48 MiB on v7x, ~96 MiB on v5e/v6e
    _VMEM_CAP = int(pltpu.get_tpu_info().vmem_capacity_bytes) * 3 // 4
except Exception:  # pragma: no cover - conservative fallback
    _VMEM_CAP = 48 << 20
_VMEM_CAP = max(16 << 20, min(_VMEM_CAP, 96 << 20))


def _round_up(x, m):
    return (x + m - 1) // m * m


# --------------------------------------------------------------------------- #
# kernels
# --------------------------------------------------------------------------- #
def _store_stats(stats_ref, y):
    """stats row 0 = per-channel sum, row 1 = per-channel sum of squares.

    `y` must already be zero on invalid (pad) rows."""
    stats_ref[0, 0, 0:1, :] = jnp.sum(y, axis=0, keepdims=True)
    stats_ref[0, 0, 1:2, :] = jnp.sum(y * y, axis=0, keepdims=True)


def _conv1_kernel(x_ref, w_ref, y_ref, stats_ref):
    """Stage A: y1 = x @ w1 (1x1 conv) + BN1 partial stats.

    x's pad rows / pad channels are zero, so no mask or affine is needed."""
    y = jnp.dot(x_ref[0].astype(MATMUL_DTYPE), w_ref[...],
                preferred_element_type=jnp.float32)
    y_ref[0] = y.astype(y_ref.dtype)
    _store_stats(stats_ref, y)                 # pad rows of y are already zero


def _bn_relu_conv1x1_kernel(y_ref, w_ref, scale_ref, shift_ref, mask_ref,
                            o_ref, stats_ref):
    """Stage C: y3 = conv1x1(relu(bn2(y2))) + BN3 partial stats."""
    h = jnp.maximum(y_ref[0].astype(jnp.float32) * scale_ref[...]
                    + shift_ref[...], 0.0) * mask_ref[...]
    y = jnp.dot(h.astype(MATMUL_DTYPE), w_ref[...],
                preferred_element_type=jnp.float32)
    o_ref[0] = y.astype(o_ref.dtype)
    _store_stats(stats_ref, y)                 # masked h -> y's pad rows are zero


def _bn_relu_conv3x3_kernel(y_ref, w_ref, scale_ref, shift_ref, mask_ref,
                            o_ref, stats_ref, h_ref, *, R, Wp8, M0, C1p):
    """Stage B: y2 = conv3x3(relu(bn1(y1))) + BN2 partial stats.

    The conv is K-fused over dx: the scratch holds the three dx-shifted copies
    of h concatenated on the lane axis, so the conv is 3 matmuls with
    K = 3*C1p whose tap rows are all sublane-aligned (offsets are multiples of
    Wp8, itself a multiple of 8).  Taps accumulate into a single local f32
    value with a single output store."""
    m = mask_ref[...]
    h = jnp.maximum(y_ref[0].astype(jnp.float32) * scale_ref[...]
                    + shift_ref[...], 0.0) * m
    # dx = -1 / 0 / +1 copies.  The circular roll wraps only masked-zero pad
    # rows, so the wrapped values equal the correct zero padding.
    h_ref[M0:M0 + R, 0:C1p] = pltpu.roll(h, shift=1, axis=0).astype(h_ref.dtype)
    h_ref[M0:M0 + R, C1p:2 * C1p] = h.astype(h_ref.dtype)
    h_ref[M0:M0 + R, 2 * C1p:3 * C1p] = (
        pltpu.roll(h, shift=R - 1, axis=0).astype(h_ref.dtype))  # == shift -1
    margin = jnp.zeros((M0, 3 * C1p), h_ref.dtype)
    h_ref[0:M0, :] = margin
    h_ref[M0 + R:M0 + R + M0, :] = margin

    acc = None
    for dy in range(3):                        # 3 aligned taps, K = 3*C1p
        start = M0 + (dy - 1) * Wp8            # static, multiple of 8
        c = jnp.dot(h_ref[start:start + R, :], w_ref[dy],
                    preferred_element_type=jnp.float32)
        acc = c if acc is None else acc + c
    o_ref[0] = acc.astype(o_ref.dtype)         # single store of the output block
    _store_stats(stats_ref, acc * m)           # pad rows hold garbage -> mask


def _bn_add_relu_kernel(y_ref, x_ref, scat_ref, scale_ref, shift_ref, out_ref):
    """Stage D: out = relu(bn3(y3) + identity @ scatter)   (index_add_)."""
    h = y_ref[0] * scale_ref[...] + shift_ref[...]
    xs = x_ref[0]
    # hi + lo bf16 split: exact to ~2^-17 since the scatter matrix is 0/1.
    x_hi = xs.astype(MATMUL_DTYPE)
    x_lo = (xs - x_hi.astype(jnp.float32)).astype(MATMUL_DTYPE)
    sc = scat_ref[...]
    ident = jnp.dot(x_hi, sc, preferred_element_type=jnp.float32)
    ident = ident + jnp.dot(x_lo, sc, preferred_element_type=jnp.float32)
    out_ref[0] = jnp.maximum(h + ident, 0.0)


# --------------------------------------------------------------------------- #
# wrapper
# --------------------------------------------------------------------------- #
def bottleneck_forward(x, w1, g1, b1, w2, g2, b2, w3, g3, b3, indices, eps=1e-5):
    N, Cin, H, W = x.shape
    C1, C2, C3 = w1.shape[0], w2.shape[0], w3.shape[0]
    f32 = jnp.float32

    Hp = H + 2
    Wp8 = _round_up(W + 2, 8)                  # padded width -> aligned row stride
    R0 = _round_up(Hp * Wp8, ROW_ALIGN)
    if R0 > ROW_TILE:
        TR = ROW_TILE
        R = _round_up(R0, TR)
    else:
        TR = R0
        R = R0
    nT = R // TR
    M0 = Wp8                                   # scratch margin (multiple of 8)
    Cin_p = _round_up(Cin, LANE)
    C1_p = _round_up(C1, LANE)
    C2_p = _round_up(C2, LANE)
    C3_p = _round_up(C3, LANE)
    count = float(N * H * W)

    # ---- layout plumbing: channels-last padded plane, padded channels ----
    # TODO(synk): for small channel counts (Cin, planes << 128) the lane padding
    #             dominates HBM traffic; packing spatial columns into the lane
    #             dimension would remove it but is not implemented here.
    x_nhwc = jnp.transpose(x, (0, 2, 3, 1)).astype(f32)
    xp = jnp.zeros((N, Hp, Wp8, Cin_p), f32).at[:, 1:H + 1, 1:W + 1, :Cin].set(x_nhwc)
    xp = xp.reshape(N, Hp * Wp8, Cin_p)
    if R != Hp * Wp8:
        xp = jnp.pad(xp, ((0, 0), (0, R - Hp * Wp8), (0, 0)))

    r = jnp.arange(R)
    ip, jp = r // Wp8, r % Wp8
    valid = (r < Hp * Wp8) & (ip >= 1) & (ip <= H) & (jp >= 1) & (jp <= W)
    mask = valid.astype(f32).reshape(R, 1)      # 1.0 on real pixel rows

    def pad2(a, rows, cols):
        return jnp.pad(a, ((0, rows - a.shape[0]), (0, cols - a.shape[1])))

    # weights: 1x1 convs -> (Cin_p, Cout_p); 3x3 -> dx-fused (3, 3*C1_p, C2_p)
    w1m = pad2(jnp.transpose(w1[:, :, 0, 0], (1, 0)), Cin_p, C1_p).astype(MATMUL_DTYPE)
    w3m = pad2(jnp.transpose(w3[:, :, 0, 0], (1, 0)), C2_p, C3_p).astype(MATMUL_DTYPE)
    w2t = jnp.transpose(w2, (2, 3, 1, 0))                        # (3, 3, C1, C2)
    w2t = jnp.pad(w2t, ((0, 0), (0, 0), (0, C1_p - C1), (0, C2_p - C2)))
    w2t = w2t.reshape(3, 3 * C1_p, C2_p).astype(MATMUL_DTYPE)    # [dy, dx*C1p+cin, cout]

    # index_add_(1, indices, identity) == identity @ one_hot(indices, C3)
    scat = pad2(jax.nn.one_hot(indices, C3, dtype=f32), Cin_p, C3_p).astype(MATMUL_DTYPE)

    def gp(v, c):
        return jnp.pad(v.astype(f32), (0, c - v.shape[0]))

    def bn_affine(stats, gamma_p, beta_p):
        st = stats.reshape(-1, 2, stats.shape[-1])
        s = jnp.sum(st[:, 0, :], axis=0)
        ss = jnp.sum(st[:, 1, :], axis=0)
        mu = s / count
        var = jnp.maximum(ss / count - mu * mu, 0.0)     # one-pass variance
        scale = gamma_p * jax.lax.rsqrt(var + eps)
        shift = beta_p - mu * scale
        return scale.reshape(1, -1), shift.reshape(1, -1)

    # --- BlockSpec helpers ---
    def tile(C):                 # (1, TR, C) row tile, grid (N, nT)
        return pl.BlockSpec((1, TR, C), lambda n, t: (n, t, 0))

    def plane(C):                # (1, R, C) full plane, grid (N,)
        return pl.BlockSpec((1, R, C), lambda n: (n, 0, 0))

    def rep2(shape):
        return pl.BlockSpec(shape, lambda n, t: (0,) * len(shape))

    def rep1(shape):
        return pl.BlockSpec(shape, lambda n: (0,) * len(shape))

    def stat2(C):
        return pl.BlockSpec((1, 1, 2, C), lambda n, t: (n, t, 0, 0))

    def stat1(C):
        return pl.BlockSpec((1, 1, 2, C), lambda n: (n, 0, 0, 0))

    def params(sem, block_defs, scratch_bytes=0):
        blk = sum(math.prod(s) * _ITEMSIZE[d] for s, d in block_defs)
        vmem = int(2 * blk + scratch_bytes + (4 << 20))   # double-buffered + margin
        return pltpu.CompilerParams(
            dimension_semantics=sem,
            vmem_limit_bytes=int(min(max(vmem, 16 << 20), _VMEM_CAP)))

    def cost(flops, nbytes):
        return pl.CostEstimate(flops=int(flops), transcendentals=0,
                               bytes_accessed=int(nbytes))

    act_b = _ITEMSIZE[ACT_DTYPE]

    # ---- A: conv1 (1x1) + bn1 partial stats ----
    y1, st1 = pl.pallas_call(
        _conv1_kernel,
        grid=(N, nT),
        in_specs=[tile(Cin_p), rep2((Cin_p, C1_p))],
        out_specs=(tile(C1_p), stat2(C1_p)),
        out_shape=(jax.ShapeDtypeStruct((N, R, C1_p), ACT_DTYPE),
                   jax.ShapeDtypeStruct((N, nT, 2, C1_p), f32)),
        compiler_params=params(
            ("parallel", "parallel"),
            [((1, TR, Cin_p), f32), ((Cin_p, C1_p), MATMUL_DTYPE),
             ((1, TR, C1_p), ACT_DTYPE), ((1, 1, 2, C1_p), f32)]),
        cost_estimate=cost(2 * N * R * Cin_p * C1_p,
                           N * R * (Cin_p * 4 + C1_p * act_b)),
    )(xp, w1m)
    scale1, shift1 = bn_affine(st1, gp(g1, C1_p), gp(b1, C1_p))

    # ---- B: bn1 + relu + conv2 (3x3, dx-fused) + bn2 partial stats ----
    S_rows = R + 2 * M0
    y2, st2 = pl.pallas_call(
        functools.partial(_bn_relu_conv3x3_kernel, R=R, Wp8=Wp8, M0=M0, C1p=C1_p),
        grid=(N,),
        in_specs=[plane(C1_p), rep1((3, 3 * C1_p, C2_p)), rep1((1, C1_p)),
                  rep1((1, C1_p)), rep1((R, 1))],
        out_specs=(plane(C2_p), stat1(C2_p)),
        out_shape=(jax.ShapeDtypeStruct((N, R, C2_p), ACT_DTYPE),
                   jax.ShapeDtypeStruct((N, 1, 2, C2_p), f32)),
        scratch_shapes=[pltpu.VMEM((S_rows, 3 * C1_p), MATMUL_DTYPE)],
        compiler_params=params(
            ("parallel",),
            [((1, R, C1_p), ACT_DTYPE), ((3, 3 * C1_p, C2_p), MATMUL_DTYPE),
             ((1, R, C2_p), ACT_DTYPE), ((1, 1, 2, C2_p), f32), ((R, 1), f32)],
            scratch_bytes=S_rows * 3 * C1_p * 2),
        cost_estimate=cost(2 * 9 * N * R * C1_p * C2_p,
                           N * R * (C1_p + C2_p) * act_b),
    )(y1, w2t, scale1, shift1, mask)
    scale2, shift2 = bn_affine(st2, gp(g2, C2_p), gp(b2, C2_p))

    # ---- C: bn2 + relu + conv3 (1x1) + bn3 partial stats ----
    y3, st3 = pl.pallas_call(
        _bn_relu_conv1x1_kernel,
        grid=(N, nT),
        in_specs=[tile(C2_p), rep2((C2_p, C3_p)), rep2((1, C2_p)),
                  rep2((1, C2_p)),
                  pl.BlockSpec((TR, 1), lambda n, t: (t, 0))],
        out_specs=(tile(C3_p), stat2(C3_p)),
        out_shape=(jax.ShapeDtypeStruct((N, R, C3_p), f32),
                   jax.ShapeDtypeStruct((N, nT, 2, C3_p), f32)),
        compiler_params=params(
            ("parallel", "parallel"),
            [((1, TR, C2_p), ACT_DTYPE), ((C2_p, C3_p), MATMUL_DTYPE),
             ((1, TR, C3_p), f32), ((1, 1, 2, C3_p), f32), ((TR, 1), f32)]),
        cost_estimate=cost(2 * N * R * C2_p * C3_p,
                           N * R * (C2_p * act_b + C3_p * 4)),
    )(y2, w3m, scale2, shift2, mask)
    scale3, shift3 = bn_affine(st3, gp(g3, C3_p), gp(b3, C3_p))

    # ---- D: bn3 + index_add(identity) + relu ----
    out_flat = pl.pallas_call(
        _bn_add_relu_kernel,
        grid=(N, nT),
        in_specs=[tile(C3_p), tile(Cin_p), rep2((Cin_p, C3_p)),
                  rep2((1, C3_p)), rep2((1, C3_p))],
        out_specs=tile(C3_p),
        out_shape=jax.ShapeDtypeStruct((N, R, C3_p), f32),
        compiler_params=params(
            ("parallel", "parallel"),
            [((1, TR, C3_p), f32), ((1, TR, Cin_p), f32),
             ((Cin_p, C3_p), MATMUL_DTYPE), ((1, TR, C3_p), f32)]),
        cost_estimate=cost(2 * 2 * N * R * Cin_p * C3_p,
                           N * R * (2 * C3_p * 4 + Cin_p * 4)),
    )(y3, xp, scat, scale3, shift3)

    # TODO(synk): kernel D still writes the padded plane; emitting the dense
    #             NCHW output directly would save one more XLA pass over it.
    out = out_flat[:, :Hp * Wp8, :C3].reshape(N, Hp, Wp8, C3)
    out = out[:, 1:H + 1, 1:W + 1, :]
    return jnp.transpose(out, (0, 3, 1, 2))                      # back to NCHW


# --------------------------------------------------------------------------- #
# pure-JAX reference (training-mode BN; conv operands in bf16 to mirror the MXU)
# --------------------------------------------------------------------------- #
def ref_forward(x, w1, g1, b1, w2, g2, b2, w3, g3, b3, indices, eps=1e-5):
    def conv(h, w, pad):
        return jax.lax.conv_general_dilated(
            h.astype(MATMUL_DTYPE), w.astype(MATMUL_DTYPE), (1, 1), pad,
            dimension_numbers=("NCHW", "OIHW", "NCHW"),
            preferred_element_type=jnp.float32)

    def bn(h, g, b):
        mu = jnp.mean(h, axis=(0, 2, 3), keepdims=True)
        var = jnp.mean((h - mu) ** 2, axis=(0, 2, 3), keepdims=True)
        return ((h - mu) * jax.lax.rsqrt(var + eps) * g.reshape(1, -1, 1, 1)
                + b.reshape(1, -1, 1, 1))

    out = jax.nn.relu(bn(conv(x, w1, ((0, 0), (0, 0))), g1, b1))
    out = jax.nn.relu(bn(conv(out, w2, ((1, 1), (1, 1))), g2, b2))
    out = bn(conv(out, w3, ((0, 0), (0, 0))), g3, b3)
    out = out.at[:, indices, :, :].add(x)                # index_add_ (dups accumulate)
    return jax.nn.relu(out)


if __name__ == "__main__":
    key = jax.random.PRNGKey(0)
    kx, k1, k2, k3 = jax.random.split(key, 4)

    # Bottleneck sizes: conv1: (planes, inplanes), conv2: (planes, planes),
    # conv3: (planes*expansion, planes), indices: inplanes
    N, Cin, H, W = 2, 8, 16, 16
    planes = 4
    C1, C2, C3 = planes, planes, planes * 4

    x = jax.random.normal(kx, (N, Cin, H, W), jnp.float32)
    w1 = 0.3 * jax.random.normal(k1, (C1, Cin, 1, 1), jnp.float32)
    w2 = 0.3 * jax.random.normal(k2, (C2, C1, 3, 3), jnp.float32)
    w3 = 0.3 * jax.random.normal(k3, (C3, C2, 1, 1), jnp.float32)
    # nn.BatchNorm2d default init: weight=1, bias=0
    g1, b1 = jnp.ones((C1,), jnp.float32), jnp.zeros((C1,), jnp.float32)
    g2, b2 = jnp.ones((C2,), jnp.float32), jnp.zeros((C2,), jnp.float32)
    g3, b3 = jnp.ones((C3,), jnp.float32), jnp.zeros((C3,), jnp.float32)
    # register_buffer('indices', torch.zeros(sizes['indices'], dtype=torch.int))
    indices = jnp.zeros((Cin,), jnp.int32)

    fwd = jax.jit(bottleneck_forward)
    out = jax.block_until_ready(
        fwd(x, w1, g1, b1, w2, g2, b2, w3, g3, b3, indices))
    ref = jax.block_until_ready(
        ref_forward(x, w1, g1, b1, w2, g2, b2, w3, g3, b3, indices))

    assert out.shape == (N, C3, H, W), out.shape
    err = float(jnp.max(jnp.abs(out - ref)))
    # bf16 storage of the y1/y2 intermediates (per the perf review) costs up to
    # ~1e-2 absolute vs the f32-intermediate reference after BN normalization.
    assert jnp.allclose(out, ref, atol=3e-2, rtol=1e-2), err
    print("KERNEL_OK")
</pallas_src>

<mosaic_0001>
module attributes {stable_mosaic.version = 11 : i64} {
  func.func @_conv1_kernel(%arg0: i32, %arg1: i32, %arg2: memref<1x432x128xf32, #tpu.memory_space<vmem>>, %arg3: memref<128x128xbf16, #tpu.memory_space<vmem>>, %arg4: memref<1x432x128xbf16, #tpu.memory_space<vmem>>, %arg5: memref<1x1x2x128xf32, #tpu.memory_space<vmem>>) attributes {dimension_semantics = [#tpu.dimension_semantics<parallel>, #tpu.dimension_semantics<parallel>], iteration_bounds = array<i64: 2, 1>, scalar_prefetch = 0 : i64, scratch_operands = 0 : i64, tpu.core_type = #tpu.core_type<tc>, window_params = [{transform_indices = @transform_0, window_bounds = array<i64: 1, 432, 128>}, {pipeline_mode = #tpu.pipeline_mode<synchronous>, transform_indices = @transform_1, window_bounds = array<i64: 128, 128>}, {transform_indices = @transform_2, window_bounds = array<i64: 1, 432, 128>}, {transform_indices = @transform_3, window_bounds = array<i64: 1, 1, 2, 128>}]} {
    %c0 = arith.constant 0 : index
    %c0_0 = arith.constant 0 : index
    %c0_1 = arith.constant 0 : index
    %0 = vector.load %arg2[%c0, %c0_0, %c0_1] : memref<1x432x128xf32, #tpu.memory_space<vmem>>, vector<1x432x128xf32>
    %1 = vector.shape_cast %0 : vector<1x432x128xf32> to vector<432x128xf32>
    %2 = arith.truncf %1 : vector<432x128xf32> to vector<432x128xbf16>
    %c0_2 = arith.constant 0 : index
    %c0_3 = arith.constant 0 : index
    %3 = vector.load %arg3[%c0_2, %c0_3] : memref<128x128xbf16, #tpu.memory_space<vmem>>, vector<128x128xbf16>
    %cst = arith.constant dense<0.000000e+00> : vector<432x128xf32>
    %4 = tpu.matmul %2, %3, %cst {dimension_numbers = #tpu.dot_dimension_numbers<[1], [0], [0], [1], [0, 0, 1, 1], [], []>} : vector<432x128xbf16>, vector<128x128xbf16>, vector<432x128xf32> -> vector<432x128xf32>
    %5 = arith.truncf %4 : vector<432x128xf32> to vector<432x128xbf16>
    %c0_4 = arith.constant 0 : index
    %c0_5 = arith.constant 0 : index
    %c0_6 = arith.constant 0 : index
    %6 = vector.load %arg4[%c0_4, %c0_5, %c0_6] : memref<1x432x128xbf16, #tpu.memory_space<vmem>>, vector<1x432x128xbf16>
    %7 = vector.shape_cast %6 : vector<1x432x128xbf16> to vector<432x128xbf16>
    %8 = vector.shape_cast %5 : vector<432x128xbf16> to vector<1x432x128xbf16>
    tpu.vector_store %arg4[%c0_4, %c0_5, %c0_6], %8 {strides = array<i32>} : memref<1x432x128xbf16, #tpu.memory_space<vmem>>, vector<1x432x128xbf16>,
    %cst_7 = arith.constant dense<0.000000e+00> : vector<128xf32>
    %9 = vector.multi_reduction <add>, %4, %cst_7 [0] : vector<432x128xf32> to vector<128xf32>
    %10 = vector.shape_cast %9 : vector<128xf32> to vector<1x128xf32>
    %c0_8 = arith.constant 0 : index
    %c0_9 = arith.constant 0 : index
    %c0_10 = arith.constant 0 : index
    %c0_11 = arith.constant 0 : index
    %11 = vector.load %arg5[%c0_8, %c0_9, %c0_10, %c0_11] : memref<1x1x2x128xf32, #tpu.memory_space<vmem>>, vector<1x1x1x128xf32>
    %12 = vector.shape_cast %11 : vector<1x1x1x128xf32> to vector<1x128xf32>
    %13 = vector.shape_cast %10 : vector<1x128xf32> to vector<1x1x1x128xf32>
    tpu.vector_store %arg5[%c0_8, %c0_9, %c0_10, %c0_11], %13 {strides = array<i32>} : memref<1x1x2x128xf32, #tpu.memory_space<vmem>>, vector<1x1x1x128xf32>,
    %14 = arith.mulf %4, %4 : vector<432x128xf32>
    %cst_12 = arith.constant dense<0.000000e+00> : vector<128xf32>
    %15 = vector.multi_reduction <add>, %14, %cst_12 [0] : vector<432x128xf32> to vector<128xf32>
    %16 = vector.shape_cast %15 : vector<128xf32> to vector<1x128xf32>
    %c0_13 = arith.constant 0 : index
    %c0_14 = arith.constant 0 : index
    %c1 = arith.constant 1 : index
    %c0_15 = arith.constant 0 : index
    %17 = vector.load %arg5[%c0_13, %c0_14, %c1, %c0_15] : memref<1x1x2x128xf32, #tpu.memory_space<vmem>>, vector<1x1x1x128xf32>
    %18 = vector.shape_cast %17 : vector<1x1x1x128xf32> to vector<1x128xf32>
    %19 = vector.shape_cast %16 : vector<1x128xf32> to vector<1x1x1x128xf32>
    tpu.vector_store %arg5[%c0_13, %c0_14, %c1, %c0_15], %19 {strides = array<i32>} : memref<1x1x2x128xf32, #tpu.memory_space<vmem>>, vector<1x1x1x128xf32>,
    return
  }
  func.func @transform_0(%arg0: i32, %arg1: i32) -> (i32, i32, i32) {
    %c0_i32 = arith.constant 0 : i32
    %c0_i32_0 = arith.constant 0 : i32
    return %arg0, %arg1, %c0_i32 : i32, i32, i32
  }
  func.func @transform_1(%arg0: i32, %arg1: i32) -> (i32, i32) {
    %c0_i32 = arith.constant 0 : i32
    %c0_i32_0 = arith.constant 0 : i32
    %c0_i32_1 = arith.constant 0 : i32
    return %c0_i32, %c0_i32_0 : i32, i32
  }
  func.func @transform_2(%arg0: i32, %arg1: i32) -> (i32, i32, i32) {
    %c0_i32 = arith.constant 0 : i32
    %c0_i32_0 = arith.constant 0 : i32
    return %arg0, %arg1, %c0_i32 : i32, i32, i32
  }
  func.func @transform_3(%arg0: i32, %arg1: i32) -> (i32, i32, i32, i32) {
    %c0_i32 = arith.constant 0 : i32
    %c0_i32_0 = arith.constant 0 : i32
    %c0_i32_1 = arith.constant 0 : i32
    return %arg0, %arg1, %c0_i32, %c0_i32_0 : i32, i32, i32, i32
  }
}

module attributes {stable_mosaic.version = 11 : i64} {
  func.func @_bn_relu_conv3x3_kernel(%arg0: i32, %arg1: memref<1x432x128xbf16, #tpu.memory_space<vmem>>, %arg2: memref<3x384x128xbf16, #tpu.memory_space<vmem>>, %arg3: memref<1x128xf32, #tpu.memory_space<vmem>>, %arg4: memref<1x128xf32, #tpu.memory_space<vmem>>, %arg5: memref<432x1xf32, #tpu.memory_space<vmem>>, %arg6: memref<1x432x128xbf16, #tpu.memory_space<vmem>>, %arg7: memref<1x1x2x128xf32, #tpu.memory_space<vmem>>, %arg8: memref<480x384xbf16, #tpu.memory_space<vmem>>) attributes {dimension_semantics = [#tpu.dimension_semantics<parallel>], iteration_bounds = array<i64: 2>, scalar_prefetch = 0 : i64, scratch_operands = 1 : i64, tpu.core_type = #tpu.core_type<tc>, window_params = [{transform_indices = @transform_0, window_bounds = array<i64: 1, 432, 128>}, {pipeline_mode = #tpu.pipeline_mode<synchronous>, transform_indices = @transform_1, window_bounds = array<i64: 3, 384, 128>}, {pipeline_mode = #tpu.pipeline_mode<synchronous>, transform_indices = @transform_2, window_bounds = array<i64: 1, 128>}, {pipeline_mode = #tpu.pipeline_mode<synchronous>, transform_indices = @transform_3, window_bounds = array<i64: 1, 128>}, {pipeline_mode = #tpu.pipeline_mode<synchronous>, transform_indices = @transform_4, window_bounds = array<i64: 432, 1>}, {transform_indices = @transform_5, window_bounds = array<i64: 1, 432, 128>}, {transform_indices = @transform_6, window_bounds = array<i64: 1, 1, 2, 128>}]} {
    %c0 = arith.constant 0 : index
    %c0_0 = arith.constant 0 : index
    %0 = vector.load %arg5[%c0, %c0_0] : memref<432x1xf32, #tpu.memory_space<vmem>>, vector<432x1xf32>
    %c0_1 = arith.constant 0 : index
    %c0_2 = arith.constant 0 : index
    %c0_3 = arith.constant 0 : index
    %1 = vector.load %arg1[%c0_1, %c0_2, %c0_3] : memref<1x432x128xbf16, #tpu.memory_space<vmem>>, vector<1x432x128xbf16>
    %2 = vector.shape_cast %1 : vector<1x432x128xbf16> to vector<432x128xbf16>
    %3 = arith.extf %2 : vector<432x128xbf16> to vector<432x128xf32>
    %c0_4 = arith.constant 0 : index
    %c0_5 = arith.constant 0 : index
    %4 = vector.load %arg3[%c0_4, %c0_5] : memref<1x128xf32, #tpu.memory_space<vmem>>, vector<1x128xf32>
    %5 = vector.broadcast %4 : vector<1x128xf32> to vector<432x128xf32>
    %6 = arith.mulf %3, %5 : vector<432x128xf32>
    %c0_6 = arith.constant 0 : index
    %c0_7 = arith.constant 0 : index
    %7 = vector.load %arg4[%c0_6, %c0_7] : memref<1x128xf32, #tpu.memory_space<vmem>>, vector<1x128xf32>
    %8 = vector.broadcast %7 : vector<1x128xf32> to vector<432x128xf32>
    %9 = arith.addf %6, %8 : vector<432x128xf32>
    %cst = arith.constant 0.000000e+00 : f32
    %10 = vector.broadcast %cst : f32 to vector<432x128xf32>
    %11 = arith.maximumf %9, %10 : vector<432x128xf32>
    %12 = vector.broadcast %0 : vector<432x1xf32> to vector<432x128xf32>
    %13 = arith.mulf %11, %12 : vector<432x128xf32>
    %c1_i32 = arith.constant 1 : i32
    %14 = tpu.dynamic_rotate %13 by %c1_i32 dim 0 : vector<432x128xf32>, i32 -> vector<432x128xf32>
    %15 = arith.truncf %14 : vector<432x128xf32> to vector<432x128xbf16>
    %c24 = arith.constant 24 : index
    %c0_8 = arith.constant 0 : index
    %16 = vector.load %arg8[%c24, %c0_8] : memref<480x384xbf16, #tpu.memory_space<vmem>>, vector<432x128xbf16>
    tpu.vector_store %arg8[%c24, %c0_8], %15 {strides = array<i32>} : memref<480x384xbf16, #tpu.memory_space<vmem>>, vector<432x128xbf16>,
    %17 = arith.truncf %13 : vector<432x128xf32> to vector<432x128xbf16>
    %c24_9 = arith.constant 24 : index
    %c128 = arith.constant 128 : index
    %18 = vector.load %arg8[%c24_9, %c128] : memref<480x384xbf16, #tpu.memory_space<vmem>>, vector<432x128xbf16>
    tpu.vector_store %arg8[%c24_9, %c128], %17 {strides = array<i32>} : memref<480x384xbf16, #tpu.memory_space<vmem>>, vector<432x128xbf16>,
    %c431_i32 = arith.constant 431 : i32
    %19 = tpu.dynamic_rotate %13 by %c431_i32 dim 0 : vector<432x128xf32>, i32 -> vector<432x128xf32>
    %20 = arith.truncf %19 : vector<432x128xf32> to vector<432x128xbf16>
    %c24_10 = arith.constant 24 : index
    %c256 = arith.constant 256 : index
    %21 = vector.load %arg8[%c24_10, %c256] : memref<480x384xbf16, #tpu.memory_space<vmem>>, vector<432x128xbf16>
    tpu.vector_store %arg8[%c24_10, %c256], %20 {strides = array<i32>} : memref<480x384xbf16, #tpu.memory_space<vmem>>, vector<432x128xbf16>,
    %cst_11 = arith.constant 0.000000e+00 : bf16
    %22 = vector.broadcast %cst_11 : bf16 to vector<24x384xbf16>
    %c0_12 = arith.constant 0 : index
    %c0_13 = arith.constant 0 : index
    %23 = vector.load %arg8[%c0_12, %c0_13] : memref<480x384xbf16, #tpu.memory_space<vmem>>, vector<24x384xbf16>
    tpu.vector_store %arg8[%c0_12, %c0_13], %22 {strides = array<i32>} : memref<480x384xbf16, #tpu.memory_space<vmem>>, vector<24x384xbf16>,
    %c456 = arith.constant 456 : index
    %c0_14 = arith.constant 0 : index
    %24 = vector.load %arg8[%c456, %c0_14] : memref<480x384xbf16, #tpu.memory_space<vmem>>, vector<24x384xbf16>
    tpu.vector_store %arg8[%c456, %c0_14], %22 {strides = array<i32>} : memref<480x384xbf16, #tpu.memory_space<vmem>>, vector<24x384xbf16>,
    %c0_15 = arith.constant 0 : index
    %c0_16 = arith.constant 0 : index
    %25 = vector.load %arg8[%c0_15, %c0_16] : memref<480x384xbf16, #tpu.memory_space<vmem>>, vector<432x384xbf16>
    %c0_17 = arith.constant 0 : index
    %c0_18 = arith.constant 0 : index
    %c0_19 = arith.constant 0 : index
    %26 = vector.load %arg2[%c0_17, %c0_18, %c0_19] : memref<3x384x128xbf16, #tpu.memory_space<vmem>>, vector<1x384x128xbf16>
    %27 = vector.shape_cast %26 : vector<1x384x128xbf16> to vector<384x128xbf16>
    %cst_20 = arith.constant dense<0.000000e+00> : vector<432x128xf32>
    %28 = tpu.matmul %25, %27, %cst_20 {dimension_numbers = #tpu.dot_dimension_numbers<[1], [0], [0], [1], [0, 0, 1, 1], [], []>} : vector<432x384xbf16>, vector<384x128xbf16>, vector<432x128xf32> -> vector<432x128xf32>
    %c24_21 = arith.constant 24 : index
    %c0_22 = arith.constant 0 : index
    %29 = vector.load %arg8[%c24_21, %c0_22] : memref<480x384xbf16, #tpu.memory_space<vmem>>, vector<432x384xbf16>
    %c1 = arith.constant 1 : index
    %c0_23 = arith.constant 0 : index
    %c0_24 = arith.constant 0 : index
    %30 = vector.load %arg2[%c1, %c0_23, %c0_24] : memref<3x384x128xbf16, #tpu.memory_space<vmem>>, vector<1x384x128xbf16>
    %31 = vector.shape_cast %30 : vector<1x384x128xbf16> to vector<384x128xbf16>
    %cst_25 = arith.constant dense<0.000000e+00> : vector<432x128xf32>
    %32 = tpu.matmul %29, %31, %cst_25 {dimension_numbers = #tpu.dot_dimension_numbers<[1], [0], [0], [1], [0, 0, 1, 1], [], []>} : vector<432x384xbf16>, vector<384x128xbf16>, vector<432x128xf32> -> vector<432x128xf32>
    %33 = arith.addf %28, %32 : vector<432x128xf32>
    %c48 = arith.constant 48 : index
    %c0_26 = arith.constant 0 : index
    %34 = vector.load %arg8[%c48, %c0_26] : memref<480x384xbf16, #tpu.memory_space<vmem>>, vector<432x384xbf16>
    %c2 = arith.constant 2 : index
    %c0_27 = arith.constant 0 : index
    %c0_28 = arith.constant 0 : index
    %35 = vector.load %arg2[%c2, %c0_27, %c0_28] : memref<3x384x128xbf16, #tpu.memory_space<vmem>>, vector<1x384x128xbf16>
    %36 = vector.shape_cast %35 : vector<1x384x128xbf16> to vector<384x128xbf16>
    %cst_29 = arith.constant dense<0.000000e+00> : vector<432x128xf32>
    %37 = tpu.matmul %34, %36, %cst_29 {dimension_numbers = #tpu.dot_dimension_numbers<[1], [0], [0], [1], [0, 0, 1, 1], [], []>} : vector<432x384xbf16>, vector<384x128xbf16>, vector<432x128xf32> -> vector<432x128xf32>
    %38 = arith.addf %33, %37 : vector<432x128xf32>
    %39 = arith.truncf %38 : vector<432x128xf32> to vector<432x128xbf16>
    %c0_30 = arith.constant 0 : index
    %c0_31 = arith.constant 0 : index
    %c0_32 = arith.constant 0 : index
    %40 = vector.load %arg6[%c0_30, %c0_31, %c0_32] : memref<1x432x128xbf16, #tpu.memory_space<vmem>>, vector<1x432x128xbf16>
    %41 = vector.shape_cast %40 : vector<1x432x128xbf16> to vector<432x128xbf16>
    %42 = vector.shape_cast %39 : vector<432x128xbf16> to vector<1x432x128xbf16>
    tpu.vector_store %arg6[%c0_30, %c0_31, %c0_32], %42 {strides = array<i32>} : memref<1x432x128xbf16, #tpu.memory_space<vmem>>, vector<1x432x128xbf16>,
    %43 = vector.broadcast %0 : vector<432x1xf32> to vector<432x128xf32>
    %44 = arith.mulf %38, %43 : vector<432x128xf32>
    %cst_33 = arith.constant dense<0.000000e+00> : vector<128xf32>
    %45 = vector.multi_reduction <add>, %44, %cst_33 [0] : vector<432x128xf32> to vector<128xf32>
    %46 = vector.shape_cast %45 : vector<128xf32> to vector<1x128xf32>
    %c0_34 = arith.constant 0 : index
    %c0_35 = arith.constant 0 : index
    %c0_36 = arith.constant 0 : index
    %c0_37 = arith.constant 0 : index
    %47 = vector.load %arg7[%c0_34, %c0_35, %c0_36, %c0_37] : memref<1x1x2x128xf32, #tpu.memory_space<vmem>>, vector<1x1x1x128xf32>
    %48 = vector.shape_cast %47 : vector<1x1x1x128xf32> to vector<1x128xf32>
    %49 = vector.shape_cast %46 : vector<1x128xf32> to vector<1x1x1x128xf32>
    tpu.vector_store %arg7[%c0_34, %c0_35, %c0_36, %c0_37], %49 {strides = array<i32>} : memref<1x1x2x128xf32, #tpu.memory_space<vmem>>, vector<1x1x1x128xf32>,
    %50 = arith.mulf %44, %44 : vector<432x128xf32>
    %cst_38 = arith.constant dense<0.000000e+00> : vector<128xf32>
    %51 = vector.multi_reduction <add>, %50, %cst_38 [0] : vector<432x128xf32> to vector<128xf32>
    %52 = vector.shape_cast %51 : vector<128xf32> to vector<1x128xf32>
    %c0_39 = arith.constant 0 : index
    %c0_40 = arith.constant 0 : index
    %c1_41 = arith.constant 1 : index
    %c0_42 = arith.constant 0 : index
    %53 = vector.load %arg7[%c0_39, %c0_40, %c1_41, %c0_42] : memref<1x1x2x128xf32, #tpu.memory_space<vmem>>, vector<1x1x1x128xf32>
    %54 = vector.shape_cast %53 : vector<1x1x1x128xf32> to vector<1x128xf32>
    %55 = vector.shape_cast %52 : vector<1x128xf32> to vector<1x1x1x128xf32>
    tpu.vector_store %arg7[%c0_39, %c0_40, %c1_41, %c0_42], %55 {strides = array<i32>} : memref<1x1x2x128xf32, #tpu.memory_space<vmem>>, vector<1x1x1x128xf32>,
    return
  }
  func.func @transform_0(%arg0: i32) -> (i32, i32, i32) {
    %c0_i32 = arith.constant 0 : i32
    %c0_i32_0 = arith.constant 0 : i32
    %c0_i32_1 = arith.constant 0 : i32
    return %arg0, %c0_i32, %c0_i32_0 : i32, i32, i32
  }
  func.func @transform_1(%arg0: i32) -> (i32, i32, i32) {
    %c0_i32 = arith.constant 0 : i32
    %c0_i32_0 = arith.constant 0 : i32
    %c0_i32_1 = arith.constant 0 : i32
    %c0_i32_2 = arith.constant 0 : i32
    return %c0_i32, %c0_i32_0, %c0_i32_1 : i32, i32, i32
  }
  func.func @transform_2(%arg0: i32) -> (i32, i32) {
    %c0_i32 = arith.constant 0 : i32
    %c0_i32_0 = arith.constant 0 : i32
    %c0_i32_1 = arith.constant 0 : i32
    return %c0_i32, %c0_i32_0 : i32, i32
  }
  func.func @transform_3(%arg0: i32) -> (i32, i32) {
    %c0_i32 = arith.constant 0 : i32
    %c0_i32_0 = arith.constant 0 : i32
    %c0_i32_1 = arith.constant 0 : i32
    return %c0_i32, %c0_i32_0 : i32, i32
  }
  func.func @transform_4(%arg0: i32) -> (i32, i32) {
    %c0_i32 = arith.constant 0 : i32
    %c0_i32_0 = arith.constant 0 : i32
    %c0_i32_1 = arith.constant 0 : i32
    return %c0_i32, %c0_i32_0 : i32, i32
  }
  func.func @transform_5(%arg0: i32) -> (i32, i32, i32) {
    %c0_i32 = arith.constant 0 : i32
    %c0_i32_0 = arith.constant 0 : i32
    %c0_i32_1 = arith.constant 0 : i32
    return %arg0, %c0_i32, %c0_i32_0 : i32, i32, i32
  }
  func.func @transform_6(%arg0: i32) -> (i32, i32, i32, i32) {
    %c0_i32 = arith.constant 0 : i32
    %c0_i32_0 = arith.constant 0 : i32
    %c0_i32_1 = arith.constant 0 : i32
    %c0_i32_2 = arith.constant 0 : i32
    return %arg0, %c0_i32, %c0_i32_0, %c0_i32_1 : i32, i32, i32, i32
  }
}

module attributes {stable_mosaic.version = 11 : i64} {
  func.func @_bn_relu_conv1x1_kernel(%arg0: i32, %arg1: i32, %arg2: memref<1x432x128xbf16, #tpu.memory_space<vmem>>, %arg3: memref<128x128xbf16, #tpu.memory_space<vmem>>, %arg4: memref<1x128xf32, #tpu.memory_space<vmem>>, %arg5: memref<1x128xf32, #tpu.memory_space<vmem>>, %arg6: memref<432x1xf32, #tpu.memory_space<vmem>>, %arg7: memref<1x432x128xf32, #tpu.memory_space<vmem>>, %arg8: memref<1x1x2x128xf32, #tpu.memory_space<vmem>>) attributes {dimension_semantics = [#tpu.dimension_semantics<parallel>, #tpu.dimension_semantics<parallel>], iteration_bounds = array<i64: 2, 1>, scalar_prefetch = 0 : i64, scratch_operands = 0 : i64, tpu.core_type = #tpu.core_type<tc>, window_params = [{transform_indices = @transform_0, window_bounds = array<i64: 1, 432, 128>}, {pipeline_mode = #tpu.pipeline_mode<synchronous>, transform_indices = @transform_1, window_bounds = array<i64: 128, 128>}, {pipeline_mode = #tpu.pipeline_mode<synchronous>, transform_indices = @transform_2, window_bounds = array<i64: 1, 128>}, {pipeline_mode = #tpu.pipeline_mode<synchronous>, transform_indices = @transform_3, window_bounds = array<i64: 1, 128>}, {transform_indices = @transform_4, window_bounds = array<i64: 432, 1>}, {transform_indices = @transform_5, window_bounds = array<i64: 1, 432, 128>}, {transform_indices = @transform_6, window_bounds = array<i64: 1, 1, 2, 128>}]} {
    %c0 = arith.constant 0 : index
    %c0_0 = arith.constant 0 : index
    %c0_1 = arith.constant 0 : index
    %0 = vector.load %arg2[%c0, %c0_0, %c0_1] : memref<1x432x128xbf16, #tpu.memory_space<vmem>>, vector<1x432x128xbf16>
    %1 = vector.shape_cast %0 : vector<1x432x128xbf16> to vector<432x128xbf16>
    %2 = arith.extf %1 : vector<432x128xbf16> to vector<432x128xf32>
    %c0_2 = arith.constant 0 : index
    %c0_3 = arith.constant 0 : index
    %3 = vector.load %arg4[%c0_2, %c0_3] : memref<1x128xf32, #tpu.memory_space<vmem>>, vector<1x128xf32>
    %4 = vector.broadcast %3 : vector<1x128xf32> to vector<432x128xf32>
    %5 = arith.mulf %2, %4 : vector<432x128xf32>
    %c0_4 = arith.constant 0 : index
    %c0_5 = arith.constant 0 : index
    %6 = vector.load %arg5[%c0_4, %c0_5] : memref<1x128xf32, #tpu.memory_space<vmem>>, vector<1x128xf32>
    %7 = vector.broadcast %6 : vector<1x128xf32> to vector<432x128xf32>
    %8 = arith.addf %5, %7 : vector<432x128xf32>
    %cst = arith.constant 0.000000e+00 : f32
    %9 = vector.broadcast %cst : f32 to vector<432x128xf32>
    %10 = arith.maximumf %8, %9 : vector<432x128xf32>
    %c0_6 = arith.constant 0 : index
    %c0_7 = arith.constant 0 : index
    %11 = vector.load %arg6[%c0_6, %c0_7] : memref<432x1xf32, #tpu.memory_space<vmem>>, vector<432x1xf32>
    %12 = vector.broadcast %11 : vector<432x1xf32> to vector<432x128xf32>
    %13 = arith.mulf %10, %12 : vector<432x128xf32>
    %14 = arith.truncf %13 : vector<432x128xf32> to vector<432x128xbf16>
    %c0_8 = arith.constant 0 : index
    %c0_9 = arith.constant 0 : index
    %15 = vector.load %arg3[%c0_8, %c0_9] : memref<128x128xbf16, #tpu.memory_space<vmem>>, vector<128x128xbf16>
    %cst_10 = arith.constant dense<0.000000e+00> : vector<432x128xf32>
    %16 = tpu.matmul %14, %15, %cst_10 {dimension_numbers = #tpu.dot_dimension_numbers<[1], [0], [0], [1], [0, 0, 1, 1], [], []>} : vector<432x128xbf16>, vector<128x128xbf16>, vector<432x128xf32> -> vector<432x128xf32>
    %c0_11 = arith.constant 0 : index
    %c0_12 = arith.constant 0 : index
    %c0_13 = arith.constant 0 : index
    %17 = vector.load %arg7[%c0_11, %c0_12, %c0_13] : memref<1x432x128xf32, #tpu.memory_space<vmem>>, vector<1x432x128xf32>
    %18 = vector.shape_cast %17 : vector<1x432x128xf32> to vector<432x128xf32>
    %19 = vector.shape_cast %16 : vector<432x128xf32> to vector<1x432x128xf32>
    tpu.vector_store %arg7[%c0_11, %c0_12, %c0_13], %19 {strides = array<i32>} : memref<1x432x128xf32, #tpu.memory_space<vmem>>, vector<1x432x128xf32>,
    %cst_14 = arith.constant dense<0.000000e+00> : vector<128xf32>
    %20 = vector.multi_reduction <add>, %16, %cst_14 [0] : vector<432x128xf32> to vector<128xf32>
    %21 = vector.shape_cast %20 : vector<128xf32> to vector<1x128xf32>
    %c0_15 = arith.constant 0 : index
    %c0_16 = arith.constant 0 : index
    %c0_17 = arith.constant 0 : index
    %c0_18 = arith.constant 0 : index
    %22 = vector.load %arg8[%c0_15, %c0_16, %c0_17, %c0_18] : memref<1x1x2x128xf32, #tpu.memory_space<vmem>>, vector<1x1x1x128xf32>
    %23 = vector.shape_cast %22 : vector<1x1x1x128xf32> to vector<1x128xf32>
    %24 = vector.shape_cast %21 : vector<1x128xf32> to vector<1x1x1x128xf32>
    tpu.vector_store %arg8[%c0_15, %c0_16, %c0_17, %c0_18], %24 {strides = array<i32>} : memref<1x1x2x128xf32, #tpu.memory_space<vmem>>, vector<1x1x1x128xf32>,
    %25 = arith.mulf %16, %16 : vector<432x128xf32>
    %cst_19 = arith.constant dense<0.000000e+00> : vector<128xf32>
    %26 = vector.multi_reduction <add>, %25, %cst_19 [0] : vector<432x128xf32> to vector<128xf32>
    %27 = vector.shape_cast %26 : vector<128xf32> to vector<1x128xf32>
    %c0_20 = arith.constant 0 : index
    %c0_21 = arith.constant 0 : index
    %c1 = arith.constant 1 : index
    %c0_22 = arith.constant 0 : index
    %28 = vector.load %arg8[%c0_20, %c0_21, %c1, %c0_22] : memref<1x1x2x128xf32, #tpu.memory_space<vmem>>, vector<1x1x1x128xf32>
    %29 = vector.shape_cast %28 : vector<1x1x1x128xf32> to vector<1x128xf32>
    %30 = vector.shape_cast %27 : vector<1x128xf32> to vector<1x1x1x128xf32>
    tpu.vector_store %arg8[%c0_20, %c0_21, %c1, %c0_22], %30 {strides = array<i32>} : memref<1x1x2x128xf32, #tpu.memory_space<vmem>>, vector<1x1x1x128xf32>,
    return
  }
  func.func @transform_0(%arg0: i32, %arg1: i32) -> (i32, i32, i32) {
    %c0_i32 = arith.constant 0 : i32
    %c0_i32_0 = arith.constant 0 : i32
    return %arg0, %arg1, %c0_i32 : i32, i32, i32
  }
  func.func @transform_1(%arg0: i32, %arg1: i32) -> (i32, i32) {
    %c0_i32 = arith.constant 0 : i32
    %c0_i32_0 = arith.constant 0 : i32
    %c0_i32_1 = arith.constant 0 : i32
    return %c0_i32, %c0_i32_0 : i32, i32
  }
  func.func @transform_2(%arg0: i32, %arg1: i32) -> (i32, i32) {
    %c0_i32 = arith.constant 0 : i32
    %c0_i32_0 = arith.constant 0 : i32
    %c0_i32_1 = arith.constant 0 : i32
    return %c0_i32, %c0_i32_0 : i32, i32
  }
  func.func @transform_3(%arg0: i32, %arg1: i32) -> (i32, i32) {
    %c0_i32 = arith.constant 0 : i32
    %c0_i32_0 = arith.constant 0 : i32
    %c0_i32_1 = arith.constant 0 : i32
    return %c0_i32, %c0_i32_0 : i32, i32
  }
  func.func @transform_4(%arg0: i32, %arg1: i32) -> (i32, i32) {
    %c0_i32 = arith.constant 0 : i32
    %c0_i32_0 = arith.constant 0 : i32
    return %arg1, %c0_i32 : i32, i32
  }
  func.func @transform_5(%arg0: i32, %arg1: i32) -> (i32, i32, i32) {
    %c0_i32 = arith.constant 0 : i32
    %c0_i32_0 = arith.constant 0 : i32
    return %arg0, %arg1, %c0_i32 : i32, i32, i32
  }
  func.func @transform_6(%arg0: i32, %arg1: i32) -> (i32, i32, i32, i32) {
    %c0_i32 = arith.constant 0 : i32
    %c0_i32_0 = arith.constant 0 : i32
    %c0_i32_1 = arith.constant 0 : i32
    return %arg0, %arg1, %c0_i32, %c0_i32_0 : i32, i32, i32, i32
  }
}

module attributes {stable_mosaic.version = 11 : i64} {
  func.func @_bn_add_relu_kernel(%arg0: i32, %arg1: i32, %arg2: memref<1x432x128xf32, #tpu.memory_space<vmem>>, %arg3: memref<1x432x128xf32, #tpu.memory_space<vmem>>, %arg4: memref<128x128xbf16, #tpu.memory_space<vmem>>, %arg5: memref<1x128xf32, #tpu.memory_space<vmem>>, %arg6: memref<1x128xf32, #tpu.memory_space<vmem>>, %arg7: memref<1x432x128xf32, #tpu.memory_space<vmem>>) attributes {dimension_semantics = [#tpu.dimension_semantics<parallel>, #tpu.dimension_semantics<parallel>], iteration_bounds = array<i64: 2, 1>, scalar_prefetch = 0 : i64, scratch_operands = 0 : i64, tpu.core_type = #tpu.core_type<tc>, window_params = [{transform_indices = @transform_0, window_bounds = array<i64: 1, 432, 128>}, {transform_indices = @transform_1, window_bounds = array<i64: 1, 432, 128>}, {pipeline_mode = #tpu.pipeline_mode<synchronous>, transform_indices = @transform_2, window_bounds = array<i64: 128, 128>}, {pipeline_mode = #tpu.pipeline_mode<synchronous>, transform_indices = @transform_3, window_bounds = array<i64: 1, 128>}, {pipeline_mode = #tpu.pipeline_mode<synchronous>, transform_indices = @transform_4, window_bounds = array<i64: 1, 128>}, {transform_indices = @transform_5, window_bounds = array<i64: 1, 432, 128>}]} {
    %c0 = arith.constant 0 : index
    %c0_0 = arith.constant 0 : index
    %c0_1 = arith.constant 0 : index
    %0 = vector.load %arg2[%c0, %c0_0, %c0_1] : memref<1x432x128xf32, #tpu.memory_space<vmem>>, vector<1x432x128xf32>
    %1 = vector.shape_cast %0 : vector<1x432x128xf32> to vector<432x128xf32>
    %c0_2 = arith.constant 0 : index
    %c0_3 = arith.constant 0 : index
    %2 = vector.load %arg5[%c0_2, %c0_3] : memref<1x128xf32, #tpu.memory_space<vmem>>, vector<1x128xf32>
    %3 = vector.broadcast %2 : vector<1x128xf32> to vector<432x128xf32>
    %4 = arith.mulf %1, %3 : vector<432x128xf32>
    %c0_4 = arith.constant 0 : index
    %c0_5 = arith.constant 0 : index
    %5 = vector.load %arg6[%c0_4, %c0_5] : memref<1x128xf32, #tpu.memory_space<vmem>>, vector<1x128xf32>
    %6 = vector.broadcast %5 : vector<1x128xf32> to vector<432x128xf32>
    %7 = arith.addf %4, %6 : vector<432x128xf32>
    %c0_6 = arith.constant 0 : index
    %c0_7 = arith.constant 0 : index
    %c0_8 = arith.constant 0 : index
    %8 = vector.load %arg3[%c0_6, %c0_7, %c0_8] : memref<1x432x128xf32, #tpu.memory_space<vmem>>, vector<1x432x128xf32>
    %9 = vector.shape_cast %8 : vector<1x432x128xf32> to vector<432x128xf32>
    %10 = arith.truncf %9 : vector<432x128xf32> to vector<432x128xbf16>
    %11 = arith.extf %10 : vector<432x128xbf16> to vector<432x128xf32>
    %12 = arith.subf %9, %11 : vector<432x128xf32>
    %13 = arith.truncf %12 : vector<432x128xf32> to vector<432x128xbf16>
    %c0_9 = arith.constant 0 : index
    %c0_10 = arith.constant 0 : index
    %14 = vector.load %arg4[%c0_9, %c0_10] : memref<128x128xbf16, #tpu.memory_space<vmem>>, vector<128x128xbf16>
    %cst = arith.constant dense<0.000000e+00> : vector<432x128xf32>
    %15 = tpu.matmul %10, %14, %cst {dimension_numbers = #tpu.dot_dimension_numbers<[1], [0], [0], [1], [0, 0, 1, 1], [], []>} : vector<432x128xbf16>, vector<128x128xbf16>, vector<432x128xf32> -> vector<432x128xf32>
    %cst_11 = arith.constant dense<0.000000e+00> : vector<432x128xf32>
    %16 = tpu.matmul %13, %14, %cst_11 {dimension_numbers = #tpu.dot_dimension_numbers<[1], [0], [0], [1], [0, 0, 1, 1], [], []>} : vector<432x128xbf16>, vector<128x128xbf16>, vector<432x128xf32> -> vector<432x128xf32>
    %17 = arith.addf %15, %16 : vector<432x128xf32>
    %18 = arith.addf %7, %17 : vector<432x128xf32>
    %cst_12 = arith.constant 0.000000e+00 : f32
    %19 = vector.broadcast %cst_12 : f32 to vector<432x128xf32>
    %20 = arith.maximumf %18, %19 : vector<432x128xf32>
    %c0_13 = arith.constant 0 : index
    %c0_14 = arith.constant 0 : index
    %c0_15 = arith.constant 0 : index
    %21 = vector.load %arg7[%c0_13, %c0_14, %c0_15] : memref<1x432x128xf32, #tpu.memory_space<vmem>>, vector<1x432x128xf32>
    %22 = vector.shape_cast %21 : vector<1x432x128xf32> to vector<432x128xf32>
    %23 = vector.shape_cast %20 : vector<432x128xf32> to vector<1x432x128xf32>
    tpu.vector_store %arg7[%c0_13, %c0_14, %c0_15], %23 {strides = array<i32>} : memref<1x432x128xf32, #tpu.memory_space<vmem>>, vector<1x432x128xf32>,
    return
  }
  func.func @transform_0(%arg0: i32, %arg1: i32) -> (i32, i32, i32) {
    %c0_i32 = arith.constant 0 : i32
    %c0_i32_0 = arith.constant 0 : i32
    return %arg0, %arg1, %c0_i32 : i32, i32, i32
  }
  func.func @transform_1(%arg0: i32, %arg1: i32) -> (i32, i32, i32) {
    %c0_i32 = arith.constant 0 : i32
    %c0_i32_0 = arith.constant 0 : i32
    return %arg0, %arg1, %c0_i32 : i32, i32, i32
  }
  func.func @transform_2(%arg0: i32, %arg1: i32) -> (i32, i32) {
    %c0_i32 = arith.constant 0 : i32
    %c0_i32_0 = arith.constant 0 : i32
    %c0_i32_1 = arith.constant 0 : i32
    return %c0_i32, %c0_i32_0 : i32, i32
  }
  func.func @transform_3(%arg0: i32, %arg1: i32) -> (i32, i32) {
    %c0_i32 = arith.constant 0 : i32
    %c0_i32_0 = arith.constant 0 : i32
    %c0_i32_1 = arith.constant 0 : i32
    return %c0_i32, %c0_i32_0 : i32, i32
  }
  func.func @transform_4(%arg0: i32, %arg1: i32) -> (i32, i32) {
    %c0_i32 = arith.constant 0 : i32
    %c0_i32_0 = arith.constant 0 : i32
    %c0_i32_1 = arith.constant 0 : i32
    return %c0_i32, %c0_i32_0 : i32, i32
  }
  func.func @transform_5(%arg0: i32, %arg1: i32) -> (i32, i32, i32) {
    %c0_i32 = arith.constant 0 : i32
    %c0_i32_0 = arith.constant 0 : i32
    return %arg0, %arg1, %c0_i32 : i32, i32, i32
  }
}

</mosaic_0001>

<bundles_post_ra>
// kernel: bottleneck_forward.4
= control target key start
LH: loop header
LB: loop body
LE: loop exit
PB: predicated region body
PF: predicated region fallthrough
CT: control target
= control target key end

     0   :  { %s1740_s12 = smov 0   ;;  %s1742_s13 = smov 0   ;;  %s2120_s0 = inlined_call_operand.vmem [shape: f32[2,432,128], index: 0, kind: input, shape index: {}]   ;;  %s2121_s1 = inlined_call_operand.vmem [shape: bf16[128,128], index: 1, kind: input, shape index: {}]   ;;  %s2122_s2 = inlined_call_operand.vmem [shape: bf16[2,432,128], index: 2, kind: output, shape index: {0}]   ;;  %s2123_s3 = inlined_call_operand.vmem [shape: f32[2,1,2,128], index: 3, kind: output, shape index: {1}]  }
   0x1   :  { %s1744_s14 = smov 0  }
   0x2 LB: > { %s26_s15 = sadd.s32 1, %s1712_s13  ;;  %p1200_p0 = scmp.ge.s32.totalorder %s1716_s14, 1  ;;  %s1716_s14 = sphi %s1744_s14, %s14_s14   ;;  %s1712_s13 = sphi %s1742_s13, %s2125_s13   ;;  %s1708_s12 = sphi %s1740_s12, %s2124_s12  }
   0x3   : > { %p28_p1 = scmp.ge.s32.totalorder %s26_s15, 2  ;;  %p163_p2 = scmp.lt.s32.totalorder %s1716_s14, 3 }
   0x5   : > { %s2127_s15 = smov (%p28_p1, %s26_s15), 0  ;;  %p164_p3 = pnand %p1200_p0, %p163_p2 }
   0x6   : > { %v1686_v0 = vld [vmem:[%s2121_s1] sm:$0xff] (!%p164_p3)   ;;  %v1718_v1 = vmov (!%p164_p3), 0.0   ;;  %v1687_v2 = vld [vmem:[%s2121_s1 + $0x8] sm:$0xff] (!%p164_p3)   ;;  %vm1719_vm0 = vmmov (!%p164_p3), 0   ;;  %v1688_v3 = vld [vmem:[%s2121_s1 + $0x10] sm:$0xff] (!%p164_p3)   ;;  %p203_p4 = scmp.lt.s32.totalorder (!%p164_p3), %s1708_s12, 1 }
   0x7   : > { %167 = sbr.rel (%p164_p3) target bundleno = 426 (0x1aa), region = 28  ;;  %1518 = vmatprep.subr.bf16.mxu0 (!%p164_p3), %v1718_v1  ;;  %1642 = vmatprep.subr.bf16.mxu1 (!%p164_p3), %v1718_v1  ;;  %v1689_v4 = vld [vmem:[%s2121_s1 + $0x18] sm:$0xff] (!%p164_p3)   ;;  %v1690_v5 = vld [vmem:[%s2121_s1 + $0x20] sm:$0xff] (!%p164_p3)   ;;  %v1691_v6 = vld [vmem:[%s2121_s1 + $0x28] sm:$0xff] (!%p164_p3)  }
   0x8   : > { %1519 = vmatpush3.bf16.msra.mxu0 (!%p164_p3), %v1686_v0  ;;  %1534 = vmatprep.mubr.msk.bf16.mxu0 (!%p164_p3), %vm1719_vm0, %v1718_v1  ;;  %v1692_v7 = vld [vmem:[%s2121_s1 + $0x30] sm:$0xff] (!%p164_p3)   ;;  %v1693_v8 = vld [vmem:[%s2121_s1 + $0x38] sm:$0xff] (!%p164_p3)  }
   0x9   : > { %1520 = vmatprep.subr.bf16.mxu0 (!%p164_p3), %v1718_v1  ;;  %1650 = vmatpush3.bf16.msra.mxu1 (!%p164_p3), %v1686_v0 }
   0xa   : > { %1643 = vmatprep.subr.bf16.mxu1 (!%p164_p3), %v1718_v1  ;;  %1590 = vmatprep.mubr.msk.bf16.mxu1 (!%p164_p3), %vm1719_vm0, %v1718_v1 }
   0xc   : > { %1521 = vmatpush3.bf16.msra.mxu0 (!%p164_p3), %v1687_v2 }
   0xd   : > { %1522 = vmatprep.subr.bf16.mxu0 (!%p164_p3), %v1718_v1  ;;  %1651 = vmatpush3.bf16.msra.mxu1 (!%p164_p3), %v1687_v2 }
   0xe   : > { %1644 = vmatprep.subr.bf16.mxu1 %v1718_v1  ;;  %s2129_s12 = smov (!%p203_p4, %s1708_s12), 1 }
   0xf   : > { %s1658_s28 = smul.u32 432, %s2129_s12  ;;  %s1203_s17 = sshll.u32 %s2129_s12, 1 }
  0x10   : > { %1523 = vmatpush3.bf16.msra.mxu0 %v1688_v3  ;;  %s1659_s9 = smul.u32 216, %s2129_s12  ;;  %s228_s20 = scalar_lea.vmem %s2123_s3, %s1203_s17 }
  0x11   : > { %1524 = vmatprep.subr.bf16.mxu0 %v1718_v1  ;;  %1652 = vmatpush3.bf16.msra.mxu1 %v1688_v3  ;;  %s1806_s6 = scalar_lea.vmem %s2120_s0, %s1658_s28 }
  0x12   : > { %1645 = vmatprep.subr.bf16.mxu1 %v1718_v1  ;;  %v230_v9 = vld [vmem:[%s1806_s6] sm:$0xff]  ;;  %v231_v10 = vld [vmem:[%s1806_s6 + $0x8] sm:$0xff]  ;;  %v232_v15 = vld [vmem:[%s1806_s6 + $0x10] sm:$0xff]  ;;  %s1924_s16 = scalar_lea.vmem %s2122_s2, %s1659_s9 }
  0x13   : > { %v258_v11 = vld [vmem:[%s1806_s6 + $0xe0] sm:$0xff]  ;;  %v259_v12 = vld [vmem:[%s1806_s6 + $0xe8] sm:$0xff]  ;;  %v284_v13 = vpack.c.bf16 %v231_v10, %v230_v9  ;;  %v233_v16 = vld [vmem:[%s1806_s6 + $0x18] sm:$0xff] }
  0x14   : > { %1525 = vmatpush3.bf16.msra.mxu0 %v1689_v4  ;;  %v298_v14 = vpack.c.bf16 %v259_v12, %v258_v11  ;;  %v260_v17 = vld [vmem:[%s1806_s6 + $0xf0] sm:$0xff]  ;;  %v261_v18 = vld [vmem:[%s1806_s6 + $0xf8] sm:$0xff]  ;;  %v285_v19 = vpack.c.bf16 %v233_v16, %v232_v15  ;;  %v234_v21 = vld [vmem:[%s1806_s6 + $0x20] sm:$0xff] }
  0x15   : > { %1526 = vmatprep.subr.bf16.mxu0 %v1718_v1  ;;  %1653 = vmatpush3.bf16.msra.mxu1 %v1689_v4  ;;  %v299_v20 = vpack.c.bf16 %v261_v18, %v260_v17  ;;  %v235_v22 = vld [vmem:[%s1806_s6 + $0x28] sm:$0xff]  ;;  %v262_v23 = vld [vmem:[%s1806_s6 + $0x100] sm:$0xff]  ;;  %v236_v27 = vld [vmem:[%s1806_s6 + $0x30] sm:$0xff] }
  0x16   : > { %1646 = vmatprep.subr.bf16.mxu1 %v1718_v1  ;;  %v263_v24 = vld [vmem:[%s1806_s6 + $0x108] sm:$0xff]  ;;  %v286_v25 = vpack.c.bf16 %v235_v22, %v234_v21  ;;  %v237_v28 = vld [vmem:[%s1806_s6 + $0x38] sm:$0xff]  ;;  %v264_v29 = vld [vmem:[%s1806_s6 + $0x110] sm:$0xff] }
  0x17   : > { %v300_v26 = vpack.c.bf16 %v263_v24, %v262_v23  ;;  %v265_v30 = vld [vmem:[%s1806_s6 + $0x118] sm:$0xff]  ;;  %v287_v31 = vpack.c.bf16 %v237_v28, %v236_v27  ;;  %v238_v33 = vld [vmem:[%s1806_s6 + $0x40] sm:$0xff]  ;;  %v239_v34 = vld [vmem:[%s1806_s6 + $0x48] sm:$0xff] }
  0x18   : > { %1527 = vmatpush3.bf16.msra.mxu0 %v1690_v5  ;;  %v301_v32 = vpack.c.bf16 %v265_v30, %v264_v29  ;;  %v266_v35 = vld [vmem:[%s1806_s6 + $0x120] sm:$0xff]  ;;  %v267_v36 = vld [vmem:[%s1806_s6 + $0x128] sm:$0xff]  ;;  %v288_v37 = vpack.c.bf16 %v239_v34, %v238_v33  ;;  %v240_v39 = vld [vmem:[%s1806_s6 + $0x50] sm:$0xff] }
  0x19   : > { %1528 = vmatprep.subr.bf16.mxu0 %v1718_v1  ;;  %1654 = vmatpush3.bf16.msra.mxu1 %v1690_v5  ;;  %v302_v38 = vpack.c.bf16 %v267_v36, %v266_v35  ;;  %v241_v40 = vld [vmem:[%s1806_s6 + $0x58] sm:$0xff]  ;;  %v268_v41 = vld [vmem:[%s1806_s6 + $0x130] sm:$0xff]  ;;  %v242_v45 = vld [vmem:[%s1806_s6 + $0x60] sm:$0xff] }
  0x1a   : > { %1647 = vmatprep.subr.bf16.mxu1 %v1718_v1  ;;  %v269_v42 = vld [vmem:[%s1806_s6 + $0x138] sm:$0xff]  ;;  %v289_v43 = vpack.c.bf16 %v241_v40, %v240_v39  ;;  %v243_v46 = vld [vmem:[%s1806_s6 + $0x68] sm:$0xff]  ;;  %v270_v47 = vld [vmem:[%s1806_s6 + $0x140] sm:$0xff] }
  0x1b   : > { %v303_v44 = vpack.c.bf16 %v269_v42, %v268_v41  ;;  %v271_v48 = vld [vmem:[%s1806_s6 + $0x148] sm:$0xff]  ;;  %v290_v49 = vpack.c.bf16 %v243_v46, %v242_v45  ;;  %v244_v51 = vld [vmem:[%s1806_s6 + $0x70] sm:$0xff]  ;;  %v245_v52 = vld [vmem:[%s1806_s6 + $0x78] sm:$0xff] }
  0x1c   : > { %1529 = vmatpush3.bf16.msra.mxu0 %v1691_v6  ;;  %v304_v50 = vpack.c.bf16 %v271_v48, %v270_v47  ;;  %v272_v53 = vld [vmem:[%s1806_s6 + $0x150] sm:$0xff]  ;;  %v273_v54 = vld [vmem:[%s1806_s6 + $0x158] sm:$0xff]  ;;  %v291_v55 = vpack.c.bf16 %v245_v52, %v244_v51  ;;  %v246_v57 = vld [vmem:[%s1806_s6 + $0x80] sm:$0xff] }
  0x1d   : > { %1530 = vmatprep.subr.bf16.mxu0 %v1718_v1  ;;  %1655 = vmatpush3.bf16.msra.mxu1 %v1691_v6  ;;  %v305_v56 = vpack.c.bf16 %v273_v54, %v272_v53  ;;  %v247_v58 = vld [vmem:[%s1806_s6 + $0x88] sm:$0xff]  ;;  %v274_v59 = vld [vmem:[%s1806_s6 + $0x160] sm:$0xff]  ;;  %v248_v63 = vld [vmem:[%s1806_s6 + $0x90] sm:$0xff] }
  0x1e   : > { %1648 = vmatprep.subr.bf16.mxu1 %v1718_v1  ;;  %v275_v60 = vld [vmem:[%s1806_s6 + $0x168] sm:$0xff]  ;;  %v292_v61 = vpack.c.bf16 %v247_v58, %v246_v57  ;;  %v249_v0 = vld [vmem:[%s1806_s6 + $0x98] sm:$0xff]  ;;  %v276_v2 = vld [vmem:[%s1806_s6 + $0x170] sm:$0xff] }
  0x1f   : > { %v306_v62 = vpack.c.bf16 %v275_v60, %v274_v59  ;;  %v277_v3 = vld [vmem:[%s1806_s6 + $0x178] sm:$0xff]  ;;  %v293_v4 = vpack.c.bf16 %v249_v0, %v248_v63  ;;  %v250_v6 = vld [vmem:[%s1806_s6 + $0xa0] sm:$0xff]  ;;  %v279_v9 = vld [vmem:[%s1806_s6 + $0x188] sm:$0xff] }
  0x20   : > { %1531 = vmatpush3.bf16.msra.mxu0 %v1692_v7  ;;  %v307_v5 = vpack.c.bf16 %v277_v3, %v276_v2  ;;  %v252_v12 = vld [vmem:[%s1806_s6 + $0xb0] sm:$0xff]  ;;  %v281_v15 = vld [vmem:[%s1806_s6 + $0x198] sm:$0xff]  ;;  %v254_v18 = vld [vmem:[%s1806_s6 + $0xc0] sm:$0xff] }
  0x21   : > { %1532 = vmatprep.subr.bf16.mxu0 %v1718_v1  ;;  %1656 = vmatpush3.bf16.msra.mxu1 %v1692_v7  ;;  %v251_v7 = vld [vmem:[%s1806_s6 + $0xa8] sm:$0xff]  ;;  %v256_v24 = vld [vmem:[%s1806_s6 + $0xd0] sm:$0xff] }
  0x22   : > { %1649 = vmatprep.subr.bf16.mxu1 %v1718_v1  ;;  %v294_v10 = vpack.c.bf16 %v251_v7, %v250_v6  ;;  %v283_v21 = vld [vmem:[%s1806_s6 + $0x1a8] sm:$0xff] }
  0x24   : > { %1533 = vmatpush3.bf16.msra.mxu0 %v1693_v8 }
  0x25   : > { %1657 = vmatpush3.bf16.msra.mxu1 %v1693_v8  ;;  %v278_v8 = vld [vmem:[%s1806_s6 + $0x180] sm:$0xff] }
  0x26   : > { %v308_v11 = vpack.c.bf16 %v279_v9, %v278_v8 }
  0x27   : > { %1535 = vmatmul.mubr.bf16.vlgmr.msra.gmra.mrb[0].mxu0 %v284_v13  ;;  %v253_v13 = vld [vmem:[%s1806_s6 + $0xb8] sm:$0xff] }
  0x28   : > { %1538 = vmatprep.mubr.msk.bf16.mxu0 %vm1719_vm0, %v1718_v1  ;;  %1591 = vmatmul.mubr.bf16.vlgmr.msra.gmra.mrb[0].mxu1 %v298_v14  ;;  %v280_v14 = vld [vmem:[%s1806_s6 + $0x190] sm:$0xff]  ;;  %v295_v16 = vpack.c.bf16 %v253_v13, %v252_v12 }
  0x29   : > { %1594 = vmatprep.mubr.msk.bf16.mxu1 %vm1719_vm0, %v1718_v1  ;;  %v309_v17 = vpack.c.bf16 %v281_v15, %v280_v14 }
  0x2f   : > { %1539 = vmatmul.mubr.bf16.gmra.mrb[4].mxu0 %v285_v19  ;;  %v255_v19 = vld [vmem:[%s1806_s6 + $0xc8] sm:$0xff] }
  0x30   : > { %1542 = vmatprep.mubr.msk.bf16.mxu0 %vm1719_vm0, %v1718_v1  ;;  %1595 = vmatmul.mubr.bf16.gmra.mrb[4].mxu1 %v299_v20  ;;  %v282_v20 = vld [vmem:[%s1806_s6 + $0x1a0] sm:$0xff]  ;;  %v296_v22 = vpack.c.bf16 %v255_v19, %v254_v18 }
  0x31   : > { %1598 = vmatprep.mubr.msk.bf16.mxu1 %vm1719_vm0, %v1718_v1  ;;  %v310_v23 = vpack.c.bf16 %v283_v21, %v282_v20 }
  0x37   : > { %1543 = vmatmul.mubr.bf16.gmra.mrb[8].mxu0 %v286_v25  ;;  %v257_v25 = vld [vmem:[%s1806_s6 + $0xd8] sm:$0xff] }
  0x38   : > { %1546 = vmatprep.mubr.msk.bf16.mxu0 %vm1719_vm0, %v1718_v1  ;;  %1599 = vmatmul.mubr.bf16.gmra.mrb[8].mxu1 %v300_v26  ;;  %v297_v26 = vpack.c.bf16 %v257_v25, %v256_v24 }
  0x39   : > { %1602 = vmatprep.mubr.msk.bf16.mxu1 %vm1719_vm0, %v1718_v1 }
  0x3f   : > { %1547 = vmatmul.mubr.bf16.gmra.mrb[12].mxu0 %v287_v31 }
  0x40   : > { %1550 = vmatprep.mubr.msk.bf16.mxu0 %vm1719_vm0, %v1718_v1  ;;  %1603 = vmatmul.mubr.bf16.gmra.mrb[12].mxu1 %v301_v32 }
  0x41   : > { %1606 = vmatprep.mubr.msk.bf16.mxu1 %vm1719_vm0, %v1718_v1 }
  0x47   : > { %1551 = vmatmul.mubr.bf16.gmra.mrb[16].mxu0 %v288_v37 }
  0x48   : > { %1554 = vmatprep.mubr.msk.bf16.mxu0 %vm1719_vm0, %v1718_v1  ;;  %1607 = vmatmul.mubr.bf16.gmra.mrb[16].mxu1 %v302_v38 }
  0x49   : > { %1610 = vmatprep.mubr.msk.bf16.mxu1 %vm1719_vm0, %v1718_v1 }
  0x4f   : > { %1555 = vmatmul.mubr.bf16.gmra.mrb[20].mxu0 %v289_v43 }
  0x50   : > { %1558 = vmatprep.mubr.msk.bf16.mxu0 %vm1719_vm0, %v1718_v1  ;;  %1611 = vmatmul.mubr.bf16.gmra.mrb[20].mxu1 %v303_v44 }
  0x51   : > { %1614 = vmatprep.mubr.msk.bf16.mxu1 %vm1719_vm0, %v1718_v1 }
  0x57   : > { %1559 = vmatmul.mubr.bf16.gmra.mrb[24].mxu0 %v290_v49 }
  0x58   : > { %1562 = vmatprep.mubr.msk.bf16.mxu0 %vm1719_vm0, %v1718_v1  ;;  %1615 = vmatmul.mubr.bf16.gmra.mrb[24].mxu1 %v304_v50 }
  0x59   : > { %1618 = vmatprep.mubr.msk.bf16.mxu1 %vm1719_vm0, %v1718_v1 }
  0x5f   : > { %1563 = vmatmul.mubr.bf16.gmra.mrb[28].mxu0 %v291_v55 }
  0x60   : > { %1566 = vmatprep.mubr.msk.bf16.mxu0 %vm1719_vm0, %v1718_v1  ;;  %1619 = vmatmul.mubr.bf16.gmra.mrb[28].mxu1 %v305_v56 }
  0x61   : > { %1622 = vmatprep.mubr.msk.bf16.mxu1 %vm1719_vm0, %v1718_v1 }
  0x67   : > { %1567 = vmatmul.mubr.bf16.gmra.mrb[32].mxu0 %v292_v61 }
  0x68   : > { %1570 = vmatprep.mubr.msk.bf16.mxu0 %vm1719_vm0, %v1718_v1  ;;  %1623 = vmatmul.mubr.bf16.gmra.mrb[32].mxu1 %v306_v62 }
  0x69   : > { %1626 = vmatprep.mubr.msk.bf16.mxu1 %vm1719_vm0, %v1718_v1 }
  0x6f   : > { %1571 = vmatmul.mubr.bf16.gmra.mrb[36].mxu0 %v293_v4 }
  0x70   : > { %1574 = vmatprep.mubr.msk.bf16.mxu0 %vm1719_vm0, %v1718_v1  ;;  %1627 = vmatmul.mubr.bf16.gmra.mrb[36].mxu1 %v307_v5 }
  0x71   : > { %1630 = vmatprep.mubr.msk.bf16.mxu1 %vm1719_vm0, %v1718_v1 }
  0x77   : > { %1575 = vmatmul.mubr.bf16.gmra.mrb[40].mxu0 %v294_v10 }
  0x78   : > { %1578 = vmatprep.mubr.msk.bf16.mxu0 %vm1719_vm0, %v1718_v1  ;;  %1631 = vmatmul.mubr.bf16.gmra.mrb[40].mxu1 %v308_v11 }
  0x79   : > { %1634 = vmatprep.mubr.msk.bf16.mxu1 %vm1719_vm0, %v1718_v1 }
  0x7f   : > { %1579 = vmatmul.mubr.bf16.gmra.mrb[44].mxu0 %v295_v16 }
  0x80   : > { %1582 = vmatprep.mubr.msk.bf16.mxu0 %vm1719_vm0, %v1718_v1  ;;  %1635 = vmatmul.mubr.bf16.gmra.mrb[44].mxu1 %v309_v17 }
  0x81   : > { %1638 = vmatprep.mubr.msk.bf16.mxu1 %vm1719_vm0, %v1718_v1 }
  0x87   : > { %1583 = vmatmul.mubr.bf16.gmra.mrb[48].mxu0 %v296_v22 }
  0x88   : > { %1586 = vmatprep.mubr.msk.bf16.mxu0 %vm1719_vm0, %v1718_v1  ;;  %1639 = vmatmul.mubr.bf16.gmra.mrb[48].mxu1 %v310_v23 }
  0x8f   : > { %1587 = vmatmul.mubr.bf16.gmra.mrb[52].mxu0 %v297_v26 }
  0xfa   : > { %v409_v27 = vpop.f32.mrb[0].mxu0 }
  0xfb   : > { %v1536_v28 = vpop.f32.mrb[1].mxu0  ;;  %v1919_v29 = vpop.f32.mrb[0].mxu1  ;;  %v954_v1 = vmul.f32 %v409_v27, %v409_v27 }
  0xfc   : > { %v412_v30 = vpop.f32.mrb[2].mxu0  ;;  %v1592_v31 = vpop.f32.mrb[1].mxu1 }
  0xfd   : > { %v1325_v32 = vpack.c.bf16 %v412_v30, %v409_v27  ;;  %v894_v33 = vadd.f32 %v412_v30, %v409_v27  ;;  %v955_v34 = vmul.f32 %v412_v30, %v412_v30  ;;  %v1537_v35 = vpop.f32.mrb[3].mxu0  ;;  %v1926_v36 = vpop.f32.mrb[2].mxu1 }
  0xfe   : > { %v1395_v37 = vpack.c.bf16 %v1926_v36, %v1919_v29  ;;  %v1593_v38 = vpop.f32.mrb[3].mxu1 }
  0xff   : > { %1326 = vst [vmem:[%s1924_s16] sm:$0xff] %v1325_v32   ;;  %v1008_v39 = vadd.f32 %v955_v34, %v954_v1 }
 0x100   : > { %1470 = vst [vmem:[%s1924_s16 + $0x70] sm:$0xff] %v1395_v37  }
 0x102   : > { %v417_v40 = vpop.f32.mrb[4].mxu0 }
 0x103   : > { %v895_v41 = vadd.f32 %v894_v33, %v417_v40  ;;  %v956_v42 = vmul.f32 %v417_v40, %v417_v40  ;;  %v1540_v43 = vpop.f32.mrb[5].mxu0  ;;  %v1932_v44 = vpop.f32.mrb[4].mxu1 }
 0x104   : > { %v420_v45 = vpop.f32.mrb[6].mxu0  ;;  %v1596_v46 = vpop.f32.mrb[5].mxu1 }
 0x105   : > { %v1009_v47 = vadd.f32 %v1008_v39, %v956_v42  ;;  %v1330_v48 = vpack.c.bf16 %v420_v45, %v417_v40  ;;  %v896_v49 = vadd.f32 %v895_v41, %v420_v45  ;;  %v957_v50 = vmul.f32 %v420_v45, %v420_v45  ;;  %v1541_v51 = vpop.f32.mrb[7].mxu0  ;;  %v1934_v52 = vpop.f32.mrb[6].mxu1 }
 0x106   : > { %v1400_v53 = vpack.c.bf16 %v1934_v52, %v1932_v44  ;;  %v1597_v54 = vpop.f32.mrb[7].mxu1 }
 0x107   : > { %1457 = vst [vmem:[%s1924_s16 + $0x8] sm:$0xff] %v1330_v48   ;;  %v1010_v55 = vadd.f32 %v1009_v47, %v957_v50 }
 0x108   : > { %1471 = vst [vmem:[%s1924_s16 + $0x78] sm:$0xff] %v1400_v53  }
 0x10a   : > { %v425_v56 = vpop.f32.mrb[8].mxu0 }
 0x10b   : > { %v897_v57 = vadd.f32 %v896_v49, %v425_v56  ;;  %v958_v58 = vmul.f32 %v425_v56, %v425_v56  ;;  %v1544_v59 = vpop.f32.mrb[9].mxu0  ;;  %v1940_v60 = vpop.f32.mrb[8].mxu1 }
 0x10c   : > { %v428_v61 = vpop.f32.mrb[10].mxu0  ;;  %v1600_v62 = vpop.f32.mrb[9].mxu1 }
 0x10d   : > { %v1011_v63 = vadd.f32 %v1010_v55, %v958_v58  ;;  %v1335_v0 = vpack.c.bf16 %v428_v61, %v425_v56  ;;  %v898_v2 = vadd.f32 %v897_v57, %v428_v61  ;;  %v959_v3 = vmul.f32 %v428_v61, %v428_v61  ;;  %v1545_v4 = vpop.f32.mrb[11].mxu0  ;;  %v1942_v5 = vpop.f32.mrb[10].mxu1 }
 0x10e   : > { %v1405_v6 = vpack.c.bf16 %v1942_v5, %v1940_v60  ;;  %v1601_v7 = vpop.f32.mrb[11].mxu1 }
 0x10f   : > { %1458 = vst [vmem:[%s1924_s16 + $0x10] sm:$0xff] %v1335_v0   ;;  %v1012_v8 = vadd.f32 %v1011_v63, %v959_v3 }
 0x110   : > { %1472 = vst [vmem:[%s1924_s16 + $0x80] sm:$0xff] %v1405_v6  }
 0x112   : > { %v433_v9 = vpop.f32.mrb[12].mxu0 }
 0x113   : > { %v899_v10 = vadd.f32 %v898_v2, %v433_v9  ;;  %v960_v11 = vmul.f32 %v433_v9, %v433_v9  ;;  %v1548_v12 = vpop.f32.mrb[13].mxu0  ;;  %v1948_v13 = vpop.f32.mrb[12].mxu1 }
 0x114   : > { %v436_v14 = vpop.f32.mrb[14].mxu0  ;;  %v1604_v15 = vpop.f32.mrb[13].mxu1 }
 0x115   : > { %v1013_v16 = vadd.f32 %v1012_v8, %v960_v11  ;;  %v1340_v17 = vpack.c.bf16 %v436_v14, %v433_v9  ;;  %v900_v18 = vadd.f32 %v899_v10, %v436_v14  ;;  %v961_v19 = vmul.f32 %v436_v14, %v436_v14  ;;  %v1549_v20 = vpop.f32.mrb[15].mxu0  ;;  %v1950_v21 = vpop.f32.mrb[14].mxu1 }
 0x116   : > { %v1410_v22 = vpack.c.bf16 %v1950_v21, %v1948_v13  ;;  %v1605_v23 = vpop.f32.mrb[15].mxu1 }
 0x117   : > { %1459 = vst [vmem:[%s1924_s16 + $0x18] sm:$0xff] %v1340_v17   ;;  %v1014_v24 = vadd.f32 %v1013_v16, %v961_v19 }
 0x118   : > { %1473 = vst [vmem:[%s1924_s16 + $0x88] sm:$0xff] %v1410_v22  }
 0x11a   : > { %v441_v25 = vpop.f32.mrb[16].mxu0 }
 0x11b   : > { %v901_v26 = vadd.f32 %v900_v18, %v441_v25  ;;  %v962_v27 = vmul.f32 %v441_v25, %v441_v25  ;;  %v1552_v28 = vpop.f32.mrb[17].mxu0  ;;  %v1956_v30 = vpop.f32.mrb[16].mxu1 }
 0x11c   : > { %v444_v31 = vpop.f32.mrb[18].mxu0  ;;  %v1608_v1 = vpop.f32.mrb[17].mxu1 }
 0x11d   : > { %v1015_v32 = vadd.f32 %v1014_v24, %v962_v27  ;;  %v1345_v33 = vpack.c.bf16 %v444_v31, %v441_v25  ;;  %v902_v34 = vadd.f32 %v901_v26, %v444_v31  ;;  %v963_v35 = vmul.f32 %v444_v31, %v444_v31  ;;  %v1553_v37 = vpop.f32.mrb[19].mxu0  ;;  %v1958_v38 = vpop.f32.mrb[18].mxu1 }
 0x11e   : > { %v1415_v39 = vpack.c.bf16 %v1958_v38, %v1956_v30  ;;  %v1609_v40 = vpop.f32.mrb[19].mxu1 }
 0x11f   : > { %1460 = vst [vmem:[%s1924_s16 + $0x20] sm:$0xff] %v1345_v33   ;;  %v1016_v41 = vadd.f32 %v1015_v32, %v963_v35 }
 0x120   : > { %1474 = vst [vmem:[%s1924_s16 + $0x90] sm:$0xff] %v1415_v39  }
 0x122   : > { %v449_v42 = vpop.f32.mrb[20].mxu0 }
 0x123   : > { %v903_v43 = vadd.f32 %v902_v34, %v449_v42  ;;  %v964_v45 = vmul.f32 %v449_v42, %v449_v42  ;;  %v1556_v46 = vpop.f32.mrb[21].mxu0  ;;  %v1964_v47 = vpop.f32.mrb[20].mxu1 }
 0x124   : > { %v452_v48 = vpop.f32.mrb[22].mxu0  ;;  %v1612_v49 = vpop.f32.mrb[21].mxu1 }
 0x125   : > { %v1017_v50 = vadd.f32 %v1016_v41, %v964_v45  ;;  %v1350_v51 = vpack.c.bf16 %v452_v48, %v449_v42  ;;  %v904_v53 = vadd.f32 %v903_v43, %v452_v48  ;;  %v965_v54 = vmul.f32 %v452_v48, %v452_v48  ;;  %v1557_v55 = vpop.f32.mrb[23].mxu0  ;;  %v1966_v56 = vpop.f32.mrb[22].mxu1 }
 0x126   : > { %v1420_v57 = vpack.c.bf16 %v1966_v56, %v1964_v47  ;;  %v1613_v58 = vpop.f32.mrb[23].mxu1 }
 0x127   : > { %1461 = vst [vmem:[%s1924_s16 + $0x28] sm:$0xff] %v1350_v51   ;;  %v1018_v59 = vadd.f32 %v1017_v50, %v965_v54 }
 0x128   : > { %1475 = vst [vmem:[%s1924_s16 + $0x98] sm:$0xff] %v1420_v57  }
 0x12a   : > { %v457_v61 = vpop.f32.mrb[24].mxu0 }
 0x12b   : > { %v905_v62 = vadd.f32 %v904_v53, %v457_v61  ;;  %v966_v63 = vmul.f32 %v457_v61, %v457_v61  ;;  %v1560_v0 = vpop.f32.mrb[25].mxu0  ;;  %v1972_v2 = vpop.f32.mrb[24].mxu1 }
 0x12c   : > { %v460_v3 = vpop.f32.mrb[26].mxu0  ;;  %v1616_v4 = vpop.f32.mrb[25].mxu1 }
 0x12d   : > { %v1019_v6 = vadd.f32 %v1018_v59, %v966_v63  ;;  %v1355_v7 = vpack.c.bf16 %v460_v3, %v457_v61  ;;  %v906_v8 = vadd.f32 %v905_v62, %v460_v3  ;;  %v967_v9 = vmul.f32 %v460_v3, %v460_v3  ;;  %v1561_v10 = vpop.f32.mrb[27].mxu0  ;;  %v1974_v11 = vpop.f32.mrb[26].mxu1 }
 0x12e   : > { %v1425_v12 = vpack.c.bf16 %v1974_v11, %v1972_v2  ;;  %v1617_v14 = vpop.f32.mrb[27].mxu1 }
 0x12f   : > { %1462 = vst [vmem:[%s1924_s16 + $0x30] sm:$0xff] %v1355_v7   ;;  %v1020_v15 = vadd.f32 %v1019_v6, %v967_v9 }
 0x130   : > { %1476 = vst [vmem:[%s1924_s16 + $0xa0] sm:$0xff] %v1425_v12  }
 0x132   : > { %v465_v16 = vpop.f32.mrb[28].mxu0 }
 0x133   : > { %v907_v17 = vadd.f32 %v906_v8, %v465_v16  ;;  %v968_v18 = vmul.f32 %v465_v16, %v465_v16  ;;  %v1564_v19 = vpop.f32.mrb[29].mxu0  ;;  %v1980_v20 = vpop.f32.mrb[28].mxu1 }
 0x134   : > { %v468_v22 = vpop.f32.mrb[30].mxu0  ;;  %v1620_v23 = vpop.f32.mrb[29].mxu1 }
 0x135   : > { %v1021_v24 = vadd.f32 %v1020_v15, %v968_v18  ;;  %v1360_v25 = vpack.c.bf16 %v468_v22, %v465_v16  ;;  %v908_v26 = vadd.f32 %v907_v17, %v468_v22  ;;  %v969_v27 = vmul.f32 %v468_v22, %v468_v22  ;;  %v1565_v28 = vpop.f32.mrb[31].mxu0  ;;  %v1982_v31 = vpop.f32.mrb[30].mxu1 }
 0x136   : > { %v1430_v1 = vpack.c.bf16 %v1982_v31, %v1980_v20  ;;  %v1621_v32 = vpop.f32.mrb[31].mxu1 }
 0x137   : > { %1463 = vst [vmem:[%s1924_s16 + $0x38] sm:$0xff] %v1360_v25   ;;  %v1022_v33 = vadd.f32 %v1021_v24, %v969_v27 }
 0x138   : > { %1477 = vst [vmem:[%s1924_s16 + $0xa8] sm:$0xff] %v1430_v1  }
 0x13a   : > { %v473_v34 = vpop.f32.mrb[32].mxu0 }
 0x13b   : > { %v909_v35 = vadd.f32 %v908_v26, %v473_v34  ;;  %v970_v37 = vmul.f32 %v473_v34, %v473_v34  ;;  %v1568_v39 = vpop.f32.mrb[33].mxu0  ;;  %v1988_v40 = vpop.f32.mrb[32].mxu1 }
 0x13c   : > { %v476_v41 = vpop.f32.mrb[34].mxu0  ;;  %v1624_v42 = vpop.f32.mrb[33].mxu1 }
 0x13d   : > { %v1023_v43 = vadd.f32 %v1022_v33, %v970_v37  ;;  %v1365_v45 = vpack.c.bf16 %v476_v41, %v473_v34  ;;  %v910_v46 = vadd.f32 %v909_v35, %v476_v41  ;;  %v971_v48 = vmul.f32 %v476_v41, %v476_v41  ;;  %v1569_v49 = vpop.f32.mrb[35].mxu0  ;;  %v1990_v50 = vpop.f32.mrb[34].mxu1 }
 0x13e   : > { %v1435_v51 = vpack.c.bf16 %v1990_v50, %v1988_v40  ;;  %v1625_v53 = vpop.f32.mrb[35].mxu1 }
 0x13f   : > { %1464 = vst [vmem:[%s1924_s16 + $0x40] sm:$0xff] %v1365_v45   ;;  %v1024_v54 = vadd.f32 %v1023_v43, %v971_v48 }
 0x140   : > { %1478 = vst [vmem:[%s1924_s16 + $0xb0] sm:$0xff] %v1435_v51  }
 0x142   : > { %v481_v55 = vpop.f32.mrb[36].mxu0 }
 0x143   : > { %v911_v57 = vadd.f32 %v910_v46, %v481_v55  ;;  %v972_v58 = vmul.f32 %v481_v55, %v481_v55  ;;  %v1572_v59 = vpop.f32.mrb[37].mxu0  ;;  %v1996_v61 = vpop.f32.mrb[36].mxu1 }
 0x144   : > { %v484_v62 = vpop.f32.mrb[38].mxu0  ;;  %v1628_v63 = vpop.f32.mrb[37].mxu1 }
 0x145   : > { %v1025_v0 = vadd.f32 %v1024_v54, %v972_v58  ;;  %v1370_v3 = vpack.c.bf16 %v484_v62, %v481_v55  ;;  %v912_v4 = vadd.f32 %v911_v57, %v484_v62  ;;  %v973_v6 = vmul.f32 %v484_v62, %v484_v62  ;;  %v1573_v7 = vpop.f32.mrb[39].mxu0  ;;  %v1998_v8 = vpop.f32.mrb[38].mxu1 }
 0x146   : > { %v1440_v9 = vpack.c.bf16 %v1998_v8, %v1996_v61  ;;  %v1629_v10 = vpop.f32.mrb[39].mxu1 }
 0x147   : > { %1465 = vst [vmem:[%s1924_s16 + $0x48] sm:$0xff] %v1370_v3   ;;  %v1026_v12 = vadd.f32 %v1025_v0, %v973_v6 }
 0x148   : > { %1479 = vst [vmem:[%s1924_s16 + $0xb8] sm:$0xff] %v1440_v9  }
 0x14a   : > { %v489_v14 = vpop.f32.mrb[40].mxu0 }
 0x14b   : > { %v913_v15 = vadd.f32 %v912_v4, %v489_v14  ;;  %v974_v16 = vmul.f32 %v489_v14, %v489_v14  ;;  %v1576_v17 = vpop.f32.mrb[41].mxu0  ;;  %v2004_v18 = vpop.f32.mrb[40].mxu1 }
 0x14c   : > { %v492_v19 = vpop.f32.mrb[42].mxu0  ;;  %v1632_v22 = vpop.f32.mrb[41].mxu1 }
 0x14d   : > { %v1027_v23 = vadd.f32 %v1026_v12, %v974_v16  ;;  %v1375_v24 = vpack.c.bf16 %v492_v19, %v489_v14  ;;  %v914_v25 = vadd.f32 %v913_v15, %v492_v19  ;;  %v975_v26 = vmul.f32 %v492_v19, %v492_v19  ;;  %v1577_v27 = vpop.f32.mrb[43].mxu0  ;;  %v2006_v28 = vpop.f32.mrb[42].mxu1 }
 0x14e   : > { %v1445_v1 = vpack.c.bf16 %v2006_v28, %v2004_v18  ;;  %v1633_v32 = vpop.f32.mrb[43].mxu1 }
 0x14f   : > { %1466 = vst [vmem:[%s1924_s16 + $0x50] sm:$0xff] %v1375_v24   ;;  %v1028_v33 = vadd.f32 %v1027_v23, %v975_v26 }
 0x150   : > { %1480 = vst [vmem:[%s1924_s16 + $0xc0] sm:$0xff] %v1445_v1  }
 0x152   : > { %v497_v34 = vpop.f32.mrb[44].mxu0 }
 0x153   : > { %v915_v35 = vadd.f32 %v914_v25, %v497_v34  ;;  %v976_v37 = vmul.f32 %v497_v34, %v497_v34  ;;  %v1580_v39 = vpop.f32.mrb[45].mxu0  ;;  %v2012_v41 = vpop.f32.mrb[44].mxu1 }
 0x154   : > { %v500_v42 = vpop.f32.mrb[46].mxu0  ;;  %v1636_v43 = vpop.f32.mrb[45].mxu1  ;;  %v983_v39 = vmul.f32 %v1926_v36, %v1926_v36 }
 0x155   : > { %v1029_v45 = vadd.f32 %v1028_v33, %v976_v37  ;;  %v1380_v46 = vpack.c.bf16 %v500_v42, %v497_v34  ;;  %v916_v48 = vadd.f32 %v915_v35, %v500_v42  ;;  %v977_v49 = vmul.f32 %v500_v42, %v500_v42  ;;  %v1581_v51 = vpop.f32.mrb[47].mxu0  ;;  %v2014_v53 = vpop.f32.mrb[46].mxu1 }
 0x156   : > { %v1450_v54 = vpack.c.bf16 %v2014_v53, %v2012_v41  ;;  %v1637_v55 = vpop.f32.mrb[47].mxu1  ;;  %v982_v34 = vmul.f32 %v1919_v29, %v1919_v29 }
 0x157   : > { %1467 = vst [vmem:[%s1924_s16 + $0x58] sm:$0xff] %v1380_v46   ;;  %v1030_v57 = vadd.f32 %v1029_v45, %v977_v49  ;;  %v984_v45 = vmul.f32 %v1932_v44, %v1932_v44  ;;  %v985_v49 = vmul.f32 %v1934_v52, %v1934_v52 }
 0x158   : > { %1481 = vst [vmem:[%s1924_s16 + $0xc8] sm:$0xff] %v1450_v54  }
 0x15a   : > { %v505_v58 = vpop.f32.mrb[48].mxu0 }
 0x15b   : > { %v917_v59 = vadd.f32 %v916_v48, %v505_v58  ;;  %v978_v62 = vmul.f32 %v505_v58, %v505_v58  ;;  %v1584_v63 = vpop.f32.mrb[49].mxu0  ;;  %v2020_v0 = vpop.f32.mrb[48].mxu1 }
 0x15c   : > { %v508_v3 = vpop.f32.mrb[50].mxu0  ;;  %v1640_v4 = vpop.f32.mrb[49].mxu1 }
 0x15d   : > { %v1031_v6 = vadd.f32 %v1030_v57, %v978_v62  ;;  %v1385_v7 = vpack.c.bf16 %v508_v3, %v505_v58  ;;  %v918_v9 = vadd.f32 %v917_v59, %v508_v3  ;;  %v979_v10 = vmul.f32 %v508_v3, %v508_v3  ;;  %v1585_v12 = vpop.f32.mrb[51].mxu0  ;;  %v2022_v14 = vpop.f32.mrb[50].mxu1 }
 0x15e   : > { %v1455_v15 = vpack.c.bf16 %v2022_v14, %v2020_v0  ;;  %v1641_v16 = vpop.f32.mrb[51].mxu1 }
 0x15f   : > { %1468 = vst [vmem:[%s1924_s16 + $0x60] sm:$0xff] %v1385_v7   ;;  %v1032_v17 = vadd.f32 %v1031_v6, %v979_v10 }
 0x160   : > { %1482 = vst [vmem:[%s1924_s16 + $0xd0] sm:$0xff] %v1455_v15  }
 0x162   : > { %v513_v19 = vpop.f32.mrb[52].mxu0 }
 0x163   : > { %v919_v22 = vadd.f32 %v918_v9, %v513_v19  ;;  %v980_v23 = vmul.f32 %v513_v19, %v513_v19  ;;  %v1588_v24 = vpop.f32.mrb[53].mxu0 }
 0x164   : > { %v516_v25 = vpop.f32.mrb[54].mxu0 }
 0x165   : > { %v1033_v26 = vadd.f32 %v1032_v17, %v980_v23  ;;  %v1390_v27 = vpack.c.bf16 %v516_v25, %v513_v19  ;;  %v920_v1 = vadd.f32 %v919_v22, %v516_v25  ;;  %v981_v32 = vmul.f32 %v516_v25, %v516_v25  ;;  %v1589_v33 = vpop.f32.mrb[55].mxu0 }
 0x166   : > { %v995_v23 = vmul.f32 %v1974_v11, %v1974_v11  ;;  %v998_v33 = vmul.f32 %v1988_v40, %v1988_v40 }
 0x167   : > { %1469 = vst [vmem:[%s1924_s16 + $0x68] sm:$0xff] %v1390_v27   ;;  %v921_v35 = vadd.f32 %v920_v1, %v1919_v29  ;;  %v1034_v37 = vadd.f32 %v1033_v26, %v981_v32  ;;  %v986_v29 = vmul.f32 %v1940_v60, %v1940_v60  ;;  %v996_v26 = vmul.f32 %v1980_v20, %v1980_v20 }
 0x168   : > { %v997_v1 = vmul.f32 %v1982_v31, %v1982_v31 }
 0x169   : > { %v922_v42 = vadd.f32 %v921_v35, %v1926_v36  ;;  %v1035_v43 = vadd.f32 %v1034_v37, %v982_v34  ;;  %v987_v36 = vmul.f32 %v1942_v5, %v1942_v5  ;;  %v999_v35 = vmul.f32 %v1990_v50, %v1990_v50 }
 0x16b   : > { %v923_v46 = vadd.f32 %v922_v42, %v1932_v44  ;;  %v1036_v48 = vadd.f32 %v1035_v43, %v983_v39  ;;  %v988_v44 = vmul.f32 %v1948_v13, %v1948_v13  ;;  %v1000_v39 = vmul.f32 %v1996_v61, %v1996_v61 }
 0x16c   : > { %v1001_v43 = vmul.f32 %v1998_v8, %v1998_v8 }
 0x16d   : > { %v924_v51 = vadd.f32 %v923_v46, %v1934_v52  ;;  %v1037_v54 = vadd.f32 %v1036_v48, %v984_v45  ;;  %v989_v52 = vmul.f32 %v1950_v21, %v1950_v21  ;;  %v1002_v46 = vmul.f32 %v2004_v18, %v2004_v18 }
 0x16f   : > { %v925_v55 = vadd.f32 %v924_v51, %v1940_v60  ;;  %v1038_v57 = vadd.f32 %v1037_v54, %v985_v49  ;;  %v990_v60 = vmul.f32 %v1956_v30, %v1956_v30  ;;  %v1003_v49 = vmul.f32 %v2006_v28, %v2006_v28 }
 0x170   : > { %v1004_v54 = vmul.f32 %v2012_v41, %v2012_v41 }
 0x171   : > { %v926_v58 = vadd.f32 %v925_v55, %v1942_v5  ;;  %v1039_v59 = vadd.f32 %v1038_v57, %v986_v29  ;;  %v991_v5 = vmul.f32 %v1958_v38, %v1958_v38  ;;  %v1005_v55 = vmul.f32 %v2014_v53, %v2014_v53 }
 0x173   : > { %v1040_v62 = vadd.f32 %v1039_v59, %v987_v36  ;;  %v927_v63 = vadd.f32 %v926_v58, %v1948_v13  ;;  %v992_v13 = vmul.f32 %v1964_v47, %v1964_v47  ;;  %v1007_v59 = vmul.f32 %v2022_v14, %v2022_v14 }
 0x175   : > { %v928_v3 = vadd.f32 %v927_v63, %v1950_v21  ;;  %v1041_v4 = vadd.f32 %v1040_v62, %v988_v44  ;;  %v993_v21 = vmul.f32 %v1966_v56, %v1966_v56 }
 0x177   : > { %v929_v6 = vadd.f32 %v928_v3, %v1956_v30  ;;  %v1042_v7 = vadd.f32 %v1041_v4, %v989_v52  ;;  %v994_v30 = vmul.f32 %v1972_v2, %v1972_v2 }
 0x179   : > { %v930_v9 = vadd.f32 %v929_v6, %v1958_v38  ;;  %v1043_v10 = vadd.f32 %v1042_v7, %v990_v60 }
 0x17b   : > { %v931_v12 = vadd.f32 %v930_v9, %v1964_v47  ;;  %v1044_v15 = vadd.f32 %v1043_v10, %v991_v5 }
 0x17d   : > { %v932_v16 = vadd.f32 %v931_v12, %v1966_v56  ;;  %v1045_v17 = vadd.f32 %v1044_v15, %v992_v13 }
 0x17f   : > { %v933_v19 = vadd.f32 %v932_v16, %v1972_v2  ;;  %v1046_v22 = vadd.f32 %v1045_v17, %v993_v21 }
 0x181   : > { %v934_v38 = vadd.f32 %v933_v19, %v1974_v11  ;;  %v1047_v24 = vadd.f32 %v1046_v22, %v994_v30 }
 0x183   : > { %v1048_v47 = vadd.f32 %v1047_v24, %v995_v23  ;;  %v935_v25 = vadd.f32 %v934_v38, %v1980_v20 }
 0x185   : > { %v1049_v56 = vadd.f32 %v1048_v47, %v996_v26  ;;  %v936_v27 = vadd.f32 %v935_v25, %v1982_v31 }
 0x187   : > { %v1050_v2 = vadd.f32 %v1049_v56, %v997_v1  ;;  %v937_v32 = vadd.f32 %v936_v27, %v1988_v40 }
 0x189   : > { %v1051_v11 = vadd.f32 %v1050_v2, %v998_v33  ;;  %v938_v34 = vadd.f32 %v937_v32, %v1990_v50 }
 0x18b   : > { %v1052_v37 = vadd.f32 %v1051_v11, %v999_v35  ;;  %v939_v20 = vadd.f32 %v938_v34, %v1996_v61 }
 0x18d   : > { %v1053_v42 = vadd.f32 %v1052_v37, %v1000_v39  ;;  %v940_v31 = vadd.f32 %v939_v20, %v1998_v8 }
 0x18f   : > { %v1054_v45 = vadd.f32 %v1053_v42, %v1001_v43  ;;  %v941_v40 = vadd.f32 %v940_v31, %v2004_v18  ;;  %v1006_v18 = vmul.f32 %v2020_v0, %v2020_v0 }
 0x191   : > { %v1055_v48 = vadd.f32 %v1054_v45, %v1002_v46  ;;  %v942_v50 = vadd.f32 %v941_v40, %v2006_v28 }
 0x193   : > { %v1056_v51 = vadd.f32 %v1055_v48, %v1003_v49  ;;  %v943_v61 = vadd.f32 %v942_v50, %v2012_v41 }
 0x195   : > { %v1057_v8 = vadd.f32 %v1056_v51, %v1004_v54  ;;  %v944_v29 = vadd.f32 %v943_v61, %v2014_v53 }
 0x197   : > { %v1058_v57 = vadd.f32 %v1057_v8, %v1005_v55  ;;  %v945_v36 = vadd.f32 %v944_v29, %v2020_v0 }
 0x199   : > { %v1059_v28 = vadd.f32 %v1058_v57, %v1006_v18  ;;  %v946_v58 = vadd.f32 %v945_v36, %v2022_v14 }
 0x19b   : > { %v947_v41 = vrot.slane %v946_v58, 4  ;;  %v1060_v44 = vadd.f32 %v1059_v28, %v1007_v59 }
 0x19d   : > { %v948_v62 = vadd.f32 %v947_v41, %v946_v58  ;;  %v1061_v63 = vrot.slane %v1060_v44, 4 }
 0x19f   : > { %v949_v52 = vrot.slane %v948_v62, 2  ;;  %v1062_v3 = vadd.f32 %v1061_v63, %v1060_v44 }
 0x1a1   : > { %v950_v53 = vadd.f32 %v949_v52, %v948_v62  ;;  %v1063_v4 = vrot.slane %v1062_v3, 2 }
 0x1a3   : > { %v951_v60 = vrot.slane %v950_v53, 1  ;;  %v1064_v6 = vadd.f32 %v1063_v4, %v1062_v3 }
 0x1a5   : > { %v952_v0 = vadd.f32 %v951_v60, %v950_v53  ;;  %v1065_v7 = vrot.slane %v1064_v6, 1 }
 0x1a7   : > { %953 = vst [vmem:[%s228_s20] sm:$0x1] %v952_v0  ;;  %v1066_v5 = vadd.f32 %v1065_v7, %v1064_v6 }
 0x1a9   : > { %1067 = vst [vmem:[%s228_s20 + $0x1] sm:$0x1] %v1066_v5 }
 0x1aa PF: > { %s14_s14 = sadd.s32 1, %s1716_s14   ;;  %s2124_s12 = smov %s1712_s13 }
 0x1ab   : > { %p11_p5 = scmp.ge.s32.totalorder %s14_s14, 4   ;;  %s2125_s13 = smov %s2127_s15 }
 0x1ad   :  { %13 = sbr.rel (!%p11_p5) target bundleno = 2 (0x2), region = 70 }

// kernel: bottleneck_forward.6
= control target key start
LH: loop header
LB: loop body
LE: loop exit
PB: predicated region body
PF: predicated region fallthrough
CT: control target
= control target key end

     0   :  { %s2137_s21 = smov 0   ;;  %s2139_s22 = smov 0   ;;  %s2845_s0 = inlined_call_operand.vmem [shape: bf16[2,432,128], index: 0, kind: input, shape index: {}]   ;;  %s2846_s1 = inlined_call_operand.vmem [shape: bf16[128,128], index: 1, kind: input, shape index: {}]   ;;  %s2847_s2 = inlined_call_operand.vmem [shape: f32[1,128], index: 2, kind: input, shape index: {}]   ;;  %s2848_s3 = inlined_call_operand.vmem [shape: f32[1,128], index: 3, kind: input, shape index: {}]   ;;  %s2849_s4 = inlined_call_operand.vmem [shape: f32[432,1], index: 4, kind: input, shape index: {}]   ;;  %s2850_s5 = inlined_call_operand.vmem [shape: f32[2,432,128], index: 5, kind: output, shape index: {0}]   ;;  %s2851_s6 = inlined_call_operand.vmem [shape: f32[2,1,2,128], index: 6, kind: output, shape index: {1}]  }
   0x1   :  { %s2141_s23 = smov 0  }
   0x2 LB: > { %s29_s24 = sadd.s32 1, %s2093_s22  ;;  %p1711_p0 = scmp.ge.s32.totalorder %s2097_s23, 1  ;;  %s2097_s23 = sphi %s2141_s23, %s17_s23   ;;  %s2093_s22 = sphi %s2139_s22, %s2853_s22   ;;  %s2089_s21 = sphi %s2137_s21, %s2852_s21  }
   0x3   : > { %p31_p1 = scmp.ge.s32.totalorder %s29_s24, 2  ;;  %p249_p2 = scmp.lt.s32.totalorder %s2097_s23, 3 }
   0x5   : > { %s2855_s24 = smov (%p31_p1, %s29_s24), 0  ;;  %p250_p3 = pnand %p1711_p0, %p249_p2 }
   0x6   : > { %v619_v0 = vld [vmem:[%s2849_s4 + $0x10] sm:$0xff] (!%p250_p3)  ;;  %v617_v1 = vld [vmem:[%s2849_s4] sm:$0xff] (!%p250_p3)  ;;  %v2099_v2 = vmov (!%p250_p3), 0   ;;  %v620_v3 = vld [vmem:[%s2849_s4 + $0x18] sm:$0xff] (!%p250_p3)  ;;  %v2100_v5 = vmov (!%p250_p3), 0.0   ;;  %vm2101_vm0 = vmmov (!%p250_p3), 0  }
   0x7   : > { %253 = sbr.rel (%p250_p3) target bundleno = 531 (0x213), region = 40  ;;  %2066 = vset.pattern.permute.xlu1 (!%p250_p3), %v2099_v2  ;;  %2065 = vset.pattern.permute.xlu0 (!%p250_p3), %v2099_v2  ;;  %v618_v4 = vld [vmem:[%s2849_s4 + $0x8] sm:$0xff] (!%p250_p3)  ;;  %v621_v7 = vld [vmem:[%s2849_s4 + $0x20] sm:$0xff] (!%p250_p3)  ;;  %v624_v8 = vld [vmem:[%s2849_s4 + $0x38] sm:$0xff] (!%p250_p3)  ;;  %p300_p4 = scmp.lt.s32.totalorder (!%p250_p3), %s2089_s21, 1 }
   0x8   : > { %683 = vperm.xlu1 (!%p250_p3), %2066, %v619_v0   ;;  %673 = vperm.xlu0 (!%p250_p3), %2065, %v617_v1   ;;  %v622_v6 = vld [vmem:[%s2849_s4 + $0x28] sm:$0xff] (!%p250_p3)  ;;  %v623_v9 = vld [vmem:[%s2849_s4 + $0x30] sm:$0xff] (!%p250_p3)  ;;  %v625_v11 = vld [vmem:[%s2849_s4 + $0x40] sm:$0xff] (!%p250_p3) }
   0x9   : > { %1896 = vmatprep.subr.bf16.mxu0 (!%p250_p3), %v2100_v5  ;;  %2020 = vmatprep.subr.bf16.mxu1 (!%p250_p3), %v2100_v5  ;;  %v626_v10 = vld [vmem:[%s2849_s4 + $0x48] sm:$0xff] (!%p250_p3)  ;;  %v628_v12 = vld [vmem:[%s2849_s4 + $0x58] sm:$0xff] (!%p250_p3)  ;;  %v2067_v13 = vld [vmem:[%s2846_s1] sm:$0xff] (!%p250_p3)  }
   0xa   : > { %1912 = vmatprep.mubr.msk.bf16.mxu0 (!%p250_p3), %vm2101_vm0, %v2100_v5  ;;  %1968 = vmatprep.mubr.msk.bf16.mxu1 (!%p250_p3), %vm2101_vm0, %v2100_v5  ;;  %v627_v14 = vld [vmem:[%s2849_s4 + $0x50] sm:$0xff] (!%p250_p3)  ;;  %v2068_v15 = vld [vmem:[%s2846_s1 + $0x8] sm:$0xff] (!%p250_p3)   ;;  %v629_v17 = vld [vmem:[%s2849_s4 + $0x60] sm:$0xff] (!%p250_p3) }
   0xb   : > { %1897 = vmatpush3.bf16.msra.mxu0 (!%p250_p3), %v2067_v13  ;;  %2028 = vmatpush3.bf16.msra.mxu1 (!%p250_p3), %v2067_v13  ;;  %v630_v16 = vld [vmem:[%s2849_s4 + $0x68] sm:$0xff] (!%p250_p3)  ;;  %v2069_v18 = vld [vmem:[%s2846_s1 + $0x10] sm:$0xff] (!%p250_p3)   ;;  %v632_v19 = vld [vmem:[%s2849_s4 + $0x78] sm:$0xff] (!%p250_p3) }
   0xc   : > { %688 = vperm.xlu1 (!%p250_p3), %2066, %v620_v3   ;;  %678 = vperm.xlu0 (!%p250_p3), %2065, %v618_v4   ;;  %v631_v20 = vld [vmem:[%s2849_s4 + $0x70] sm:$0xff] (!%p250_p3)  ;;  %v2070_v21 = vld [vmem:[%s2846_s1 + $0x18] sm:$0xff] (!%p250_p3)   ;;  %v646_v22 = vld [vmem:[%s2849_s4 + $0xe8] sm:$0xff] (!%p250_p3) }
   0xd   : > { %1898 = vmatprep.subr.bf16.mxu0 (!%p250_p3), %v2100_v5  ;;  %2021 = vmatprep.subr.bf16.mxu1 (!%p250_p3), %v2100_v5  ;;  %v645_v23 = vld [vmem:[%s2849_s4 + $0xe0] sm:$0xff] (!%p250_p3)  ;;  %v634_v25 = vld [vmem:[%s2849_s4 + $0x88] sm:$0xff] (!%p250_p3)  ;;  %v648_v28 = vld [vmem:[%s2849_s4 + $0xf8] sm:$0xff] (!%p250_p3) }
   0xe   : > { %v2071_v24 = vld [vmem:[%s2846_s1 + $0x20] sm:$0xff]   ;;  %v2072_v27 = vld [vmem:[%s2846_s1 + $0x28] sm:$0xff]   ;;  %v647_v29 = vld [vmem:[%s2849_s4 + $0xf0] sm:$0xff]  ;;  %s2857_s21 = smov (!%p300_p4, %s2089_s21), 1 }
   0xf   : > { %1899 = vmatpush3.bf16.msra.mxu0 %v2068_v15  ;;  %2029 = vmatpush3.bf16.msra.mxu1 %v2068_v15  ;;  %v633_v26 = vld [vmem:[%s2849_s4 + $0x80] sm:$0xff]  ;;  %v2073_v30 = vld [vmem:[%s2846_s1 + $0x30] sm:$0xff]   ;;  %v636_v31 = vld [vmem:[%s2849_s4 + $0x98] sm:$0xff]  ;;  %s2036_s29 = smul.u32 216, %s2857_s21  ;;  %s1714_s17 = sshll.u32 %s2857_s21, 1 }
  0x10   : > { %698 = vperm.xlu1 %2066, %v622_v6   ;;  %693 = vperm.xlu0 %2065, %v621_v7   ;;  %v635_v32 = vld [vmem:[%s2849_s4 + $0x90] sm:$0xff]  ;;  %v2074_v33 = vld [vmem:[%s2846_s1 + $0x38] sm:$0xff]   ;;  %v650_v34 = vld [vmem:[%s2849_s4 + $0x108] sm:$0xff]  ;;  %s2037_s13 = smul.u32 432, %s2857_s21  ;;  %s331_s20 = scalar_lea.vmem %s2851_s6, %s1714_s17 }
  0x11   : > { %1900 = vmatprep.subr.bf16.mxu0 %v2100_v5  ;;  %2022 = vmatprep.subr.bf16.mxu1 %v2100_v5  ;;  %v649_v35 = vld [vmem:[%s2849_s4 + $0x100] sm:$0xff]  ;;  %v638_v36 = vld [vmem:[%s2849_s4 + $0xa8] sm:$0xff]  ;;  %v652_v38 = vld [vmem:[%s2849_s4 + $0x118] sm:$0xff]  ;;  %s2371_s8 = scalar_lea.vmem %s2845_s0, %s2036_s29 }
  0x12   : > { %v637_v37 = vld [vmem:[%s2849_s4 + $0xa0] sm:$0xff]  ;;  %v651_v39 = vld [vmem:[%s2849_s4 + $0x110] sm:$0xff]  ;;  %v640_v40 = vld [vmem:[%s2849_s4 + $0xb8] sm:$0xff]  ;;  %s2632_s16 = scalar_lea.vmem %s2850_s5, %s2037_s13 }
  0x13   : > { %1901 = vmatpush3.bf16.msra.mxu0 %v2069_v18  ;;  %2030 = vmatpush3.bf16.msra.mxu1 %v2069_v18  ;;  %v639_v41 = vld [vmem:[%s2849_s4 + $0xb0] sm:$0xff]  ;;  %v654_v42 = vld [vmem:[%s2849_s4 + $0x128] sm:$0xff]  ;;  %v653_v43 = vld [vmem:[%s2849_s4 + $0x120] sm:$0xff] }
  0x14   : > { %708 = vperm.xlu1 %2066, %v624_v8   ;;  %703 = vperm.xlu0 %2065, %v623_v9   ;;  %v642_v44 = vld [vmem:[%s2849_s4 + $0xc8] sm:$0xff]  ;;  %v641_v45 = vld [vmem:[%s2849_s4 + $0xc0] sm:$0xff]  ;;  %v656_v46 = vld [vmem:[%s2849_s4 + $0x138] sm:$0xff] }
  0x15   : > { %1902 = vmatprep.subr.bf16.mxu0 %v2100_v5  ;;  %2023 = vmatprep.subr.bf16.mxu1 %v2100_v5  ;;  %v655_v47 = vld [vmem:[%s2849_s4 + $0x130] sm:$0xff]  ;;  %v644_v48 = vld [vmem:[%s2849_s4 + $0xd8] sm:$0xff]  ;;  %v658_v50 = vld [vmem:[%s2849_s4 + $0x148] sm:$0xff] }
  0x16   : > { %v643_v49 = vld [vmem:[%s2849_s4 + $0xd0] sm:$0xff]  ;;  %v657_v51 = vld [vmem:[%s2849_s4 + $0x140] sm:$0xff]  ;;  %v660_v52 = vld [vmem:[%s2849_s4 + $0x158] sm:$0xff] }
  0x17   : > { %1903 = vmatpush3.bf16.msra.mxu0 %v2070_v21  ;;  %2031 = vmatpush3.bf16.msra.mxu1 %v2070_v21  ;;  %v659_v53 = vld [vmem:[%s2849_s4 + $0x150] sm:$0xff]  ;;  %v662_v54 = vld [vmem:[%s2849_s4 + $0x168] sm:$0xff]  ;;  %v661_v55 = vld [vmem:[%s2849_s4 + $0x160] sm:$0xff] }
  0x18   : > { %718 = vperm.xlu1 %2066, %v626_v10   ;;  %713 = vperm.xlu0 %2065, %v625_v11   ;;  %v664_v56 = vld [vmem:[%s2849_s4 + $0x178] sm:$0xff]  ;;  %v663_v57 = vld [vmem:[%s2849_s4 + $0x170] sm:$0xff]  ;;  %v666_v58 = vld [vmem:[%s2849_s4 + $0x188] sm:$0xff] }
  0x19   : > { %1904 = vmatprep.subr.bf16.mxu0 %v2100_v5  ;;  %2024 = vmatprep.subr.bf16.mxu1 %v2100_v5  ;;  %v665_v59 = vld [vmem:[%s2849_s4 + $0x180] sm:$0xff]  ;;  %v668_v60 = vld [vmem:[%s2849_s4 + $0x198] sm:$0xff]  ;;  %v667_v61 = vld [vmem:[%s2849_s4 + $0x190] sm:$0xff] }
  0x1a   : > { %v670_v62 = vld [vmem:[%s2849_s4 + $0x1a8] sm:$0xff]  ;;  %v669_v63 = vld [vmem:[%s2849_s4 + $0x1a0] sm:$0xff]  ;;  %v1836_v15 = vld [vmem:[%s2371_s8 + $0x10] sm:$0xff]  }
  0x1b   : > { %1905 = vmatpush3.bf16.msra.mxu0 %v2071_v24  ;;  %2032 = vmatpush3.bf16.msra.mxu1 %v2071_v24  ;;  %v1728_v0 = vld [vmem:[%s2371_s8] sm:$0xff]   ;;  %v1835_v4 = vld [vmem:[%s2371_s8 + $0x8] sm:$0xff]  }
  0x1c   : > { %728 = vperm.xlu1 %2066, %v628_v12   ;;  %723 = vperm.xlu0 %2065, %v627_v14   ;;  %v1729_v1 = vunpack.c.l.bf16 %v1728_v0  ;;  %v1730_v2 = vunpack.c.h.bf16 %v1728_v0  ;;  %v2377_v3 = vld [vmem:[%s2847_s2] ss:$0 sm:$0xff]  ;;  %v1733_v9 = vunpack.c.l.bf16 %v1835_v4  ;;  %v1734_v10 = vunpack.c.h.bf16 %v1835_v4 }
  0x1d   : > { %1906 = vmatprep.subr.bf16.mxu0 %v2100_v5  ;;  %2025 = vmatprep.subr.bf16.mxu1 %v2100_v5  ;;  %v2385_v8 = vld [vmem:[%s2848_s3] ss:$0 sm:$0xff] }
  0x1e   : > { %v448_v6 = vmul.f32 %v1729_v1, %v2377_v3  ;;  %v449_v7 = vmul.f32 %v1730_v2, %v2377_v3  ;;  %v450_v13 = vmul.f32 %v1733_v9, %v2377_v3  ;;  %v451_v14 = vmul.f32 %v1734_v10, %v2377_v3  ;;  %v1849_v1 = vld [vmem:[%s2371_s8 + $0x78] sm:$0xff]   ;;  %v1839_v10 = vld [vmem:[%s2371_s8 + $0x28] sm:$0xff]  }
  0x1f   : > { %1907 = vmatpush3.bf16.msra.mxu0 %v2072_v27  ;;  %2033 = vmatpush3.bf16.msra.mxu1 %v2072_v27 }
  0x20   : > { %738 = vperm.xlu1 %2066, %v630_v16   ;;  %733 = vperm.xlu0 %2065, %v629_v17   ;;  %v509_v11 = vadd.f32 %v2385_v8, %v448_v6  ;;  %v510_v12 = vadd.f32 %v2385_v8, %v449_v7  ;;  %v511_v21 = vadd.f32 %v2385_v8, %v450_v13  ;;  %v1790_v13 = vunpack.c.h.bf16 %v1849_v1 }
  0x21   : > { %1908 = vmatprep.subr.bf16.mxu0 %v2100_v5  ;;  %2026 = vmatprep.subr.bf16.mxu1 %v2100_v5 }
  0x22   : > { %v563_v18 = vmax.f32 %v509_v11, 0.0 }
  0x23   : > { %1909 = vmatpush3.bf16.msra.mxu0 %v2073_v30  ;;  %2034 = vmatpush3.bf16.msra.mxu1 %v2073_v30 }
  0x24   : > { %748 = vperm.xlu1 %2066, %v632_v19   ;;  %743 = vperm.xlu0 %2065, %v631_v20   ;;  %v564_v19 = vmax.f32 %v510_v12, 0.0  ;;  %v1738_v20 = vunpack.c.h.bf16 %v1836_v15 }
  0x25   : > { %1910 = vmatprep.subr.bf16.mxu0 %v2100_v5  ;;  %2027 = vmatprep.subr.bf16.mxu1 %v2100_v5 }
  0x27   : > { %1911 = vmatpush3.bf16.msra.mxu0 %v2074_v33  ;;  %2035 = vmatpush3.bf16.msra.mxu1 %v2074_v33  ;;  %v1837_v33 = vld [vmem:[%s2371_s8 + $0x18] sm:$0xff]  }
  0x28   : > { %818 = vperm.xlu1 %2066, %v646_v22   ;;  %813 = vperm.xlu0 %2065, %v645_v23   ;;  %v512_v22 = vadd.f32 %v2385_v8, %v451_v14  ;;  %v1737_v23 = vunpack.c.l.bf16 %v1836_v15 }
  0x2a   : > { %v566_v30 = vmax.f32 %v512_v22, 0.0 }
  0x2c   : > { %758 = vperm.xlu1 %2066, %v634_v25   ;;  %753 = vperm.xlu0 %2065, %v633_v26  }
  0x30   : > { %828 = vperm.xlu1 %2066, %v648_v28   ;;  %823 = vperm.xlu0 %2065, %v647_v29   ;;  %v453_v28 = vmul.f32 %v1738_v20, %v2377_v3  ;;  %v565_v29 = vmax.f32 %v511_v21, 0.0 }
  0x34   : > { %768 = vperm.xlu1 %2066, %v636_v31   ;;  %763 = vperm.xlu0 %2065, %v635_v32   ;;  %v452_v32 = vmul.f32 %v1737_v23, %v2377_v3 }
  0x38   : > { %838 = vperm.xlu1 %2066, %v650_v34   ;;  %833 = vperm.xlu0 %2065, %v649_v35  }
  0x3c   : > { %778 = vperm.xlu1 %2066, %v638_v36   ;;  %773 = vperm.xlu0 %2065, %v637_v37   ;;  %v1742_v36 = vunpack.c.h.bf16 %v1837_v33  ;;  %v1741_v37 = vunpack.c.l.bf16 %v1837_v33 }
  0x40   : > { %848 = vperm.xlu1 %2066, %v652_v38   ;;  %843 = vperm.xlu0 %2065, %v651_v39  }
  0x44   : > { %788 = vperm.xlu1 %2066, %v640_v40   ;;  %783 = vperm.xlu0 %2065, %v639_v41   ;;  %v514_v40 = vadd.f32 %v2385_v8, %v453_v28  ;;  %v513_v41 = vadd.f32 %v2385_v8, %v452_v32 }
  0x48   : > { %858 = vperm.xlu1 %2066, %v654_v42   ;;  %853 = vperm.xlu0 %2065, %v653_v43  }
  0x4c   : > { %798 = vperm.xlu1 %2066, %v642_v44   ;;  %793 = vperm.xlu0 %2065, %v641_v45   ;;  %v455_v44 = vmul.f32 %v1742_v36, %v2377_v3  ;;  %v1848_v45 = vld [vmem:[%s2371_s8 + $0x70] sm:$0xff]  }
  0x50   : > { %868 = vperm.xlu1 %2066, %v656_v46   ;;  %863 = vperm.xlu0 %2065, %v655_v47   ;;  %v568_v47 = vmax.f32 %v514_v40, 0.0 }
  0x54   : > { %808 = vperm.xlu1 %2066, %v644_v48   ;;  %803 = vperm.xlu0 %2065, %v643_v49   ;;  %v567_v48 = vmax.f32 %v513_v41, 0.0  ;;  %v454_v49 = vmul.f32 %v1741_v37, %v2377_v3 }
  0x58   : > { %878 = vperm.xlu1 %2066, %v658_v50   ;;  %873 = vperm.xlu0 %2065, %v657_v51   ;;  %v1838_v50 = vld [vmem:[%s2371_s8 + $0x20] sm:$0xff]  }
  0x5c   : > { %888 = vperm.xlu1 %2066, %v660_v52   ;;  %883 = vperm.xlu0 %2065, %v659_v53   ;;  %v1786_v53 = vunpack.c.h.bf16 %v1848_v45 }
  0x60   : > { %898 = vperm.xlu1 %2066, %v662_v54   ;;  %893 = vperm.xlu0 %2065, %v661_v55   ;;  %v1785_v54 = vunpack.c.l.bf16 %v1848_v45  ;;  %v516_v55 = vadd.f32 %v2385_v8, %v455_v44 }
  0x62   : > { %v476_v0 = vmul.f32 %v1785_v54, %v2377_v3  ;;  %v570_v6 = vmax.f32 %v516_v55, 0.0 }
  0x64   : > { %908 = vperm.xlu1 %2066, %v664_v56   ;;  %903 = vperm.xlu0 %2065, %v663_v57   ;;  %v1746_v56 = vunpack.c.h.bf16 %v1838_v50  ;;  %v537_v15 = vadd.f32 %v2385_v8, %v476_v0 }
  0x66   : > { %v457_v2 = vmul.f32 %v1746_v56, %v2377_v3 }
  0x68   : > { %918 = vperm.xlu1 %2066, %v666_v58   ;;  %913 = vperm.xlu0 %2065, %v665_v59   ;;  %v515_v59 = vadd.f32 %v2385_v8, %v454_v49  ;;  %v518_v21 = vadd.f32 %v2385_v8, %v457_v2 }
  0x6a   : > { %v569_v7 = vmax.f32 %v515_v59, 0.0  ;;  %v572_v32 = vmax.f32 %v518_v21, 0.0  ;;  %v1851_v59 = vld [vmem:[%s2371_s8 + $0x88] sm:$0xff]  }
  0x6c   : > { %928 = vperm.xlu1 %2066, %v668_v60   ;;  %923 = vperm.xlu0 %2065, %v667_v61   ;;  %v1745_v60 = vunpack.c.l.bf16 %v1838_v50 }
  0x6e   : > { %v456_v9 = vmul.f32 %v1745_v60, %v2377_v3 }
  0x70   : > { %938 = vperm.xlu1 %2066, %v670_v62   ;;  %933 = vperm.xlu0 %2065, %v669_v63   ;;  %v477_v63 = vmul.f32 %v1786_v53, %v2377_v3  ;;  %v517_v22 = vadd.f32 %v2385_v8, %v456_v9 }
  0x72   : > { %v538_v14 = vadd.f32 %v2385_v8, %v477_v63  ;;  %v571_v33 = vmax.f32 %v517_v22, 0.0 }
  0x87   : > { %v684_v16 = vpop.permute.xlu1 %683  ;;  %v674_v17 = vpop.permute.xlu0 %673 }
  0x88   : > { %v941_v26 = vmul.f32 %v674_v17, %v563_v18  ;;  %v943_v38 = vmul.f32 %v684_v16, %v565_v29  ;;  %v1789_v16 = vunpack.c.l.bf16 %v1849_v1  ;;  %v1750_v17 = vunpack.c.h.bf16 %v1839_v10  ;;  %v1850_v29 = vld [vmem:[%s2371_s8 + $0x80] sm:$0xff]   ;;  %v1841_v1 = vld [vmem:[%s2371_s8 + $0x38] sm:$0xff]  }
  0x89   : > { %v1749_v18 = vunpack.c.l.bf16 %v1839_v10 }
  0x8a   : > { %v478_v28 = vmul.f32 %v1789_v16, %v2377_v3  ;;  %v1758_v16 = vunpack.c.h.bf16 %v1841_v1 }
  0x8b   : > { %v689_v24 = vpop.permute.xlu1 %688  ;;  %v679_v25 = vpop.permute.xlu0 %678 }
  0x8c   : > { %v942_v27 = vmul.f32 %v679_v25, %v564_v19  ;;  %v944_v39 = vmul.f32 %v689_v24, %v566_v30  ;;  %v479_v25 = vmul.f32 %v1790_v13, %v2377_v3  ;;  %v459_v30 = vmul.f32 %v1750_v17, %v2377_v3 }
  0x8d   : > { %v1757_v17 = vunpack.c.l.bf16 %v1841_v1 }
  0x8e   : > { %v995_v31 = vpack.c.bf16 %v942_v27, %v941_v26  ;;  %v996_v46 = vpack.c.bf16 %v944_v39, %v943_v38  ;;  %v592_v26 = vmax.f32 %v538_v14, 0.0  ;;  %v591_v27 = vmax.f32 %v537_v15, 0.0 }
  0x8f   : > { %v699_v34 = vpop.permute.xlu1 %698  ;;  %v694_v35 = vpop.permute.xlu0 %693  ;;  %v540_v38 = vadd.f32 %v2385_v8, %v479_v25  ;;  %v1794_v39 = vunpack.c.h.bf16 %v1850_v29  ;;  %v520_v44 = vadd.f32 %v2385_v8, %v459_v30  ;;  %v463_v30 = vmul.f32 %v1758_v16, %v2377_v3 }
  0x90   : > { %1913 = vmatmul.mubr.bf16.vlgmr.msra.gmra.mrb[0].mxu0 %v995_v31  ;;  %v946_v57 = vmul.f32 %v699_v34, %v568_v47  ;;  %v945_v58 = vmul.f32 %v694_v35, %v567_v48  ;;  %v458_v34 = vmul.f32 %v1749_v18, %v2377_v3  ;;  %v1840_v35 = vld [vmem:[%s2371_s8 + $0x30] sm:$0xff]  }
  0x91   : > { %1916 = vmatprep.mubr.msk.bf16.mxu0 %vm2101_vm0, %v2100_v5  ;;  %v1754_v45 = vunpack.c.h.bf16 %v1840_v35  ;;  %v594_v55 = vmax.f32 %v540_v38, 0.0  ;;  %v574_v60 = vmax.f32 %v520_v44, 0.0 }
  0x92   : > { %v997_v4 = vpack.c.bf16 %v946_v57, %v945_v58  ;;  %v519_v49 = vadd.f32 %v2385_v8, %v458_v34  ;;  %v481_v57 = vmul.f32 %v1794_v39, %v2377_v3  ;;  %v1842_v34 = vld [vmem:[%s2371_s8 + $0x40] sm:$0xff]  }
  0x93   : > { %v709_v42 = vpop.permute.xlu1 %708  ;;  %v704_v43 = vpop.permute.xlu0 %703 }
  0x94   : > { %v948_v19 = vmul.f32 %v709_v42, %v570_v6  ;;  %v947_v20 = vmul.f32 %v704_v43, %v569_v7  ;;  %v539_v42 = vadd.f32 %v2385_v8, %v478_v28  ;;  %v1793_v43 = vunpack.c.l.bf16 %v1850_v29 }
  0x95   : > { %v573_v63 = vmax.f32 %v519_v49, 0.0  ;;  %v1798_v6 = vunpack.c.h.bf16 %v1851_v59  ;;  %v1797_v7 = vunpack.c.l.bf16 %v1851_v59  ;;  %v542_v13 = vadd.f32 %v2385_v8, %v481_v57 }
  0x96   : > { %v998_v31 = vpack.c.bf16 %v948_v19, %v947_v20  ;;  %v593_v56 = vmax.f32 %v539_v42, 0.0  ;;  %v480_v58 = vmul.f32 %v1793_v43, %v2377_v3  ;;  %v524_v43 = vadd.f32 %v2385_v8, %v463_v30 }
  0x97   : > { %v2405_v51 = vpop.permute.xlu1 %718  ;;  %v2407_v52 = vpop.permute.xlu0 %713  ;;  %v596_v28 = vmax.f32 %v542_v13, 0.0 }
  0x98   : > { %1917 = vmatmul.mubr.bf16.gmra.mrb[4].mxu0 %v996_v46  ;;  %v1753_v46 = vunpack.c.l.bf16 %v1840_v35  ;;  %v950_v47 = vmul.f32 %v2405_v51, %v572_v32  ;;  %v949_v48 = vmul.f32 %v2407_v52, %v571_v33  ;;  %v461_v51 = vmul.f32 %v1754_v45, %v2377_v3 }
  0x99   : > { %1920 = vmatprep.mubr.msk.bf16.mxu0 %vm2101_vm0, %v2100_v5  ;;  %v541_v14 = vadd.f32 %v2385_v8, %v480_v58  ;;  %v1762_v45 = vunpack.c.h.bf16 %v1842_v34 }
  0x9a   : > { %v999_v52 = vpack.c.bf16 %v950_v47, %v949_v48  ;;  %v460_v0 = vmul.f32 %v1753_v46, %v2377_v3  ;;  %v522_v15 = vadd.f32 %v2385_v8, %v461_v51  ;;  %v1761_v48 = vunpack.c.l.bf16 %v1842_v34  ;;  %v1853_v51 = vld [vmem:[%s2371_s8 + $0x98] sm:$0xff]  }
  0x9b   : > { %v2413_v61 = vpop.permute.xlu1 %728  ;;  %v2415_v62 = vpop.permute.xlu0 %723  ;;  %v595_v29 = vmax.f32 %v541_v14, 0.0 }
  0x9c   : > { %v952_v18 = vmul.f32 %v2413_v61, %v574_v60  ;;  %v951_v19 = vmul.f32 %v2415_v62, %v573_v63  ;;  %v521_v20 = vadd.f32 %v2385_v8, %v460_v0  ;;  %v462_v61 = vmul.f32 %v1757_v17, %v2377_v3  ;;  %v1852_v62 = vld [vmem:[%s2371_s8 + $0x90] sm:$0xff]   ;;  %v1843_v0 = vld [vmem:[%s2371_s8 + $0x48] sm:$0xff]  }
  0x9d   : > { %v576_v32 = vmax.f32 %v522_v15, 0.0  ;;  %v1801_v42 = vunpack.c.l.bf16 %v1852_v62  ;;  %v464_v63 = vmul.f32 %v1761_v48, %v2377_v3  ;;  %v1766_v15 = vunpack.c.h.bf16 %v1843_v0 }
  0x9e   : > { %v575_v33 = vmax.f32 %v521_v20, 0.0  ;;  %v523_v44 = vadd.f32 %v2385_v8, %v462_v61  ;;  %v1765_v16 = vunpack.c.l.bf16 %v1843_v0 }
  0x9f   : > { %v2423_v11 = vpop.permute.xlu1 %738  ;;  %v2425_v12 = vpop.permute.xlu0 %733  ;;  %v484_v59 = vmul.f32 %v1801_v42, %v2377_v3  ;;  %v467_v61 = vmul.f32 %v1766_v15, %v2377_v3 }
  0xa0   : > { %1921 = vmatmul.mubr.bf16.gmra.mrb[8].mxu0 %v997_v4  ;;  %v954_v46 = vmul.f32 %v2423_v11, %v576_v32  ;;  %v953_v47 = vmul.f32 %v2425_v12, %v575_v33  ;;  %v578_v12 = vmax.f32 %v524_v43, 0.0  ;;  %v577_v60 = vmax.f32 %v523_v44, 0.0  ;;  %v1844_v33 = vld [vmem:[%s2371_s8 + $0x50] sm:$0xff]  }
  0xa1   : > { %1924 = vmatprep.mubr.msk.bf16.mxu0 %vm2101_vm0, %v2100_v5  ;;  %v545_v13 = vadd.f32 %v2385_v8, %v484_v59  ;;  %v528_v42 = vadd.f32 %v2385_v8, %v467_v61  ;;  %v1770_v44 = vunpack.c.h.bf16 %v1844_v33 }
  0xa2   : > { %v1001_v11 = vpack.c.bf16 %v954_v46, %v953_v47  ;;  %v1769_v47 = vunpack.c.l.bf16 %v1844_v33 }
  0xa3   : > { %v2433_v23 = vpop.permute.xlu1 %748  ;;  %v2435_v24 = vpop.permute.xlu0 %743  ;;  %v599_v30 = vmax.f32 %v545_v13, 0.0 }
  0xa4   : > { %v956_v17 = vmul.f32 %v2433_v23, %v578_v12  ;;  %v466_v23 = vmul.f32 %v1765_v16, %v2377_v3  ;;  %v469_v12 = vmul.f32 %v1770_v44, %v2377_v3 }
  0xa6   : > { %v527_v43 = vadd.f32 %v2385_v8, %v466_v23 }
  0xa7   : > { %v819_v36 = vpop.permute.xlu1 %818  ;;  %v814_v37 = vpop.permute.xlu0 %813 }
  0xa8   : > { %v970_v40 = vmul.f32 %v819_v36, %v592_v26  ;;  %v969_v41 = vmul.f32 %v814_v37, %v591_v27  ;;  %1925 = vmatmul.mubr.bf16.gmra.mrb[12].mxu0 %v998_v31  ;;  %v483_v26 = vmul.f32 %v1798_v6, %v2377_v3  ;;  %v482_v27 = vmul.f32 %v1797_v7, %v2377_v3 }
  0xa9   : > { %1928 = vmatprep.mubr.msk.bf16.mxu0 %vm2101_vm0, %v2100_v5  ;;  %v1000_v31 = vpack.c.bf16 %v952_v18, %v951_v19  ;;  %v1805_v6 = vunpack.c.l.bf16 %v1853_v51  ;;  %v955_v18 = vmul.f32 %v2435_v24, %v577_v60  ;;  %v525_v19 = vadd.f32 %v2385_v8, %v464_v63  ;;  %v1854_v24 = vld [vmem:[%s2371_s8 + $0xa0] sm:$0xff]  }
  0xaa   : > { %v1009_v50 = vpack.c.bf16 %v970_v40, %v969_v41  ;;  %v544_v37 = vadd.f32 %v2385_v8, %v483_v26  ;;  %v543_v38 = vadd.f32 %v2385_v8, %v482_v27  ;;  %v1802_v41 = vunpack.c.h.bf16 %v1852_v62 }
  0xab   : > { %v2451_v53 = vpop.permute.xlu1 %758  ;;  %v2453_v54 = vpop.permute.xlu0 %753  ;;  %v1002_v62 = vpack.c.bf16 %v956_v17, %v955_v18  ;;  %v579_v32 = vmax.f32 %v525_v19, 0.0  ;;  %v582_v63 = vmax.f32 %v528_v42, 0.0  ;;  %v581_v0 = vmax.f32 %v527_v43, 0.0 }
  0xac   : > { %1969 = vmatmul.mubr.bf16.vlgmr.msra.gmra.mrb[0].mxu1 %v1009_v50  ;;  %v597_v57 = vmax.f32 %v543_v38, 0.0  ;;  %v485_v58 = vmul.f32 %v1802_v41, %v2377_v3  ;;  %v1809_v41 = vunpack.c.l.bf16 %v1854_v24 }
  0xad   : > { %1972 = vmatprep.mubr.msk.bf16.mxu1 %vm2101_vm0, %v2100_v5  ;;  %v957_v46 = vmul.f32 %v2453_v54, %v579_v32 }
  0xaf   : > { %v829_v2 = vpop.permute.xlu1 %828  ;;  %v824_v4 = vpop.permute.xlu0 %823 }
  0xb0   : > { %v972_v9 = vmul.f32 %v829_v2, %v594_v55  ;;  %v971_v10 = vmul.f32 %v824_v4, %v593_v56  ;;  %1929 = vmatmul.mubr.bf16.gmra.mrb[16].mxu0 %v999_v52  ;;  %v598_v56 = vmax.f32 %v544_v37, 0.0  ;;  %v465_v52 = vmul.f32 %v1762_v45, %v2377_v3 }
  0xb1   : > { %1932 = vmatprep.mubr.msk.bf16.mxu0 %vm2101_vm0, %v2100_v5  ;;  %v1806_v4 = vunpack.c.h.bf16 %v1853_v51 }
  0xb2   : > { %v1010_v21 = vpack.c.bf16 %v972_v9, %v971_v10  ;;  %v546_v10 = vadd.f32 %v2385_v8, %v485_v58  ;;  %v526_v14 = vadd.f32 %v2385_v8, %v465_v52  ;;  %v1845_v58 = vld [vmem:[%s2371_s8 + $0x58] sm:$0xff]  }
  0xb3   : > { %v2471_v22 = vpop.permute.xlu1 %768  ;;  %v2473_v25 = vpop.permute.xlu0 %763  ;;  %v487_v27 = vmul.f32 %v1806_v4, %v2377_v3  ;;  %v1773_v15 = vunpack.c.l.bf16 %v1845_v58 }
  0xb4   : > { %1973 = vmatmul.mubr.bf16.gmra.mrb[4].mxu1 %v1010_v21  ;;  %v960_v18 = vmul.f32 %v2471_v22, %v582_v63  ;;  %v959_v19 = vmul.f32 %v2473_v25, %v581_v0  ;;  %v1847_v63 = vld [vmem:[%s2371_s8 + $0x68] sm:$0xff]  }
  0xb5   : > { %1976 = vmatprep.mubr.msk.bf16.mxu1 %vm2101_vm0, %v2100_v5 }
  0xb6   : > { %v1004_v33 = vpack.c.bf16 %v960_v18, %v959_v19 }
  0xb7   : > { %v839_v35 = vpop.permute.xlu1 %838  ;;  %v834_v36 = vpop.permute.xlu0 %833 }
  0xb8   : > { %v974_v39 = vmul.f32 %v839_v35, %v596_v28  ;;  %v973_v40 = vmul.f32 %v834_v36, %v595_v29  ;;  %1933 = vmatmul.mubr.bf16.gmra.mrb[20].mxu0 %v1000_v31  ;;  %v486_v28 = vmul.f32 %v1805_v6, %v2377_v3  ;;  %v600_v29 = vmax.f32 %v546_v10, 0.0 }
  0xb9   : > { %1936 = vmatprep.mubr.msk.bf16.mxu0 %vm2101_vm0, %v2100_v5  ;;  %v580_v31 = vmax.f32 %v526_v14, 0.0  ;;  %v548_v36 = vadd.f32 %v2385_v8, %v487_v27  ;;  %v530_v14 = vadd.f32 %v2385_v8, %v469_v12 }
  0xba   : > { %v1011_v49 = vpack.c.bf16 %v974_v39, %v973_v40  ;;  %v547_v37 = vadd.f32 %v2385_v8, %v486_v28  ;;  %v1810_v40 = vunpack.c.h.bf16 %v1854_v24  ;;  %v1856_v28 = vld [vmem:[%s2371_s8 + $0xb0] sm:$0xff]  }
  0xbb   : > { %v2491_v50 = vpop.permute.xlu1 %778  ;;  %v2493_v55 = vpop.permute.xlu0 %773  ;;  %v958_v45 = vmul.f32 %v2451_v53, %v580_v31  ;;  %v602_v59 = vmax.f32 %v548_v36, 0.0  ;;  %v1846_v31 = vld [vmem:[%s2371_s8 + $0x60] sm:$0xff]   ;;  %v1818_v32 = vunpack.c.h.bf16 %v1856_v28  ;;  %v1817_v36 = vunpack.c.l.bf16 %v1856_v28 }
  0xbc   : > { %1977 = vmatmul.mubr.bf16.gmra.mrb[8].mxu1 %v1011_v49  ;;  %v1855_v49 = vld [vmem:[%s2371_s8 + $0xa8] sm:$0xff]   ;;  %v601_v51 = vmax.f32 %v547_v37, 0.0  ;;  %v489_v52 = vmul.f32 %v1810_v40, %v2377_v3  ;;  %v1778_v40 = vunpack.c.h.bf16 %v1846_v31 }
  0xbd   : > { %1980 = vmatprep.mubr.msk.bf16.mxu1 %vm2101_vm0, %v2100_v5  ;;  %v1814_v53 = vunpack.c.h.bf16 %v1855_v49  ;;  %v1813_v54 = vunpack.c.l.bf16 %v1855_v49  ;;  %v1003_v60 = vpack.c.bf16 %v958_v45, %v957_v46 }
  0xbe   : > { %v550_v10 = vadd.f32 %v2385_v8, %v489_v52 }
  0xbf   : > { %v849_v1 = vpop.permute.xlu1 %848  ;;  %v844_v2 = vpop.permute.xlu0 %843  ;;  %v491_v16 = vmul.f32 %v1814_v53, %v2377_v3  ;;  %v490_v17 = vmul.f32 %v1813_v54, %v2377_v3  ;;  %v473_v53 = vmul.f32 %v1778_v40, %v2377_v3 }
  0xc0   : > { %v976_v7 = vmul.f32 %v849_v1, %v598_v56  ;;  %v975_v9 = vmul.f32 %v844_v2, %v597_v57  ;;  %1937 = vmatmul.mubr.bf16.gmra.mrb[24].mxu0 %v1001_v11  ;;  %v488_v11 = vmul.f32 %v1809_v41, %v2377_v3  ;;  %v468_v1 = vmul.f32 %v1769_v47, %v2377_v3 }
  0xc1   : > { %1940 = vmatprep.mubr.msk.bf16.mxu0 %vm2101_vm0, %v2100_v5  ;;  %v1774_v2 = vunpack.c.h.bf16 %v1845_v58  ;;  %v604_v23 = vmax.f32 %v550_v10, 0.0  ;;  %v552_v22 = vadd.f32 %v2385_v8, %v491_v16  ;;  %v551_v25 = vadd.f32 %v2385_v8, %v490_v17 }
  0xc2   : > { %v1012_v20 = vpack.c.bf16 %v976_v7, %v975_v9  ;;  %v549_v13 = vadd.f32 %v2385_v8, %v488_v11  ;;  %v1777_v41 = vunpack.c.l.bf16 %v1846_v31  ;;  %v493_v47 = vmul.f32 %v1818_v32, %v2377_v3 }
  0xc3   : > { %v2511_v21 = vpop.permute.xlu1 %788  ;;  %v2513_v26 = vpop.permute.xlu0 %783  ;;  %v606_v45 = vmax.f32 %v552_v22, 0.0  ;;  %v605_v46 = vmax.f32 %v551_v25, 0.0  ;;  %v1782_v10 = vunpack.c.h.bf16 %v1847_v63 }
  0xc4   : > { %1981 = vmatmul.mubr.bf16.gmra.mrb[12].mxu1 %v1012_v20  ;;  %v529_v20 = vadd.f32 %v2385_v8, %v468_v1  ;;  %v603_v24 = vmax.f32 %v549_v13, 0.0  ;;  %v472_v54 = vmul.f32 %v1777_v41, %v2377_v3  ;;  %v554_v0 = vadd.f32 %v2385_v8, %v493_v47 }
  0xc5   : > { %1984 = vmatprep.mubr.msk.bf16.mxu1 %vm2101_vm0, %v2100_v5  ;;  %v1781_v13 = vunpack.c.l.bf16 %v1847_v63 }
  0xc7   : > { %v859_v34 = vpop.permute.xlu1 %858  ;;  %v854_v35 = vpop.permute.xlu0 %853  ;;  %v474_v31 = vmul.f32 %v1781_v13, %v2377_v3 }
  0xc8   : > { %v978_v38 = vmul.f32 %v859_v34, %v600_v29  ;;  %v977_v39 = vmul.f32 %v854_v35, %v599_v30  ;;  %1941 = vmatmul.mubr.bf16.gmra.mrb[28].mxu0 %v1002_v62  ;;  %v471_v29 = vmul.f32 %v1774_v2, %v2377_v3  ;;  %v470_v62 = vmul.f32 %v1773_v15, %v2377_v3 }
  0xc9   : > { %1944 = vmatprep.mubr.msk.bf16.mxu0 %vm2101_vm0, %v2100_v5  ;;  %v584_v34 = vmax.f32 %v530_v14, 0.0  ;;  %v583_v35 = vmax.f32 %v529_v20, 0.0  ;;  %v608_v14 = vmax.f32 %v554_v0, 0.0 }
  0xca   : > { %v1013_v48 = vpack.c.bf16 %v978_v38, %v977_v39  ;;  %v532_v37 = vadd.f32 %v2385_v8, %v471_v29  ;;  %v531_v44 = vadd.f32 %v2385_v8, %v470_v62  ;;  %v475_v62 = vmul.f32 %v1782_v10, %v2377_v3 }
  0xcb   : > { %v2532_v56 = vpop.permute.xlu1 %798  ;;  %v2534_v57 = vpop.permute.xlu0 %793  ;;  %v961_v49 = vmul.f32 %v2493_v55, %v583_v35 }
  0xcc   : > { %1985 = vmatmul.mubr.bf16.gmra.mrb[16].mxu1 %v1013_v48  ;;  %v962_v48 = vmul.f32 %v2491_v50, %v584_v34  ;;  %v586_v12 = vmax.f32 %v532_v37, 0.0  ;;  %v536_v35 = vadd.f32 %v2385_v8, %v475_v62 }
  0xcd   : > { %1988 = vmatprep.mubr.msk.bf16.mxu1 %vm2101_vm0, %v2100_v5 }
  0xce   : > { %v1005_v55 = vpack.c.bf16 %v962_v48, %v961_v49  ;;  %v964_v17 = vmul.f32 %v2511_v21, %v586_v12  ;;  %v590_v47 = vmax.f32 %v536_v35, 0.0 }
  0xcf   : > { %v869_v4 = vpop.permute.xlu1 %868  ;;  %v864_v6 = vpop.permute.xlu0 %863 }
  0xd0   : > { %v980_v7 = vmul.f32 %v869_v4, %v602_v59  ;;  %v979_v9 = vmul.f32 %v864_v6, %v601_v51  ;;  %1945 = vmatmul.mubr.bf16.gmra.mrb[32].mxu0 %v1003_v60  ;;  %v492_v59 = vmul.f32 %v1817_v36, %v2377_v3  ;;  %v1857_v51 = vld [vmem:[%s2371_s8 + $0xb8] sm:$0xff]   ;;  %v585_v60 = vmax.f32 %v531_v44, 0.0  ;;  %v1859_v44 = vld [vmem:[%s2371_s8 + $0xc8] sm:$0xff]  }
  0xd1   : > { %1948 = vmatprep.mubr.msk.bf16.mxu0 %vm2101_vm0, %v2100_v5  ;;  %v1822_v1 = vunpack.c.h.bf16 %v1857_v51  ;;  %v1821_v50 = vunpack.c.l.bf16 %v1857_v51  ;;  %v535_v36 = vadd.f32 %v2385_v8, %v474_v31 }
  0xd2   : > { %v1014_v27 = vpack.c.bf16 %v980_v7, %v979_v9  ;;  %v553_v6 = vadd.f32 %v2385_v8, %v492_v59  ;;  %v534_v7 = vadd.f32 %v2385_v8, %v473_v53  ;;  %v533_v9 = vadd.f32 %v2385_v8, %v472_v54 }
  0xd3   : > { %v2555_v30 = vpop.permute.xlu1 %808  ;;  %v2557_v61 = vpop.permute.xlu0 %803  ;;  %v495_v15 = vmul.f32 %v1822_v1, %v2377_v3  ;;  %v494_v16 = vmul.f32 %v1821_v50, %v2377_v3  ;;  %v963_v18 = vmul.f32 %v2513_v26, %v585_v60  ;;  %v589_v48 = vmax.f32 %v535_v36, 0.0  ;;  %v1860_v1 = vld [vmem:[%s2371_s8 + $0xd0] sm:$0xff]  }
  0xd4   : > { %1989 = vmatmul.mubr.bf16.gmra.mrb[20].mxu1 %v1014_v27  ;;  %v607_v20 = vmax.f32 %v553_v6, 0.0  ;;  %v1858_v27 = vld [vmem:[%s2371_s8 + $0xc0] sm:$0xff]   ;;  %v1829_v59 = vunpack.c.l.bf16 %v1859_v44  ;;  %v968_v54 = vmul.f32 %v2555_v30, %v590_v47  ;;  %v1834_v6 = vunpack.c.h.bf16 %v1860_v1 }
  0xd5   : > { %1992 = vmatprep.mubr.msk.bf16.mxu1 %vm2101_vm0, %v2100_v5  ;;  %v556_v22 = vadd.f32 %v2385_v8, %v495_v15  ;;  %v555_v25 = vadd.f32 %v2385_v8, %v494_v16  ;;  %v1826_v32 = vunpack.c.h.bf16 %v1858_v27  ;;  %v1006_v21 = vpack.c.bf16 %v964_v17, %v963_v18 }
  0xd6   : > { %v1825_v34 = vunpack.c.l.bf16 %v1858_v27  ;;  %v498_v53 = vmul.f32 %v1829_v59, %v2377_v3  ;;  %v967_v60 = vmul.f32 %v2557_v61, %v589_v48  ;;  %v1833_v30 = vunpack.c.l.bf16 %v1860_v1 }
  0xd7   : > { %v879_v38 = vpop.permute.xlu1 %878  ;;  %v874_v39 = vpop.permute.xlu0 %873  ;;  %v610_v37 = vmax.f32 %v556_v22, 0.0  ;;  %v501_v15 = vmul.f32 %v1834_v6, %v2377_v3 }
  0xd8   : > { %v982_v42 = vmul.f32 %v879_v38, %v604_v23  ;;  %v981_v43 = vmul.f32 %v874_v39, %v603_v24  ;;  %1949 = vmatmul.mubr.bf16.gmra.mrb[36].mxu0 %v1004_v33  ;;  %v588_v23 = vmax.f32 %v534_v7, 0.0  ;;  %v587_v24 = vmax.f32 %v533_v9, 0.0 }
  0xd9   : > { %1952 = vmatprep.mubr.msk.bf16.mxu0 %vm2101_vm0, %v2100_v5  ;;  %v609_v38 = vmax.f32 %v555_v25, 0.0  ;;  %v497_v39 = vmul.f32 %v1826_v32, %v2377_v3  ;;  %v1008_v7 = vpack.c.bf16 %v968_v54, %v967_v60  ;;  %v500_v16 = vmul.f32 %v1833_v30, %v2377_v3 }
  0xda   : > { %v1015_v58 = vpack.c.bf16 %v982_v42, %v981_v43  ;;  %v966_v40 = vmul.f32 %v2532_v56, %v588_v23  ;;  %v965_v41 = vmul.f32 %v2534_v57, %v587_v24  ;;  %v496_v43 = vmul.f32 %v1825_v34, %v2377_v3 }
  0xdb   : > { %v889_v52 = vpop.permute.xlu1 %888  ;;  %v884_v11 = vpop.permute.xlu0 %883  ;;  %v558_v49 = vadd.f32 %v2385_v8, %v497_v39  ;;  %v562_v27 = vadd.f32 %v2385_v8, %v501_v15 }
  0xdc   : > { %1993 = vmatmul.mubr.bf16.gmra.mrb[24].mxu1 %v1015_v58  ;;  %v984_v2 = vmul.f32 %v889_v52, %v606_v45  ;;  %v983_v4 = vmul.f32 %v884_v11, %v605_v46  ;;  %v1830_v58 = vunpack.c.h.bf16 %v1859_v44  ;;  %v1007_v56 = vpack.c.bf16 %v966_v40, %v965_v41 }
  0xdd   : > { %1996 = vmatprep.mubr.msk.bf16.mxu1 %vm2101_vm0, %v2100_v5  ;;  %v557_v52 = vadd.f32 %v2385_v8, %v496_v43  ;;  %v612_v11 = vmax.f32 %v558_v49, 0.0  ;;  %v616_v23 = vmax.f32 %v562_v27, 0.0 }
  0xde   : > { %v1016_v19 = vpack.c.bf16 %v984_v2, %v983_v4  ;;  %v499_v12 = vmul.f32 %v1830_v58, %v2377_v3  ;;  %v559_v4 = vadd.f32 %v2385_v8, %v498_v53 }
  0xdf   : > { %v899_v28 = vpop.permute.xlu1 %898  ;;  %v894_v29 = vpop.permute.xlu0 %893  ;;  %v611_v0 = vmax.f32 %v557_v52, 0.0 }
  0xe0   : > { %1953 = vmatmul.mubr.bf16.gmra.mrb[40].mxu0 %v1005_v55  ;;  %v986_v26 = vmul.f32 %v899_v28, %v608_v14  ;;  %v985_v33 = vmul.f32 %v894_v29, %v607_v20  ;;  %v560_v2 = vadd.f32 %v2385_v8, %v499_v12  ;;  %v613_v14 = vmax.f32 %v559_v4, 0.0 }
  0xe1   : > { %1956 = vmatprep.mubr.msk.bf16.mxu0 %vm2101_vm0, %v2100_v5  ;;  %v561_v28 = vadd.f32 %v2385_v8, %v500_v16 }
  0xe2   : > { %v1017_v42 = vpack.c.bf16 %v986_v26, %v985_v33  ;;  %v614_v61 = vmax.f32 %v560_v2, 0.0 }
  0xe3   : > { %v909_v45 = vpop.permute.xlu1 %908  ;;  %v904_v46 = vpop.permute.xlu0 %903  ;;  %v615_v24 = vmax.f32 %v561_v28, 0.0 }
  0xe4   : > { %1997 = vmatmul.mubr.bf16.gmra.mrb[28].mxu1 %v1016_v19  ;;  %v988_v51 = vmul.f32 %v909_v45, %v610_v37  ;;  %v987_v57 = vmul.f32 %v904_v46, %v609_v38 }
  0xe5   : > { %2000 = vmatprep.mubr.msk.bf16.mxu1 %vm2101_vm0, %v2100_v5 }
  0xe6   : > { %v1018_v63 = vpack.c.bf16 %v988_v51, %v987_v57 }
  0xe7   : > { %v919_v50 = vpop.permute.xlu1 %918  ;;  %v914_v55 = vpop.permute.xlu0 %913 }
  0xe8   : > { %1957 = vmatmul.mubr.bf16.gmra.mrb[44].mxu0 %v1006_v21  ;;  %v990_v9 = vmul.f32 %v919_v50, %v612_v11  ;;  %v989_v10 = vmul.f32 %v914_v55, %v611_v0 }
  0xe9   : > { %1960 = vmatprep.mubr.msk.bf16.mxu0 %vm2101_vm0, %v2100_v5 }
  0xea   : > { %v1019_v13 = vpack.c.bf16 %v990_v9, %v989_v10 }
  0xeb   : > { %v929_v17 = vpop.permute.xlu1 %928  ;;  %v924_v18 = vpop.permute.xlu0 %923 }
  0xec   : > { %2001 = vmatmul.mubr.bf16.gmra.mrb[32].mxu1 %v1017_v42  ;;  %v992_v19 = vmul.f32 %v929_v17, %v614_v61  ;;  %v991_v20 = vmul.f32 %v924_v18, %v613_v14 }
  0xed   : > { %2004 = vmatprep.mubr.msk.bf16.mxu1 %vm2101_vm0, %v2100_v5 }
  0xee   : > { %v1020_v29 = vpack.c.bf16 %v992_v19, %v991_v20 }
  0xef   : > { %v939_v62 = vpop.permute.xlu1 %938  ;;  %v934_v31 = vpop.permute.xlu0 %933 }
  0xf0   : > { %1961 = vmatmul.mubr.bf16.gmra.mrb[48].mxu0 %v1007_v56  ;;  %v994_v3 = vmul.f32 %v939_v62, %v616_v23  ;;  %v993_v22 = vmul.f32 %v934_v31, %v615_v24 }
  0xf1   : > { %1964 = vmatprep.mubr.msk.bf16.mxu0 %vm2101_vm0, %v2100_v5 }
  0xf2   : > { %v1021_v25 = vpack.c.bf16 %v994_v3, %v993_v22 }
  0xf4   : > { %2005 = vmatmul.mubr.bf16.gmra.mrb[36].mxu1 %v1018_v63 }
  0xf5   : > { %2008 = vmatprep.mubr.msk.bf16.mxu1 %vm2101_vm0, %v2100_v5 }
  0xf8   : > { %1965 = vmatmul.mubr.bf16.gmra.mrb[52].mxu0 %v1008_v7 }
  0xfc   : > { %2009 = vmatmul.mubr.bf16.gmra.mrb[40].mxu1 %v1019_v13 }
  0xfd   : > { %2012 = vmatprep.mubr.msk.bf16.mxu1 %vm2101_vm0, %v2100_v5 }
 0x104   : > { %2013 = vmatmul.mubr.bf16.gmra.mrb[44].mxu1 %v1020_v29 }
 0x105   : > { %2016 = vmatprep.mubr.msk.bf16.mxu1 %vm2101_vm0, %v2100_v5 }
 0x10c   : > { %2017 = vmatmul.mubr.bf16.gmra.mrb[48].mxu1 %v1021_v25 }
 0x163   : > { %v1120_v8 = vpop.f32.mrb[0].mxu0 }
 0x164   : > { %1335 = vst [vmem:[%s2632_s16] sm:$0xff] %v1120_v8  ;;  %v1914_v32 = vpop.f32.mrb[1].mxu0  ;;  %v1449_v26 = vmul.f32 %v1120_v8, %v1120_v8 }
 0x165   : > { %v1123_v21 = vpop.f32.mrb[2].mxu0 }
 0x166   : > { %1336 = vst [vmem:[%s2632_s16 + $0x8] sm:$0xff] %v1123_v21  ;;  %v1389_v5 = vadd.f32 %v1123_v21, %v1120_v8  ;;  %v1450_v33 = vmul.f32 %v1123_v21, %v1123_v21  ;;  %v1915_v34 = vpop.f32.mrb[3].mxu0 }
 0x168   : > { %v1503_v35 = vadd.f32 %v1450_v33, %v1449_v26 }
 0x16b   : > { %v1128_v36 = vpop.f32.mrb[4].mxu0 }
 0x16c   : > { %1337 = vst [vmem:[%s2632_s16 + $0x10] sm:$0xff] %v1128_v36  ;;  %v1390_v37 = vadd.f32 %v1389_v5, %v1128_v36  ;;  %v1451_v38 = vmul.f32 %v1128_v36, %v1128_v36  ;;  %v1918_v39 = vpop.f32.mrb[5].mxu0 }
 0x16d   : > { %v1131_v40 = vpop.f32.mrb[6].mxu0 }
 0x16e   : > { %v1504_v41 = vadd.f32 %v1503_v35, %v1451_v38  ;;  %1338 = vst [vmem:[%s2632_s16 + $0x18] sm:$0xff] %v1131_v40  ;;  %v1391_v42 = vadd.f32 %v1390_v37, %v1131_v40  ;;  %v1452_v43 = vmul.f32 %v1131_v40, %v1131_v40  ;;  %v1919_v44 = vpop.f32.mrb[7].mxu0 }
 0x170   : > { %v1505_v45 = vadd.f32 %v1504_v41, %v1452_v43 }
 0x173   : > { %v1136_v46 = vpop.f32.mrb[8].mxu0 }
 0x174   : > { %1339 = vst [vmem:[%s2632_s16 + $0x20] sm:$0xff] %v1136_v46  ;;  %v1392_v47 = vadd.f32 %v1391_v42, %v1136_v46  ;;  %v1453_v48 = vmul.f32 %v1136_v46, %v1136_v46  ;;  %v1922_v49 = vpop.f32.mrb[9].mxu0 }
 0x175   : > { %v1139_v58 = vpop.f32.mrb[10].mxu0 }
 0x176   : > { %v1506_v59 = vadd.f32 %v1505_v45, %v1453_v48  ;;  %1340 = vst [vmem:[%s2632_s16 + $0x28] sm:$0xff] %v1139_v58  ;;  %v1393_v56 = vadd.f32 %v1392_v47, %v1139_v58  ;;  %v1454_v51 = vmul.f32 %v1139_v58, %v1139_v58  ;;  %v1923_v57 = vpop.f32.mrb[11].mxu0 }
 0x178   : > { %v1507_v52 = vadd.f32 %v1506_v59, %v1454_v51 }
 0x17b   : > { %v1144_v11 = vpop.f32.mrb[12].mxu0 }
 0x17c   : > { %1341 = vst [vmem:[%s2632_s16 + $0x30] sm:$0xff] %v1144_v11  ;;  %v1394_v12 = vadd.f32 %v1393_v56, %v1144_v11  ;;  %v1455_v53 = vmul.f32 %v1144_v11, %v1144_v11  ;;  %v1926_v54 = vpop.f32.mrb[13].mxu0 }
 0x17d   : > { %v1147_v60 = vpop.f32.mrb[14].mxu0 }
 0x17e   : > { %v1508_v63 = vadd.f32 %v1507_v52, %v1455_v53  ;;  %1342 = vst [vmem:[%s2632_s16 + $0x38] sm:$0xff] %v1147_v60  ;;  %v1395_v0 = vadd.f32 %v1394_v12, %v1147_v60  ;;  %v1456_v1 = vmul.f32 %v1147_v60, %v1147_v60  ;;  %v1927_v50 = vpop.f32.mrb[15].mxu0 }
 0x17f   : > { %v2642_v55 = vpop.f32.mrb[0].mxu1 }
 0x180   : > { %v1509_v2 = vadd.f32 %v1508_v63, %v1456_v1  ;;  %1363 = vst [vmem:[%s2632_s16 + $0xe0] sm:$0xff] %v2642_v55  ;;  %v1970_v4 = vpop.f32.mrb[1].mxu1 }
 0x181   : > { %v2646_v6 = vpop.f32.mrb[2].mxu1 }
 0x182   : > { %1364 = vst [vmem:[%s2632_s16 + $0xe8] sm:$0xff] %v2646_v6  ;;  %v1971_v7 = vpop.f32.mrb[3].mxu1 }
 0x183   : > { %v1152_v9 = vpop.f32.mrb[16].mxu0 }
 0x184   : > { %1343 = vst [vmem:[%s2632_s16 + $0x40] sm:$0xff] %v1152_v9  ;;  %v1396_v10 = vadd.f32 %v1395_v0, %v1152_v9  ;;  %v1457_v30 = vmul.f32 %v1152_v9, %v1152_v9  ;;  %v1930_v61 = vpop.f32.mrb[17].mxu0 }
 0x185   : > { %v1155_v13 = vpop.f32.mrb[18].mxu0 }
 0x186   : > { %v1510_v14 = vadd.f32 %v1509_v2, %v1457_v30  ;;  %1344 = vst [vmem:[%s2632_s16 + $0x48] sm:$0xff] %v1155_v13  ;;  %v1397_v15 = vadd.f32 %v1396_v10, %v1155_v13  ;;  %v1458_v16 = vmul.f32 %v1155_v13, %v1155_v13  ;;  %v1931_v17 = vpop.f32.mrb[19].mxu0 }
 0x187   : > { %v2652_v18 = vpop.f32.mrb[4].mxu1 }
 0x188   : > { %v1511_v19 = vadd.f32 %v1510_v14, %v1458_v16  ;;  %1365 = vst [vmem:[%s2632_s16 + $0xf0] sm:$0xff] %v2652_v18  ;;  %v1974_v20 = vpop.f32.mrb[5].mxu1 }
 0x189   : > { %v2656_v27 = vpop.f32.mrb[6].mxu1 }
 0x18a   : > { %1366 = vst [vmem:[%s2632_s16 + $0xf8] sm:$0xff] %v2656_v27  ;;  %v1975_v28 = vpop.f32.mrb[7].mxu1 }
 0x18b   : > { %v1160_v29 = vpop.f32.mrb[20].mxu0 }
 0x18c   : > { %1345 = vst [vmem:[%s2632_s16 + $0x50] sm:$0xff] %v1160_v29  ;;  %v1398_v23 = vadd.f32 %v1397_v15, %v1160_v29  ;;  %v1459_v24 = vmul.f32 %v1160_v29, %v1160_v29  ;;  %v1934_v62 = vpop.f32.mrb[21].mxu0 }
 0x18d   : > { %v1163_v31 = vpop.f32.mrb[22].mxu0 }
 0x18e   : > { %v1512_v3 = vadd.f32 %v1511_v19, %v1459_v24  ;;  %1346 = vst [vmem:[%s2632_s16 + $0x58] sm:$0xff] %v1163_v31  ;;  %v1399_v22 = vadd.f32 %v1398_v23, %v1163_v31  ;;  %v1460_v25 = vmul.f32 %v1163_v31, %v1163_v31  ;;  %v1935_v8 = vpop.f32.mrb[23].mxu0 }
 0x18f   : > { %v2662_v32 = vpop.f32.mrb[8].mxu1 }
 0x190   : > { %v1513_v21 = vadd.f32 %v1512_v3, %v1460_v25  ;;  %1367 = vst [vmem:[%s2632_s16 + $0x100] sm:$0xff] %v2662_v32  ;;  %v1978_v26 = vpop.f32.mrb[9].mxu1 }
 0x191   : > { %v2666_v5 = vpop.f32.mrb[10].mxu1 }
 0x192   : > { %1368 = vst [vmem:[%s2632_s16 + $0x108] sm:$0xff] %v2666_v5  ;;  %v1979_v33 = vpop.f32.mrb[11].mxu1 }
 0x193   : > { %v1168_v34 = vpop.f32.mrb[24].mxu0 }
 0x194   : > { %1347 = vst [vmem:[%s2632_s16 + $0x60] sm:$0xff] %v1168_v34  ;;  %v1400_v35 = vadd.f32 %v1399_v22, %v1168_v34  ;;  %v1461_v36 = vmul.f32 %v1168_v34, %v1168_v34  ;;  %v1938_v37 = vpop.f32.mrb[25].mxu0 }
 0x195   : > { %v1171_v38 = vpop.f32.mrb[26].mxu0 }
 0x196   : > { %v1514_v39 = vadd.f32 %v1513_v21, %v1461_v36  ;;  %1348 = vst [vmem:[%s2632_s16 + $0x68] sm:$0xff] %v1171_v38  ;;  %v1401_v40 = vadd.f32 %v1400_v35, %v1171_v38  ;;  %v1462_v41 = vmul.f32 %v1171_v38, %v1171_v38  ;;  %v1939_v42 = vpop.f32.mrb[27].mxu0 }
 0x197   : > { %v2672_v43 = vpop.f32.mrb[12].mxu1 }
 0x198   : > { %v1515_v44 = vadd.f32 %v1514_v39, %v1462_v41  ;;  %1369 = vst [vmem:[%s2632_s16 + $0x110] sm:$0xff] %v2672_v43  ;;  %v1982_v45 = vpop.f32.mrb[13].mxu1 }
 0x199   : > { %v2676_v46 = vpop.f32.mrb[14].mxu1 }
 0x19a   : > { %1370 = vst [vmem:[%s2632_s16 + $0x118] sm:$0xff] %v2676_v46  ;;  %v1983_v47 = vpop.f32.mrb[15].mxu1 }
 0x19b   : > { %v1176_v48 = vpop.f32.mrb[28].mxu0 }
 0x19c   : > { %1349 = vst [vmem:[%s2632_s16 + $0x70] sm:$0xff] %v1176_v48  ;;  %v1402_v49 = vadd.f32 %v1401_v40, %v1176_v48  ;;  %v1463_v58 = vmul.f32 %v1176_v48, %v1176_v48  ;;  %v1942_v59 = vpop.f32.mrb[29].mxu0 }
 0x19d   : > { %v1179_v56 = vpop.f32.mrb[30].mxu0 }
 0x19e   : > { %v1516_v51 = vadd.f32 %v1515_v44, %v1463_v58  ;;  %1350 = vst [vmem:[%s2632_s16 + $0x78] sm:$0xff] %v1179_v56  ;;  %v1403_v57 = vadd.f32 %v1402_v49, %v1179_v56  ;;  %v1464_v52 = vmul.f32 %v1179_v56, %v1179_v56  ;;  %v1943_v11 = vpop.f32.mrb[31].mxu0 }
 0x19f   : > { %v2682_v12 = vpop.f32.mrb[16].mxu1 }
 0x1a0   : > { %v1517_v53 = vadd.f32 %v1516_v51, %v1464_v52  ;;  %1371 = vst [vmem:[%s2632_s16 + $0x120] sm:$0xff] %v2682_v12  ;;  %v1986_v54 = vpop.f32.mrb[17].mxu1 }
 0x1a1   : > { %v2686_v60 = vpop.f32.mrb[18].mxu1 }
 0x1a2   : > { %1372 = vst [vmem:[%s2632_s16 + $0x128] sm:$0xff] %v2686_v60  ;;  %v1987_v63 = vpop.f32.mrb[19].mxu1 }
 0x1a3   : > { %v1184_v0 = vpop.f32.mrb[32].mxu0 }
 0x1a4   : > { %1351 = vst [vmem:[%s2632_s16 + $0x80] sm:$0xff] %v1184_v0  ;;  %v1404_v1 = vadd.f32 %v1403_v57, %v1184_v0  ;;  %v1465_v50 = vmul.f32 %v1184_v0, %v1184_v0  ;;  %v1946_v2 = vpop.f32.mrb[33].mxu0 }
 0x1a5   : > { %v1187_v4 = vpop.f32.mrb[34].mxu0 }
 0x1a6   : > { %v1518_v7 = vadd.f32 %v1517_v53, %v1465_v50  ;;  %1352 = vst [vmem:[%s2632_s16 + $0x88] sm:$0xff] %v1187_v4  ;;  %v1405_v9 = vadd.f32 %v1404_v1, %v1187_v4  ;;  %v1466_v10 = vmul.f32 %v1187_v4, %v1187_v4  ;;  %v1947_v30 = vpop.f32.mrb[35].mxu0 }
 0x1a7   : > { %v2692_v61 = vpop.f32.mrb[20].mxu1 }
 0x1a8   : > { %v1519_v13 = vadd.f32 %v1518_v7, %v1466_v10  ;;  %1373 = vst [vmem:[%s2632_s16 + $0x130] sm:$0xff] %v2692_v61  ;;  %v1990_v14 = vpop.f32.mrb[21].mxu1 }
 0x1a9   : > { %v2696_v15 = vpop.f32.mrb[22].mxu1 }
 0x1aa   : > { %1374 = vst [vmem:[%s2632_s16 + $0x138] sm:$0xff] %v2696_v15  ;;  %v1991_v16 = vpop.f32.mrb[23].mxu1 }
 0x1ab   : > { %v1192_v17 = vpop.f32.mrb[36].mxu0 }
 0x1ac   : > { %1353 = vst [vmem:[%s2632_s16 + $0x90] sm:$0xff] %v1192_v17  ;;  %v1406_v19 = vadd.f32 %v1405_v9, %v1192_v17  ;;  %v1467_v20 = vmul.f32 %v1192_v17, %v1192_v17  ;;  %v1950_v28 = vpop.f32.mrb[37].mxu0 }
 0x1ad   : > { %v1195_v29 = vpop.f32.mrb[38].mxu0 }
 0x1ae   : > { %v1520_v23 = vadd.f32 %v1519_v13, %v1467_v20  ;;  %1354 = vst [vmem:[%s2632_s16 + $0x98] sm:$0xff] %v1195_v29  ;;  %v1407_v24 = vadd.f32 %v1406_v19, %v1195_v29  ;;  %v1468_v62 = vmul.f32 %v1195_v29, %v1195_v29  ;;  %v1951_v31 = vpop.f32.mrb[39].mxu0 }
 0x1af   : > { %v2702_v3 = vpop.f32.mrb[24].mxu1 }
 0x1b0   : > { %v1521_v22 = vadd.f32 %v1520_v23, %v1468_v62  ;;  %1375 = vst [vmem:[%s2632_s16 + $0x140] sm:$0xff] %v2702_v3  ;;  %v1994_v25 = vpop.f32.mrb[25].mxu1 }
 0x1b1   : > { %v2706_v8 = vpop.f32.mrb[26].mxu1 }
 0x1b2   : > { %1376 = vst [vmem:[%s2632_s16 + $0x148] sm:$0xff] %v2706_v8  ;;  %v1995_v21 = vpop.f32.mrb[27].mxu1 }
 0x1b3   : > { %v1200_v26 = vpop.f32.mrb[40].mxu0 }
 0x1b4   : > { %1355 = vst [vmem:[%s2632_s16 + $0xa0] sm:$0xff] %v1200_v26  ;;  %v1408_v33 = vadd.f32 %v1407_v24, %v1200_v26  ;;  %v1469_v34 = vmul.f32 %v1200_v26, %v1200_v26  ;;  %v1954_v35 = vpop.f32.mrb[41].mxu0 }
 0x1b5   : > { %v1203_v36 = vpop.f32.mrb[42].mxu0 }
 0x1b6   : > { %v1522_v37 = vadd.f32 %v1521_v22, %v1469_v34  ;;  %1356 = vst [vmem:[%s2632_s16 + $0xa8] sm:$0xff] %v1203_v36  ;;  %v1409_v38 = vadd.f32 %v1408_v33, %v1203_v36  ;;  %v1470_v39 = vmul.f32 %v1203_v36, %v1203_v36  ;;  %v1955_v40 = vpop.f32.mrb[43].mxu0  ;;  %v1477_v34 = vmul.f32 %v2642_v55, %v2642_v55 }
 0x1b7   : > { %v2712_v41 = vpop.f32.mrb[28].mxu1 }
 0x1b8   : > { %v1523_v42 = vadd.f32 %v1522_v37, %v1470_v39  ;;  %1377 = vst [vmem:[%s2632_s16 + $0x150] sm:$0xff] %v2712_v41  ;;  %v1998_v44 = vpop.f32.mrb[29].mxu1  ;;  %v1478_v39 = vmul.f32 %v2646_v6, %v2646_v6 }
 0x1b9   : > { %v2716_v45 = vpop.f32.mrb[30].mxu1 }
 0x1ba   : > { %1378 = vst [vmem:[%s2632_s16 + $0x158] sm:$0xff] %v2716_v45  ;;  %v1999_v47 = vpop.f32.mrb[31].mxu1 }
 0x1bb   : > { %v1208_v48 = vpop.f32.mrb[44].mxu0  ;;  %v1479_v47 = vmul.f32 %v2652_v18, %v2652_v18 }
 0x1bc   : > { %1357 = vst [vmem:[%s2632_s16 + $0xb0] sm:$0xff] %v1208_v48  ;;  %v1410_v49 = vadd.f32 %v1409_v38, %v1208_v48  ;;  %v1471_v58 = vmul.f32 %v1208_v48, %v1208_v48  ;;  %v1958_v59 = vpop.f32.mrb[45].mxu0 }
 0x1bd   : > { %v1211_v56 = vpop.f32.mrb[46].mxu0 }
 0x1be   : > { %v1524_v51 = vadd.f32 %v1523_v42, %v1471_v58  ;;  %1358 = vst [vmem:[%s2632_s16 + $0xb8] sm:$0xff] %v1211_v56  ;;  %v1411_v57 = vadd.f32 %v1410_v49, %v1211_v56  ;;  %v1472_v52 = vmul.f32 %v1211_v56, %v1211_v56  ;;  %v1959_v11 = vpop.f32.mrb[47].mxu0  ;;  %v1480_v49 = vmul.f32 %v2656_v27, %v2656_v27 }
 0x1bf   : > { %v2722_v53 = vpop.f32.mrb[32].mxu1 }
 0x1c0   : > { %v1525_v54 = vadd.f32 %v1524_v51, %v1472_v52  ;;  %1379 = vst [vmem:[%s2632_s16 + $0x160] sm:$0xff] %v2722_v53  ;;  %v2002_v63 = vpop.f32.mrb[33].mxu1 }
 0x1c1   : > { %v2726_v0 = vpop.f32.mrb[34].mxu1 }
 0x1c2   : > { %1380 = vst [vmem:[%s2632_s16 + $0x168] sm:$0xff] %v2726_v0  ;;  %v2003_v1 = vpop.f32.mrb[35].mxu1 }
 0x1c3   : > { %v1216_v50 = vpop.f32.mrb[48].mxu0  ;;  %v1483_v1 = vmul.f32 %v2672_v43, %v2672_v43 }
 0x1c4   : > { %1359 = vst [vmem:[%s2632_s16 + $0xc0] sm:$0xff] %v1216_v50  ;;  %v1412_v2 = vadd.f32 %v1411_v57, %v1216_v50  ;;  %v1473_v4 = vmul.f32 %v1216_v50, %v1216_v50  ;;  %v1962_v7 = vpop.f32.mrb[49].mxu0 }
 0x1c5   : > { %v1219_v9 = vpop.f32.mrb[50].mxu0 }
 0x1c6   : > { %v1526_v10 = vadd.f32 %v1525_v54, %v1473_v4  ;;  %1360 = vst [vmem:[%s2632_s16 + $0xc8] sm:$0xff] %v1219_v9  ;;  %v1413_v30 = vadd.f32 %v1412_v2, %v1219_v9  ;;  %v1474_v13 = vmul.f32 %v1219_v9, %v1219_v9  ;;  %v1963_v14 = vpop.f32.mrb[51].mxu0  ;;  %v1484_v2 = vmul.f32 %v2676_v46, %v2676_v46 }
 0x1c7   : > { %v2732_v16 = vpop.f32.mrb[36].mxu1 }
 0x1c8   : > { %v1527_v17 = vadd.f32 %v1526_v10, %v1474_v13  ;;  %1381 = vst [vmem:[%s2632_s16 + $0x170] sm:$0xff] %v2732_v16  ;;  %v2006_v19 = vpop.f32.mrb[37].mxu1 }
 0x1c9   : > { %v2736_v20 = vpop.f32.mrb[38].mxu1 }
 0x1ca   : > { %1382 = vst [vmem:[%s2632_s16 + $0x178] sm:$0xff] %v2736_v20  ;;  %v2007_v28 = vpop.f32.mrb[39].mxu1 }
 0x1cb   : > { %v1224_v29 = vpop.f32.mrb[52].mxu0 }
 0x1cc   : > { %1361 = vst [vmem:[%s2632_s16 + $0xd0] sm:$0xff] %v1224_v29  ;;  %v1414_v23 = vadd.f32 %v1413_v30, %v1224_v29  ;;  %v1475_v24 = vmul.f32 %v1224_v29, %v1224_v29  ;;  %v1966_v62 = vpop.f32.mrb[53].mxu0 }
 0x1cd   : > { %v1227_v31 = vpop.f32.mrb[54].mxu0 }
 0x1ce   : > { %v1528_v22 = vadd.f32 %v1527_v17, %v1475_v24  ;;  %1362 = vst [vmem:[%s2632_s16 + $0xd8] sm:$0xff] %v1227_v31  ;;  %v1415_v25 = vadd.f32 %v1414_v23, %v1227_v31  ;;  %v1476_v21 = vmul.f32 %v1227_v31, %v1227_v31  ;;  %v1967_v26 = vpop.f32.mrb[55].mxu0  ;;  %v1489_v31 = vmul.f32 %v2702_v3, %v2702_v3 }
 0x1cf   : > { %v2742_v33 = vpop.f32.mrb[40].mxu1 }
 0x1d0   : > { %v1416_v35 = vadd.f32 %v1415_v25, %v2642_v55  ;;  %v1529_v36 = vadd.f32 %v1528_v22, %v1476_v21  ;;  %1383 = vst [vmem:[%s2632_s16 + $0x180] sm:$0xff] %v2742_v33  ;;  %v2010_v37 = vpop.f32.mrb[41].mxu1  ;;  %v1490_v25 = vmul.f32 %v2706_v8, %v2706_v8 }
 0x1d1   : > { %v2749_v38 = vpop.f32.mrb[42].mxu1 }
 0x1d2   : > { %v1417_v40 = vadd.f32 %v1416_v35, %v2646_v6  ;;  %v1530_v42 = vadd.f32 %v1529_v36, %v1477_v34  ;;  %1384 = vst [vmem:[%s2632_s16 + $0x188] sm:$0xff] %v2749_v38  ;;  %v2011_v44 = vpop.f32.mrb[43].mxu1  ;;  %v1481_v6 = vmul.f32 %v2662_v32, %v2662_v32 }
 0x1d4   : > { %v1418_v55 = vadd.f32 %v1417_v40, %v2652_v18  ;;  %v1531_v48 = vadd.f32 %v1530_v42, %v1478_v39  ;;  %v1482_v18 = vmul.f32 %v2666_v5, %v2666_v5 }
 0x1d6   : > { %v1419_v58 = vadd.f32 %v1418_v55, %v2656_v27  ;;  %v1532_v59 = vadd.f32 %v1531_v48, %v1479_v47 }
 0x1d7   : > { %v2762_v56 = vpop.f32.mrb[44].mxu1 }
 0x1d8   : > { %v1420_v51 = vadd.f32 %v1419_v58, %v2662_v32  ;;  %v1533_v57 = vadd.f32 %v1532_v59, %v1480_v49  ;;  %1385 = vst [vmem:[%s2632_s16 + $0x190] sm:$0xff] %v2762_v56  ;;  %v2014_v52 = vpop.f32.mrb[45].mxu1  ;;  %v1497_v58 = vmul.f32 %v2742_v33, %v2742_v33 }
 0x1d9   : > { %v2769_v11 = vpop.f32.mrb[46].mxu1  ;;  %v1499_v52 = vmul.f32 %v2762_v56, %v2762_v56 }
 0x1da   : > { %v1421_v27 = vadd.f32 %v1420_v51, %v2666_v5  ;;  %v1534_v54 = vadd.f32 %v1533_v57, %v1481_v6  ;;  %1386 = vst [vmem:[%s2632_s16 + $0x198] sm:$0xff] %v2769_v11  ;;  %v2015_v63 = vpop.f32.mrb[47].mxu1  ;;  %v1485_v5 = vmul.f32 %v2682_v12, %v2682_v12  ;;  %v1498_v51 = vmul.f32 %v2749_v38, %v2749_v38 }
 0x1dc   : > { %v1422_v32 = vadd.f32 %v1421_v27, %v2672_v43  ;;  %v1535_v50 = vadd.f32 %v1534_v54, %v1482_v18  ;;  %v1486_v43 = vmul.f32 %v2686_v60, %v2686_v60 }
 0x1de   : > { %v1423_v4 = vadd.f32 %v1422_v32, %v2676_v46  ;;  %v1536_v7 = vadd.f32 %v1535_v50, %v1483_v1  ;;  %v1487_v46 = vmul.f32 %v2692_v61, %v2692_v61 }
 0x1df   : > { %v1328_v9 = vpop.f32.mrb[48].mxu1 }
 0x1e0   : > { %v1424_v10 = vadd.f32 %v1423_v4, %v2682_v12  ;;  %v1537_v30 = vadd.f32 %v1536_v7, %v1484_v2  ;;  %1387 = vst [vmem:[%s2632_s16 + $0x1a0] sm:$0xff] %v1328_v9  ;;  %v2018_v13 = vpop.f32.mrb[49].mxu1  ;;  %v1488_v12 = vmul.f32 %v2696_v15, %v2696_v15  ;;  %v1501_v63 = vmul.f32 %v1328_v9, %v1328_v9 }
 0x1e1   : > { %v1331_v14 = vpop.f32.mrb[50].mxu1 }
 0x1e2   : > { %v1425_v17 = vadd.f32 %v1424_v10, %v2686_v60  ;;  %v1538_v19 = vadd.f32 %v1537_v30, %v1485_v5  ;;  %1388 = vst [vmem:[%s2632_s16 + $0x1a8] sm:$0xff] %v1331_v14  ;;  %v2019_v28 = vpop.f32.mrb[51].mxu1  ;;  %v1502_v50 = vmul.f32 %v1331_v14, %v1331_v14 }
 0x1e4   : > { %v1539_v29 = vadd.f32 %v1538_v19, %v1486_v43  ;;  %v1426_v23 = vadd.f32 %v1425_v17, %v2692_v61  ;;  %v1491_v61 = vmul.f32 %v2712_v41, %v2712_v41 }
 0x1e6   : > { %v1427_v24 = vadd.f32 %v1426_v23, %v2696_v15  ;;  %v1540_v62 = vadd.f32 %v1539_v29, %v1487_v46  ;;  %v1492_v15 = vmul.f32 %v2716_v45, %v2716_v45 }
 0x1e8   : > { %v1428_v60 = vadd.f32 %v1427_v24, %v2702_v3  ;;  %v1541_v22 = vadd.f32 %v1540_v62, %v1488_v12  ;;  %v1493_v3 = vmul.f32 %v2722_v53, %v2722_v53 }
 0x1ea   : > { %v1429_v21 = vadd.f32 %v1428_v60, %v2706_v8  ;;  %v1542_v26 = vadd.f32 %v1541_v22, %v1489_v31  ;;  %v1494_v8 = vmul.f32 %v2726_v0, %v2726_v0 }
 0x1ec   : > { %v1430_v34 = vadd.f32 %v1429_v21, %v2712_v41  ;;  %v1543_v35 = vadd.f32 %v1542_v26, %v1490_v25  ;;  %v1495_v41 = vmul.f32 %v2732_v16, %v2732_v16 }
 0x1ee   : > { %v1431_v36 = vadd.f32 %v1430_v34, %v2716_v45  ;;  %v1544_v37 = vadd.f32 %v1543_v35, %v1491_v61  ;;  %v1496_v45 = vmul.f32 %v2736_v20, %v2736_v20 }
 0x1f0   : > { %v1432_v39 = vadd.f32 %v1431_v36, %v2722_v53  ;;  %v1545_v40 = vadd.f32 %v1544_v37, %v1492_v15 }
 0x1f2   : > { %v1433_v42 = vadd.f32 %v1432_v39, %v2726_v0  ;;  %v1546_v44 = vadd.f32 %v1545_v40, %v1493_v3 }
 0x1f4   : > { %v1434_v47 = vadd.f32 %v1433_v42, %v2732_v16  ;;  %v1547_v55 = vadd.f32 %v1546_v44, %v1494_v8 }
 0x1f6   : > { %v1435_v48 = vadd.f32 %v1434_v47, %v2736_v20  ;;  %v1548_v49 = vadd.f32 %v1547_v55, %v1495_v41 }
 0x1f8   : > { %v1436_v53 = vadd.f32 %v1435_v48, %v2742_v33  ;;  %v1549_v59 = vadd.f32 %v1548_v49, %v1496_v45  ;;  %v1500_v33 = vmul.f32 %v2769_v11, %v2769_v11 }
 0x1fa   : > { %v1550_v0 = vadd.f32 %v1549_v59, %v1497_v58  ;;  %v1437_v6 = vadd.f32 %v1436_v53, %v2749_v38 }
 0x1fc   : > { %v1551_v16 = vadd.f32 %v1550_v0, %v1498_v51  ;;  %v1438_v57 = vadd.f32 %v1437_v6, %v2762_v56 }
 0x1fe   : > { %v1552_v20 = vadd.f32 %v1551_v16, %v1499_v52  ;;  %v1439_v18 = vadd.f32 %v1438_v57, %v2769_v11 }
 0x200   : > { %v1553_v27 = vadd.f32 %v1552_v20, %v1500_v33  ;;  %v1440_v54 = vadd.f32 %v1439_v18, %v1328_v9 }
 0x202   : > { %v1554_v1 = vadd.f32 %v1553_v27, %v1501_v63  ;;  %v1441_v32 = vadd.f32 %v1440_v54, %v1331_v14 }
 0x204   : > { %v1442_v38 = vrot.slane %v1441_v32, 4  ;;  %v1555_v2 = vadd.f32 %v1554_v1, %v1502_v50 }
 0x206   : > { %v1443_v4 = vadd.f32 %v1442_v38, %v1441_v32  ;;  %v1556_v7 = vrot.slane %v1555_v2, 4 }
 0x208   : > { %v1444_v5 = vrot.slane %v1443_v4, 2  ;;  %v1557_v10 = vadd.f32 %v1556_v7, %v1555_v2 }
 0x20a   : > { %v1445_v56 = vadd.f32 %v1444_v5, %v1443_v4  ;;  %v1558_v30 = vrot.slane %v1557_v10, 2 }
 0x20c   : > { %v1446_v13 = vrot.slane %v1445_v56, 1  ;;  %v1559_v43 = vadd.f32 %v1558_v30, %v1557_v10 }
 0x20e   : > { %v1447_v11 = vadd.f32 %v1446_v13, %v1445_v56  ;;  %v1560_v9 = vrot.slane %v1559_v43, 1 }
 0x210   : > { %1448 = vst [vmem:[%s331_s20] sm:$0x1] %v1447_v11  ;;  %v1561_v17 = vadd.f32 %v1560_v9, %v1559_v43 }
 0x212   : > { %1562 = vst [vmem:[%s331_s20 + $0x1] sm:$0x1] %v1561_v17 }
 0x213 PF: > { %s17_s23 = sadd.s32 1, %s2097_s23   ;;  %s2852_s21 = smov %s2093_s22 }
 0x214   : > { %p14_p5 = scmp.ge.s32.totalorder %s17_s23, 4   ;;  %s2853_s22 = smov %s2855_s24 }
 0x216   :  { %16 = sbr.rel (!%p14_p5) target bundleno = 2 (0x2), region = 85 }

// kernel: bottleneck_forward.7
= control target key start
LH: loop header
LB: loop body
LE: loop exit
PB: predicated region body
PF: predicated region fallthrough
CT: control target
= control target key end

     0   :  { %s1953_s18 = smov 0   ;;  %s1955_s19 = smov 0   ;;  %s2430_s0 = inlined_call_operand.vmem [shape: f32[2,432,128], index: 0, kind: input, shape index: {}]   ;;  %s2431_s1 = inlined_call_operand.vmem [shape: f32[2,432,128], index: 1, kind: input, shape index: {}]   ;;  %s2432_s2 = inlined_call_operand.vmem [shape: bf16[128,128], index: 2, kind: input, shape index: {}]   ;;  %s2433_s3 = inlined_call_operand.vmem [shape: f32[1,128], index: 3, kind: input, shape index: {}]   ;;  %s2434_s4 = inlined_call_operand.vmem [shape: f32[1,128], index: 4, kind: input, shape index: {}]   ;;  %s2435_s5 = inlined_call_operand.vmem [shape: f32[2,432,128], index: 5, kind: output, shape index: {}]  }
   0x1   :  { %s1957_s20 = smov 0  }
   0x2 LB: > { %s27_s21 = sadd.s32 1, %s1915_s19  ;;  %p1526_p0 = scmp.ge.s32.totalorder %s1919_s20, 1  ;;  %s1919_s20 = sphi %s1957_s20, %s15_s20   ;;  %s1915_s19 = sphi %s1955_s19, %s2437_s19   ;;  %s1911_s18 = sphi %s1953_s18, %s2436_s18  }
   0x3   : > { %p29_p1 = scmp.ge.s32.totalorder %s27_s21, 2  ;;  %p225_p2 = scmp.lt.s32.totalorder %s1919_s20, 3 }
   0x5   : > { %s2439_s21 = smov (%p29_p1, %s27_s21), 0  ;;  %p226_p3 = pnand %p1526_p0, %p225_p2 }
   0x6   : > { %v1887_v0 = vld [vmem:[%s2432_s2] sm:$0xff] (!%p226_p3)   ;;  %v1921_v1 = vmov (!%p226_p3), 0.0   ;;  %v1888_v2 = vld [vmem:[%s2432_s2 + $0x8] sm:$0xff] (!%p226_p3)   ;;  %p271_p4 = scmp.lt.s32.totalorder (!%p226_p3), %s1911_s18, 1  ;;  %vm1922_vm0 = vmmov (!%p226_p3), 0   ;;  %v1889_v3 = vld [vmem:[%s2432_s2 + $0x10] sm:$0xff] (!%p226_p3)  }
   0x7   : > { %229 = sbr.rel (%p226_p3) target bundleno = 468 (0x1d4), region = 40  ;;  %1612 = vmatprep.subr.bf16.mxu0 (!%p226_p3), %v1921_v1  ;;  %1736 = vmatprep.subr.bf16.mxu1 (!%p226_p3), %v1921_v1  ;;  %v1890_v4 = vld [vmem:[%s2432_s2 + $0x18] sm:$0xff] (!%p226_p3)   ;;  %v1891_v5 = vld [vmem:[%s2432_s2 + $0x20] sm:$0xff] (!%p226_p3)   ;;  %v1892_v9 = vld [vmem:[%s2432_s2 + $0x28] sm:$0xff] (!%p226_p3)  }
   0x8   : > { %1613 = vmatpush3.bf16.msra.mxu0 (!%p226_p3), %v1887_v0  ;;  %1737 = vmatpush3.bf16.msra.mxu1 (!%p226_p3), %v1887_v0  ;;  %v1893_v12 = vld [vmem:[%s2432_s2 + $0x30] sm:$0xff] (!%p226_p3)   ;;  %v1894_v18 = vld [vmem:[%s2432_s2 + $0x38] sm:$0xff] (!%p226_p3)  }
   0x9   : > { %1614 = vmatprep.subr.bf16.mxu0 (!%p226_p3), %v1921_v1  ;;  %1738 = vmatprep.subr.bf16.mxu1 (!%p226_p3), %v1921_v1 }
   0xa   : > { %1628 = vmatprep.mubr.msk.bf16.mxu0 (!%p226_p3), %vm1922_vm0, %v1921_v1  ;;  %1752 = vmatprep.mubr.msk.bf16.mxu1 (!%p226_p3), %vm1922_vm0, %v1921_v1 }
   0xc   : > { %1615 = vmatpush3.bf16.msra.mxu0 (!%p226_p3), %v1888_v2  ;;  %1739 = vmatpush3.bf16.msra.mxu1 (!%p226_p3), %v1888_v2 }
   0xd   : > { %1616 = vmatprep.subr.bf16.mxu0 (!%p226_p3), %v1921_v1  ;;  %1740 = vmatprep.subr.bf16.mxu1 (!%p226_p3), %v1921_v1 }
   0xe   : > { %s2441_s18 = smov (!%p271_p4, %s1911_s18), 1 }
   0xf   : > { %s1990_s28 = smul.u32 432, %s2441_s18 }
  0x10   : > { %1617 = vmatpush3.bf16.msra.mxu0 %v1889_v3  ;;  %1741 = vmatpush3.bf16.msra.mxu1 %v1889_v3 }
  0x11   : > { %1618 = vmatprep.subr.bf16.mxu0 %v1921_v1  ;;  %1742 = vmatprep.subr.bf16.mxu1 %v1921_v1  ;;  %s2001_s8 = scalar_lea.vmem %s2431_s1, %s1990_s28  ;;  %s2181_s22 = scalar_lea.vmem %s2430_s0, %s1990_s28 }
  0x12   : > { %v477_v6 = vld [vmem:[%s2001_s8] sm:$0xff]  ;;  %v478_v7 = vld [vmem:[%s2001_s8 + $0x8] sm:$0xff]  ;;  %v479_v13 = vld [vmem:[%s2001_s8 + $0x10] sm:$0xff]  ;;  %s2210_s30 = scalar_lea.vmem %s2435_s5, %s1990_s28 }
  0x13   : > { %v531_v8 = vpack.c.bf16 %v478_v7, %v477_v6  ;;  %v480_v14 = vld [vmem:[%s2001_s8 + $0x18] sm:$0xff]  ;;  %v481_v22 = vld [vmem:[%s2001_s8 + $0x20] sm:$0xff]  ;;  %v482_v23 = vld [vmem:[%s2001_s8 + $0x28] sm:$0xff] }
  0x14   : > { %1619 = vmatpush3.bf16.msra.mxu0 %v1890_v4  ;;  %1743 = vmatpush3.bf16.msra.mxu1 %v1890_v4  ;;  %v532_v17 = vpack.c.bf16 %v480_v14, %v479_v13  ;;  %v533_v26 = vpack.c.bf16 %v482_v23, %v481_v22  ;;  %v483_v30 = vld [vmem:[%s2001_s8 + $0x30] sm:$0xff]  ;;  %v484_v31 = vld [vmem:[%s2001_s8 + $0x38] sm:$0xff]  ;;  %v485_v38 = vld [vmem:[%s2001_s8 + $0x40] sm:$0xff] }
  0x15   : > { %1620 = vmatprep.subr.bf16.mxu0 %v1921_v1  ;;  %1744 = vmatprep.subr.bf16.mxu1 %v1921_v1  ;;  %v558_v10 = vunpack.c.l.bf16 %v531_v8  ;;  %v559_v11 = vunpack.c.h.bf16 %v531_v8  ;;  %v534_v34 = vpack.c.bf16 %v484_v31, %v483_v30  ;;  %v486_v39 = vld [vmem:[%s2001_s8 + $0x48] sm:$0xff]  ;;  %v487_v46 = vld [vmem:[%s2001_s8 + $0x50] sm:$0xff]  ;;  %v488_v47 = vld [vmem:[%s2001_s8 + $0x58] sm:$0xff] }
  0x16   : > { %v560_v20 = vunpack.c.l.bf16 %v532_v17  ;;  %v561_v21 = vunpack.c.h.bf16 %v532_v17  ;;  %v562_v28 = vunpack.c.l.bf16 %v533_v26  ;;  %v563_v29 = vunpack.c.h.bf16 %v533_v26  ;;  %v489_v54 = vld [vmem:[%s2001_s8 + $0x60] sm:$0xff]  ;;  %v490_v55 = vld [vmem:[%s2001_s8 + $0x68] sm:$0xff]  ;;  %v491_v62 = vld [vmem:[%s2001_s8 + $0x70] sm:$0xff] }
  0x17   : > { %v612_v15 = vsub.f32 %v477_v6, %v558_v10  ;;  %v613_v16 = vsub.f32 %v478_v7, %v559_v11  ;;  %v564_v36 = vunpack.c.l.bf16 %v534_v34  ;;  %v565_v37 = vunpack.c.h.bf16 %v534_v34  ;;  %v492_v63 = vld [vmem:[%s2001_s8 + $0x78] sm:$0xff]  ;;  %v493_v7 = vld [vmem:[%s2001_s8 + $0x80] sm:$0xff] }
  0x18   : > { %1621 = vmatpush3.bf16.msra.mxu0 %v1891_v5  ;;  %1745 = vmatpush3.bf16.msra.mxu1 %v1891_v5  ;;  %v614_v24 = vsub.f32 %v479_v13, %v560_v20  ;;  %v615_v25 = vsub.f32 %v480_v14, %v561_v21  ;;  %v616_v32 = vsub.f32 %v481_v22, %v562_v28 }
  0x19   : > { %1622 = vmatprep.subr.bf16.mxu0 %v1921_v1  ;;  %1746 = vmatprep.subr.bf16.mxu1 %v1921_v1  ;;  %v666_v19 = vpack.c.bf16 %v613_v16, %v612_v15  ;;  %v617_v33 = vsub.f32 %v482_v23, %v563_v29  ;;  %v618_v40 = vsub.f32 %v483_v30, %v564_v36  ;;  %v495_v15 = vld [vmem:[%s2001_s8 + $0x90] sm:$0xff]  ;;  %v496_v16 = vld [vmem:[%s2001_s8 + $0x98] sm:$0xff]  ;;  %v497_v23 = vld [vmem:[%s2001_s8 + $0xa0] sm:$0xff] }
  0x1a   : > { %v667_v27 = vpack.c.bf16 %v615_v25, %v614_v24  ;;  %v619_v41 = vsub.f32 %v484_v31, %v565_v37  ;;  %v535_v42 = vpack.c.bf16 %v486_v39, %v485_v38  ;;  %v536_v50 = vpack.c.bf16 %v488_v47, %v487_v46  ;;  %v498_v24 = vld [vmem:[%s2001_s8 + $0xa8] sm:$0xff]  ;;  %v499_v31 = vld [vmem:[%s2001_s8 + $0xb0] sm:$0xff] }
  0x1b   : > { %v668_v35 = vpack.c.bf16 %v617_v33, %v616_v32  ;;  %v537_v58 = vpack.c.bf16 %v490_v55, %v489_v54  ;;  %v538_v3 = vpack.c.bf16 %v492_v63, %v491_v62  ;;  %v500_v32 = vld [vmem:[%s2001_s8 + $0xb8] sm:$0xff] }
  0x1c   : > { %1623 = vmatpush3.bf16.msra.mxu0 %v1892_v9  ;;  %1747 = vmatpush3.bf16.msra.mxu1 %v1892_v9  ;;  %v669_v43 = vpack.c.bf16 %v619_v41, %v618_v40  ;;  %v566_v44 = vunpack.c.l.bf16 %v535_v42  ;;  %v567_v45 = vunpack.c.h.bf16 %v535_v42  ;;  %v568_v52 = vunpack.c.l.bf16 %v536_v50  ;;  %v502_v40 = vld [vmem:[%s2001_s8 + $0xc8] sm:$0xff] }
  0x1d   : > { %1624 = vmatprep.subr.bf16.mxu0 %v1921_v1  ;;  %1748 = vmatprep.subr.bf16.mxu1 %v1921_v1  ;;  %v569_v53 = vunpack.c.h.bf16 %v536_v50  ;;  %v570_v60 = vunpack.c.l.bf16 %v537_v58  ;;  %v571_v61 = vunpack.c.h.bf16 %v537_v58  ;;  %v572_v5 = vunpack.c.l.bf16 %v538_v3 }
  0x1e   : > { %v620_v48 = vsub.f32 %v485_v38, %v566_v44  ;;  %v621_v49 = vsub.f32 %v486_v39, %v567_v45  ;;  %v622_v56 = vsub.f32 %v487_v46, %v568_v52  ;;  %v573_v6 = vunpack.c.h.bf16 %v538_v3  ;;  %v501_v39 = vld [vmem:[%s2001_s8 + $0xc0] sm:$0xff] }
  0x1f   : > { %v623_v57 = vsub.f32 %v488_v47, %v569_v53  ;;  %v624_v0 = vsub.f32 %v489_v54, %v570_v60  ;;  %v625_v2 = vsub.f32 %v490_v55, %v571_v61  ;;  %v626_v9 = vsub.f32 %v491_v62, %v572_v5  ;;  %v503_v47 = vld [vmem:[%s2001_s8 + $0xd0] sm:$0xff]  ;;  %v505_v55 = vld [vmem:[%s2001_s8 + $0xe0] sm:$0xff] }
  0x20   : > { %1625 = vmatpush3.bf16.msra.mxu0 %v1893_v12  ;;  %1749 = vmatpush3.bf16.msra.mxu1 %v1893_v12  ;;  %v670_v51 = vpack.c.bf16 %v621_v49, %v620_v48  ;;  %v627_v10 = vsub.f32 %v492_v63, %v573_v6  ;;  %v504_v48 = vld [vmem:[%s2001_s8 + $0xd8] sm:$0xff]  ;;  %v507_v63 = vld [vmem:[%s2001_s8 + $0xf0] sm:$0xff] }
  0x21   : > { %1626 = vmatprep.subr.bf16.mxu0 %v1921_v1  ;;  %1750 = vmatprep.subr.bf16.mxu1 %v1921_v1  ;;  %v671_v59 = vpack.c.bf16 %v623_v57, %v622_v56  ;;  %v672_v4 = vpack.c.bf16 %v625_v2, %v624_v0  ;;  %v506_v56 = vld [vmem:[%s2001_s8 + $0xe8] sm:$0xff]  ;;  %v508_v0 = vld [vmem:[%s2001_s8 + $0xf8] sm:$0xff] }
  0x22   : > { %v673_v12 = vpack.c.bf16 %v627_v10, %v626_v9  ;;  %v510_v9 = vld [vmem:[%s2001_s8 + $0x108] sm:$0xff] }
  0x24   : > { %1627 = vmatpush3.bf16.msra.mxu0 %v1894_v18  ;;  %1751 = vmatpush3.bf16.msra.mxu1 %v1894_v18 }
  0x27   : > { %1629 = vmatmul.mubr.bf16.vlgmr.msra.gmra.mrb[0].mxu0 %v666_v19  ;;  %1753 = vmatmul.mubr.bf16.vlgmr.msra.gmra.mrb[0].mxu1 %v531_v8  ;;  %v494_v8 = vld [vmem:[%s2001_s8 + $0x88] sm:$0xff]  ;;  %v540_v19 = vpack.c.bf16 %v496_v16, %v495_v15 }
  0x28   : > { %1632 = vmatprep.mubr.msk.bf16.mxu0 %vm1922_vm0, %v1921_v1  ;;  %1756 = vmatprep.mubr.msk.bf16.mxu1 %vm1922_vm0, %v1921_v1  ;;  %v539_v11 = vpack.c.bf16 %v494_v8, %v493_v7 }
  0x29   : > { %v576_v21 = vunpack.c.l.bf16 %v540_v19  ;;  %v577_v22 = vunpack.c.h.bf16 %v540_v19 }
  0x2a   : > { %v574_v13 = vunpack.c.l.bf16 %v539_v11  ;;  %v575_v14 = vunpack.c.h.bf16 %v539_v11 }
  0x2b   : > { %v630_v25 = vsub.f32 %v495_v15, %v576_v21 }
  0x2c   : > { %v629_v18 = vsub.f32 %v494_v8, %v575_v14  ;;  %v509_v8 = vld [vmem:[%s2001_s8 + $0x100] sm:$0xff] }
  0x2f   : > { %1633 = vmatmul.mubr.bf16.gmra.mrb[4].mxu0 %v667_v27  ;;  %1757 = vmatmul.mubr.bf16.gmra.mrb[4].mxu1 %v532_v17  ;;  %v628_v17 = vsub.f32 %v493_v7, %v574_v13  ;;  %v541_v27 = vpack.c.bf16 %v498_v24, %v497_v23 }
  0x30   : > { %1636 = vmatprep.mubr.msk.bf16.mxu0 %vm1922_vm0, %v1921_v1  ;;  %1760 = vmatprep.mubr.msk.bf16.mxu1 %vm1922_vm0, %v1921_v1 }
  0x31   : > { %v674_v20 = vpack.c.bf16 %v629_v18, %v628_v17  ;;  %v578_v29 = vunpack.c.l.bf16 %v541_v27  ;;  %v579_v30 = vunpack.c.h.bf16 %v541_v27  ;;  %v512_v17 = vld [vmem:[%s2001_s8 + $0x118] sm:$0xff] }
  0x33   : > { %v632_v33 = vsub.f32 %v497_v23, %v578_v29 }
  0x37   : > { %1637 = vmatmul.mubr.bf16.gmra.mrb[8].mxu0 %v668_v35  ;;  %1761 = vmatmul.mubr.bf16.gmra.mrb[8].mxu1 %v533_v26  ;;  %v631_v26 = vsub.f32 %v496_v16, %v577_v22  ;;  %v542_v35 = vpack.c.bf16 %v500_v32, %v499_v31  ;;  %v511_v16 = vld [vmem:[%s2001_s8 + $0x110] sm:$0xff] }
  0x38   : > { %1640 = vmatprep.mubr.msk.bf16.mxu0 %vm1922_vm0, %v1921_v1  ;;  %1764 = vmatprep.mubr.msk.bf16.mxu1 %vm1922_vm0, %v1921_v1 }
  0x39   : > { %v675_v28 = vpack.c.bf16 %v631_v26, %v630_v25  ;;  %v580_v37 = vunpack.c.l.bf16 %v542_v35  ;;  %v581_v38 = vunpack.c.h.bf16 %v542_v35  ;;  %v514_v25 = vld [vmem:[%s2001_s8 + $0x128] sm:$0xff] }
  0x3b   : > { %v634_v41 = vsub.f32 %v499_v31, %v580_v37 }
  0x3f   : > { %1641 = vmatmul.mubr.bf16.gmra.mrb[12].mxu0 %v669_v43  ;;  %1765 = vmatmul.mubr.bf16.gmra.mrb[12].mxu1 %v534_v34  ;;  %v633_v34 = vsub.f32 %v498_v24, %v579_v30  ;;  %v543_v43 = vpack.c.bf16 %v502_v40, %v501_v39  ;;  %v513_v24 = vld [vmem:[%s2001_s8 + $0x120] sm:$0xff] }
  0x40   : > { %1644 = vmatprep.mubr.msk.bf16.mxu0 %vm1922_vm0, %v1921_v1  ;;  %1768 = vmatprep.mubr.msk.bf16.mxu1 %vm1922_vm0, %v1921_v1 }
  0x41   : > { %v676_v36 = vpack.c.bf16 %v633_v34, %v632_v33  ;;  %v582_v45 = vunpack.c.l.bf16 %v543_v43  ;;  %v583_v46 = vunpack.c.h.bf16 %v543_v43  ;;  %v516_v33 = vld [vmem:[%s2001_s8 + $0x138] sm:$0xff] }
  0x43   : > { %v636_v49 = vsub.f32 %v501_v39, %v582_v45 }
  0x47   : > { %1645 = vmatmul.mubr.bf16.gmra.mrb[16].mxu0 %v670_v51  ;;  %1769 = vmatmul.mubr.bf16.gmra.mrb[16].mxu1 %v535_v42  ;;  %v635_v42 = vsub.f32 %v500_v32, %v581_v38  ;;  %v544_v51 = vpack.c.bf16 %v504_v48, %v503_v47  ;;  %v515_v32 = vld [vmem:[%s2001_s8 + $0x130] sm:$0xff] }
  0x48   : > { %1648 = vmatprep.mubr.msk.bf16.mxu0 %vm1922_vm0, %v1921_v1  ;;  %1772 = vmatprep.mubr.msk.bf16.mxu1 %vm1922_vm0, %v1921_v1 }
  0x49   : > { %v677_v44 = vpack.c.bf16 %v635_v42, %v634_v41  ;;  %v584_v53 = vunpack.c.l.bf16 %v544_v51  ;;  %v585_v54 = vunpack.c.h.bf16 %v544_v51  ;;  %v518_v41 = vld [vmem:[%s2001_s8 + $0x148] sm:$0xff] }
  0x4b   : > { %v638_v57 = vsub.f32 %v503_v47, %v584_v53 }
  0x4f   : > { %1649 = vmatmul.mubr.bf16.gmra.mrb[20].mxu0 %v671_v59  ;;  %1773 = vmatmul.mubr.bf16.gmra.mrb[20].mxu1 %v536_v50  ;;  %v637_v50 = vsub.f32 %v502_v40, %v583_v46  ;;  %v545_v59 = vpack.c.bf16 %v506_v56, %v505_v55  ;;  %v517_v40 = vld [vmem:[%s2001_s8 + $0x140] sm:$0xff] }
  0x50   : > { %1652 = vmatprep.mubr.msk.bf16.mxu0 %vm1922_vm0, %v1921_v1  ;;  %1776 = vmatprep.mubr.msk.bf16.mxu1 %vm1922_vm0, %v1921_v1 }
  0x51   : > { %v678_v52 = vpack.c.bf16 %v637_v50, %v636_v49  ;;  %v586_v61 = vunpack.c.l.bf16 %v545_v59  ;;  %v587_v62 = vunpack.c.h.bf16 %v545_v59  ;;  %v520_v49 = vld [vmem:[%s2001_s8 + $0x158] sm:$0xff] }
  0x53   : > { %v640_v2 = vsub.f32 %v505_v55, %v586_v61 }
  0x57   : > { %1653 = vmatmul.mubr.bf16.gmra.mrb[24].mxu0 %v672_v4  ;;  %1777 = vmatmul.mubr.bf16.gmra.mrb[24].mxu1 %v537_v58  ;;  %v639_v58 = vsub.f32 %v504_v48, %v585_v54  ;;  %v546_v4 = vpack.c.bf16 %v508_v0, %v507_v63  ;;  %v519_v48 = vld [vmem:[%s2001_s8 + $0x150] sm:$0xff] }
  0x58   : > { %1656 = vmatprep.mubr.msk.bf16.mxu0 %vm1922_vm0, %v1921_v1  ;;  %1780 = vmatprep.mubr.msk.bf16.mxu1 %vm1922_vm0, %v1921_v1 }
  0x59   : > { %v679_v60 = vpack.c.bf16 %v639_v58, %v638_v57  ;;  %v588_v6 = vunpack.c.l.bf16 %v546_v4  ;;  %v589_v7 = vunpack.c.h.bf16 %v546_v4  ;;  %v522_v57 = vld [vmem:[%s2001_s8 + $0x168] sm:$0xff] }
  0x5b   : > { %v642_v10 = vsub.f32 %v507_v63, %v588_v6 }
  0x5f   : > { %1657 = vmatmul.mubr.bf16.gmra.mrb[28].mxu0 %v673_v12  ;;  %1781 = vmatmul.mubr.bf16.gmra.mrb[28].mxu1 %v538_v3  ;;  %v641_v3 = vsub.f32 %v506_v56, %v587_v62  ;;  %v547_v12 = vpack.c.bf16 %v510_v9, %v509_v8  ;;  %v521_v56 = vld [vmem:[%s2001_s8 + $0x160] sm:$0xff] }
  0x60   : > { %1660 = vmatprep.mubr.msk.bf16.mxu0 %vm1922_vm0, %v1921_v1  ;;  %1784 = vmatprep.mubr.msk.bf16.mxu1 %vm1922_vm0, %v1921_v1 }
  0x61   : > { %v680_v5 = vpack.c.bf16 %v641_v3, %v640_v2  ;;  %v590_v14 = vunpack.c.l.bf16 %v547_v12  ;;  %v591_v15 = vunpack.c.h.bf16 %v547_v12  ;;  %v524_v2 = vld [vmem:[%s2001_s8 + $0x178] sm:$0xff] }
  0x63   : > { %v644_v18 = vsub.f32 %v509_v8, %v590_v14 }
  0x67   : > { %1661 = vmatmul.mubr.bf16.gmra.mrb[32].mxu0 %v674_v20  ;;  %1785 = vmatmul.mubr.bf16.gmra.mrb[32].mxu1 %v539_v11  ;;  %v643_v11 = vsub.f32 %v508_v0, %v589_v7  ;;  %v548_v20 = vpack.c.bf16 %v512_v17, %v511_v16  ;;  %v523_v0 = vld [vmem:[%s2001_s8 + $0x170] sm:$0xff] }
  0x68   : > { %1664 = vmatprep.mubr.msk.bf16.mxu0 %vm1922_vm0, %v1921_v1  ;;  %1788 = vmatprep.mubr.msk.bf16.mxu1 %vm1922_vm0, %v1921_v1 }
  0x69   : > { %v681_v13 = vpack.c.bf16 %v643_v11, %v642_v10  ;;  %v592_v22 = vunpack.c.l.bf16 %v548_v20  ;;  %v593_v23 = vunpack.c.h.bf16 %v548_v20  ;;  %v526_v10 = vld [vmem:[%s2001_s8 + $0x188] sm:$0xff] }
  0x6b   : > { %v646_v26 = vsub.f32 %v511_v16, %v592_v22 }
  0x6f   : > { %1665 = vmatmul.mubr.bf16.gmra.mrb[36].mxu0 %v675_v28  ;;  %1789 = vmatmul.mubr.bf16.gmra.mrb[36].mxu1 %v540_v19  ;;  %v645_v19 = vsub.f32 %v510_v9, %v591_v15  ;;  %v549_v28 = vpack.c.bf16 %v514_v25, %v513_v24  ;;  %v525_v9 = vld [vmem:[%s2001_s8 + $0x180] sm:$0xff] }
  0x70   : > { %1668 = vmatprep.mubr.msk.bf16.mxu0 %vm1922_vm0, %v1921_v1  ;;  %1792 = vmatprep.mubr.msk.bf16.mxu1 %vm1922_vm0, %v1921_v1 }
  0x71   : > { %v682_v21 = vpack.c.bf16 %v645_v19, %v644_v18  ;;  %v594_v30 = vunpack.c.l.bf16 %v549_v28  ;;  %v595_v31 = vunpack.c.h.bf16 %v549_v28  ;;  %v528_v18 = vld [vmem:[%s2001_s8 + $0x198] sm:$0xff] }
  0x73   : > { %v648_v34 = vsub.f32 %v513_v24, %v594_v30 }
  0x77   : > { %1669 = vmatmul.mubr.bf16.gmra.mrb[40].mxu0 %v676_v36  ;;  %1793 = vmatmul.mubr.bf16.gmra.mrb[40].mxu1 %v541_v27  ;;  %v647_v27 = vsub.f32 %v512_v17, %v593_v23  ;;  %v550_v36 = vpack.c.bf16 %v516_v33, %v515_v32  ;;  %v527_v17 = vld [vmem:[%s2001_s8 + $0x190] sm:$0xff] }
  0x78   : > { %1672 = vmatprep.mubr.msk.bf16.mxu0 %vm1922_vm0, %v1921_v1  ;;  %1796 = vmatprep.mubr.msk.bf16.mxu1 %vm1922_vm0, %v1921_v1 }
  0x79   : > { %v683_v29 = vpack.c.bf16 %v647_v27, %v646_v26  ;;  %v596_v38 = vunpack.c.l.bf16 %v550_v36  ;;  %v597_v39 = vunpack.c.h.bf16 %v550_v36  ;;  %v530_v26 = vld [vmem:[%s2001_s8 + $0x1a8] sm:$0xff] }
  0x7b   : > { %v650_v42 = vsub.f32 %v515_v32, %v596_v38  ;;  %v302_v38 = vld [vmem:[%s2181_s22 + $0x8] sm:$0xff] }
  0x7f   : > { %1673 = vmatmul.mubr.bf16.gmra.mrb[44].mxu0 %v677_v44  ;;  %1797 = vmatmul.mubr.bf16.gmra.mrb[44].mxu1 %v542_v35  ;;  %v649_v35 = vsub.f32 %v514_v25, %v595_v31  ;;  %v551_v44 = vpack.c.bf16 %v518_v41, %v517_v40  ;;  %v529_v25 = vld [vmem:[%s2001_s8 + $0x1a0] sm:$0xff] }
  0x80   : > { %1676 = vmatprep.mubr.msk.bf16.mxu0 %vm1922_vm0, %v1921_v1  ;;  %1800 = vmatprep.mubr.msk.bf16.mxu1 %vm1922_vm0, %v1921_v1 }
  0x81   : > { %v684_v37 = vpack.c.bf16 %v649_v35, %v648_v34  ;;  %v598_v46 = vunpack.c.l.bf16 %v551_v44  ;;  %v599_v47 = vunpack.c.h.bf16 %v551_v44  ;;  %v301_v35 = vld [vmem:[%s2181_s22] sm:$0xff] }
  0x83   : > { %v652_v50 = vsub.f32 %v517_v40, %v598_v46  ;;  %v2198_v40 = vld [vmem:[%s2434_s4] ss:$0 sm:$0xff] }
  0x87   : > { %1677 = vmatmul.mubr.bf16.gmra.mrb[48].mxu0 %v678_v52  ;;  %1801 = vmatmul.mubr.bf16.gmra.mrb[48].mxu1 %v543_v43  ;;  %v651_v43 = vsub.f32 %v516_v33, %v597_v39  ;;  %v552_v52 = vpack.c.bf16 %v520_v49, %v519_v48 }
  0x88   : > { %1680 = vmatprep.mubr.msk.bf16.mxu0 %vm1922_vm0, %v1921_v1  ;;  %1804 = vmatprep.mubr.msk.bf16.mxu1 %vm1922_vm0, %v1921_v1 }
  0x89   : > { %v685_v45 = vpack.c.bf16 %v651_v43, %v650_v42  ;;  %v600_v54 = vunpack.c.l.bf16 %v552_v52  ;;  %v601_v55 = vunpack.c.h.bf16 %v552_v52 }
  0x8b   : > { %v654_v58 = vsub.f32 %v519_v48, %v600_v54 }
  0x8f   : > { %1681 = vmatmul.mubr.bf16.gmra.mrb[52].mxu0 %v679_v60  ;;  %1805 = vmatmul.mubr.bf16.gmra.mrb[52].mxu1 %v544_v51  ;;  %v653_v51 = vsub.f32 %v518_v41, %v599_v47  ;;  %v553_v60 = vpack.c.bf16 %v522_v57, %v521_v56 }
  0x90   : > { %1684 = vmatprep.mubr.msk.bf16.mxu0 %vm1922_vm0, %v1921_v1  ;;  %1808 = vmatprep.mubr.msk.bf16.mxu1 %vm1922_vm0, %v1921_v1 }
  0x91   : > { %v686_v53 = vpack.c.bf16 %v653_v51, %v652_v50  ;;  %v602_v62 = vunpack.c.l.bf16 %v553_v60  ;;  %v603_v63 = vunpack.c.h.bf16 %v553_v60  ;;  %v304_v51 = vld [vmem:[%s2181_s22 + $0x18] sm:$0xff] }
  0x93   : > { %v656_v3 = vsub.f32 %v521_v56, %v602_v62 }
  0x97   : > { %1685 = vmatmul.mubr.bf16.gmra.mrb[56].mxu0 %v680_v5  ;;  %1809 = vmatmul.mubr.bf16.gmra.mrb[56].mxu1 %v545_v59  ;;  %v655_v59 = vsub.f32 %v520_v49, %v601_v55  ;;  %v554_v5 = vpack.c.bf16 %v524_v2, %v523_v0 }
  0x98   : > { %1688 = vmatprep.mubr.msk.bf16.mxu0 %vm1922_vm0, %v1921_v1  ;;  %1812 = vmatprep.mubr.msk.bf16.mxu1 %vm1922_vm0, %v1921_v1 }
  0x99   : > { %v687_v61 = vpack.c.bf16 %v655_v59, %v654_v58  ;;  %v604_v7 = vunpack.c.l.bf16 %v554_v5  ;;  %v605_v8 = vunpack.c.h.bf16 %v554_v5 }
  0x9b   : > { %v658_v11 = vsub.f32 %v523_v0, %v604_v7  ;;  %v305_v0 = vld [vmem:[%s2181_s22 + $0x20] sm:$0xff] }
  0x9f   : > { %1689 = vmatmul.mubr.bf16.gmra.mrb[60].mxu0 %v681_v13  ;;  %1813 = vmatmul.mubr.bf16.gmra.mrb[60].mxu1 %v546_v4  ;;  %v657_v4 = vsub.f32 %v522_v57, %v603_v63  ;;  %v555_v13 = vpack.c.bf16 %v526_v10, %v525_v9 }
  0xa0   : > { %1692 = vmatprep.mubr.msk.bf16.mxu0 %vm1922_vm0, %v1921_v1  ;;  %1816 = vmatprep.mubr.msk.bf16.mxu1 %vm1922_vm0, %v1921_v1 }
  0xa1   : > { %v688_v6 = vpack.c.bf16 %v657_v4, %v656_v3  ;;  %v606_v15 = vunpack.c.l.bf16 %v555_v13  ;;  %v607_v16 = vunpack.c.h.bf16 %v555_v13 }
  0xa3   : > { %v660_v19 = vsub.f32 %v525_v9, %v606_v15 }
  0xa7   : > { %1693 = vmatmul.mubr.bf16.gmra.mrb[64].mxu0 %v682_v21  ;;  %1817 = vmatmul.mubr.bf16.gmra.mrb[64].mxu1 %v547_v12  ;;  %v659_v12 = vsub.f32 %v524_v2, %v605_v8  ;;  %v556_v21 = vpack.c.bf16 %v528_v18, %v527_v17  ;;  %v306_v8 = vld [vmem:[%s2181_s22 + $0x28] sm:$0xff] }
  0xa8   : > { %1696 = vmatprep.mubr.msk.bf16.mxu0 %vm1922_vm0, %v1921_v1  ;;  %1820 = vmatprep.mubr.msk.bf16.mxu1 %vm1922_vm0, %v1921_v1 }
  0xa9   : > { %v689_v14 = vpack.c.bf16 %v659_v12, %v658_v11  ;;  %v608_v23 = vunpack.c.l.bf16 %v556_v21  ;;  %v609_v24 = vunpack.c.h.bf16 %v556_v21 }
  0xab   : > { %v662_v27 = vsub.f32 %v527_v17, %v608_v23 }
  0xaf   : > { %1697 = vmatmul.mubr.bf16.gmra.mrb[68].mxu0 %v683_v29  ;;  %1821 = vmatmul.mubr.bf16.gmra.mrb[68].mxu1 %v548_v20  ;;  %v661_v20 = vsub.f32 %v526_v10, %v607_v16  ;;  %v557_v29 = vpack.c.bf16 %v530_v26, %v529_v25 }
  0xb0   : > { %1700 = vmatprep.mubr.msk.bf16.mxu0 %vm1922_vm0, %v1921_v1  ;;  %1824 = vmatprep.mubr.msk.bf16.mxu1 %vm1922_vm0, %v1921_v1 }
  0xb1   : > { %v690_v22 = vpack.c.bf16 %v661_v20, %v660_v19  ;;  %v610_v31 = vunpack.c.l.bf16 %v557_v29  ;;  %v611_v32 = vunpack.c.h.bf16 %v557_v29 }
  0xb3   : > { %v664_v33 = vsub.f32 %v529_v25, %v610_v31  ;;  %v665_v34 = vsub.f32 %v530_v26, %v611_v32 }
  0xb7   : > { %1701 = vmatmul.mubr.bf16.gmra.mrb[72].mxu0 %v684_v37  ;;  %1825 = vmatmul.mubr.bf16.gmra.mrb[72].mxu1 %v549_v28  ;;  %v663_v28 = vsub.f32 %v528_v18, %v609_v24  ;;  %v692_v37 = vpack.c.bf16 %v665_v34, %v664_v33 }
  0xb8   : > { %1704 = vmatprep.mubr.msk.bf16.mxu0 %vm1922_vm0, %v1921_v1  ;;  %1828 = vmatprep.mubr.msk.bf16.mxu1 %vm1922_vm0, %v1921_v1 }
  0xb9   : > { %v691_v30 = vpack.c.bf16 %v663_v28, %v662_v27  ;;  %v308_v28 = vld [vmem:[%s2181_s22 + $0x38] sm:$0xff] }
  0xbf   : > { %1705 = vmatmul.mubr.bf16.gmra.mrb[76].mxu0 %v685_v45  ;;  %1829 = vmatmul.mubr.bf16.gmra.mrb[76].mxu1 %v550_v36  ;;  %v2191_v36 = vld [vmem:[%s2433_s3] ss:$0 sm:$0xff] }
  0xc0   : > { %1708 = vmatprep.mubr.msk.bf16.mxu0 %vm1922_vm0, %v1921_v1  ;;  %1832 = vmatprep.mubr.msk.bf16.mxu1 %vm1922_vm0, %v1921_v1  ;;  %v362_v39 = vmul.f32 %v2191_v36, %v301_v35  ;;  %v365_v59 = vmul.f32 %v2191_v36, %v304_v51  ;;  %v367_v16 = vmul.f32 %v2191_v36, %v306_v8 }
  0xc2   : > { %v423_v41 = vadd.f32 %v2198_v40, %v362_v39  ;;  %v428_v25 = vadd.f32 %v2198_v40, %v367_v16 }
  0xc7   : > { %1709 = vmatmul.mubr.bf16.gmra.mrb[80].mxu0 %v686_v53  ;;  %1833 = vmatmul.mubr.bf16.gmra.mrb[80].mxu1 %v551_v44  ;;  %v303_v44 = vld [vmem:[%s2181_s22 + $0x10] sm:$0xff] }
  0xc8   : > { %1712 = vmatprep.mubr.msk.bf16.mxu0 %vm1922_vm0, %v1921_v1  ;;  %1836 = vmatprep.mubr.msk.bf16.mxu1 %vm1922_vm0, %v1921_v1  ;;  %v364_v56 = vmul.f32 %v2191_v36, %v303_v44 }
  0xcf   : > { %1713 = vmatmul.mubr.bf16.gmra.mrb[84].mxu0 %v687_v61  ;;  %1837 = vmatmul.mubr.bf16.gmra.mrb[84].mxu1 %v552_v52  ;;  %v425_v61 = vadd.f32 %v2198_v40, %v364_v56 }
  0xd0   : > { %1716 = vmatprep.mubr.msk.bf16.mxu0 %vm1922_vm0, %v1921_v1  ;;  %1840 = vmatprep.mubr.msk.bf16.mxu1 %vm1922_vm0, %v1921_v1 }
  0xd7   : > { %1717 = vmatmul.mubr.bf16.gmra.mrb[88].mxu0 %v688_v6  ;;  %1841 = vmatmul.mubr.bf16.gmra.mrb[88].mxu1 %v553_v60 }
  0xd8   : > { %1720 = vmatprep.mubr.msk.bf16.mxu0 %vm1922_vm0, %v1921_v1  ;;  %1844 = vmatprep.mubr.msk.bf16.mxu1 %vm1922_vm0, %v1921_v1 }
  0xdf   : > { %1721 = vmatmul.mubr.bf16.gmra.mrb[92].mxu0 %v689_v14  ;;  %1845 = vmatmul.mubr.bf16.gmra.mrb[92].mxu1 %v554_v5  ;;  %v426_v5 = vadd.f32 %v2198_v40, %v365_v59 }
  0xe0   : > { %1724 = vmatprep.mubr.msk.bf16.mxu0 %vm1922_vm0, %v1921_v1  ;;  %1848 = vmatprep.mubr.msk.bf16.mxu1 %vm1922_vm0, %v1921_v1 }
  0xe7   : > { %1725 = vmatmul.mubr.bf16.gmra.mrb[96].mxu0 %v690_v22  ;;  %1849 = vmatmul.mubr.bf16.gmra.mrb[96].mxu1 %v555_v13  ;;  %v366_v13 = vmul.f32 %v2191_v36, %v305_v0 }
  0xe8   : > { %1728 = vmatprep.mubr.msk.bf16.mxu0 %vm1922_vm0, %v1921_v1  ;;  %1852 = vmatprep.mubr.msk.bf16.mxu1 %vm1922_vm0, %v1921_v1 }
  0xe9   : > { %v427_v18 = vadd.f32 %v2198_v40, %v366_v13 }
  0xef   : > { %1729 = vmatmul.mubr.bf16.gmra.mrb[100].mxu0 %v691_v30  ;;  %1853 = vmatmul.mubr.bf16.gmra.mrb[100].mxu1 %v556_v21  ;;  %v307_v21 = vld [vmem:[%s2181_s22 + $0x30] sm:$0xff] }
  0xf0   : > { %1732 = vmatprep.mubr.msk.bf16.mxu0 %vm1922_vm0, %v1921_v1  ;;  %1856 = vmatprep.mubr.msk.bf16.mxu1 %vm1922_vm0, %v1921_v1  ;;  %v363_v1 = vmul.f32 %v2191_v36, %v302_v38  ;;  %v368_v33 = vmul.f32 %v2191_v36, %v307_v21 }
  0xf2   : > { %v424_v48 = vadd.f32 %v2198_v40, %v363_v1  ;;  %v429_v39 = vadd.f32 %v2198_v40, %v368_v33 }
  0xf7   : > { %1733 = vmatmul.mubr.bf16.gmra.mrb[104].mxu0 %v692_v37  ;;  %1857 = vmatmul.mubr.bf16.gmra.mrb[104].mxu1 %v557_v29  ;;  %v369_v37 = vmul.f32 %v2191_v36, %v308_v28 }
  0xfa   : > { %v791_v42 = vpop.f32.mrb[0].mxu0  ;;  %v1040_v43 = vpop.f32.mrb[0].mxu1 }
  0xfb   : > { %v1041_v45 = vadd.f32 %v1040_v43, %v791_v42  ;;  %v1630_v46 = vpop.f32.mrb[1].mxu0  ;;  %v1754_v47 = vpop.f32.mrb[1].mxu1  ;;  %v309_v42 = vld [vmem:[%s2181_s22 + $0x40] sm:$0xff] }
  0xfc   : > { %v794_v49 = vpop.f32.mrb[2].mxu0  ;;  %v1043_v50 = vpop.f32.mrb[2].mxu1  ;;  %v430_v46 = vadd.f32 %v2198_v40, %v369_v37 }
  0xfd   : > { %v1255_v52 = vadd.f32 %v1041_v45, %v423_v41  ;;  %v1044_v53 = vadd.f32 %v1043_v50, %v794_v49  ;;  %v1631_v54 = vpop.f32.mrb[3].mxu0  ;;  %v1755_v55 = vpop.f32.mrb[3].mxu1  ;;  %v310_v49 = vld [vmem:[%s2181_s22 + $0x48] sm:$0xff] }
  0xfe   : > { %v370_v54 = vmul.f32 %v2191_v36, %v309_v42 }
  0xff   : > { %v1309_v57 = vmax.f32 %v1255_v52, 0.0  ;;  %v1256_v58 = vadd.f32 %v1044_v53, %v424_v48 }
 0x100   : > { %v431_v59 = vadd.f32 %v2198_v40, %v370_v54 }
 0x101   : > { %1363 = vst [vmem:[%s2210_s30] sm:$0xff] %v1309_v57  ;;  %v1310_v60 = vmax.f32 %v1256_v58, 0.0  ;;  %v371_v57 = vmul.f32 %v2191_v36, %v310_v49 }
 0x102   : > { %v799_v62 = vpop.f32.mrb[4].mxu0  ;;  %v1048_v63 = vpop.f32.mrb[4].mxu1 }
 0x103   : > { %1364 = vst [vmem:[%s2210_s30 + $0x8] sm:$0xff] %v1310_v60  ;;  %v1049_v2 = vadd.f32 %v1048_v63, %v799_v62  ;;  %v1634_v3 = vpop.f32.mrb[5].mxu0  ;;  %v1758_v4 = vpop.f32.mrb[5].mxu1  ;;  %v311_v62 = vld [vmem:[%s2181_s22 + $0x50] sm:$0xff] }
 0x104   : > { %v802_v6 = vpop.f32.mrb[6].mxu0  ;;  %v1051_v7 = vpop.f32.mrb[6].mxu1  ;;  %v432_v3 = vadd.f32 %v2198_v40, %v371_v57 }
 0x105   : > { %v1257_v9 = vadd.f32 %v1049_v2, %v425_v61  ;;  %v1052_v10 = vadd.f32 %v1051_v7, %v802_v6  ;;  %v1635_v11 = vpop.f32.mrb[7].mxu0  ;;  %v1759_v12 = vpop.f32.mrb[7].mxu1  ;;  %v312_v6 = vld [vmem:[%s2181_s22 + $0x58] sm:$0xff] }
 0x106   : > { %v372_v11 = vmul.f32 %v2191_v36, %v311_v62 }
 0x107   : > { %v1311_v14 = vmax.f32 %v1257_v9, 0.0  ;;  %v1258_v15 = vadd.f32 %v1052_v10, %v426_v5 }
 0x108   : > { %v433_v16 = vadd.f32 %v2198_v40, %v372_v11 }
 0x109   : > { %1365 = vst [vmem:[%s2210_s30 + $0x10] sm:$0xff] %v1311_v14  ;;  %v1312_v17 = vmax.f32 %v1258_v15, 0.0  ;;  %v373_v14 = vmul.f32 %v2191_v36, %v312_v6 }
 0x10a   : > { %v807_v19 = vpop.f32.mrb[8].mxu0  ;;  %v1056_v20 = vpop.f32.mrb[8].mxu1 }
 0x10b   : > { %1366 = vst [vmem:[%s2210_s30 + $0x18] sm:$0xff] %v1312_v17  ;;  %v1057_v22 = vadd.f32 %v1056_v20, %v807_v19  ;;  %v1638_v23 = vpop.f32.mrb[9].mxu0  ;;  %v1762_v24 = vpop.f32.mrb[9].mxu1  ;;  %v313_v19 = vld [vmem:[%s2181_s22 + $0x60] sm:$0xff] }
 0x10c   : > { %v810_v26 = vpop.f32.mrb[10].mxu0  ;;  %v1059_v27 = vpop.f32.mrb[10].mxu1  ;;  %v434_v23 = vadd.f32 %v2198_v40, %v373_v14 }
 0x10d   : > { %v1259_v29 = vadd.f32 %v1057_v22, %v427_v18  ;;  %v1060_v30 = vadd.f32 %v1059_v27, %v810_v26  ;;  %v1639_v31 = vpop.f32.mrb[11].mxu0  ;;  %v1763_v32 = vpop.f32.mrb[11].mxu1  ;;  %v314_v26 = vld [vmem:[%s2181_s22 + $0x68] sm:$0xff] }
 0x10e   : > { %v374_v31 = vmul.f32 %v2191_v36, %v313_v19 }
 0x10f   : > { %v1313_v34 = vmax.f32 %v1259_v29, 0.0  ;;  %v1260_v35 = vadd.f32 %v1060_v30, %v428_v25 }
 0x110   : > { %v435_v37 = vadd.f32 %v2198_v40, %v374_v31 }
 0x111   : > { %1367 = vst [vmem:[%s2210_s30 + $0x20] sm:$0xff] %v1313_v34  ;;  %v1314_v38 = vmax.f32 %v1260_v35, 0.0  ;;  %v375_v34 = vmul.f32 %v2191_v36, %v314_v26 }
 0x112   : > { %v815_v1 = vpop.f32.mrb[12].mxu0  ;;  %v1064_v41 = vpop.f32.mrb[12].mxu1 }
 0x113   : > { %1368 = vst [vmem:[%s2210_s30 + $0x28] sm:$0xff] %v1314_v38  ;;  %v1065_v43 = vadd.f32 %v1064_v41, %v815_v1  ;;  %v1642_v44 = vpop.f32.mrb[13].mxu0  ;;  %v1766_v45 = vpop.f32.mrb[13].mxu1  ;;  %v315_v1 = vld [vmem:[%s2181_s22 + $0x70] sm:$0xff] }
 0x114   : > { %v818_v47 = vpop.f32.mrb[14].mxu0  ;;  %v1067_v48 = vpop.f32.mrb[14].mxu1  ;;  %v436_v44 = vadd.f32 %v2198_v40, %v375_v34 }
 0x115   : > { %v1261_v50 = vadd.f32 %v1065_v43, %v429_v39  ;;  %v1068_v51 = vadd.f32 %v1067_v48, %v818_v47  ;;  %v1643_v52 = vpop.f32.mrb[15].mxu0  ;;  %v1767_v53 = vpop.f32.mrb[15].mxu1  ;;  %v316_v47 = vld [vmem:[%s2181_s22 + $0x78] sm:$0xff] }
 0x116   : > { %v376_v52 = vmul.f32 %v2191_v36, %v315_v1 }
 0x117   : > { %v1315_v55 = vmax.f32 %v1261_v50, 0.0  ;;  %v1262_v56 = vadd.f32 %v1068_v51, %v430_v46 }
 0x118   : > { %v437_v57 = vadd.f32 %v2198_v40, %v376_v52 }
 0x119   : > { %1369 = vst [vmem:[%s2210_s30 + $0x30] sm:$0xff] %v1315_v55  ;;  %v1316_v58 = vmax.f32 %v1262_v56, 0.0  ;;  %v377_v55 = vmul.f32 %v2191_v36, %v316_v47 }
 0x11a   : > { %v823_v60 = vpop.f32.mrb[16].mxu0  ;;  %v1072_v61 = vpop.f32.mrb[16].mxu1 }
 0x11b   : > { %1370 = vst [vmem:[%s2210_s30 + $0x38] sm:$0xff] %v1316_v58  ;;  %v1073_v63 = vadd.f32 %v1072_v61, %v823_v60  ;;  %v1646_v0 = vpop.f32.mrb[17].mxu0  ;;  %v1770_v2 = vpop.f32.mrb[17].mxu1  ;;  %v317_v60 = vld [vmem:[%s2181_s22 + $0x80] sm:$0xff] }
 0x11c   : > { %v826_v4 = vpop.f32.mrb[18].mxu0  ;;  %v1075_v5 = vpop.f32.mrb[18].mxu1  ;;  %v438_v0 = vadd.f32 %v2198_v40, %v377_v55 }
 0x11d   : > { %v1263_v7 = vadd.f32 %v1073_v63, %v431_v59  ;;  %v1076_v8 = vadd.f32 %v1075_v5, %v826_v4  ;;  %v1647_v9 = vpop.f32.mrb[19].mxu0  ;;  %v1771_v10 = vpop.f32.mrb[19].mxu1  ;;  %v318_v4 = vld [vmem:[%s2181_s22 + $0x88] sm:$0xff] }
 0x11e   : > { %v378_v9 = vmul.f32 %v2191_v36, %v317_v60 }
 0x11f   : > { %v1317_v12 = vmax.f32 %v1263_v7, 0.0  ;;  %v1264_v13 = vadd.f32 %v1076_v8, %v432_v3 }
 0x120   : > { %v439_v14 = vadd.f32 %v2198_v40, %v378_v9 }
 0x121   : > { %1371 = vst [vmem:[%s2210_s30 + $0x40] sm:$0xff] %v1317_v12  ;;  %v1318_v15 = vmax.f32 %v1264_v13, 0.0  ;;  %v379_v12 = vmul.f32 %v2191_v36, %v318_v4 }
 0x122   : > { %v831_v17 = vpop.f32.mrb[20].mxu0  ;;  %v1080_v18 = vpop.f32.mrb[20].mxu1 }
 0x123   : > { %1372 = vst [vmem:[%s2210_s30 + $0x48] sm:$0xff] %v1318_v15  ;;  %v1081_v20 = vadd.f32 %v1080_v18, %v831_v17  ;;  %v1650_v21 = vpop.f32.mrb[21].mxu0  ;;  %v1774_v22 = vpop.f32.mrb[21].mxu1  ;;  %v319_v17 = vld [vmem:[%s2181_s22 + $0x90] sm:$0xff] }
 0x124   : > { %v834_v24 = vpop.f32.mrb[22].mxu0  ;;  %v1083_v25 = vpop.f32.mrb[22].mxu1  ;;  %v440_v21 = vadd.f32 %v2198_v40, %v379_v12 }
 0x125   : > { %v1265_v27 = vadd.f32 %v1081_v20, %v433_v16  ;;  %v1084_v28 = vadd.f32 %v1083_v25, %v834_v24  ;;  %v1651_v29 = vpop.f32.mrb[23].mxu0  ;;  %v1775_v30 = vpop.f32.mrb[23].mxu1  ;;  %v320_v24 = vld [vmem:[%s2181_s22 + $0x98] sm:$0xff] }
 0x126   : > { %v380_v29 = vmul.f32 %v2191_v36, %v319_v17 }
 0x127   : > { %v1319_v32 = vmax.f32 %v1265_v27, 0.0  ;;  %v1266_v33 = vadd.f32 %v1084_v28, %v434_v23 }
 0x128   : > { %v441_v34 = vadd.f32 %v2198_v40, %v380_v29 }
 0x129   : > { %1373 = vst [vmem:[%s2210_s30 + $0x50] sm:$0xff] %v1319_v32  ;;  %v1320_v35 = vmax.f32 %v1266_v33, 0.0  ;;  %v381_v32 = vmul.f32 %v2191_v36, %v320_v24 }
 0x12a   : > { %v839_v38 = vpop.f32.mrb[24].mxu0  ;;  %v1088_v39 = vpop.f32.mrb[24].mxu1 }
 0x12b   : > { %1374 = vst [vmem:[%s2210_s30 + $0x58] sm:$0xff] %v1320_v35  ;;  %v1089_v41 = vadd.f32 %v1088_v39, %v839_v38  ;;  %v1654_v42 = vpop.f32.mrb[25].mxu0  ;;  %v1778_v43 = vpop.f32.mrb[25].mxu1  ;;  %v321_v38 = vld [vmem:[%s2181_s22 + $0xa0] sm:$0xff] }
 0x12c   : > { %v842_v45 = vpop.f32.mrb[26].mxu0  ;;  %v1091_v46 = vpop.f32.mrb[26].mxu1  ;;  %v442_v42 = vadd.f32 %v2198_v40, %v381_v32 }
 0x12d   : > { %v1267_v48 = vadd.f32 %v1089_v41, %v435_v37  ;;  %v1092_v49 = vadd.f32 %v1091_v46, %v842_v45  ;;  %v1655_v50 = vpop.f32.mrb[27].mxu0  ;;  %v1779_v51 = vpop.f32.mrb[27].mxu1  ;;  %v322_v45 = vld [vmem:[%s2181_s22 + $0xa8] sm:$0xff] }
 0x12e   : > { %v382_v50 = vmul.f32 %v2191_v36, %v321_v38 }
 0x12f   : > { %v1321_v53 = vmax.f32 %v1267_v48, 0.0  ;;  %v1268_v54 = vadd.f32 %v1092_v49, %v436_v44 }
 0x130   : > { %v443_v55 = vadd.f32 %v2198_v40, %v382_v50 }
 0x131   : > { %1375 = vst [vmem:[%s2210_s30 + $0x60] sm:$0xff] %v1321_v53  ;;  %v1322_v56 = vmax.f32 %v1268_v54, 0.0  ;;  %v383_v53 = vmul.f32 %v2191_v36, %v322_v45 }
 0x132   : > { %v847_v58 = vpop.f32.mrb[28].mxu0  ;;  %v1096_v59 = vpop.f32.mrb[28].mxu1 }
 0x133   : > { %1376 = vst [vmem:[%s2210_s30 + $0x68] sm:$0xff] %v1322_v56  ;;  %v1097_v61 = vadd.f32 %v1096_v59, %v847_v58  ;;  %v1658_v62 = vpop.f32.mrb[29].mxu0  ;;  %v1782_v63 = vpop.f32.mrb[29].mxu1  ;;  %v323_v58 = vld [vmem:[%s2181_s22 + $0xb0] sm:$0xff] }
 0x134   : > { %v850_v2 = vpop.f32.mrb[30].mxu0  ;;  %v1099_v3 = vpop.f32.mrb[30].mxu1  ;;  %v444_v62 = vadd.f32 %v2198_v40, %v383_v53 }
 0x135   : > { %v1269_v5 = vadd.f32 %v1097_v61, %v437_v57  ;;  %v1100_v6 = vadd.f32 %v1099_v3, %v850_v2  ;;  %v1659_v7 = vpop.f32.mrb[31].mxu0  ;;  %v1783_v8 = vpop.f32.mrb[31].mxu1  ;;  %v324_v2 = vld [vmem:[%s2181_s22 + $0xb8] sm:$0xff] }
 0x136   : > { %v384_v7 = vmul.f32 %v2191_v36, %v323_v58 }
 0x137   : > { %v1323_v10 = vmax.f32 %v1269_v5, 0.0  ;;  %v1270_v11 = vadd.f32 %v1100_v6, %v438_v0 }
 0x138   : > { %v445_v12 = vadd.f32 %v2198_v40, %v384_v7 }
 0x139   : > { %1377 = vst [vmem:[%s2210_s30 + $0x70] sm:$0xff] %v1323_v10  ;;  %v1324_v13 = vmax.f32 %v1270_v11, 0.0  ;;  %v385_v10 = vmul.f32 %v2191_v36, %v324_v2 }
 0x13a   : > { %v855_v15 = vpop.f32.mrb[32].mxu0  ;;  %v1104_v16 = vpop.f32.mrb[32].mxu1 }
 0x13b   : > { %1378 = vst [vmem:[%s2210_s30 + $0x78] sm:$0xff] %v1324_v13  ;;  %v1105_v18 = vadd.f32 %v1104_v16, %v855_v15  ;;  %v1662_v19 = vpop.f32.mrb[33].mxu0  ;;  %v1786_v20 = vpop.f32.mrb[33].mxu1  ;;  %v325_v15 = vld [vmem:[%s2181_s22 + $0xc0] sm:$0xff] }
 0x13c   : > { %v858_v22 = vpop.f32.mrb[34].mxu0  ;;  %v1107_v23 = vpop.f32.mrb[34].mxu1  ;;  %v446_v19 = vadd.f32 %v2198_v40, %v385_v10 }
 0x13d   : > { %v1271_v25 = vadd.f32 %v1105_v18, %v439_v14  ;;  %v1108_v26 = vadd.f32 %v1107_v23, %v858_v22  ;;  %v1663_v27 = vpop.f32.mrb[35].mxu0  ;;  %v1787_v28 = vpop.f32.mrb[35].mxu1  ;;  %v326_v22 = vld [vmem:[%s2181_s22 + $0xc8] sm:$0xff] }
 0x13e   : > { %v386_v27 = vmul.f32 %v2191_v36, %v325_v15 }
 0x13f   : > { %v1325_v30 = vmax.f32 %v1271_v25, 0.0  ;;  %v1272_v31 = vadd.f32 %v1108_v26, %v440_v21 }
 0x140   : > { %v447_v32 = vadd.f32 %v2198_v40, %v386_v27 }
 0x141   : > { %1379 = vst [vmem:[%s2210_s30 + $0x80] sm:$0xff] %v1325_v30  ;;  %v1326_v33 = vmax.f32 %v1272_v31, 0.0  ;;  %v387_v30 = vmul.f32 %v2191_v36, %v326_v22 }
 0x142   : > { %v863_v35 = vpop.f32.mrb[36].mxu0  ;;  %v1112_v37 = vpop.f32.mrb[36].mxu1 }
 0x143   : > { %1380 = vst [vmem:[%s2210_s30 + $0x88] sm:$0xff] %v1326_v33  ;;  %v1113_v39 = vadd.f32 %v1112_v37, %v863_v35  ;;  %v1666_v1 = vpop.f32.mrb[37].mxu0  ;;  %v1790_v41 = vpop.f32.mrb[37].mxu1  ;;  %v327_v35 = vld [vmem:[%s2181_s22 + $0xd0] sm:$0xff] }
 0x144   : > { %v866_v43 = vpop.f32.mrb[38].mxu0  ;;  %v1115_v44 = vpop.f32.mrb[38].mxu1  ;;  %v448_v1 = vadd.f32 %v2198_v40, %v387_v30 }
 0x145   : > { %v1273_v46 = vadd.f32 %v1113_v39, %v441_v34  ;;  %v1116_v47 = vadd.f32 %v1115_v44, %v866_v43  ;;  %v1667_v48 = vpop.f32.mrb[39].mxu0  ;;  %v1791_v49 = vpop.f32.mrb[39].mxu1  ;;  %v328_v43 = vld [vmem:[%s2181_s22 + $0xd8] sm:$0xff] }
 0x146   : > { %v388_v48 = vmul.f32 %v2191_v36, %v327_v35 }
 0x147   : > { %v1327_v51 = vmax.f32 %v1273_v46, 0.0  ;;  %v1274_v52 = vadd.f32 %v1116_v47, %v442_v42 }
 0x148   : > { %v449_v53 = vadd.f32 %v2198_v40, %v388_v48 }
 0x149   : > { %1381 = vst [vmem:[%s2210_s30 + $0x90] sm:$0xff] %v1327_v51  ;;  %v1328_v54 = vmax.f32 %v1274_v52, 0.0  ;;  %v389_v51 = vmul.f32 %v2191_v36, %v328_v43 }
 0x14a   : > { %v871_v56 = vpop.f32.mrb[40].mxu0  ;;  %v1120_v57 = vpop.f32.mrb[40].mxu1 }
 0x14b   : > { %1382 = vst [vmem:[%s2210_s30 + $0x98] sm:$0xff] %v1328_v54  ;;  %v1121_v59 = vadd.f32 %v1120_v57, %v871_v56  ;;  %v1670_v60 = vpop.f32.mrb[41].mxu0  ;;  %v1794_v61 = vpop.f32.mrb[41].mxu1  ;;  %v329_v56 = vld [vmem:[%s2181_s22 + $0xe0] sm:$0xff] }
 0x14c   : > { %v874_v63 = vpop.f32.mrb[42].mxu0  ;;  %v1123_v0 = vpop.f32.mrb[42].mxu1  ;;  %v450_v60 = vadd.f32 %v2198_v40, %v389_v51 }
 0x14d   : > { %v1275_v3 = vadd.f32 %v1121_v59, %v443_v55  ;;  %v1124_v4 = vadd.f32 %v1123_v0, %v874_v63  ;;  %v1671_v5 = vpop.f32.mrb[43].mxu0  ;;  %v1795_v6 = vpop.f32.mrb[43].mxu1  ;;  %v330_v63 = vld [vmem:[%s2181_s22 + $0xe8] sm:$0xff] }
 0x14e   : > { %v390_v5 = vmul.f32 %v2191_v36, %v329_v56 }
 0x14f   : > { %v1329_v8 = vmax.f32 %v1275_v3, 0.0  ;;  %v1276_v9 = vadd.f32 %v1124_v4, %v444_v62 }
 0x150   : > { %v451_v10 = vadd.f32 %v2198_v40, %v390_v5 }
 0x151   : > { %1383 = vst [vmem:[%s2210_s30 + $0xa0] sm:$0xff] %v1329_v8  ;;  %v1330_v11 = vmax.f32 %v1276_v9, 0.0  ;;  %v391_v8 = vmul.f32 %v2191_v36, %v330_v63 }
 0x152   : > { %v879_v13 = vpop.f32.mrb[44].mxu0  ;;  %v1128_v14 = vpop.f32.mrb[44].mxu1 }
 0x153   : > { %1384 = vst [vmem:[%s2210_s30 + $0xa8] sm:$0xff] %v1330_v11  ;;  %v1129_v16 = vadd.f32 %v1128_v14, %v879_v13  ;;  %v1674_v17 = vpop.f32.mrb[45].mxu0  ;;  %v1798_v18 = vpop.f32.mrb[45].mxu1  ;;  %v331_v13 = vld [vmem:[%s2181_s22 + $0xf0] sm:$0xff] }
 0x154   : > { %v882_v20 = vpop.f32.mrb[46].mxu0  ;;  %v1131_v21 = vpop.f32.mrb[46].mxu1  ;;  %v452_v17 = vadd.f32 %v2198_v40, %v391_v8 }
 0x155   : > { %v1277_v23 = vadd.f32 %v1129_v16, %v445_v12  ;;  %v1132_v24 = vadd.f32 %v1131_v21, %v882_v20  ;;  %v1675_v25 = vpop.f32.mrb[47].mxu0  ;;  %v1799_v26 = vpop.f32.mrb[47].mxu1  ;;  %v332_v20 = vld [vmem:[%s2181_s22 + $0xf8] sm:$0xff] }
 0x156   : > { %v392_v25 = vmul.f32 %v2191_v36, %v331_v13 }
 0x157   : > { %v1331_v28 = vmax.f32 %v1277_v23, 0.0  ;;  %v1278_v29 = vadd.f32 %v1132_v24, %v446_v19 }
 0x158   : > { %v453_v30 = vadd.f32 %v2198_v40, %v392_v25 }
 0x159   : > { %1385 = vst [vmem:[%s2210_s30 + $0xb0] sm:$0xff] %v1331_v28  ;;  %v1332_v31 = vmax.f32 %v1278_v29, 0.0  ;;  %v393_v28 = vmul.f32 %v2191_v36, %v332_v20 }
 0x15a   : > { %v887_v33 = vpop.f32.mrb[48].mxu0  ;;  %v1136_v34 = vpop.f32.mrb[48].mxu1 }
 0x15b   : > { %1386 = vst [vmem:[%s2210_s30 + $0xb8] sm:$0xff] %v1332_v31  ;;  %v1137_v37 = vadd.f32 %v1136_v34, %v887_v33  ;;  %v1678_v38 = vpop.f32.mrb[49].mxu0  ;;  %v1802_v39 = vpop.f32.mrb[49].mxu1  ;;  %v333_v33 = vld [vmem:[%s2181_s22 + $0x100] sm:$0xff] }
 0x15c   : > { %v890_v41 = vpop.f32.mrb[50].mxu0  ;;  %v1139_v42 = vpop.f32.mrb[50].mxu1  ;;  %v454_v38 = vadd.f32 %v2198_v40, %v393_v28 }
 0x15d   : > { %v1279_v44 = vadd.f32 %v1137_v37, %v447_v32  ;;  %v1140_v45 = vadd.f32 %v1139_v42, %v890_v41  ;;  %v1679_v46 = vpop.f32.mrb[51].mxu0  ;;  %v1803_v47 = vpop.f32.mrb[51].mxu1  ;;  %v334_v41 = vld [vmem:[%s2181_s22 + $0x108] sm:$0xff] }
 0x15e   : > { %v394_v46 = vmul.f32 %v2191_v36, %v333_v33 }
 0x15f   : > { %v1333_v49 = vmax.f32 %v1279_v44, 0.0  ;;  %v1280_v50 = vadd.f32 %v1140_v45, %v448_v1 }
 0x160   : > { %v455_v51 = vadd.f32 %v2198_v40, %v394_v46 }
 0x161   : > { %1387 = vst [vmem:[%s2210_s30 + $0xc0] sm:$0xff] %v1333_v49  ;;  %v1334_v52 = vmax.f32 %v1280_v50, 0.0  ;;  %v395_v49 = vmul.f32 %v2191_v36, %v334_v41 }
 0x162   : > { %v895_v54 = vpop.f32.mrb[52].mxu0  ;;  %v1144_v55 = vpop.f32.mrb[52].mxu1 }
 0x163   : > { %1388 = vst [vmem:[%s2210_s30 + $0xc8] sm:$0xff] %v1334_v52  ;;  %v1145_v57 = vadd.f32 %v1144_v55, %v895_v54  ;;  %v1682_v58 = vpop.f32.mrb[53].mxu0  ;;  %v1806_v59 = vpop.f32.mrb[53].mxu1  ;;  %v335_v54 = vld [vmem:[%s2181_s22 + $0x110] sm:$0xff] }
 0x164   : > { %v898_v61 = vpop.f32.mrb[54].mxu0  ;;  %v1147_v62 = vpop.f32.mrb[54].mxu1  ;;  %v456_v58 = vadd.f32 %v2198_v40, %v395_v49 }
 0x165   : > { %v1281_v0 = vadd.f32 %v1145_v57, %v449_v53  ;;  %v1148_v2 = vadd.f32 %v1147_v62, %v898_v61  ;;  %v1683_v3 = vpop.f32.mrb[55].mxu0  ;;  %v1807_v4 = vpop.f32.mrb[55].mxu1  ;;  %v336_v61 = vld [vmem:[%s2181_s22 + $0x118] sm:$0xff] }
 0x166   : > { %v396_v3 = vmul.f32 %v2191_v36, %v335_v54 }
 0x167   : > { %v1335_v6 = vmax.f32 %v1281_v0, 0.0  ;;  %v1282_v7 = vadd.f32 %v1148_v2, %v450_v60 }
 0x168   : > { %v457_v8 = vadd.f32 %v2198_v40, %v396_v3 }
 0x169   : > { %1389 = vst [vmem:[%s2210_s30 + $0xd0] sm:$0xff] %v1335_v6  ;;  %v1336_v9 = vmax.f32 %v1282_v7, 0.0  ;;  %v397_v6 = vmul.f32 %v2191_v36, %v336_v61 }
 0x16a   : > { %v903_v11 = vpop.f32.mrb[56].mxu0  ;;  %v1152_v12 = vpop.f32.mrb[56].mxu1 }
 0x16b   : > { %1390 = vst [vmem:[%s2210_s30 + $0xd8] sm:$0xff] %v1336_v9  ;;  %v1153_v14 = vadd.f32 %v1152_v12, %v903_v11  ;;  %v1686_v15 = vpop.f32.mrb[57].mxu0  ;;  %v1810_v16 = vpop.f32.mrb[57].mxu1  ;;  %v337_v11 = vld [vmem:[%s2181_s22 + $0x120] sm:$0xff] }
 0x16c   : > { %v906_v18 = vpop.f32.mrb[58].mxu0  ;;  %v1155_v19 = vpop.f32.mrb[58].mxu1  ;;  %v458_v15 = vadd.f32 %v2198_v40, %v397_v6 }
 0x16d   : > { %v1283_v21 = vadd.f32 %v1153_v14, %v451_v10  ;;  %v1156_v22 = vadd.f32 %v1155_v19, %v906_v18  ;;  %v1687_v23 = vpop.f32.mrb[59].mxu0  ;;  %v1811_v24 = vpop.f32.mrb[59].mxu1  ;;  %v338_v18 = vld [vmem:[%s2181_s22 + $0x128] sm:$0xff] }
 0x16e   : > { %v398_v23 = vmul.f32 %v2191_v36, %v337_v11 }
 0x16f   : > { %v1337_v26 = vmax.f32 %v1283_v21, 0.0  ;;  %v1284_v27 = vadd.f32 %v1156_v22, %v452_v17 }
 0x170   : > { %v459_v28 = vadd.f32 %v2198_v40, %v398_v23 }
 0x171   : > { %1391 = vst [vmem:[%s2210_s30 + $0xe0] sm:$0xff] %v1337_v26  ;;  %v1338_v29 = vmax.f32 %v1284_v27, 0.0  ;;  %v399_v26 = vmul.f32 %v2191_v36, %v338_v18 }
 0x172   : > { %v911_v31 = vpop.f32.mrb[60].mxu0  ;;  %v1160_v32 = vpop.f32.mrb[60].mxu1 }
 0x173   : > { %1392 = vst [vmem:[%s2210_s30 + $0xe8] sm:$0xff] %v1338_v29  ;;  %v1161_v34 = vadd.f32 %v1160_v32, %v911_v31  ;;  %v1690_v35 = vpop.f32.mrb[61].mxu0  ;;  %v1814_v37 = vpop.f32.mrb[61].mxu1  ;;  %v339_v31 = vld [vmem:[%s2181_s22 + $0x130] sm:$0xff] }
 0x174   : > { %v914_v39 = vpop.f32.mrb[62].mxu0  ;;  %v1163_v1 = vpop.f32.mrb[62].mxu1  ;;  %v460_v35 = vadd.f32 %v2198_v40, %v399_v26 }
 0x175   : > { %v1285_v42 = vadd.f32 %v1161_v34, %v453_v30  ;;  %v1164_v43 = vadd.f32 %v1163_v1, %v914_v39  ;;  %v1691_v44 = vpop.f32.mrb[63].mxu0  ;;  %v1815_v45 = vpop.f32.mrb[63].mxu1  ;;  %v340_v39 = vld [vmem:[%s2181_s22 + $0x138] sm:$0xff] }
 0x176   : > { %v400_v44 = vmul.f32 %v2191_v36, %v339_v31 }
 0x177   : > { %v1339_v47 = vmax.f32 %v1285_v42, 0.0  ;;  %v1286_v48 = vadd.f32 %v1164_v43, %v454_v38 }
 0x178   : > { %v461_v49 = vadd.f32 %v2198_v40, %v400_v44 }
 0x179   : > { %1393 = vst [vmem:[%s2210_s30 + $0xf0] sm:$0xff] %v1339_v47  ;;  %v1340_v50 = vmax.f32 %v1286_v48, 0.0  ;;  %v401_v47 = vmul.f32 %v2191_v36, %v340_v39 }
 0x17a   : > { %v919_v52 = vpop.f32.mrb[64].mxu0  ;;  %v1168_v53 = vpop.f32.mrb[64].mxu1 }
 0x17b   : > { %1394 = vst [vmem:[%s2210_s30 + $0xf8] sm:$0xff] %v1340_v50  ;;  %v1169_v55 = vadd.f32 %v1168_v53, %v919_v52  ;;  %v1694_v56 = vpop.f32.mrb[65].mxu0  ;;  %v1818_v57 = vpop.f32.mrb[65].mxu1  ;;  %v341_v52 = vld [vmem:[%s2181_s22 + $0x140] sm:$0xff] }
 0x17c   : > { %v922_v59 = vpop.f32.mrb[66].mxu0  ;;  %v1171_v60 = vpop.f32.mrb[66].mxu1  ;;  %v462_v56 = vadd.f32 %v2198_v40, %v401_v47 }
 0x17d   : > { %v1287_v62 = vadd.f32 %v1169_v55, %v455_v51  ;;  %v1172_v63 = vadd.f32 %v1171_v60, %v922_v59  ;;  %v1695_v0 = vpop.f32.mrb[67].mxu0  ;;  %v1819_v2 = vpop.f32.mrb[67].mxu1  ;;  %v342_v59 = vld [vmem:[%s2181_s22 + $0x148] sm:$0xff] }
 0x17e   : > { %v402_v0 = vmul.f32 %v2191_v36, %v341_v52 }
 0x17f   : > { %v1341_v4 = vmax.f32 %v1287_v62, 0.0  ;;  %v1288_v5 = vadd.f32 %v1172_v63, %v456_v58 }
 0x180   : > { %v463_v6 = vadd.f32 %v2198_v40, %v402_v0 }
 0x181   : > { %1395 = vst [vmem:[%s2210_s30 + $0x100] sm:$0xff] %v1341_v4  ;;  %v1342_v7 = vmax.f32 %v1288_v5, 0.0  ;;  %v403_v4 = vmul.f32 %v2191_v36, %v342_v59 }
 0x182   : > { %v927_v9 = vpop.f32.mrb[68].mxu0  ;;  %v1176_v10 = vpop.f32.mrb[68].mxu1 }
 0x183   : > { %1396 = vst [vmem:[%s2210_s30 + $0x108] sm:$0xff] %v1342_v7  ;;  %v1177_v12 = vadd.f32 %v1176_v10, %v927_v9  ;;  %v1698_v13 = vpop.f32.mrb[69].mxu0  ;;  %v1822_v14 = vpop.f32.mrb[69].mxu1  ;;  %v343_v9 = vld [vmem:[%s2181_s22 + $0x150] sm:$0xff] }
 0x184   : > { %v930_v16 = vpop.f32.mrb[70].mxu0  ;;  %v1179_v17 = vpop.f32.mrb[70].mxu1  ;;  %v464_v13 = vadd.f32 %v2198_v40, %v403_v4 }
 0x185   : > { %v1289_v19 = vadd.f32 %v1177_v12, %v457_v8  ;;  %v1180_v20 = vadd.f32 %v1179_v17, %v930_v16  ;;  %v1699_v21 = vpop.f32.mrb[71].mxu0  ;;  %v1823_v22 = vpop.f32.mrb[71].mxu1  ;;  %v344_v16 = vld [vmem:[%s2181_s22 + $0x158] sm:$0xff] }
 0x186   : > { %v404_v21 = vmul.f32 %v2191_v36, %v343_v9 }
 0x187   : > { %v1343_v24 = vmax.f32 %v1289_v19, 0.0  ;;  %v1290_v25 = vadd.f32 %v1180_v20, %v458_v15 }
 0x188   : > { %v465_v26 = vadd.f32 %v2198_v40, %v404_v21 }
 0x189   : > { %1397 = vst [vmem:[%s2210_s30 + $0x110] sm:$0xff] %v1343_v24  ;;  %v1344_v27 = vmax.f32 %v1290_v25, 0.0  ;;  %v405_v24 = vmul.f32 %v2191_v36, %v344_v16 }
 0x18a   : > { %v935_v29 = vpop.f32.mrb[72].mxu0  ;;  %v1184_v30 = vpop.f32.mrb[72].mxu1 }
 0x18b   : > { %1398 = vst [vmem:[%s2210_s30 + $0x118] sm:$0xff] %v1344_v27  ;;  %v1185_v32 = vadd.f32 %v1184_v30, %v935_v29  ;;  %v1702_v33 = vpop.f32.mrb[73].mxu0  ;;  %v1826_v34 = vpop.f32.mrb[73].mxu1  ;;  %v345_v29 = vld [vmem:[%s2181_s22 + $0x160] sm:$0xff] }
 0x18c   : > { %v938_v37 = vpop.f32.mrb[74].mxu0  ;;  %v1187_v38 = vpop.f32.mrb[74].mxu1  ;;  %v466_v33 = vadd.f32 %v2198_v40, %v405_v24 }
 0x18d   : > { %v1291_v1 = vadd.f32 %v1185_v32, %v459_v28  ;;  %v1188_v41 = vadd.f32 %v1187_v38, %v938_v37  ;;  %v1703_v42 = vpop.f32.mrb[75].mxu0  ;;  %v1827_v43 = vpop.f32.mrb[75].mxu1  ;;  %v346_v37 = vld [vmem:[%s2181_s22 + $0x168] sm:$0xff] }
 0x18e   : > { %v406_v42 = vmul.f32 %v2191_v36, %v345_v29 }
 0x18f   : > { %v1345_v45 = vmax.f32 %v1291_v1, 0.0  ;;  %v1292_v46 = vadd.f32 %v1188_v41, %v460_v35 }
 0x190   : > { %v467_v47 = vadd.f32 %v2198_v40, %v406_v42 }
 0x191   : > { %1399 = vst [vmem:[%s2210_s30 + $0x120] sm:$0xff] %v1345_v45  ;;  %v1346_v48 = vmax.f32 %v1292_v46, 0.0  ;;  %v407_v45 = vmul.f32 %v2191_v36, %v346_v37 }
 0x192   : > { %v943_v50 = vpop.f32.mrb[76].mxu0  ;;  %v1192_v51 = vpop.f32.mrb[76].mxu1 }
 0x193   : > { %1400 = vst [vmem:[%s2210_s30 + $0x128] sm:$0xff] %v1346_v48  ;;  %v1193_v53 = vadd.f32 %v1192_v51, %v943_v50  ;;  %v1706_v54 = vpop.f32.mrb[77].mxu0  ;;  %v1830_v55 = vpop.f32.mrb[77].mxu1  ;;  %v347_v50 = vld [vmem:[%s2181_s22 + $0x170] sm:$0xff] }
 0x194   : > { %v946_v57 = vpop.f32.mrb[78].mxu0  ;;  %v1195_v58 = vpop.f32.mrb[78].mxu1  ;;  %v468_v54 = vadd.f32 %v2198_v40, %v407_v45 }
 0x195   : > { %v1293_v60 = vadd.f32 %v1193_v53, %v461_v49  ;;  %v1196_v61 = vadd.f32 %v1195_v58, %v946_v57  ;;  %v1707_v62 = vpop.f32.mrb[79].mxu0  ;;  %v1831_v63 = vpop.f32.mrb[79].mxu1  ;;  %v348_v57 = vld [vmem:[%s2181_s22 + $0x178] sm:$0xff] }
 0x196   : > { %v408_v62 = vmul.f32 %v2191_v36, %v347_v50 }
 0x197   : > { %v1347_v2 = vmax.f32 %v1293_v60, 0.0  ;;  %v1294_v3 = vadd.f32 %v1196_v61, %v462_v56 }
 0x198   : > { %v469_v4 = vadd.f32 %v2198_v40, %v408_v62 }
 0x199   : > { %1401 = vst [vmem:[%s2210_s30 + $0x130] sm:$0xff] %v1347_v2  ;;  %v1348_v5 = vmax.f32 %v1294_v3, 0.0  ;;  %v409_v2 = vmul.f32 %v2191_v36, %v348_v57 }
 0x19a   : > { %v951_v7 = vpop.f32.mrb[80].mxu0  ;;  %v1200_v8 = vpop.f32.mrb[80].mxu1 }
 0x19b   : > { %1402 = vst [vmem:[%s2210_s30 + $0x138] sm:$0xff] %v1348_v5  ;;  %v1201_v10 = vadd.f32 %v1200_v8, %v951_v7  ;;  %v1710_v11 = vpop.f32.mrb[81].mxu0  ;;  %v1834_v12 = vpop.f32.mrb[81].mxu1  ;;  %v349_v7 = vld [vmem:[%s2181_s22 + $0x180] sm:$0xff] }
 0x19c   : > { %v954_v14 = vpop.f32.mrb[82].mxu0  ;;  %v1203_v15 = vpop.f32.mrb[82].mxu1  ;;  %v2396_v11 = vld [vmem:[%s2434_s4] ss:$0 sm:$0xff] }
 0x19d   : > { %v1295_v17 = vadd.f32 %v1201_v10, %v463_v6  ;;  %v1204_v18 = vadd.f32 %v1203_v15, %v954_v14  ;;  %v1711_v19 = vpop.f32.mrb[83].mxu0  ;;  %v1835_v20 = vpop.f32.mrb[83].mxu1  ;;  %v470_v12 = vadd.f32 %v2396_v11, %v409_v2  ;;  %v350_v14 = vld [vmem:[%s2181_s22 + $0x188] sm:$0xff] }
 0x19f   : > { %v1349_v22 = vmax.f32 %v1295_v17, 0.0  ;;  %v1296_v23 = vadd.f32 %v1204_v18, %v464_v13  ;;  %v1896_v18 = vld [vmem:[%s2433_s3] ss:$0 sm:$0xff] }
 0x1a0   : > { %v410_v19 = vmul.f32 %v1896_v18, %v349_v7 }
 0x1a1   : > { %1403 = vst [vmem:[%s2210_s30 + $0x140] sm:$0xff] %v1349_v22  ;;  %v1350_v25 = vmax.f32 %v1296_v23, 0.0  ;;  %v411_v22 = vmul.f32 %v1896_v18, %v350_v14 }
 0x1a2   : > { %v959_v27 = vpop.f32.mrb[84].mxu0  ;;  %v1208_v28 = vpop.f32.mrb[84].mxu1  ;;  %v471_v24 = vadd.f32 %v2396_v11, %v410_v19 }
 0x1a3   : > { %1404 = vst [vmem:[%s2210_s30 + $0x148] sm:$0xff] %v1350_v25  ;;  %v1209_v30 = vadd.f32 %v1208_v28, %v959_v27  ;;  %v1714_v31 = vpop.f32.mrb[85].mxu0  ;;  %v1838_v32 = vpop.f32.mrb[85].mxu1  ;;  %v351_v27 = vld [vmem:[%s2181_s22 + $0x190] sm:$0xff] }
 0x1a4   : > { %v962_v34 = vpop.f32.mrb[86].mxu0  ;;  %v1211_v35 = vpop.f32.mrb[86].mxu1  ;;  %v472_v31 = vadd.f32 %v2396_v11, %v411_v22 }
 0x1a5   : > { %v1297_v38 = vadd.f32 %v1209_v30, %v465_v26  ;;  %v1212_v39 = vadd.f32 %v1211_v35, %v962_v34  ;;  %v1715_v1 = vpop.f32.mrb[87].mxu0  ;;  %v1839_v41 = vpop.f32.mrb[87].mxu1  ;;  %v352_v34 = vld [vmem:[%s2181_s22 + $0x198] sm:$0xff] }
 0x1a6   : > { %v412_v1 = vmul.f32 %v1896_v18, %v351_v27 }
 0x1a7   : > { %v1351_v43 = vmax.f32 %v1297_v38, 0.0  ;;  %v1298_v44 = vadd.f32 %v1212_v39, %v466_v33 }
 0x1a8   : > { %v473_v45 = vadd.f32 %v2396_v11, %v412_v1 }
 0x1a9   : > { %1405 = vst [vmem:[%s2210_s30 + $0x150] sm:$0xff] %v1351_v43  ;;  %v1352_v46 = vmax.f32 %v1298_v44, 0.0  ;;  %v413_v43 = vmul.f32 %v1896_v18, %v352_v34 }
 0x1aa   : > { %v967_v48 = vpop.f32.mrb[88].mxu0  ;;  %v1216_v49 = vpop.f32.mrb[88].mxu1 }
 0x1ab   : > { %1406 = vst [vmem:[%s2210_s30 + $0x158] sm:$0xff] %v1352_v46  ;;  %v1217_v51 = vadd.f32 %v1216_v49, %v967_v48  ;;  %v1718_v52 = vpop.f32.mrb[89].mxu0  ;;  %v1842_v53 = vpop.f32.mrb[89].mxu1  ;;  %v353_v48 = vld [vmem:[%s2181_s22 + $0x1a0] sm:$0xff] }
 0x1ac   : > { %v970_v55 = vpop.f32.mrb[90].mxu0  ;;  %v1219_v56 = vpop.f32.mrb[90].mxu1  ;;  %v474_v52 = vadd.f32 %v2396_v11, %v413_v43 }
 0x1ad   : > { %v1299_v58 = vadd.f32 %v1217_v51, %v467_v47  ;;  %v1220_v59 = vadd.f32 %v1219_v56, %v970_v55  ;;  %v1719_v60 = vpop.f32.mrb[91].mxu0  ;;  %v1843_v61 = vpop.f32.mrb[91].mxu1  ;;  %v354_v55 = vld [vmem:[%s2181_s22 + $0x1a8] sm:$0xff] }
 0x1ae   : > { %v414_v60 = vmul.f32 %v1896_v18, %v353_v48 }
 0x1af   : > { %v1353_v63 = vmax.f32 %v1299_v58, 0.0  ;;  %v1300_v0 = vadd.f32 %v1220_v59, %v468_v54 }
 0x1b0   : > { %v475_v2 = vadd.f32 %v2396_v11, %v414_v60 }
 0x1b1   : > { %1407 = vst [vmem:[%s2210_s30 + $0x160] sm:$0xff] %v1353_v63  ;;  %v1354_v3 = vmax.f32 %v1300_v0, 0.0  ;;  %v415_v63 = vmul.f32 %v1896_v18, %v354_v55 }
 0x1b2   : > { %v975_v5 = vpop.f32.mrb[92].mxu0  ;;  %v1224_v6 = vpop.f32.mrb[92].mxu1 }
 0x1b3   : > { %1408 = vst [vmem:[%s2210_s30 + $0x168] sm:$0xff] %v1354_v3  ;;  %v1225_v8 = vadd.f32 %v1224_v6, %v975_v5  ;;  %v1722_v9 = vpop.f32.mrb[93].mxu0  ;;  %v1846_v10 = vpop.f32.mrb[93].mxu1 }
 0x1b4   : > { %v978_v36 = vpop.f32.mrb[94].mxu0  ;;  %v1227_v13 = vpop.f32.mrb[94].mxu1 }
 0x1b5   : > { %v1301_v40 = vadd.f32 %v1225_v8, %v469_v4  ;;  %v1228_v15 = vadd.f32 %v1227_v13, %v978_v36  ;;  %v1723_v16 = vpop.f32.mrb[95].mxu0  ;;  %v1847_v17 = vpop.f32.mrb[95].mxu1  ;;  %v476_v8 = vadd.f32 %v2396_v11, %v415_v63 }
 0x1b7   : > { %v1355_v20 = vmax.f32 %v1301_v40, 0.0  ;;  %v1302_v21 = vadd.f32 %v1228_v15, %v470_v12 }
 0x1b9   : > { %1409 = vst [vmem:[%s2210_s30 + $0x170] sm:$0xff] %v1355_v20  ;;  %v1356_v23 = vmax.f32 %v1302_v21, 0.0 }
 0x1ba   : > { %v983_v25 = vpop.f32.mrb[96].mxu0  ;;  %v1232_v26 = vpop.f32.mrb[96].mxu1 }
 0x1bb   : > { %1410 = vst [vmem:[%s2210_s30 + $0x178] sm:$0xff] %v1356_v23  ;;  %v1233_v28 = vadd.f32 %v1232_v26, %v983_v25  ;;  %v1726_v29 = vpop.f32.mrb[97].mxu0  ;;  %v1850_v30 = vpop.f32.mrb[97].mxu1 }
 0x1bc   : > { %v986_v32 = vpop.f32.mrb[98].mxu0  ;;  %v1235_v33 = vpop.f32.mrb[98].mxu1 }
 0x1bd   : > { %v1303_v35 = vadd.f32 %v1233_v28, %v471_v24  ;;  %v1236_v37 = vadd.f32 %v1235_v33, %v986_v32  ;;  %v1727_v38 = vpop.f32.mrb[99].mxu0  ;;  %v1851_v39 = vpop.f32.mrb[99].mxu1 }
 0x1bf   : > { %v1357_v41 = vmax.f32 %v1303_v35, 0.0  ;;  %v1304_v42 = vadd.f32 %v1236_v37, %v472_v31 }
 0x1c1   : > { %1411 = vst [vmem:[%s2210_s30 + $0x180] sm:$0xff] %v1357_v41  ;;  %v1358_v44 = vmax.f32 %v1304_v42, 0.0 }
 0x1c2   : > { %v991_v46 = vpop.f32.mrb[100].mxu0  ;;  %v1240_v47 = vpop.f32.mrb[100].mxu1 }
 0x1c3   : > { %1412 = vst [vmem:[%s2210_s30 + $0x188] sm:$0xff] %v1358_v44  ;;  %v1241_v49 = vadd.f32 %v1240_v47, %v991_v46  ;;  %v1730_v50 = vpop.f32.mrb[101].mxu0  ;;  %v1854_v51 = vpop.f32.mrb[101].mxu1 }
 0x1c4   : > { %v994_v53 = vpop.f32.mrb[102].mxu0  ;;  %v1243_v54 = vpop.f32.mrb[102].mxu1 }
 0x1c5   : > { %v1305_v56 = vadd.f32 %v1241_v49, %v473_v45  ;;  %v1244_v57 = vadd.f32 %v1243_v54, %v994_v53  ;;  %v1731_v58 = vpop.f32.mrb[103].mxu0  ;;  %v1855_v59 = vpop.f32.mrb[103].mxu1 }
 0x1c7   : > { %v1359_v61 = vmax.f32 %v1305_v56, 0.0  ;;  %v1306_v62 = vadd.f32 %v1244_v57, %v474_v52 }
 0x1c9   : > { %1413 = vst [vmem:[%s2210_s30 + $0x190] sm:$0xff] %v1359_v61  ;;  %v1360_v0 = vmax.f32 %v1306_v62, 0.0 }
 0x1ca   : > { %v999_v3 = vpop.f32.mrb[104].mxu0  ;;  %v1248_v4 = vpop.f32.mrb[104].mxu1 }
 0x1cb   : > { %1414 = vst [vmem:[%s2210_s30 + $0x198] sm:$0xff] %v1360_v0  ;;  %v1249_v5 = vadd.f32 %v1248_v4, %v999_v3  ;;  %v1734_v6 = vpop.f32.mrb[105].mxu0  ;;  %v1858_v7 = vpop.f32.mrb[105].mxu1 }
 0x1cc   : > { %v1002_v9 = vpop.f32.mrb[106].mxu0  ;;  %v1251_v10 = vpop.f32.mrb[106].mxu1 }
 0x1cd   : > { %v1307_v12 = vadd.f32 %v1249_v5, %v475_v2  ;;  %v1252_v36 = vadd.f32 %v1251_v10, %v1002_v9  ;;  %v1735_v13 = vpop.f32.mrb[107].mxu0  ;;  %v1859_v14 = vpop.f32.mrb[107].mxu1 }
 0x1cf   : > { %v1361_v40 = vmax.f32 %v1307_v12, 0.0  ;;  %v1308_v15 = vadd.f32 %v1252_v36, %v476_v8 }
 0x1d1   : > { %1415 = vst [vmem:[%s2210_s30 + $0x1a0] sm:$0xff] %v1361_v40  ;;  %v1362_v16 = vmax.f32 %v1308_v15, 0.0 }
 0x1d3   : > { %1416 = vst [vmem:[%s2210_s30 + $0x1a8] sm:$0xff] %v1362_v16 }
 0x1d4 PF: > { %s15_s20 = sadd.s32 1, %s1919_s20   ;;  %s2436_s18 = smov %s1915_s19 }
 0x1d5   : > { %p12_p5 = scmp.ge.s32.totalorder %s15_s20, 4   ;;  %s2437_s19 = smov %s2439_s21 }
 0x1d7   :  { %14 = sbr.rel (!%p12_p5) target bundleno = 2 (0x2), region = 73 }

// kernel: bottleneck_forward.5
= control target key start
LH: loop header
LB: loop body
LE: loop exit
PB: predicated region body
PF: predicated region fallthrough
CT: control target
= control target key end

     0   :  { %s6446_s21 = smov 0   ;;  %s9552_s0 = inlined_call_operand.vmem [shape: bf16[2,432,128], index: 0, kind: input, shape index: {}]   ;;  %s9553_s1 = inlined_call_operand.vmem [shape: bf16[3,384,128], index: 1, kind: input, shape index: {}]   ;;  %s9554_s2 = inlined_call_operand.vmem [shape: f32[1,128], index: 2, kind: input, shape index: {}]   ;;  %s9555_s3 = inlined_call_operand.vmem [shape: f32[1,128], index: 3, kind: input, shape index: {}]   ;;  %s9556_s4 = inlined_call_operand.vmem [shape: f32[432,1], index: 4, kind: input, shape index: {}]   ;;  %s9557_s5 = inlined_call_operand.vmem [shape: bf16[2,432,128], index: 5, kind: output, shape index: {0}]   ;;  %s9558_s6 = inlined_call_operand.vmem [shape: f32[2,1,2,128], index: 6, kind: output, shape index: {1}]  }
   0x1 LB: > { %s4859_s22 = sadd.s32 4294967295, %s6406_s21   ;;  %p4863_p0 = scmp.ge.s32.totalorder %s6406_s21, 1  ;;  %s6406_s21 = sphi %s6446_s21, %s17_s21  }
   0x2   : > { %p215_p1 = scmp.lt.s32.totalorder %s6406_s21, 3 }
   0x4   : > { %p216_p2 = pnand %p4863_p0, %p215_p1 }
   0x6   : > { %219 = sbr.rel (%p216_p2) target bundleno = 1211 (0x4bb), region = 40 }
   0xd   : > { %v266_v0 = vld [vmem:[%s9556_s4 + $0x10] sm:$0xff]  ;;  %v264_v1 = vld [vmem:[%s9556_s4] sm:$0xff]  ;;  %v6408_v2 = vmov 0   ;;  %v267_v3 = vld [vmem:[%s9556_s4 + $0x18] sm:$0xff]  ;;  %v9559_v5 = vmov 0.0   ;;  %vm6410_vm0 = vmmov 0  }
   0xe   : > { %6276 = vset.pattern.permute.xlu1 %v6408_v2  ;;  %1636 = vst [vmem:[#allocation2] sm:$0xff] %v6408_v2  ;;  %1639 = vst [vmem:[#allocation2 + $0x18] sm:$0xf] %v6408_v2  ;;  %6275 = vset.pattern.permute.xlu0 %v6408_v2  ;;  %v265_v4 = vld [vmem:[%s9556_s4 + $0x8] sm:$0xff]  ;;  %v268_v7 = vld [vmem:[%s9556_s4 + $0x20] sm:$0xff]  ;;  %p249_p3 = scmp.lt.s32.totalorder %s4859_s22, 1 }
   0xf   : > { %1640 = vst [vmem:[#allocation2 + $0x20] sm:$0xf] %v6408_v2  ;;  %1641 = vst [vmem:[#allocation2 + $0x28] sm:$0xf] %v6408_v2  ;;  %614 = vperm.xlu1 %6276, %v266_v0   ;;  %604 = vperm.xlu0 %6275, %v264_v1   ;;  %v269_v6 = vld [vmem:[%s9556_s4 + $0x28] sm:$0xff]  ;;  %v271_v8 = vld [vmem:[%s9556_s4 + $0x38] sm:$0xff] }
  0x10   : > { %1642 = vst [vmem:[#allocation2 + $0x2a0] sm:$0xf0] %v6408_v2  ;;  %1643 = vst [vmem:[#allocation2 + $0x2a8] sm:$0xf0] %v6408_v2  ;;  %5547 = vmatprep.subr.bf16.mxu0 %v9559_v5  ;;  %2309 = vmatprep.subr.bf16.mxu1 %v6408_v2  ;;  %v270_v9 = vld [vmem:[%s9556_s4 + $0x30] sm:$0xff]  ;;  %v273_v10 = vld [vmem:[%s9556_s4 + $0x48] sm:$0xff] }
  0x11   : > { %1644 = vst [vmem:[#allocation2 + $0x2b0] sm:$0xf0] %v6408_v2  ;;  %v272_v11 = vld [vmem:[%s9556_s4 + $0x40] sm:$0xff]  ;;  %v275_v13 = vld [vmem:[%s9556_s4 + $0x58] sm:$0xff]  ;;  %v274_v14 = vld [vmem:[%s9556_s4 + $0x50] sm:$0xff]  ;;  %5563 = vmatprep.mubr.msk.bf16.mxu0 %vm6410_vm0, %v9559_v5  ;;  %s9921_s22 = smov (!%p249_p3, %s4859_s22), 1 }
  0x12   : > { %v6277_v12 = vld [vmem:[%s9553_s1 + $0x140] sm:$0xff]   ;;  %v6278_v15 = vld [vmem:[%s9553_s1 + $0x148] sm:$0xff]   ;;  %v6279_v18 = vld [vmem:[%s9553_s1 + $0x150] sm:$0xff]   ;;  %s6263_s7 = smul.u32 216, %s9921_s22  ;;  %vm1091_vm3 = vcmask 1043456  }
  0x13   : > { %619 = vperm.xlu1 %6276, %v267_v3   ;;  %609 = vperm.xlu0 %6275, %v265_v4   ;;  %v277_v16 = vld [vmem:[%s9556_s4 + $0x68] sm:$0xff]  ;;  %v276_v17 = vld [vmem:[%s9556_s4 + $0x60] sm:$0xff]  ;;  %v279_v19 = vld [vmem:[%s9556_s4 + $0x78] sm:$0xff] }
  0x14   : > { %5548 = vmatpush3.bf16.msra.mxu0 %v6277_v12  ;;  %v278_v20 = vld [vmem:[%s9556_s4 + $0x70] sm:$0xff]  ;;  %v6280_v21 = vld [vmem:[%s9553_s1 + $0x158] sm:$0xff]   ;;  %v281_v22 = vld [vmem:[%s9556_s4 + $0x88] sm:$0xff]  ;;  %s6651_s20 = scalar_lea.vmem %s9552_s0, %s6263_s7  ;;  %s9103_s12 = scalar_lea.vmem %s9557_s5, %s6263_s7 }
  0x15   : > { %5549 = vmatprep.subr.bf16.mxu0 %v9559_v5  ;;  %v280_v23 = vld [vmem:[%s9556_s4 + $0x80] sm:$0xff]  ;;  %v283_v25 = vld [vmem:[%s9556_s4 + $0x98] sm:$0xff]  ;;  %v282_v26 = vld [vmem:[%s9556_s4 + $0x90] sm:$0xff]  ;;  %s4866_s7 = sshll.u32 %s9921_s22, 1 }
  0x16   : > { %v6281_v24 = vld [vmem:[%s9553_s1 + $0x160] sm:$0xff]   ;;  %v6282_v27 = vld [vmem:[%s9553_s1 + $0x168] sm:$0xff]   ;;  %v6283_v30 = vld [vmem:[%s9553_s1 + $0x170] sm:$0xff]   ;;  %s262_s15 = scalar_lea.vmem %s9558_s6, %s4866_s7 }
  0x17   : > { %629 = vperm.xlu1 %6276, %v269_v6   ;;  %624 = vperm.xlu0 %6275, %v268_v7   ;;  %v285_v28 = vld [vmem:[%s9556_s4 + $0xa8] sm:$0xff]  ;;  %v284_v29 = vld [vmem:[%s9556_s4 + $0xa0] sm:$0xff]  ;;  %v287_v31 = vld [vmem:[%s9556_s4 + $0xb8] sm:$0xff] }
  0x18   : > { %5550 = vmatpush3.bf16.msra.mxu0 %v6278_v15  ;;  %v286_v32 = vld [vmem:[%s9556_s4 + $0xb0] sm:$0xff]  ;;  %v6284_v33 = vld [vmem:[%s9553_s1 + $0x178] sm:$0xff]   ;;  %v6286_v34 = vld [vmem:[%s9553_s1 + $0xc0] sm:$0xff]  }
  0x19   : > { %5551 = vmatprep.subr.bf16.mxu0 %v9559_v5  ;;  %v289_v35 = vld [vmem:[%s9556_s4 + $0xc8] sm:$0xff]  ;;  %v288_v36 = vld [vmem:[%s9556_s4 + $0xc0] sm:$0xff]  ;;  %2310 = vmatpush1.bf16.msra.mxu1 %v6286_v34  ;;  %v291_v38 = vld [vmem:[%s9556_s4 + $0xd8] sm:$0xff] }
  0x1a   : > { %2311 = vmatprep.subr.bf16.mxu1 %v6408_v2  ;;  %v6287_v37 = vld [vmem:[%s9553_s1 + $0xc8] sm:$0xff]   ;;  %v290_v39 = vld [vmem:[%s9556_s4 + $0xd0] sm:$0xff]  ;;  %v292_v41 = vld [vmem:[%s9556_s4 + $0xe0] sm:$0xff] }
  0x1b   : > { %639 = vperm.xlu1 %6276, %v271_v8   ;;  %634 = vperm.xlu0 %6275, %v270_v9   ;;  %v293_v40 = vld [vmem:[%s9556_s4 + $0xe8] sm:$0xff]  ;;  %v295_v42 = vld [vmem:[%s9556_s4 + $0xf8] sm:$0xff]  ;;  %v294_v43 = vld [vmem:[%s9556_s4 + $0xf0] sm:$0xff]  ;;  %v980_v8 = vlaneseq }
  0x1c   : > { %5552 = vmatpush3.bf16.msra.mxu0 %v6279_v18  ;;  %v6288_v44 = vld [vmem:[%s9553_s1 + $0xd0] sm:$0xff]   ;;  %v297_v45 = vld [vmem:[%s9556_s4 + $0x108] sm:$0xff]  ;;  %v296_v46 = vld [vmem:[%s9556_s4 + $0x100] sm:$0xff] }
  0x1d   : > { %5553 = vmatprep.subr.bf16.mxu0 %v9559_v5  ;;  %2312 = vmatpush1.bf16.msra.mxu1 %v6287_v37  ;;  %v6289_v47 = vld [vmem:[%s9553_s1 + $0xd8] sm:$0xff]   ;;  %v298_v49 = vld [vmem:[%s9556_s4 + $0x110] sm:$0xff]  ;;  %v6290_v50 = vld [vmem:[%s9553_s1 + $0xe0] sm:$0xff]  }
  0x1e   : > { %2313 = vmatprep.subr.bf16.mxu1 %v6408_v2  ;;  %v299_v48 = vld [vmem:[%s9556_s4 + $0x118] sm:$0xff]  ;;  %v317_v51 = vld [vmem:[%s9556_s4 + $0x1a8] sm:$0xff]  ;;  %v300_v52 = vld [vmem:[%s9556_s4 + $0x120] sm:$0xff] }
  0x1f   : > { %649 = vperm.xlu1 %6276, %v273_v10   ;;  %644 = vperm.xlu0 %6275, %v272_v11   ;;  %v302_v53 = vld [vmem:[%s9556_s4 + $0x130] sm:$0xff]  ;;  %v301_v54 = vld [vmem:[%s9556_s4 + $0x128] sm:$0xff]  ;;  %v304_v57 = vld [vmem:[%s9556_s4 + $0x140] sm:$0xff] }
  0x20   : > { %5554 = vmatpush3.bf16.msra.mxu0 %v6280_v21  ;;  %v6291_v55 = vld [vmem:[%s9553_s1 + $0xe8] sm:$0xff]   ;;  %v303_v58 = vld [vmem:[%s9556_s4 + $0x138] sm:$0xff]  ;;  %v5148_v60 = vld [vmem:[%s6651_s20] sm:$0xff]  }
  0x21   : > { %5555 = vmatprep.subr.bf16.mxu0 %v9559_v5  ;;  %2314 = vmatpush1.bf16.msra.mxu1 %v6288_v44  ;;  %v5390_v56 = vld [vmem:[%s6651_s20 + $0x8] sm:$0xff]   ;;  %v6292_v61 = vld [vmem:[%s9553_s1 + $0xf0] sm:$0xff]   ;;  %v6671_v63 = vld [vmem:[%s9554_s2] ss:$0 sm:$0xff]  ;;  %v5149_v0 = vunpack.c.l.bf16 %v5148_v60  ;;  %v5150_v1 = vunpack.c.h.bf16 %v5148_v60 }
  0x22   : > { %2315 = vmatprep.subr.bf16.mxu1 %v6408_v2  ;;  %v5153_v59 = vunpack.c.l.bf16 %v5390_v56  ;;  %v5154_v62 = vunpack.c.h.bf16 %v5390_v56  ;;  %v306_v3 = vld [vmem:[%s9556_s4 + $0x150] sm:$0xff]  ;;  %v305_v7 = vld [vmem:[%s9556_s4 + $0x148] sm:$0xff]  ;;  %v5392_v9 = vld [vmem:[%s6651_s20 + $0x18] sm:$0xff]  }
  0x23   : > { %659 = vperm.xlu1 %6276, %v275_v13   ;;  %654 = vperm.xlu0 %6275, %v274_v14   ;;  %v5391_v6 = vld [vmem:[%s6651_s20 + $0x10] sm:$0xff]   ;;  %v6294_v10 = vld [vmem:[%s9553_s1 + $0xf8] sm:$0xff]   ;;  %v5393_v12 = vld [vmem:[%s6651_s20 + $0x20] sm:$0xff]   ;;  %v433_v14 = vmul.f32 %v5149_v0, %v6671_v63  ;;  %v434_v15 = vmul.f32 %v5150_v1, %v6671_v63  ;;  %v5162_v21 = vunpack.c.h.bf16 %v5392_v9 }
  0x24   : > { %5556 = vmatpush3.bf16.msra.mxu0 %v6281_v24  ;;  %v435_v4 = vmul.f32 %v5153_v59, %v6671_v63  ;;  %v436_v11 = vmul.f32 %v5154_v62, %v6671_v63  ;;  %v6691_v13 = vld [vmem:[%s9555_s3] ss:$0 sm:$0xff]  ;;  %v5395_v18 = vld [vmem:[%s6651_s20 + $0x30] sm:$0xff]   ;;  %v6706_v24 = vshrl.u32 %v980_v8, 7  ;;  %v309_v44 = vld [vmem:[%s9556_s4 + $0x168] sm:$0xff] }
  0x25   : > { %5557 = vmatprep.subr.bf16.mxu0 %v9559_v5  ;;  %2316 = vmatpush1.bf16.msra.mxu1 %v6289_v47  ;;  %v6717_v34 = vadd.f32 %v6691_v13, %v433_v14  ;;  %v5173_v37 = vunpack.c.l.bf16 %v5395_v18  ;;  %v6296_v62 = vld [vmem:[%s9553_s1 + $0x108] sm:$0xff]   ;;  %v312_v0 = vld [vmem:[%s9556_s4 + $0x180] sm:$0xff]  ;;  %v311_v1 = vld [vmem:[%s9556_s4 + $0x178] sm:$0xff] }
  0x26   : > { %2317 = vmatprep.subr.bf16.mxu1 %v6408_v2  ;;  %vm982_vm1 = vcmp.lt.s32.totalorder %v6706_v24, 1  ;;  %vm1418_vm2 = vcmp.lt.s32.totalorder %v6706_v24, 7 }
  0x27   : > { %669 = vperm.xlu1 %6276, %v277_v16   ;;  %664 = vperm.xlu0 %6275, %v276_v17   ;;  %v5158_v16 = vunpack.c.h.bf16 %v5391_v6  ;;  %v5394_v17 = vld [vmem:[%s6651_s20 + $0x28] sm:$0xff]  }
  0x28   : > { %5558 = vmatpush3.bf16.msra.mxu0 %v6282_v27  ;;  %v5165_v27 = vunpack.c.l.bf16 %v5393_v12 }
  0x29   : > { %5559 = vmatprep.subr.bf16.mxu0 %v9559_v5  ;;  %2318 = vmatpush1.bf16.msra.mxu1 %v6290_v50 }
  0x2a   : > { %2319 = vmatprep.subr.bf16.mxu1 %v6408_v2  ;;  %v441_v47 = vmul.f32 %v5165_v27, %v6671_v63 }
  0x2b   : > { %679 = vperm.xlu1 %6276, %v279_v19   ;;  %674 = vperm.xlu0 %6275, %v278_v20   ;;  %v6698_v19 = vadd.f32 %v6691_v13, %v435_v4  ;;  %v5157_v20 = vunpack.c.l.bf16 %v5391_v6 }
  0x2c   : > { %5560 = vmatpush3.bf16.msra.mxu0 %v6283_v30  ;;  %v5170_v30 = vunpack.c.h.bf16 %v5394_v17  ;;  %v6771_v6 = vadd.f32 %v6691_v13, %v441_v47  ;;  %v5415_v47 = vld [vmem:[%s6651_s20 + $0xd0] sm:$0xff]  }
  0x2d   : > { %5561 = vmatprep.subr.bf16.mxu0 %v9559_v5  ;;  %2320 = vmatpush1.bf16.msra.mxu1 %v6291_v55  ;;  %v445_v55 = vmul.f32 %v5173_v37, %v6671_v63  ;;  %v5410_v37 = vld [vmem:[%s6651_s20 + $0xa8] sm:$0xff]  }
  0x2e   : > { %2321 = vmatprep.subr.bf16.mxu1 %v6408_v2  ;;  %v444_v50 = vmul.f32 %v5170_v30, %v6671_v63 }
  0x2f   : > { %689 = vperm.xlu1 %6276, %v281_v22   ;;  %684 = vperm.xlu0 %6275, %v280_v23   ;;  %v308_v22 = vld [vmem:[%s9556_s4 + $0x160] sm:$0xff]  ;;  %v307_v23 = vld [vmem:[%s9556_s4 + $0x158] sm:$0xff] }
  0x30   : > { %5562 = vmatpush3.bf16.msra.mxu0 %v6284_v33  ;;  %v6295_v33 = vld [vmem:[%s9553_s1 + $0x100] sm:$0xff]   ;;  %v6775_v8 = vadd.f32 %v6691_v13, %v444_v50 }
  0x31   : > { %5671 = vmatprep.subr.bf16.mxu0 %v9559_v5  ;;  %2322 = vmatpush1.bf16.msra.mxu1 %v6292_v61  ;;  %v5398_v61 = vld [vmem:[%s6651_s20 + $0x48] sm:$0xff]  }
  0x32   : > { %2323 = vmatprep.subr.bf16.mxu1 %v6408_v2 }
  0x33   : > { %699 = vperm.xlu1 %6276, %v283_v25   ;;  %694 = vperm.xlu0 %6275, %v282_v26   ;;  %v5161_v25 = vunpack.c.l.bf16 %v5392_v9  ;;  %v5166_v26 = vunpack.c.h.bf16 %v5393_v12  ;;  %v6784_v12 = vadd.f32 %v6691_v13, %v445_v55  ;;  %v315_v55 = vld [vmem:[%s9556_s4 + $0x198] sm:$0xff] }
  0x35   : > { %2324 = vmatpush1.bf16.msra.mxu1 %v6294_v10 }
  0x36   : > { %2325 = vmatprep.subr.bf16.mxu1 %v6408_v2 }
  0x37   : > { %709 = vperm.xlu1 %6276, %v285_v28   ;;  %704 = vperm.xlu0 %6275, %v284_v29   ;;  %v5396_v28 = vld [vmem:[%s6651_s20 + $0x38] sm:$0xff]   ;;  %v6711_v29 = vadd.f32 %v6691_v13, %v436_v11 }
  0x39   : > { %2326 = vmatpush1.bf16.msra.mxu1 %v6295_v33 }
  0x3a   : > { %2327 = vmatprep.subr.bf16.mxu1 %v6408_v2 }
  0x3b   : > { %719 = vperm.xlu1 %6276, %v287_v31   ;;  %714 = vperm.xlu0 %6275, %v286_v32   ;;  %v5169_v31 = vunpack.c.l.bf16 %v5394_v17  ;;  %v5174_v32 = vunpack.c.h.bf16 %v5395_v18  ;;  %v314_v17 = vld [vmem:[%s9556_s4 + $0x190] sm:$0xff] }
  0x3d   : > { %2328 = vmatpush1.bf16.msra.mxu1 %v6296_v62 }
  0x3e   : > { %2329 = vmatprep.subr.bf16.mxu1 %v6408_v2 }
  0x3f   : > { %729 = vperm.xlu1 %6276, %v289_v35   ;;  %724 = vperm.xlu0 %6275, %v288_v36   ;;  %v6720_v35 = vadd.f32 %v6691_v13, %v434_v15  ;;  %v438_v36 = vmul.f32 %v5158_v16, %v6671_v63  ;;  %v5186_v15 = vunpack.c.h.bf16 %v5398_v61  ;;  %v5185_v16 = vunpack.c.l.bf16 %v5398_v61 }
  0x43   : > { %739 = vperm.xlu1 %6276, %v291_v38   ;;  %734 = vperm.xlu0 %6275, %v290_v39   ;;  %v550_v38 = vmax.f32 %v6698_v19, 0.0  ;;  %v437_v39 = vmul.f32 %v5157_v20, %v6671_v63  ;;  %v6349_v20 = vld [vmem:[#allocation2] sm:$0xff] }
  0x47   : > { %749 = vperm.xlu1 %6276, %v293_v40   ;;  %744 = vperm.xlu0 %6275, %v292_v41   ;;  %v440_v40 = vmul.f32 %v5162_v21, %v6671_v63  ;;  %v5178_v41 = vunpack.c.h.bf16 %v5396_v28  ;;  %v5234_v21 = vunpack.c.h.bf16 %v5410_v37 }
  0x49   : > { %v6751_v59 = vadd.f32 %v6691_v13, %v440_v40  ;;  %v448_v60 = vmul.f32 %v5178_v41, %v6671_v63  ;;  %v5401_v40 = vld [vmem:[%s6651_s20 + $0x60] sm:$0xff]   ;;  %v5408_v41 = vld [vmem:[%s6651_s20 + $0x98] sm:$0xff]  }
  0x4a   : > { %v5198_v61 = vunpack.c.h.bf16 %v5401_v40  ;;  %v5197_v62 = vunpack.c.l.bf16 %v5401_v40  ;;  %v5226_v27 = vunpack.c.h.bf16 %v5408_v41 }
  0x4b   : > { %759 = vperm.xlu1 %6276, %v295_v42   ;;  %754 = vperm.xlu0 %6275, %v294_v43   ;;  %v5397_v42 = vld [vmem:[%s6651_s20 + $0x40] sm:$0xff]   ;;  %v310_v43 = vld [vmem:[%s9556_s4 + $0x170] sm:$0xff] }
  0x4c   : > { %v5182_v56 = vunpack.c.h.bf16 %v5397_v42  ;;  %v5181_v11 = vunpack.c.l.bf16 %v5397_v42 }
  0x4e   : > { %v450_v14 = vmul.f32 %v5182_v56, %v6671_v63 }
  0x4f   : > { %769 = vperm.xlu1 %6276, %v297_v45   ;;  %764 = vperm.xlu0 %6275, %v296_v46   ;;  %v439_v45 = vmul.f32 %v5161_v25, %v6671_v63  ;;  %v442_v46 = vmul.f32 %v5166_v26, %v6671_v63  ;;  %v313_v25 = vld [vmem:[%s9556_s4 + $0x188] sm:$0xff] }
  0x50   : > { %v6818_v42 = vadd.f32 %v6691_v13, %v450_v14 }
  0x51   : > { %v6768_v4 = vadd.f32 %v6691_v13, %v442_v46  ;;  %v5403_v46 = vld [vmem:[%s6651_s20 + $0x70] sm:$0xff]  }
  0x52   : > { %v5206_v14 = vunpack.c.h.bf16 %v5403_v46 }
  0x53   : > { %779 = vperm.xlu1 %6276, %v299_v48   ;;  %774 = vperm.xlu0 %6275, %v298_v49   ;;  %v5177_v48 = vunpack.c.l.bf16 %v5396_v28  ;;  %v5225_v28 = vunpack.c.l.bf16 %v5408_v41 }
  0x57   : > { %869 = vperm.xlu1 %6276, %v317_v51   ;;  %784 = vperm.xlu0 %6275, %v300_v52   ;;  %v443_v51 = vmul.f32 %v5169_v31, %v6671_v63  ;;  %v446_v52 = vmul.f32 %v5174_v32, %v6671_v63  ;;  %v5399_v31 = vld [vmem:[%s6651_s20 + $0x50] sm:$0xff]   ;;  %v5400_v32 = vld [vmem:[%s6651_s20 + $0x58] sm:$0xff]  }
  0x58   : > { %v5189_v50 = vunpack.c.l.bf16 %v5399_v31 }
  0x59   : > { %v6778_v9 = vadd.f32 %v6691_v13, %v443_v51  ;;  %v6781_v10 = vadd.f32 %v6691_v13, %v446_v52  ;;  %v5194_v51 = vunpack.c.h.bf16 %v5400_v32  ;;  %v316_v52 = vld [vmem:[%s9556_s4 + $0x1a0] sm:$0xff] }
  0x5b   : > { %794 = vperm.xlu1 %6276, %v302_v53   ;;  %789 = vperm.xlu0 %6275, %v301_v54   ;;  %v6743_v54 = vadd.f32 %v6691_v13, %v438_v36  ;;  %v9666_v53 = vmax.f32 %v6720_v35, 0.0 }
  0x5f   : > { %804 = vperm.xlu1 %6276, %v304_v57   ;;  %799 = vperm.xlu0 %6275, %v303_v58   ;;  %v6748_v58 = vadd.f32 %v6691_v13, %v437_v39  ;;  %v449_v39 = vmul.f32 %v5181_v11, %v6671_v63 }
  0x63   : > { %814 = vperm.xlu1 %6276, %v306_v3   ;;  %809 = vperm.xlu0 %6275, %v305_v7   ;;  %v6765_v3 = vadd.f32 %v6691_v13, %v439_v45  ;;  %v447_v7 = vmul.f32 %v5177_v48, %v6671_v63  ;;  %v5402_v45 = vld [vmem:[%s6651_s20 + $0x68] sm:$0xff]   ;;  %v5190_v48 = vunpack.c.h.bf16 %v5399_v31 }
  0x64   : > { %v5201_v11 = vunpack.c.l.bf16 %v5402_v45 }
  0x65   : > { %v6807_v30 = vadd.f32 %v6691_v13, %v447_v7  ;;  %v5202_v7 = vunpack.c.h.bf16 %v5402_v45  ;;  %v454_v31 = vmul.f32 %v5190_v48, %v6671_v63  ;;  %v5405_v45 = vld [vmem:[%s6651_s20 + $0x80] sm:$0xff]  }
  0x67   : > { %824 = vperm.xlu1 %6276, %v308_v22   ;;  %819 = vperm.xlu0 %6275, %v307_v23   ;;  %v6795_v22 = vadd.f32 %v6691_v13, %v448_v60  ;;  %v6297_v23 = vld [vmem:[%s9553_s1 + $0x110] sm:$0xff]   ;;  %v5193_v60 = vunpack.c.l.bf16 %v5400_v32  ;;  %v453_v32 = vmul.f32 %v5189_v50, %v6671_v63  ;;  %v460_v48 = vmul.f32 %v5202_v7, %v6671_v63 }
  0x68   : > { %2330 = vmatpush1.bf16.msra.mxu1 %v6297_v23  ;;  %v459_v50 = vmul.f32 %v5201_v11, %v6671_v63 }
  0x69   : > { %2331 = vmatprep.subr.bf16.mxu1 %v6408_v2  ;;  %v455_v5 = vmul.f32 %v5193_v60, %v6671_v63 }
  0x6b   : > { %834 = vperm.xlu1 %6276, %v310_v43   ;;  %829 = vperm.xlu0 %6275, %v309_v44   ;;  %v452_v43 = vmul.f32 %v5186_v15, %v6671_v63  ;;  %v451_v44 = vmul.f32 %v5185_v16, %v6671_v63  ;;  %v6298_v15 = vld [vmem:[%s9553_s1 + $0x118] sm:$0xff]   ;;  %v458_v16 = vmul.f32 %v5198_v61, %v6671_v63  ;;  %v5214_v61 = vunpack.c.h.bf16 %v5405_v45 }
  0x6c   : > { %2332 = vmatpush1.bf16.msra.mxu1 %v6298_v15  ;;  %v6877_v15 = vadd.f32 %v6691_v13, %v455_v5  ;;  %v5213_v5 = vunpack.c.l.bf16 %v5405_v45 }
  0x6d   : > { %v6845_v23 = vadd.f32 %v6691_v13, %v451_v44  ;;  %v6299_v44 = vld [vmem:[%s9553_s1 + $0x120] sm:$0xff]   ;;  %2333 = vmatprep.subr.bf16.mxu1 %v6408_v2 }
  0x6f   : > { %844 = vperm.xlu1 %6276, %v312_v0   ;;  %839 = vperm.xlu0 %6275, %v311_v1   ;;  %v5404_v0 = vld [vmem:[%s6651_s20 + $0x78] sm:$0xff]   ;;  %v6835_v1 = vadd.f32 %v6691_v13, %v449_v39  ;;  %v456_v39 = vmul.f32 %v5194_v51, %v6671_v63  ;;  %v462_v51 = vmul.f32 %v5206_v14, %v6671_v63  ;;  %v5406_v14 = vld [vmem:[%s6651_s20 + $0x88] sm:$0xff]  }
  0x70   : > { %v5210_v40 = vunpack.c.h.bf16 %v5404_v0  ;;  %v5209_v56 = vunpack.c.l.bf16 %v5404_v0  ;;  %v6869_v0 = vadd.f32 %v6691_v13, %v453_v32  ;;  %2334 = vmatpush1.bf16.msra.mxu1 %v6299_v44  ;;  %v6887_v32 = vadd.f32 %v6691_v13, %v460_v48  ;;  %v6300_v48 = vld [vmem:[%s9553_s1 + $0x128] sm:$0xff]  }
  0x71   : > { %v6872_v7 = vadd.f32 %v6691_v13, %v456_v39  ;;  %v6890_v39 = vadd.f32 %v6691_v13, %v459_v50  ;;  %2335 = vmatprep.subr.bf16.mxu1 %v6408_v2  ;;  %v5217_v44 = vunpack.c.l.bf16 %v5406_v14  ;;  %v5407_v50 = vld [vmem:[%s6651_s20 + $0x90] sm:$0xff]  }
  0x72   : > { %v464_v11 = vmul.f32 %v5210_v40, %v6671_v63  ;;  %v6893_v40 = vadd.f32 %v6691_v13, %v462_v51  ;;  %v5254_v51 = vunpack.c.h.bf16 %v5415_v47  ;;  %v5221_v36 = vunpack.c.l.bf16 %v5407_v50 }
  0x73   : > { %854 = vperm.xlu1 %6276, %v314_v17   ;;  %849 = vperm.xlu0 %6275, %v313_v25   ;;  %v6842_v17 = vadd.f32 %v6691_v13, %v452_v43  ;;  %v5205_v25 = vunpack.c.l.bf16 %v5403_v46  ;;  %v457_v43 = vmul.f32 %v5197_v62, %v6671_v63  ;;  %v6866_v62 = vadd.f32 %v6691_v13, %v454_v31 }
  0x74   : > { %v463_v31 = vmul.f32 %v5209_v56, %v6671_v63  ;;  %v466_v56 = vmul.f32 %v5214_v61, %v6671_v63  ;;  %2336 = vmatpush1.bf16.msra.mxu1 %v6300_v48  ;;  %v5409_v61 = vld [vmem:[%s6651_s20 + $0xa0] sm:$0xff]   ;;  %v467_v45 = vmul.f32 %v5217_v44, %v6671_v63  ;;  %v5222_v33 = vunpack.c.h.bf16 %v5407_v50 }
  0x75   : > { %v461_v60 = vmul.f32 %v5205_v25, %v6671_v63  ;;  %v6883_v25 = vadd.f32 %v6691_v13, %v457_v43  ;;  %v5218_v43 = vunpack.c.h.bf16 %v5406_v14  ;;  %2337 = vmatprep.subr.bf16.mxu1 %v6408_v2  ;;  %v5411_v2 = vld [vmem:[%s6651_s20 + $0xb0] sm:$0xff]   ;;  %v5233_v44 = vunpack.c.l.bf16 %v5410_v37  ;;  %v6303_v37 = vld [vmem:[%s9553_s1 + $0x138] sm:$0xff]  }
  0x76   : > { %v6913_v46 = vadd.f32 %v6691_v13, %v463_v31  ;;  %v6926_v31 = vadd.f32 %v6691_v13, %v466_v56  ;;  %v5229_v56 = vunpack.c.l.bf16 %v5409_v61  ;;  %v5230_v26 = vunpack.c.h.bf16 %v5409_v61  ;;  %v5412_v61 = vld [vmem:[%s6651_s20 + $0xb8] sm:$0xff]  }
  0x77   : > { %864 = vperm.xlu1 %6276, %v316_v52   ;;  %859 = vperm.xlu0 %6275, %v315_v55   ;;  %v6880_v55 = vadd.f32 %v6691_v13, %v458_v16  ;;  %v6897_v16 = vadd.f32 %v6691_v13, %v461_v60  ;;  %v6907_v52 = vadd.f32 %v6691_v13, %v464_v11  ;;  %v6302_v11 = vld [vmem:[%s9553_s1 + $0x130] sm:$0xff]   ;;  %v5238_v18 = vunpack.c.h.bf16 %v5411_v2 }
  0x78   : > { %v465_v60 = vmul.f32 %v5213_v5, %v6671_v63  ;;  %v468_v48 = vmul.f32 %v5218_v43, %v6671_v63  ;;  %2338 = vmatpush1.bf16.msra.mxu1 %v6302_v11  ;;  %v6945_v14 = vadd.f32 %v6691_v13, %v467_v45  ;;  %v5237_v5 = vunpack.c.l.bf16 %v5411_v2 }
  0x79   : > { %2339 = vmatprep.subr.bf16.mxu1 %v6349_v20  ;;  %v486_v41 = vmul.f32 %v5254_v51, %v6671_v63  ;;  %v469_v11 = vmul.f32 %v5221_v36, %v6671_v63  ;;  %v471_v47 = vmul.f32 %v5225_v28, %v6671_v63  ;;  %v472_v45 = vmul.f32 %v5226_v27, %v6671_v63 }
  0x7a   : > { %v6938_v43 = vadd.f32 %v6691_v13, %v465_v60  ;;  %v6942_v50 = vadd.f32 %v6691_v13, %v468_v48  ;;  %9648 = vst [vmem:[#allocation3_spill] sm:$0xff] %v6945_v14  ;;  %v470_v60 = vmul.f32 %v5222_v33, %v6671_v63  ;;  %v473_v48 = vmul.f32 %v5229_v56, %v6671_v63 }
  0x7b   : > { %v5241_v57 = vunpack.c.l.bf16 %v5412_v61  ;;  %v475_v51 = vmul.f32 %v5233_v44, %v6671_v63  ;;  %v474_v36 = vmul.f32 %v5230_v26, %v6671_v63  ;;  %v476_v33 = vmul.f32 %v5234_v21, %v6671_v63 }
  0x7c   : > { %2340 = vmatpush1.bf16.msra.mxu1 %v6303_v37  ;;  %v477_v2 = vmul.f32 %v5237_v5, %v6671_v63  ;;  %v478_v56 = vmul.f32 %v5238_v18, %v6671_v63  ;;  %v6967_v49 = vadd.f32 %v6691_v13, %v486_v41  ;;  %v6970_v26 = vadd.f32 %v6691_v13, %v469_v11 }
  0x7d   : > { %v479_v28 = vmul.f32 %v5241_v57, %v6671_v63  ;;  %2951 = vmatprep.subr.bf16.mxu1 %v6349_v20  ;;  %v6973_v21 = vadd.f32 %v6691_v13, %v470_v60  ;;  %v6977_v5 = vadd.f32 %v6691_v13, %v471_v47  ;;  %v6980_v57 = vadd.f32 %v6691_v13, %v473_v48  ;;  %v6986_v20 = vld [vmem:[%s6651_s20 + $0xc0] sm:$0xff]  }
  0x7e   : > { %v6983_v18 = vadd.f32 %v6691_v13, %v472_v45  ;;  %v5242_v44 = vunpack.c.h.bf16 %v5412_v61  ;;  %v6990_v41 = vadd.f32 %v6691_v13, %v475_v51  ;;  %v6993_v11 = vadd.f32 %v6691_v13, %v474_v36 }
  0x7f   : > { %9649 = vst [vmem:[#allocation4_spill] sm:$0xff] %v6973_v21  ;;  %9650 = vst [vmem:[#allocation5_spill] sm:$0xff] %v6977_v5  ;;  %v6996_v47 = vadd.f32 %v6691_v13, %v476_v33  ;;  %v5245_v60 = vunpack.c.l.bf16 %v6986_v20  ;;  %v7004_v45 = vadd.f32 %v6691_v13, %v477_v2  ;;  %v7007_v61 = vadd.f32 %v6691_v13, %v479_v28 }
  0x80   : > { %9651 = vst [vmem:[#allocation6_spill] sm:$0xff] %v6980_v57  ;;  %9652 = vst [vmem:[#allocation7_spill] sm:$0xff] %v6983_v18  ;;  %v7010_v51 = vadd.f32 %v6691_v13, %v478_v56  ;;  %v480_v36 = vmul.f32 %v5242_v44, %v6671_v63  ;;  %v9661_v14 = vmax.f32 %v6717_v34, 0.0 }
  0x81   : > { %9653 = vst [vmem:[#allocation8_spill] sm:$0xff] %v6990_v41  ;;  %9654 = vst [vmem:[#allocation9_spill] sm:$0xff] %v6993_v11  ;;  %v481_v2 = vmul.f32 %v5245_v60, %v6671_v63  ;;  %v5414_v41 = vld [vmem:[%s6651_s20 + $0xc8] sm:$0xff]  }
  0x82   : > { %9655 = vst [vmem:[#allocation10_spill] sm:$0xff] %v6996_v47  ;;  %9658 = vst [vmem:[#allocation13_spill] sm:$0xff] %v7004_v45  ;;  %v7027_v19 = vadd.f32 %v6691_v13, %v480_v36  ;;  %v5249_v47 = vunpack.c.l.bf16 %v5414_v41 }
  0x83   : > { %9659 = vst [vmem:[#allocation14_spill] sm:$0xff] %v7007_v61  ;;  %9660 = vst [vmem:[#allocation15_spill] sm:$0xff] %v7010_v51  ;;  %v7048_v11 = vadd.f32 %v6691_v13, %v481_v2  ;;  %v5246_v2 = vunpack.c.h.bf16 %v6986_v20 }
  0x84   : > { %9662 = vst [vmem:[#allocation16_spill] sm:$0xff] %v7027_v19 }
  0x85   : > { %9667 = vst [vmem:[#allocation19_spill] sm:$0xff] %v7048_v11  ;;  %v9673_v11 = vmax.f32 %v6748_v58, 0.0 }
  0x8e   : > { %v6999_v37 = vpop.permute.xlu1 %614  ;;  %v7001_v48 = vpop.permute.xlu0 %604 }
  0x8f   : > { %9656 = vst [vmem:[#allocation11_spill] sm:$0xff] %v6999_v37  ;;  %9657 = vst [vmem:[#allocation12_spill] sm:$0xff] %v7001_v48  ;;  %v874_v33 = vmul.f32 %v6999_v37, %v550_v38  ;;  %v7022_v28 = vmul.f32 %v7001_v48, %v9661_v14  ;;  %v9665_v38 = vmax.f32 %v6711_v29, 0.0 }
  0x91   : > { %v928_v48 = vrot.slane %v874_v33, 7  ;;  %v1366_v56 = vrot.slane %v874_v33, 1  ;;  %v9671_v19 = vrot.slane %v7022_v28, 1 }
  0x92   : > { %v7033_v34 = vpop.permute.xlu1 %619  ;;  %v7035_v14 = vpop.permute.xlu0 %609 }
  0x93   : > { %9663 = vst [vmem:[#allocation17_spill] sm:$0xff] %v7033_v34  ;;  %9664 = vst [vmem:[#allocation18_spill] sm:$0xff] %v7035_v14  ;;  %v875_v27 = vmul.f32 %v7033_v34, %v9665_v38  ;;  %v873_v60 = vmul.f32 %v7035_v14, %v9666_v53 }
  0x95   : > { %v929_v51 = vrot.slane %v875_v27, 7  ;;  %v1202_v61 = vpack.c.bf16 %v875_v27, %v874_v33  ;;  %v927_v29 = vrot.slane %v873_v60, 7  ;;  %v1367_v38 = vrot.slane %v875_v27, 1 }
  0x96   : > { %v1201_v35 = vpack.c.bf16 %v873_v60, %v7022_v28  ;;  %v1365_v34 = vrot.slane %v873_v60, 1  ;;  %v7055_v53 = vpop.permute.xlu1 %629  ;;  %v7057_v13 = vpop.permute.xlu0 %624  ;;  %v9670_v27 = vrot.slane %v7022_v28, 7 }
  0x97   : > { %9668 = vst [vmem:[#allocation20_spill] sm:$0xff] %v7055_v53  ;;  %9669 = vst [vmem:[#allocation21_spill] sm:$0xff] %v7057_v13  ;;  %v1033_v44 = vsel %vm982_vm1, %v928_v48, %v929_v51  ;;  %v1256_v37 = vrot.slane %v1202_v61, 4  ;;  %v1034_v36 = vsel %vm982_vm1, %v927_v29, %v928_v48  ;;  %v9672_v48 = vmax.f32 %v6743_v54, 0.0 }
  0x98   : > { %v7069_v41 = vsel %vm982_vm1, %v9670_v27, %v927_v29  ;;  %v1038_v60 = vpack.c.bf16 %v1033_v44, %v1034_v36  ;;  %v1255_v14 = vrot.slane %v1201_v35, 4  ;;  %v1470_v20 = vsel %vm1418_vm2, %v1365_v34, %v1366_v56 }
  0x99   : > { %v1471_v61 = vsel %vm1418_vm2, %v9671_v19, %v1365_v34  ;;  %v877_v33 = vmul.f32 %v7055_v53, %v9672_v48  ;;  %v876_v45 = vmul.f32 %v7057_v13, %v9673_v11  ;;  %v7084_v29 = vmul.f32 %v5249_v47, %v6671_v63 }
  0x9a   : > { %v1469_v44 = vsel %vm1418_vm2, %v1366_v56, %v1367_v38  ;;  %v7089_v36 = vsel %vm1091_vm3, %v1255_v14, %v1256_v37  ;;  %1336 = vst [vmem:[#allocation2 + $0x20] sm:$0xf0] %v1255_v14  ;;  %v1473_v35 = vpack.c.bf16 %v1470_v20, %v1471_v61  ;;  %v7091_v19 = vpop.permute.xlu1 %639  ;;  %v7093_v54 = vpop.permute.xlu0 %634  ;;  %v7096_v34 = vmul.f32 %v5246_v2, %v6671_v63 }
  0x9b   : > { %9674 = vst [vmem:[#allocation22_spill] sm:$0xff] %v7089_v36  ;;  %9675 = vst [vmem:[#allocation23_spill] sm:$0xff] %v7091_v19  ;;  %v7098_v58 = vrot.slane %v1038_v60, 4  ;;  %v931_v11 = vrot.slane %v877_v33, 7  ;;  %v930_v47 = vrot.slane %v876_v45, 7  ;;  %v1203_v27 = vpack.c.bf16 %v877_v33, %v876_v45 }
  0x9c   : > { %9676 = vst [vmem:[#allocation24_spill] sm:$0xff] %v7093_v54  ;;  %1337 = vst [vmem:[#allocation2 + $0x38] sm:$0xff] %v7089_v36  ;;  %v1527_v56 = vrot.slane %v1473_v35, 4  ;;  %v1368_v48 = vrot.slane %v876_v45, 1  ;;  %v9678_v53 = vmax.f32 %v6751_v59, 0.0  ;;  %v9679_v20 = vmax.f32 %v6765_v3, 0.0 }
  0x9d   : > { %9677 = vst [vmem:[#allocation25_spill] sm:$0xff] %v7098_v58  ;;  %v1369_v13 = vrot.slane %v877_v33, 1  ;;  %v1031_v63 = vsel %vm982_vm1, %v930_v47, %v931_v11  ;;  %v1032_v2 = vsel %vm982_vm1, %v929_v51, %v930_v47  ;;  %v1258_v60 = vrot.slane %v1203_v27, 4 }
  0x9e   : > { %v879_v14 = vmul.f32 %v7091_v19, %v9678_v53  ;;  %v878_v61 = vmul.f32 %v7093_v54, %v9679_v20  ;;  %1608 = vst [vmem:[#allocation2 + $0x28] sm:$0xf0] %v1527_v56  ;;  %v1039_v18 = vpack.c.bf16 %v1031_v63, %v1032_v2  ;;  %v1468_v45 = vsel %vm1418_vm2, %v1367_v38, %v1368_v48  ;;  %v7113_v35 = vpop.permute.xlu1 %649  ;;  %v7115_v53 = vpop.permute.xlu0 %644 }
  0x9f   : > { %9680 = vst [vmem:[#allocation26_spill] sm:$0xff] %v7113_v35  ;;  %9681 = vst [vmem:[#allocation27_spill] sm:$0xff] %v7115_v53  ;;  %v1259_v33 = vsel %vm1091_vm3, %v1256_v37, %v1258_v60  ;;  %v1474_v20 = vpack.c.bf16 %v1468_v45, %v1469_v44  ;;  %v9682_v27 = vmax.f32 %v6768_v4, 0.0  ;;  %v9683_v37 = vmax.f32 %v6771_v6, 0.0 }
  0xa0   : > { %v933_v59 = vrot.slane %v879_v14, 7  ;;  %v1371_v19 = vrot.slane %v879_v14, 1  ;;  %v932_v54 = vrot.slane %v878_v61, 7  ;;  %v1095_v57 = vrot.slane %v1039_v18, 4  ;;  %1338 = vst [vmem:[#allocation2 + $0x50] sm:$0xff] %v1259_v33 }
  0xa1   : > { %v1204_v51 = vpack.c.bf16 %v879_v14, %v878_v61  ;;  %v1370_v47 = vrot.slane %v878_v61, 1  ;;  %v7122_v38 = vmul.f32 %v7113_v35, %v9682_v27  ;;  %v1528_v63 = vrot.slane %v1474_v20, 4 }
  0xa2   : > { %v1029_v2 = vsel %vm982_vm1, %v932_v54, %v933_v59  ;;  %v1030_v3 = vsel %vm982_vm1, %v931_v11, %v932_v54  ;;  %v880_v44 = vmul.f32 %v7115_v53, %v9683_v37  ;;  %v1096_v18 = vsel %vm1091_vm3, %v7098_v58, %v1095_v57  ;;  %v7135_v45 = vpop.permute.xlu1 %659  ;;  %v7137_v33 = vpop.permute.xlu0 %654 }
  0xa3   : > { %v1467_v4 = vsel %vm1418_vm2, %v1368_v48, %v1369_v13  ;;  %v1040_v14 = vpack.c.bf16 %v1029_v2, %v1030_v3  ;;  %v1260_v61 = vrot.slane %v1204_v51, 4  ;;  %9684 = vst [vmem:[#allocation28_spill] sm:$0xff] %v7135_v45  ;;  %9685 = vst [vmem:[#allocation29_spill] sm:$0xff] %v7137_v33  ;;  %v7140_v20 = vsel %vm1091_vm3, %v1527_v56, %v1528_v63 }
  0xa4   : > { %1175 = vst [vmem:[#allocation2 + $0x48] sm:$0xff] %v1096_v18  ;;  %v1465_v6 = vsel %vm1418_vm2, %v1370_v47, %v1371_v19  ;;  %v1466_v54 = vsel %vm1418_vm2, %v1369_v13, %v1370_v47  ;;  %v935_v11 = vrot.slane %v7122_v38, 7  ;;  %1609 = vst [vmem:[#allocation2 + $0x40] sm:$0xff] %v7140_v20  ;;  %v934_v27 = vrot.slane %v880_v44, 7 }
  0xa5   : > { %v1097_v48 = vrot.slane %v1040_v14, 4  ;;  %v1261_v3 = vsel %vm1091_vm3, %v1258_v60, %v1260_v61  ;;  %v1475_v51 = vpack.c.bf16 %v1466_v54, %v1467_v4  ;;  %v1205_v2 = vpack.c.bf16 %v7122_v38, %v880_v44 }
  0xa6   : > { %1339 = vst [vmem:[#allocation2 + $0x68] sm:$0xff] %v1261_v3  ;;  %v1372_v56 = vrot.slane %v880_v44, 1  ;;  %v9686_v37 = vmax.f32 %v6775_v8, 0.0  ;;  %v9687_v13 = vmax.f32 %v6778_v9, 0.0  ;;  %v1027_v60 = vsel %vm982_vm1, %v934_v27, %v935_v11  ;;  %v7163_v54 = vpop.permute.xlu1 %669  ;;  %v7165_v44 = vpop.permute.xlu0 %664 }
  0xa7   : > { %v1098_v35 = vsel %vm1091_vm3, %v1095_v57, %v1097_v48  ;;  %v1530_v14 = vrot.slane %v1475_v51, 4  ;;  %v1028_v4 = vsel %vm982_vm1, %v933_v59, %v934_v27  ;;  %9688 = vst [vmem:[#allocation30_spill] sm:$0xff] %v7163_v54  ;;  %9689 = vst [vmem:[#allocation31_spill] sm:$0xff] %v7165_v44  ;;  %v1373_v8 = vrot.slane %v7122_v38, 1  ;;  %v1778_v57 = vld [vmem:[#allocation2 + $0x20] sm:$0xf0] }
  0xa8   : > { %v7153_v18 = vmul.f32 %v7135_v45, %v9686_v37  ;;  %v882_v47 = vmul.f32 %v7137_v33, %v9687_v13  ;;  %1176 = vst [vmem:[#allocation2 + $0x60] sm:$0xff] %v1098_v35  ;;  %v1041_v3 = vpack.c.bf16 %v1027_v60, %v1028_v4  ;;  %v1262_v9 = vrot.slane %v1205_v2, 4 }
  0xa9   : > { %v1464_v37 = vsel %vm1418_vm2, %v1371_v19, %v1372_v56  ;;  %v7171_v51 = vsel %vm1091_vm3, %v1528_v63, %v1530_v14  ;;  %v1922_v4 = vrot.slane %v1778_v57, 4  ;;  %v9690_v63 = vmax.f32 %v6781_v10, 0.0 }
  0xaa   : > { %v1476_v13 = vpack.c.bf16 %v1464_v37, %v1465_v6  ;;  %v937_v45 = vrot.slane %v7153_v18, 7  ;;  %v1375_v59 = vrot.slane %v7153_v18, 1  ;;  %1610 = vst [vmem:[#allocation2 + $0x58] sm:$0xff] %v7171_v51  ;;  %v1099_v27 = vrot.slane %v1041_v3, 4  ;;  %v7183_v37 = vpop.permute.xlu1 %679  ;;  %v7185_v33 = vpop.permute.xlu0 %674 }
  0xab   : > { %v1263_v35 = vsel %vm1091_vm3, %v1260_v61, %v1262_v9  ;;  %v936_v38 = vrot.slane %v882_v47, 7  ;;  %v1206_v2 = vpack.c.bf16 %v7153_v18, %v882_v47  ;;  %v1374_v19 = vrot.slane %v882_v47, 1  ;;  %9691 = vst [vmem:[#allocation32_spill] sm:$0xff] %v7183_v37  ;;  %9692 = vst [vmem:[#allocation33_spill] sm:$0xff] %v7185_v33 }
  0xac   : > { %1340 = vst [vmem:[#allocation2 + $0x80] sm:$0xff] %v1263_v35  ;;  %v1532_v60 = vrot.slane %v1476_v13, 4  ;;  %v7181_v6 = vmul.f32 %v7163_v54, %v9690_v63  ;;  %v1100_v3 = vsel %vm1091_vm3, %v1097_v48, %v1099_v27  ;;  %v1463_v10 = vsel %vm1418_vm2, %v1372_v56, %v1373_v8  ;;  %v1779_v63 = vld [vmem:[#allocation2 + $0x28] sm:$0xf0] }
  0xad   : > { %v1025_v61 = vsel %vm982_vm1, %v936_v38, %v937_v45  ;;  %v1026_v18 = vsel %vm982_vm1, %v935_v11, %v936_v38  ;;  %v1264_v13 = vrot.slane %v1206_v2, 4  ;;  %1177 = vst [vmem:[#allocation2 + $0x78] sm:$0xff] %v1100_v3  ;;  %v1462_v35 = vsel %vm1418_vm2, %v1373_v8, %v1374_v19 }
  0xae   : > { %v7195_v47 = vsel %vm1091_vm3, %v1530_v14, %v1532_v60  ;;  %v1042_v57 = vpack.c.bf16 %v1025_v61, %v1026_v18  ;;  %v1461_v11 = vsel %vm1418_vm2, %v1374_v19, %v1375_v59  ;;  %v1477_v38 = vpack.c.bf16 %v1462_v35, %v1463_v10  ;;  %v7215_v19 = vpop.permute.xlu1 %689  ;;  %v7217_v10 = vpop.permute.xlu0 %684 }
  0xaf   : > { %1611 = vst [vmem:[#allocation2 + $0x70] sm:$0xff] %v7195_v47  ;;  %v1265_v48 = vsel %vm1091_vm3, %v1262_v9, %v1264_v13  ;;  %v9693_v2 = vrot.slane %v7089_v36, 4  ;;  %v939_v14 = vrot.slane %v7181_v6, 7  ;;  %v9694_v8 = vmax.f32 %v6784_v12, 0.0  ;;  %9696 = vst [vmem:[#allocation34_spill] sm:$0xff] %v7215_v19 }
  0xb0   : > { %v1101_v3 = vrot.slane %v1042_v57, 4  ;;  %1341 = vst [vmem:[#allocation2 + $0x98] sm:$0xff] %v1265_v48  ;;  %v9695_v18 = vmax.f32 %v6795_v22, 0.0  ;;  %9697 = vst [vmem:[#allocation35_spill] sm:$0xff] %v7217_v10  ;;  %v1534_v35 = vrot.slane %v1477_v38, 4  ;;  %v9698_v57 = vmax.f32 %v6807_v30, 0.0 }
  0xb1   : > { %v1924_v56 = vsel %vm1091_vm3, %v1922_v4, %v9693_v2  ;;  %v884_v61 = vmul.f32 %v7165_v44, %v9694_v8  ;;  %v1377_v4 = vrot.slane %v7181_v6, 1  ;;  %v1925_v2 = vrot.slane %v1779_v63, 4 }
  0xb2   : > { %2341 = vmatprep.mubr.bf16.mxu1 %v1924_v56  ;;  %v7213_v9 = vmul.f32 %v7183_v37, %v9695_v18  ;;  %v886_v48 = vmul.f32 %v7185_v33, %v9698_v57  ;;  %v1102_v12 = vsel %vm1091_vm3, %v1099_v27, %v1101_v3  ;;  %v7226_v18 = vsel %vm1091_vm3, %v1532_v60, %v1534_v35  ;;  %v7238_v60 = vpop.permute.xlu0 %694 }
  0xb3   : > { %v938_v56 = vrot.slane %v884_v61, 7  ;;  %v1207_v22 = vpack.c.bf16 %v7181_v6, %v884_v61  ;;  %v1376_v8 = vrot.slane %v884_v61, 1  ;;  %1178 = vst [vmem:[#allocation2 + $0x90] sm:$0xff] %v1102_v12  ;;  %1612 = vst [vmem:[#allocation2 + $0x88] sm:$0xff] %v7226_v18  ;;  %v7236_v61 = vpop.permute.xlu1 %699  ;;  %v9702_v58 = vmax.f32 %v6818_v42, 0.0 }
  0xb4   : > { %v941_v37 = vrot.slane %v7213_v9, 7  ;;  %v940_v38 = vrot.slane %v886_v48, 7  ;;  %v1379_v6 = vrot.slane %v7213_v9, 1  ;;  %9699 = vst [vmem:[#allocation36_spill] sm:$0xff] %v7236_v61  ;;  %9700 = vst [vmem:[#allocation37_spill] sm:$0xff] %v7238_v60  ;;  %v1208_v53 = vpack.c.bf16 %v7213_v9, %v886_v48 }
  0xb5   : > { %v1023_v30 = vsel %vm982_vm1, %v938_v56, %v939_v14  ;;  %v1024_v27 = vsel %vm982_vm1, %v937_v45, %v938_v56  ;;  %v1266_v63 = vrot.slane %v1207_v22, 4  ;;  %v1460_v12 = vsel %vm1418_vm2, %v1375_v59, %v1376_v8  ;;  %v6285_v45 = vld [vmem:[%s9553_s1 + $0x80] sm:$0xff]  }
  0xb6   : > { %v1043_v57 = vpack.c.bf16 %v1023_v30, %v1024_v27  ;;  %v1021_v54 = vsel %vm982_vm1, %v940_v38, %v941_v37  ;;  %v1022_v33 = vsel %vm982_vm1, %v939_v14, %v940_v38  ;;  %v1478_v22 = vpack.c.bf16 %v1460_v12, %v1461_v11  ;;  %v7264_v11 = vpop.permute.xlu0 %704 }
  0xb7   : > { %v1267_v56 = vsel %vm1091_vm3, %v1264_v13, %v1266_v63  ;;  %v1044_v44 = vpack.c.bf16 %v1021_v54, %v1022_v33  ;;  %v1378_v27 = vrot.slane %v886_v48, 1  ;;  %v9701_v59 = vrot.slane %v7140_v20, 4  ;;  %v7262_v13 = vpop.permute.xlu1 %709  ;;  %9705 = vst [vmem:[#allocation39_spill] sm:$0xff] %v7264_v11 }
  0xb8   : > { %v1103_v30 = vrot.slane %v1043_v57, 4  ;;  %1342 = vst [vmem:[#allocation2 + $0xb0] sm:$0xff] %v1267_v56  ;;  %v7257_v14 = vmul.f32 %v7215_v19, %v9702_v58  ;;  %v1536_v38 = vrot.slane %v1478_v22, 4  ;;  %v1268_v5 = vrot.slane %v1208_v53, 4  ;;  %9704 = vst [vmem:[#allocation38_spill] sm:$0xff] %v7262_v13 }
  0xb9   : > { %v1927_v36 = vsel %vm1091_vm3, %v1925_v2, %v9701_v59  ;;  %v1105_v21 = vrot.slane %v1044_v44, 4  ;;  %v9703_v33 = vmax.f32 %v6835_v1, 0.0  ;;  %v1459_v42 = vsel %vm1418_vm2, %v1376_v8, %v1377_v4  ;;  %v6293_v1 = vld [vmem:[%s9553_s1 + $0x88] sm:$0xff]  }
  0xba   : > { %5564 = vmatmul.mubr.bf16.vlgmr.msra.gmra.mrb[0].mxu0 %v1927_v36  ;;  %v1104_v9 = vsel %vm1091_vm3, %v1101_v3, %v1103_v30  ;;  %v1458_v58 = vsel %vm1418_vm2, %v1377_v4, %v1378_v27  ;;  %v943_v53 = vrot.slane %v7257_v14, 7  ;;  %v9706_v36 = vmov 0.0  }
  0xbb   : > { %v888_v54 = vmul.f32 %v7217_v10, %v9703_v33  ;;  %5672 = vmatpush3.bf16.msra.mxu0 %v6285_v45  ;;  %5567 = vmatprep.mubr.msk.bf16.mxu0 %vm6410_vm0, %v9706_v36  ;;  %1179 = vst [vmem:[#allocation2 + $0xa8] sm:$0xff] %v1104_v9  ;;  %v7278_v44 = vsel %vm1091_vm3, %v1534_v35, %v1536_v38  ;;  %v9707_v45 = vmax.f32 %v6842_v17, 0.0  ;;  %v7296_v59 = vpop.permute.xlu1 %719  ;;  %v7298_v33 = vpop.permute.xlu0 %714 }
  0xbc   : > { %v1106_v3 = vsel %vm1091_vm3, %v1103_v30, %v1105_v21  ;;  %v1269_v48 = vsel %vm1091_vm3, %v1266_v63, %v1268_v5  ;;  %v1479_v2 = vpack.c.bf16 %v1458_v58, %v1459_v42  ;;  %5673 = vmatprep.subr.bf16.mxu0 %v9706_v36  ;;  %1613 = vst [vmem:[#allocation2 + $0xa0] sm:$0xff] %v7278_v44  ;;  %v9708_v63 = vmax.f32 %v6845_v23, 0.0 }
  0xbd   : > { %1180 = vst [vmem:[#allocation2 + $0xc0] sm:$0xff] %v1106_v3  ;;  %1343 = vst [vmem:[#allocation2 + $0xc8] sm:$0xff] %v1269_v48  ;;  %v1457_v4 = vsel %vm1418_vm2, %v1378_v27, %v1379_v6  ;;  %v942_v8 = vrot.slane %v888_v54, 7  ;;  %v1209_v57 = vpack.c.bf16 %v7257_v14, %v888_v54  ;;  %v1380_v12 = vrot.slane %v888_v54, 1 }
  0xbe   : > { %v1538_v35 = vrot.slane %v1479_v2, 4  ;;  %v7290_v56 = vmul.f32 %v7236_v61, %v9707_v45  ;;  %v890_v22 = vmul.f32 %v7238_v60, %v9708_v63  ;;  %v9592_v30 = vrot.slane %v7171_v51, 4  ;;  %9709 = vst [vmem:[#allocation40_spill] sm:$0xff] %v7296_v59  ;;  %9710 = vst [vmem:[#allocation41_spill] sm:$0xff] %v7298_v33 }
  0xbf   : > { %v1381_v27 = vrot.slane %v7257_v14, 1  ;;  %v1019_v54 = vsel %vm982_vm1, %v942_v8, %v943_v53  ;;  %v1020_v17 = vsel %vm982_vm1, %v941_v37, %v942_v8  ;;  %v1270_v9 = vrot.slane %v1209_v57, 4  ;;  %5674 = vmatpush3.bf16.msra.mxu0 %v6293_v1  ;;  %v6301_v14 = vld [vmem:[%s9553_s1 + $0x90] sm:$0xff]   ;;  %v7324_v63 = vpop.permute.xlu1 %729 }
  0xc0   : > { %v7306_v23 = vsel %vm1091_vm3, %v1536_v38, %v1538_v35  ;;  %v1045_v42 = vpack.c.bf16 %v1019_v54, %v1020_v17  ;;  %v1456_v58 = vsel %vm1418_vm2, %v1379_v6, %v1380_v12  ;;  %v945_v3 = vrot.slane %v7290_v56, 7  ;;  %5675 = vmatprep.subr.bf16.mxu0 %v9706_v36  ;;  %9712 = vst [vmem:[#allocation42_spill] sm:$0xff] %v7324_v63  ;;  %v7326_v54 = vpop.permute.xlu0 %724 }
  0xc1   : > { %1614 = vst [vmem:[#allocation2 + $0xb8] sm:$0xff] %v7306_v23  ;;  %v1271_v37 = vsel %vm1091_vm3, %v1268_v5, %v1270_v9  ;;  %v1480_v1 = vpack.c.bf16 %v1456_v58, %v1457_v4  ;;  %v1383_v38 = vrot.slane %v7290_v56, 1  ;;  %v944_v48 = vrot.slane %v890_v22, 7  ;;  %9713 = vst [vmem:[#allocation43_spill] sm:$0xff] %v7326_v54 }
  0xc2   : > { %v1107_v2 = vrot.slane %v1045_v42, 4  ;;  %1344 = vst [vmem:[#allocation2 + $0xe0] sm:$0xff] %v1271_v37  ;;  %v1210_v6 = vpack.c.bf16 %v7290_v56, %v890_v22  ;;  %v1382_v8 = vrot.slane %v890_v22, 1  ;;  %v9711_v57 = vrot.slane %v7140_v20, 4 }
  0xc3   : > { %v1540_v5 = vrot.slane %v1480_v1, 4  ;;  %v1017_v4 = vsel %vm982_vm1, %v944_v48, %v945_v3  ;;  %v1018_v17 = vsel %vm982_vm1, %v943_v53, %v944_v48  ;;  %v9714_v56 = vmax.f32 %v6866_v62, 0.0  ;;  %5676 = vmatpush3.bf16.msra.mxu0 %v6301_v14  ;;  %v6304_v53 = vld [vmem:[%s9553_s1 + $0x98] sm:$0xff]  }
  0xc4   : > { %v1933_v45 = vsel %vm1091_vm3, %v9711_v57, %v9592_v30  ;;  %v1108_v20 = vsel %vm1091_vm3, %v1105_v21, %v1107_v2  ;;  %v1455_v42 = vsel %vm1418_vm2, %v1380_v12, %v1381_v27  ;;  %v1046_v58 = vpack.c.bf16 %v1017_v4, %v1018_v17  ;;  %5677 = vmatprep.subr.bf16.mxu0 %v9706_v36  ;;  %v7361_v4 = vpop.permute.xlu0 %734 }
  0xc5   : > { %5568 = vmatmul.mubr.bf16.gmra.mrb[4].mxu0 %v1933_v45  ;;  %v7335_v22 = vmul.f32 %v7262_v13, %v9714_v56  ;;  %v1272_v37 = vrot.slane %v1210_v6, 4  ;;  %1181 = vst [vmem:[#allocation2 + $0xd8] sm:$0xff] %v1108_v20  ;;  %v7346_v62 = vsel %vm1091_vm3, %v1538_v35, %v1540_v5  ;;  %v1453_v21 = vsel %vm1418_vm2, %v1382_v8, %v1383_v38  ;;  %v7359_v45 = vpop.permute.xlu1 %739 }
  0xc6   : > { %5571 = vmatprep.mubr.msk.bf16.mxu0 %vm6410_vm0, %v9706_v36  ;;  %v1454_v12 = vsel %vm1418_vm2, %v1381_v27, %v1382_v8  ;;  %1615 = vst [vmem:[#allocation2 + $0xd0] sm:$0xff] %v7346_v62  ;;  %v1109_v14 = vrot.slane %v1046_v58, 4  ;;  %v9715_v57 = vmax.f32 %v6869_v0, 0.0  ;;  %9716 = vst [vmem:[#allocation44_spill] sm:$0xff] %v7359_v45  ;;  %v9718_v8 = vmax.f32 %v6872_v7, 0.0  ;;  %v6305_v7 = vld [vmem:[%s9553_s1 + $0xa0] sm:$0xff]  }
  0xc7   : > { %v947_v1 = vrot.slane %v7335_v22, 7  ;;  %v1273_v48 = vsel %vm1091_vm3, %v1270_v9, %v1272_v37  ;;  %v1481_v6 = vpack.c.bf16 %v1454_v12, %v1455_v42  ;;  %9717 = vst [vmem:[#allocation45_spill] sm:$0xff] %v7361_v4  ;;  %v1385_v27 = vrot.slane %v7335_v22, 1  ;;  %5678 = vmatpush3.bf16.msra.mxu0 %v6304_v53 }
  0xc8   : > { %v892_v35 = vmul.f32 %v7264_v11, %v9715_v57  ;;  %1345 = vst [vmem:[#allocation2 + $0xf8] sm:$0xff] %v1273_v48  ;;  %v7367_v17 = vmul.f32 %v7296_v59, %v9718_v8  ;;  %v9719_v56 = vmax.f32 %v6877_v15, 0.0  ;;  %v1110_v20 = vsel %vm1091_vm3, %v1107_v2, %v1109_v14  ;;  %5679 = vmatprep.subr.bf16.mxu0 %v9706_v36 }
  0xc9   : > { %v1542_v42 = vrot.slane %v1481_v6, 4  ;;  %1182 = vst [vmem:[#allocation2 + $0xf0] sm:$0xff] %v1110_v20  ;;  %v9720_v8 = vmax.f32 %v6880_v55, 0.0  ;;  %v7394_v20 = vpop.permute.xlu0 %744  ;;  %v9724_v59 = vrot.slane %v7171_v51, 4 }
  0xca   : > { %v894_v9 = vmul.f32 %v7298_v33, %v9719_v56  ;;  %v946_v58 = vrot.slane %v892_v35, 7  ;;  %v1211_v12 = vpack.c.bf16 %v7335_v22, %v892_v35  ;;  %v1384_v48 = vrot.slane %v892_v35, 1  ;;  %v7392_v35 = vpop.permute.xlu1 %749  ;;  %9722 = vst [vmem:[#allocation47_spill] sm:$0xff] %v7394_v20 }
  0xcb   : > { %v949_v57 = vrot.slane %v7367_v17, 7  ;;  %v7382_v56 = vmul.f32 %v7324_v63, %v9720_v8  ;;  %v7386_v2 = vsel %vm1091_vm3, %v1540_v5, %v1542_v42  ;;  %9721 = vst [vmem:[#allocation46_spill] sm:$0xff] %v7392_v35  ;;  %v1387_v5 = vrot.slane %v7367_v17, 1  ;;  %5680 = vmatpush3.bf16.msra.mxu0 %v6305_v7 }
  0xcc   : > { %v948_v15 = vrot.slane %v894_v9, 7  ;;  %v1015_v22 = vsel %vm982_vm1, %v946_v58, %v947_v1  ;;  %v1016_v53 = vsel %vm982_vm1, %v945_v3, %v946_v58  ;;  %v1274_v6 = vrot.slane %v1211_v12, 4  ;;  %1616 = vst [vmem:[#allocation2 + $0xe8] sm:$0xff] %v7386_v2  ;;  %5681 = vmatprep.subr.bf16.mxu0 %v9706_v36 }
  0xcd   : > { %v1047_v55 = vpack.c.bf16 %v1015_v22, %v1016_v53  ;;  %v1452_v8 = vsel %vm1418_vm2, %v1383_v38, %v1384_v48  ;;  %v1212_v0 = vpack.c.bf16 %v7367_v17, %v894_v9  ;;  %v1386_v38 = vrot.slane %v894_v9, 1 }
  0xce   : > { %v1013_v30 = vsel %vm982_vm1, %v948_v15, %v949_v57  ;;  %v1275_v3 = vsel %vm1091_vm3, %v1272_v37, %v1274_v6  ;;  %v1482_v58 = vpack.c.bf16 %v1452_v8, %v1453_v21  ;;  %v1014_v12 = vsel %vm982_vm1, %v947_v1, %v948_v15 }
  0xcf   : > { %v1111_v22 = vrot.slane %v1047_v55, 4  ;;  %1346 = vst [vmem:[#allocation2 + $0x110] sm:$0xff] %v1275_v3  ;;  %v1048_v53 = vpack.c.bf16 %v1013_v30, %v1014_v12  ;;  %v9723_v63 = vrot.slane %v7195_v47, 4  ;;  %v1451_v37 = vsel %vm1418_vm2, %v1384_v48, %v1385_v27  ;;  %v7430_v55 = vpop.permute.xlu0 %754 }
  0xd0   : > { %v1544_v21 = vrot.slane %v1482_v58, 4  ;;  %v1276_v1 = vrot.slane %v1212_v0, 4  ;;  %v951_v7 = vrot.slane %v7382_v56, 7  ;;  %v1450_v9 = vsel %vm1418_vm2, %v1385_v27, %v1386_v38  ;;  %9727 = vst [vmem:[#allocation49_spill] sm:$0xff] %v7430_v55  ;;  %v6307_v27 = vld [vmem:[%s9553_s1 + $0xa8] sm:$0xff]  }
  0xd1   : > { %v1939_v33 = vsel %vm1091_vm3, %v9724_v59, %v9723_v63  ;;  %v1112_v15 = vsel %vm1091_vm3, %v1109_v14, %v1111_v22  ;;  %v1113_v30 = vrot.slane %v1048_v53, 4  ;;  %v1389_v51 = vrot.slane %v7382_v56, 1  ;;  %v7428_v14 = vpop.permute.xlu1 %759  ;;  %5682 = vmatpush3.bf16.msra.mxu0 %v6307_v27 }
  0xd2   : > { %5572 = vmatmul.mubr.bf16.gmra.mrb[8].mxu0 %v1939_v33  ;;  %1183 = vst [vmem:[#allocation2 + $0x108] sm:$0xff] %v1112_v15  ;;  %v1545_v59 = vsel %vm1091_vm3, %v1542_v42, %v1544_v21  ;;  %v1277_v63 = vsel %vm1091_vm3, %v1274_v6, %v1276_v1  ;;  %v1483_v0 = vpack.c.bf16 %v1450_v9, %v1451_v37  ;;  %v9725_v33 = vmax.f32 %v6883_v25, 0.0 }
  0xd3   : > { %5575 = vmatprep.mubr.msk.bf16.mxu0 %vm6410_vm0, %v9706_v36  ;;  %9726 = vst [vmem:[#allocation48_spill] sm:$0xff] %v7428_v14  ;;  %1617 = vst [vmem:[#allocation2 + $0x100] sm:$0xff] %v1545_v59  ;;  %v1114_v8 = vsel %vm1091_vm3, %v1111_v22, %v1113_v30  ;;  %v1449_v42 = vsel %vm1418_vm2, %v1386_v38, %v1387_v5  ;;  %v9728_v6 = vmax.f32 %v6887_v32, 0.0  ;;  %v9729_v3 = vmax.f32 %v6890_v39, 0.0  ;;  %v6364_v10 = vld [vmem:[#allocation2 + $0xe8] sm:$0xff] }
  0xd4   : > { %v896_v48 = vmul.f32 %v7326_v54, %v9725_v33  ;;  %1347 = vst [vmem:[#allocation2 + $0x128] sm:$0xff] %v1277_v63  ;;  %1184 = vst [vmem:[#allocation2 + $0x120] sm:$0xff] %v1114_v8  ;;  %v1546_v12 = vrot.slane %v1483_v0, 4  ;;  %v1944_v32 = vrot.slane %v7226_v18, 4  ;;  %5683 = vmatprep.subr.bf16.mxu0 %v9706_v36 }
  0xd5   : > { %v7441_v25 = vmul.f32 %v7359_v45, %v9728_v6  ;;  %v898_v58 = vmul.f32 %v7361_v4, %v9729_v3  ;;  %v7466_v3 = vpop.permute.xlu1 %769 }
  0xd6   : > { %v950_v53 = vrot.slane %v896_v48, 7  ;;  %v1213_v37 = vpack.c.bf16 %v7382_v56, %v896_v48  ;;  %v1388_v15 = vrot.slane %v896_v48, 1  ;;  %v1547_v39 = vsel %vm1091_vm3, %v1544_v21, %v1546_v12  ;;  %9730 = vst [vmem:[#allocation50_spill] sm:$0xff] %v7466_v3 }
  0xd7   : > { %v953_v22 = vrot.slane %v7441_v25, 7  ;;  %v952_v9 = vrot.slane %v898_v58, 7  ;;  %v1214_v38 = vpack.c.bf16 %v7441_v25, %v898_v58  ;;  %1618 = vst [vmem:[#allocation2 + $0x118] sm:$0xff] %v1547_v39  ;;  %v1391_v48 = vrot.slane %v7441_v25, 1 }
  0xd8   : > { %v1011_v59 = vsel %vm982_vm1, %v950_v53, %v951_v7  ;;  %v1012_v56 = vsel %vm982_vm1, %v949_v57, %v950_v53  ;;  %v1278_v63 = vrot.slane %v1213_v37, 4  ;;  %v1448_v33 = vsel %vm1418_vm2, %v1387_v5, %v1388_v15  ;;  %v7468_v57 = vpop.permute.xlu0 %764 }
  0xd9   : > { %v1049_v0 = vpack.c.bf16 %v1011_v59, %v1012_v56  ;;  %v1009_v27 = vsel %vm982_vm1, %v952_v9, %v953_v22  ;;  %v1484_v8 = vpack.c.bf16 %v1448_v33, %v1449_v42  ;;  %v1010_v17 = vsel %vm982_vm1, %v951_v7, %v952_v9  ;;  %9731 = vst [vmem:[#allocation51_spill] sm:$0xff] %v7468_v57 }
  0xda   : > { %v1279_v21 = vsel %vm1091_vm3, %v1276_v1, %v1278_v63  ;;  %v1280_v6 = vrot.slane %v1214_v38, 4  ;;  %v1050_v37 = vpack.c.bf16 %v1009_v27, %v1010_v17  ;;  %v1390_v5 = vrot.slane %v898_v58, 1 }
  0xdb   : > { %v1115_v53 = vrot.slane %v1049_v0, 4  ;;  %1348 = vst [vmem:[#allocation2 + $0x140] sm:$0xff] %v1279_v21  ;;  %v9732_v25 = vrot.slane %v7195_v47, 4  ;;  %v1548_v1 = vrot.slane %v1484_v8, 4  ;;  %v9733_v7 = vmax.f32 %v6893_v40, 0.0 }
  0xdc   : > { %v1281_v42 = vsel %vm1091_vm3, %v1278_v63, %v1280_v6  ;;  %v9734_v38 = vmax.f32 %v6897_v16, 0.0  ;;  %v1447_v56 = vsel %vm1418_vm2, %v1388_v15, %v1389_v51  ;;  %v1117_v47 = vrot.slane %v1050_v37, 4 }
  0xdd   : > { %v1945_v39 = vsel %vm1091_vm3, %v9732_v25, %v1944_v32  ;;  %v901_v9 = vmul.f32 %v7392_v35, %v9733_v7  ;;  %v1116_v58 = vsel %vm1091_vm3, %v1113_v30, %v1115_v53  ;;  %1349 = vst [vmem:[#allocation2 + $0x158] sm:$0xff] %v1281_v42  ;;  %v1446_v0 = vsel %vm1418_vm2, %v1389_v51, %v1390_v5  ;;  %v7502_v25 = vpop.permute.xlu1 %779 }
  0xde   : > { %5576 = vmatmul.mubr.bf16.gmra.mrb[12].mxu0 %v1945_v39  ;;  %v900_v59 = vmul.f32 %v7394_v20, %v9734_v38  ;;  %1185 = vst [vmem:[#allocation2 + $0x138] sm:$0xff] %v1116_v58  ;;  %v1549_v40 = vsel %vm1091_vm3, %v1546_v12, %v1548_v1  ;;  %v1445_v16 = vsel %vm1418_vm2, %v1390_v5, %v1391_v48  ;;  %v9735_v51 = vmax.f32 %v6907_v52, 0.0  ;;  %v7504_v39 = vpop.permute.xlu0 %774 }
  0xdf   : > { %5579 = vmatprep.mubr.msk.bf16.mxu0 %vm6410_vm0, %v9706_v36  ;;  %v1485_v63 = vpack.c.bf16 %v1446_v0, %v1447_v56  ;;  %v955_v33 = vrot.slane %v901_v9, 7  ;;  %1619 = vst [vmem:[#allocation2 + $0x130] sm:$0xff] %v1549_v40  ;;  %v1118_v30 = vsel %vm1091_vm3, %v1115_v53, %v1117_v47  ;;  %v9736_v12 = vmax.f32 %v6913_v46, 0.0  ;;  %9737 = vst [vmem:[#allocation52_spill] sm:$0xff] %v7502_v25 }
  0xe0   : > { %v954_v15 = vrot.slane %v900_v59, 7  ;;  %v1215_v27 = vpack.c.bf16 %v901_v9, %v900_v59  ;;  %v1392_v21 = vrot.slane %v900_v59, 1  ;;  %1186 = vst [vmem:[#allocation2 + $0x150] sm:$0xff] %v1118_v30  ;;  %v7496_v17 = vmul.f32 %v7428_v14, %v9735_v51  ;;  %9738 = vst [vmem:[#allocation53_spill] sm:$0xff] %v7504_v39 }
  0xe1   : > { %v1550_v8 = vrot.slane %v1485_v63, 4  ;;  %v902_v37 = vmul.f32 %v7430_v55, %v9736_v12  ;;  %v1950_v5 = vrot.slane %v7278_v44, 4  ;;  %v1393_v53 = vrot.slane %v901_v9, 1  ;;  %v7534_v18 = vpop.permute.xlu1 %869 }
  0xe2   : > { %v1007_v42 = vsel %vm982_vm1, %v954_v15, %v955_v33  ;;  %v1008_v52 = vsel %vm982_vm1, %v953_v22, %v954_v15  ;;  %v1282_v7 = vrot.slane %v1215_v27, 4  ;;  %v1444_v46 = vsel %vm1418_vm2, %v1391_v48, %v1392_v21  ;;  %9740 = vst [vmem:[#allocation54_spill] sm:$0xff] %v7534_v18 }
  0xe3   : > { %v1551_v38 = vsel %vm1091_vm3, %v1548_v1, %v1550_v8  ;;  %v1051_v59 = vpack.c.bf16 %v1007_v42, %v1008_v52  ;;  %v957_v58 = vrot.slane %v7496_v17, 7  ;;  %v1486_v0 = vpack.c.bf16 %v1444_v46, %v1445_v16 }
  0xe4   : > { %1620 = vst [vmem:[#allocation2 + $0x148] sm:$0xff] %v1551_v38  ;;  %v1283_v56 = vsel %vm1091_vm3, %v1280_v6, %v1282_v7  ;;  %v1395_v9 = vrot.slane %v7496_v17, 1  ;;  %v956_v40 = vrot.slane %v902_v37, 7  ;;  %v1216_v22 = vpack.c.bf16 %v7496_v17, %v902_v37 }
  0xe5   : > { %v1119_v63 = vrot.slane %v1051_v59, 4  ;;  %1350 = vst [vmem:[#allocation2 + $0x170] sm:$0xff] %v1283_v56  ;;  %v1394_v30 = vrot.slane %v902_v37, 1  ;;  %v1951_v48 = vsel %vm1091_vm3, %v1944_v32, %v1950_v5  ;;  %v1552_v1 = vrot.slane %v1486_v0, 4  ;;  %v7536_v32 = vpop.permute.xlu0 %784 }
  0xe6   : > { %v1005_v15 = vsel %vm982_vm1, %v956_v40, %v957_v58  ;;  %v1006_v6 = vsel %vm982_vm1, %v955_v33, %v956_v40  ;;  %5580 = vmatmul.mubr.bf16.gmra.mrb[16].mxu0 %v1951_v48  ;;  %v9739_v16 = vmax.f32 %v6926_v31, 0.0  ;;  %v1284_v12 = vrot.slane %v1216_v22, 4  ;;  %9741 = vst [vmem:[#allocation55_spill] sm:$0xff] %v7536_v32  ;;  %v7541_v33 = vld [vmem:[%s9555_s3] ss:$0 sm:$0xff] }
  0xe7   : > { %v1120_v51 = vsel %vm1091_vm3, %v1117_v47, %v1119_v63  ;;  %v1052_v17 = vpack.c.bf16 %v1005_v15, %v1006_v6  ;;  %5583 = vmatprep.mubr.msk.bf16.mxu0 %vm6410_vm0, %v9706_v36  ;;  %v7545_v31 = vadd.f32 %v7541_v33, %v7084_v29  ;;  %v1443_v47 = vsel %vm1418_vm2, %v1392_v21, %v1393_v53 }
  0xe8   : > { %v7529_v27 = vmul.f32 %v7466_v3, %v9739_v16  ;;  %1187 = vst [vmem:[#allocation2 + $0x168] sm:$0xff] %v1120_v51  ;;  %v1553_v37 = vsel %vm1091_vm3, %v1550_v8, %v1552_v1  ;;  %v1442_v42 = vsel %vm1418_vm2, %v1393_v53, %v1394_v30  ;;  %v1285_v59 = vsel %vm1091_vm3, %v1282_v7, %v1284_v12  ;;  %v9744_v53 = vld [vmem:[#allocation3_spill] sm:$0xff] }
  0xe9   : > { %1621 = vst [vmem:[#allocation2 + $0x160] sm:$0xff] %v1553_v37  ;;  %v1121_v38 = vrot.slane %v1052_v17, 4  ;;  %v1487_v46 = vpack.c.bf16 %v1442_v42, %v1443_v47  ;;  %v9742_v56 = vmax.f32 %v6938_v43, 0.0  ;;  %1351 = vst [vmem:[#allocation2 + $0x188] sm:$0xff] %v1285_v59  ;;  %v1441_v21 = vsel %vm1418_vm2, %v1394_v30, %v1395_v9  ;;  %v7584_v59 = vpop.permute.xlu1 %794 }
  0xea   : > { %v959_v52 = vrot.slane %v7529_v27, 7  ;;  %v9743_v8 = vmax.f32 %v6942_v50, 0.0  ;;  %v9745_v40 = vmax.f32 %v9744_v53, 0.0  ;;  %v1956_v7 = vrot.slane %v7306_v23, 4  ;;  %9747 = vst [vmem:[#allocation3_spill] sm:$0xff] %v7584_v59 }
  0xeb   : > { %v904_v29 = vmul.f32 %v7468_v57, %v9742_v56  ;;  %v1122_v43 = vsel %vm1091_vm3, %v1119_v63, %v1121_v38  ;;  %v1554_v48 = vrot.slane %v1487_v46, 4  ;;  %v9746_v51 = vmax.f32 %v6967_v49, 0.0  ;;  %v7586_v46 = vpop.permute.xlu0 %789 }
  0xec   : > { %v7562_v0 = vmul.f32 %v7502_v25, %v9743_v8  ;;  %v7567_v22 = vmul.f32 %v7504_v39, %v9745_v40  ;;  %1188 = vst [vmem:[#allocation2 + $0x180] sm:$0xff] %v1122_v43  ;;  %9748 = vst [vmem:[#allocation56_spill] sm:$0xff] %v7586_v46  ;;  %v1397_v56 = vrot.slane %v7529_v27, 1 }
  0xed   : > { %v958_v15 = vrot.slane %v904_v29, 7  ;;  %v1217_v6 = vpack.c.bf16 %v7529_v27, %v904_v29  ;;  %v1396_v30 = vrot.slane %v904_v29, 1  ;;  %v7577_v17 = vmul.f32 %v7534_v18, %v9746_v51 }
  0xee   : > { %v961_v50 = vrot.slane %v7562_v0, 7  ;;  %v960_v16 = vrot.slane %v7567_v22, 7  ;;  %v1555_v47 = vsel %vm1091_vm3, %v1552_v1, %v1554_v48  ;;  %v1218_v40 = vpack.c.bf16 %v7562_v0, %v7567_v22 }
  0xef   : > { %v1003_v63 = vsel %vm982_vm1, %v958_v15, %v959_v52  ;;  %v1004_v37 = vsel %vm982_vm1, %v957_v58, %v958_v15  ;;  %v1286_v42 = vrot.slane %v1217_v6, 4  ;;  %1622 = vst [vmem:[#allocation2 + $0x178] sm:$0xff] %v1555_v47  ;;  %v1440_v29 = vsel %vm1418_vm2, %v1395_v9, %v1396_v30 }
  0xf0   : > { %v1053_v49 = vpack.c.bf16 %v1003_v63, %v1004_v37  ;;  %v1001_v1 = vsel %vm982_vm1, %v960_v16, %v961_v50  ;;  %v1488_v58 = vpack.c.bf16 %v1440_v29, %v1441_v21  ;;  %v1002_v53 = vsel %vm982_vm1, %v959_v52, %v960_v16  ;;  %v7630_v63 = vpop.permute.xlu1 %804  ;;  %v7632_v37 = vpop.permute.xlu0 %799 }
  0xf1   : > { %v1287_v8 = vsel %vm1091_vm3, %v1284_v12, %v1286_v42  ;;  %v1054_v27 = vpack.c.bf16 %v1001_v1, %v1002_v53  ;;  %v1398_v15 = vrot.slane %v7567_v22, 1  ;;  %v1957_v9 = vsel %vm1091_vm3, %v1950_v5, %v1956_v7  ;;  %9750 = vst [vmem:[#allocation57_spill] sm:$0xff] %v7630_v63  ;;  %9751 = vst [vmem:[#allocation58_spill] sm:$0xff] %v7632_v37  ;;  %v6310_v1 = vld [vmem:[%s9553_s1 + $0xb0] sm:$0xff]  }
  0xf2   : > { %v1123_v43 = vrot.slane %v1053_v49, 4  ;;  %1352 = vst [vmem:[#allocation2 + $0x1a0] sm:$0xff] %v1287_v8  ;;  %v1556_v6 = vrot.slane %v1488_v58, 4  ;;  %v1288_v12 = vrot.slane %v1218_v40, 4  ;;  %5584 = vmatmul.mubr.bf16.gmra.mrb[20].mxu0 %v1957_v9  ;;  %v9596_v21 = vrot.slane %v7577_v17, 7  ;;  %v9753_v58 = vld [vmem:[#allocation5_spill] sm:$0xff] }
  0xf3   : > { %v7609_v52 = vadd.f32 %v7541_v33, %v7096_v34  ;;  %v1439_v22 = vsel %vm1418_vm2, %v1396_v30, %v1397_v56  ;;  %v7614_v51 = vrot.slane %v1054_v27, 4  ;;  %v1438_v44 = vsel %vm1418_vm2, %v1397_v56, %v1398_v15  ;;  %5587 = vmatprep.mubr.msk.bf16.mxu0 %vm6410_vm0, %v9706_v36  ;;  %v9755_v27 = vld [vmem:[#allocation4_spill] sm:$0xff]  ;;  %5684 = vmatpush3.bf16.msra.mxu0 %v6310_v1 }
  0xf4   : > { %v1124_v16 = vsel %vm1091_vm3, %v1121_v38, %v1123_v43  ;;  %v7621_v5 = vsel %vm1091_vm3, %v1554_v48, %v1556_v6  ;;  %v1289_v34 = vsel %vm1091_vm3, %v1286_v42, %v1288_v12  ;;  %v1489_v47 = vpack.c.bf16 %v1438_v44, %v1439_v22  ;;  %v9757_v44 = vld [vmem:[#allocation6_spill] sm:$0xff]  ;;  %5685 = vmatprep.subr.bf16.mxu0 %v9706_v36 }
  0xf5   : > { %1189 = vst [vmem:[#allocation2 + $0x198] sm:$0xff] %v1124_v16  ;;  %v9749_v38 = vrot.slane %v7022_v28, 7  ;;  %1623 = vst [vmem:[#allocation2 + $0x190] sm:$0xff] %v7621_v5  ;;  %v1399_v56 = vrot.slane %v7562_v0, 1  ;;  %v1126_v48 = vsel %vm1091_vm3, %v1123_v43, %v7614_v51  ;;  %v9752_v49 = vmax.f32 %v6970_v26, 0.0 }
  0xf6   : > { %1353 = vst [vmem:[#allocation2 + $0x1b8] sm:$0xff] %v1289_v34  ;;  %1190 = vst [vmem:[#allocation2 + $0x1b0] sm:$0xff] %v1126_v48  ;;  %v1558_v8 = vrot.slane %v1489_v47, 4  ;;  %v9754_v53 = vmax.f32 %v9753_v58, 0.0  ;;  %v9756_v43 = vmax.f32 %v9755_v27, 0.0  ;;  %v9758_v34 = vmax.f32 %v9757_v44, 0.0 }
  0xf7   : > { %v1036_v30 = vsel %vm982_vm1, %v9596_v21, %v9749_v38  ;;  %v908_v29 = vmul.f32 %v7536_v32, %v9752_v49  ;;  %v9759_v58 = vld [vmem:[#allocation25_spill] sm:$0xff]  ;;  %v9792_v32 = vld [vmem:[#allocation16_spill] sm:$0xff] }
  0xf8   : > { %v1037_v42 = vpack.c.bf16 %v7069_v41, %v1036_v30  ;;  %v7648_v40 = vmul.f32 %v7584_v59, %v9754_v53  ;;  %v909_v9 = vmul.f32 %v7586_v46, %v9756_v43  ;;  %v9597_v41 = vrot.slane %v7346_v62, 4 }
  0xf9   : > { %v962_v16 = vrot.slane %v908_v29, 7  ;;  %v1400_v22 = vrot.slane %v908_v29, 1  ;;  %v7657_v38 = vmul.f32 %v7630_v63, %v9758_v34  ;;  %v7660_v47 = vsel %vm1091_vm3, %v1556_v6, %v1558_v8  ;;  %v7681_v34 = vpop.permute.xlu1 %814 }
  0xfa   : > { %v1092_v26 = vrot.slane %v1037_v42, 4  ;;  %v964_v30 = vrot.slane %v7648_v40, 7  ;;  %v1402_v48 = vrot.slane %v7648_v40, 1  ;;  %v963_v49 = vrot.slane %v909_v9, 7  ;;  %1624 = vst [vmem:[#allocation2 + $0x1a8] sm:$0xff] %v7660_v47  ;;  %9760 = vst [vmem:[#allocation5_spill] sm:$0xff] %v7681_v34 }
  0xfb   : > { %v1437_v42 = vsel %vm1418_vm2, %v1398_v15, %v1399_v56  ;;  %v1436_v6 = vsel %vm1418_vm2, %v1399_v56, %v1400_v22  ;;  %v1219_v1 = vpack.c.bf16 %v909_v9, %v908_v29  ;;  %v1000_v27 = vsel %vm982_vm1, %v961_v50, %v962_v16 }
  0xfc   : > { %v7670_v53 = vsel %vm1091_vm3, %v1092_v26, %v9759_v58  ;;  %1173 = vst [vmem:[#allocation2 + $0x18] sm:$0xf0] %v1092_v26  ;;  %v1490_v43 = vpack.c.bf16 %v1436_v6, %v1437_v42  ;;  %v999_v15 = vsel %vm982_vm1, %v962_v16, %v963_v49  ;;  %v1401_v44 = vrot.slane %v909_v9, 1  ;;  %v7683_v58 = vpop.permute.xlu0 %809 }
  0xfd   : > { %1174 = vst [vmem:[#allocation2 + $0x30] sm:$0xff] %v7670_v53  ;;  %9761 = vst [vmem:[#allocation4_spill] sm:$0xff] %v7683_v58  ;;  %v998_v56 = vsel %vm982_vm1, %v963_v49, %v964_v30  ;;  %v1055_v29 = vpack.c.bf16 %v999_v15, %v1000_v27  ;;  %v1290_v26 = vrot.slane %v1219_v1, 4  ;;  %v1963_v0 = vsel %vm1091_vm3, %v1956_v7, %v9597_v41  ;;  %v9762_v27 = vld [vmem:[#allocation7_spill] sm:$0xff]  ;;  %v7721_v41 = vpop.permute.xlu1 %824  ;;  %v8271_v20 = vld [vmem:[#allocation2 + $0x1b8] sm:$0xff] }
  0xfe   : > { %v1560_v50 = vrot.slane %v1490_v43, 4  ;;  %v1434_v16 = vsel %vm1418_vm2, %v1401_v44, %v1402_v48  ;;  %v1435_v9 = vsel %vm1418_vm2, %v1400_v22, %v1401_v44  ;;  %5588 = vmatmul.mubr.bf16.gmra.mrb[24].mxu0 %v1963_v0  ;;  %v966_v42 = vrot.slane %v7657_v38, 7  ;;  %v9764_v43 = vld [vmem:[#allocation8_spill] sm:$0xff]  ;;  %9768 = vst [vmem:[#allocation6_spill] sm:$0xff] %v7721_v41 }
  0xff   : > { %v1127_v6 = vrot.slane %v1055_v29, 4  ;;  %v1291_v49 = vsel %vm1091_vm3, %v1288_v12, %v1290_v26  ;;  %v1491_v1 = vpack.c.bf16 %v1434_v16, %v1435_v9  ;;  %v9763_v15 = vmax.f32 %v9762_v27, 0.0  ;;  %5591 = vmatprep.mubr.msk.bf16.mxu0 %vm6410_vm0, %v9706_v36  ;;  %v9766_v12 = vld [vmem:[#allocation9_spill] sm:$0xff] }
 0x100   : > { %v7704_v7 = vsel %vm1091_vm3, %v1558_v8, %v1560_v50  ;;  %1354 = vst [vmem:[#allocation2 + $0x1d0] sm:$0xff] %v1291_v49  ;;  %v1404_v22 = vrot.slane %v7657_v38, 1  ;;  %v9765_v44 = vmax.f32 %v9764_v43, 0.0  ;;  %v9767_v0 = vmax.f32 %v9766_v12, 0.0  ;;  %v7723_v12 = vpop.permute.xlu0 %819 }
 0x101   : > { %v911_v23 = vmul.f32 %v7632_v37, %v9763_v15  ;;  %1625 = vst [vmem:[#allocation2 + $0x1c0] sm:$0xff] %v7704_v7  ;;  %v1128_v9 = vsel %vm1091_vm3, %v7614_v51, %v1127_v6  ;;  %v1562_v27 = vrot.slane %v1491_v1, 4  ;;  %9769 = vst [vmem:[#allocation25_spill] sm:$0xff] %v7723_v12  ;;  %v9793_v25 = vmax.f32 %v9792_v32, 0.0 }
 0x102   : > { %v7710_v29 = vmul.f32 %v7681_v34, %v9765_v44  ;;  %v913_v16 = vmul.f32 %v7683_v58, %v9767_v0  ;;  %1191 = vst [vmem:[#allocation2 + $0x1c8] sm:$0xff] %v1128_v9 }
 0x103   : > { %v965_v8 = vrot.slane %v911_v23, 7  ;;  %v1220_v49 = vpack.c.bf16 %v911_v23, %v7648_v40  ;;  %v1403_v15 = vrot.slane %v911_v23, 1  ;;  %v7726_v0 = vsel %vm1091_vm3, %v1560_v50, %v1562_v27 }
 0x104   : > { %v968_v43 = vrot.slane %v7710_v29, 7  ;;  %v967_v21 = vrot.slane %v913_v16, 7  ;;  %v1406_v40 = vrot.slane %v7710_v29, 1  ;;  %1626 = vst [vmem:[#allocation2 + $0x1d8] sm:$0xff] %v7726_v0  ;;  %v1405_v37 = vrot.slane %v913_v16, 1 }
 0x105   : > { %v997_v51 = vsel %vm982_vm1, %v964_v30, %v965_v8  ;;  %v1292_v1 = vrot.slane %v1220_v49, 4  ;;  %v996_v23 = vsel %vm982_vm1, %v965_v8, %v966_v42  ;;  %v1432_v44 = vsel %vm1418_vm2, %v1403_v15, %v1404_v22 }
 0x106   : > { %v1056_v9 = vpack.c.bf16 %v997_v51, %v998_v56  ;;  %v1433_v18 = vsel %vm1418_vm2, %v1402_v48, %v1403_v15  ;;  %v995_v30 = vsel %vm982_vm1, %v966_v42, %v967_v21  ;;  %v1221_v49 = vpack.c.bf16 %v913_v16, %v7657_v38  ;;  %v9774_v42 = vld [vmem:[#allocation10_spill] sm:$0xff] }
 0x107   : > { %v1293_v50 = vsel %vm1091_vm3, %v1290_v26, %v1292_v1  ;;  %v1492_v34 = vpack.c.bf16 %v1432_v44, %v1433_v18  ;;  %v1057_v63 = vpack.c.bf16 %v995_v30, %v996_v23  ;;  %v9770_v56 = vrot.slane %v7386_v2, 4  ;;  %v9772_v26 = vld [vmem:[#allocation13_spill] sm:$0xff]  ;;  %v8283_v45 = vld [vmem:[#allocation2 + $0x1d0] sm:$0xff] }
 0x108   : > { %v1129_v58 = vrot.slane %v1056_v9, 4  ;;  %1355 = vst [vmem:[#allocation2 + $0x1e8] sm:$0xff] %v1293_v50  ;;  %v9771_v8 = vrot.slane %v7346_v62, 4  ;;  %v1294_v48 = vrot.slane %v1221_v49, 4  ;;  %v9773_v18 = vmax.f32 %v9772_v26, 0.0  ;;  %v7760_v9 = vpop.permute.xlu1 %834  ;;  %v7762_v50 = vpop.permute.xlu0 %829  ;;  %v9778_v26 = vld [vmem:[#allocation14_spill] sm:$0xff] }
 0x109   : > { %v1564_v59 = vrot.slane %v1492_v34, 4  ;;  %v9775_v38 = vmax.f32 %v9774_v42, 0.0  ;;  %v1131_v23 = vrot.slane %v1057_v63, 4  ;;  %v1430_v62 = vsel %vm1418_vm2, %v1405_v37, %v1406_v40  ;;  %9776 = vst [vmem:[#allocation7_spill] sm:$0xff] %v7760_v9  ;;  %9777 = vst [vmem:[#allocation8_spill] sm:$0xff] %v7762_v50  ;;  %v9780_v42 = vld [vmem:[#allocation15_spill] sm:$0xff] }
 0x10a   : > { %v1969_v51 = vsel %vm1091_vm3, %v9771_v8, %v9770_v56  ;;  %v7750_v15 = vmul.f32 %v7721_v41, %v9773_v18  ;;  %v1130_v16 = vsel %vm1091_vm3, %v1127_v6, %v1129_v58  ;;  %v1431_v34 = vsel %vm1418_vm2, %v1404_v22, %v1405_v37 }
 0x10b   : > { %5592 = vmatmul.mubr.bf16.gmra.mrb[28].mxu0 %v1969_v51  ;;  %v915_v44 = vmul.f32 %v7723_v12, %v9775_v38  ;;  %1192 = vst [vmem:[#allocation2 + $0x1e0] sm:$0xff] %v1130_v16  ;;  %v7767_v30 = vsel %vm1091_vm3, %v1562_v27, %v1564_v59  ;;  %v7770_v6 = vsel %vm1091_vm3, %v1292_v1, %v1294_v48  ;;  %v9779_v1 = vmax.f32 %v9778_v26, 0.0  ;;  %v9788_v12 = vld [vmem:[#allocation22_spill] sm:$0xff] }
 0x10c   : > { %5595 = vmatprep.mubr.msk.bf16.mxu0 %vm6410_vm0, %v9706_v36  ;;  %v1493_v63 = vpack.c.bf16 %v1430_v62, %v1431_v34  ;;  %v970_v49 = vrot.slane %v7750_v15, 7  ;;  %1627 = vst [vmem:[#allocation2 + $0x1f0] sm:$0xff] %v7767_v30  ;;  %v1132_v37 = vsel %vm1091_vm3, %v1129_v58, %v1131_v23  ;;  %1356 = vst [vmem:[#allocation2 + $0x200] sm:$0xff] %v7770_v6  ;;  %v1408_v22 = vrot.slane %v7750_v15, 1  ;;  %v1777_v58 = vld [vmem:[#allocation2 + $0x18] sm:$0xf0] }
 0x10d   : > { %v969_v56 = vrot.slane %v915_v44, 7  ;;  %v1222_v8 = vpack.c.bf16 %v915_v44, %v7710_v29  ;;  %1193 = vst [vmem:[#allocation2 + $0x1f8] sm:$0xff] %v1132_v37  ;;  %v1407_v51 = vrot.slane %v915_v44, 1  ;;  %v7781_v18 = vmul.f32 %v7760_v9, %v9779_v1  ;;  %v7817_v9 = vpop.permute.xlu0 %839 }
 0x10e   : > { %v1566_v27 = vrot.slane %v1493_v63, 4  ;;  %v9781_v38 = vmax.f32 %v9780_v42, 0.0  ;;  %v994_v62 = vsel %vm982_vm1, %v967_v21, %v968_v43  ;;  %v7801_v42 = vld [vmem:[#allocation2 + $0x100] sm:$0xff]  ;;  %v7803_v21 = vld [vmem:[#allocation2 + $0x50] sm:$0xff]  ;;  %9783 = vst [vmem:[#allocation13_spill] sm:$0xff] %v7817_v9  ;;  %v9789_v46 = vrot.slane %v9788_v12, 4 }
 0x10f   : > { %v992_v29 = vsel %vm982_vm1, %v969_v56, %v970_v49  ;;  %v993_v44 = vsel %vm982_vm1, %v968_v43, %v969_v56  ;;  %v1296_v34 = vrot.slane %v1222_v8, 4  ;;  %v1428_v26 = vsel %vm1418_vm2, %v1407_v51, %v1408_v22  ;;  %v7810_v8 = vpop.permute.xlu1 %844  ;;  %v8295_v4 = vld [vmem:[#allocation2 + $0x1e8] sm:$0xff] }
 0x110   : > { %v7786_v16 = vmul.f32 %v7762_v50, %v9781_v38  ;;  %v7795_v63 = vsel %vm1091_vm3, %v1564_v59, %v1566_v27  ;;  %v1058_v37 = vpack.c.bf16 %v993_v44, %v994_v62  ;;  %v1429_v1 = vsel %vm1418_vm2, %v1406_v40, %v1407_v51  ;;  %9782 = vst [vmem:[#allocation9_spill] sm:$0xff] %v7810_v8 }
 0x111   : > { %1628 = vst [vmem:[#allocation2 + $0x208] sm:$0xff] %v7795_v63  ;;  %v7807_v38 = vsel %vm1091_vm3, %v1294_v48, %v1296_v34  ;;  %v1494_v43 = vpack.c.bf16 %v1428_v26, %v1429_v1  ;;  %v1919_v56 = vrot.slane %v1777_v58, 4  ;;  %v6313_v48 = vld [vmem:[%s9553_s1 + $0xb8] sm:$0xff]   ;;  %v972_v58 = vrot.slane %v7781_v18, 7 }
 0x112   : > { %v1133_v62 = vrot.slane %v1058_v37, 4  ;;  %1357 = vst [vmem:[#allocation2 + $0x218] sm:$0xff] %v7807_v38  ;;  %v971_v40 = vrot.slane %v7786_v16, 7  ;;  %v1223_v51 = vpack.c.bf16 %v7786_v16, %v7750_v15  ;;  %v1409_v44 = vrot.slane %v7786_v16, 1  ;;  %5686 = vmatpush3.bf16.msra.mxu0 %v6313_v48 }
 0x113   : > { %v1568_v26 = vrot.slane %v1494_v43, 4  ;;  %v1920_v50 = vrot.slane %v7670_v53, 4  ;;  %v9784_v37 = vrot.slane %v7781_v18, 1  ;;  %v7844_v53 = vld [vmem:[#allocation2] sm:$0xff]  ;;  %v9785_v48 = vrot.slane %v7801_v42, 4 }
 0x114   : > { %v7826_v59 = vsel %vm1091_vm3, %v1131_v23, %v1133_v62  ;;  %v991_v15 = vsel %vm982_vm1, %v970_v49, %v971_v40  ;;  %v1298_v16 = vrot.slane %v1223_v51, 4  ;;  %v1427_v23 = vsel %vm1418_vm2, %v1408_v22, %v1409_v44  ;;  %v6306_v49 = vld [vmem:[%s9553_s1] sm:$0xff]   ;;  %3723 = vmatprep.subr.bf16.mxu0 %v7844_v53 }
 0x115   : > { %1194 = vst [vmem:[#allocation2 + $0x210] sm:$0xff] %v7826_v59  ;;  %v7833_v43 = vsel %vm1091_vm3, %v1566_v27, %v1568_v26  ;;  %v1059_v41 = vpack.c.bf16 %v991_v15, %v992_v29  ;;  %v1426_v1 = vsel %vm1418_vm2, %v1409_v44, %v9784_v37  ;;  %v1921_v51 = vsel %vm1091_vm3, %v1919_v56, %v1920_v50 }
 0x116   : > { %1629 = vst [vmem:[#allocation2 + $0x220] sm:$0xff] %v7833_v43  ;;  %v7849_v27 = vsel %vm1091_vm3, %v1296_v34, %v1298_v16  ;;  %v1495_v29 = vpack.c.bf16 %v1426_v1, %v1427_v23  ;;  %v9786_v22 = vrot.slane %v7386_v2, 4  ;;  %2342 = vmatmul.mubr.bf16.vlgmr.msra.gmra.mrb[0].mxu1 %v1921_v51  ;;  %v9787_v15 = vrot.slane %v7803_v21, 4  ;;  %v9790_v1 = vld [vmem:[#allocation19_spill] sm:$0xff] }
 0x117   : > { %v1135_v37 = vrot.slane %v1059_v41, 4  ;;  %1358 = vst [vmem:[#allocation2 + $0x230] sm:$0xff] %v7849_v27  ;;  %v9791_v23 = vmax.f32 %v9790_v1, 0.0  ;;  %v919_v2 = vmul.f32 %v7817_v9, %v9793_v25  ;;  %v598_v51 = vmax.f32 %v7545_v31, 0.0  ;;  %2952 = vmatpush1.bf16.msra.mxu1 %v6306_v49  ;;  %v6308_v31 = vld [vmem:[%s9553_s1 + $0x8] sm:$0xff]   ;;  %v7909_v9 = vld [vmem:[#allocation2 + $0x118] sm:$0xff] }
 0x118   : > { %v1975_v44 = vsel %vm1091_vm3, %v9786_v22, %v9785_v48  ;;  %v1931_v34 = vsel %vm1091_vm3, %v9789_v46, %v9787_v15  ;;  %v7869_v48 = vpop.permute.xlu1 %854  ;;  %v1570_v41 = vrot.slane %v1495_v29, 4  ;;  %v7872_v22 = vpop.permute.xlu0 %849  ;;  %v597_v12 = vmax.f32 %v7609_v52, 0.0  ;;  %v7877_v46 = vld [vmem:[#allocation2 + $0x48] sm:$0xff]  ;;  %2953 = vmatprep.subr.bf16.mxu1 %v7844_v53 }
 0x119   : > { %5596 = vmatmul.mubr.bf16.gmra.mrb[32].mxu0 %v1975_v44  ;;  %v920_v56 = vmul.f32 %v7810_v8, %v9791_v23  ;;  %9794 = vst [vmem:[#allocation10_spill] sm:$0xff] %v7869_v48  ;;  %2349 = vmatprep.mubr.bf16.mxu1 %v1931_v34  ;;  %9795 = vst [vmem:[#allocation14_spill] sm:$0xff] %v7872_v22  ;;  %v990_v32 = vsel %vm982_vm1, %v971_v40, %v972_v58  ;;  %v973_v29 = vrot.slane %v919_v2, 7 }
 0x11a   : > { %5599 = vmatprep.mubr.msk.bf16.mxu0 %vm6410_vm0, %v9706_v36  ;;  %v7882_v25 = vsel %vm1091_vm3, %v1133_v62, %v1135_v37  ;;  %v7889_v52 = vsel %vm1091_vm3, %v1568_v26, %v1570_v41  ;;  %v1224_v15 = vpack.c.bf16 %v919_v2, %v7781_v18  ;;  %v1411_v34 = vrot.slane %v919_v2, 1 }
 0x11b   : > { %v1412_v44 = vrot.slane %v920_v56, 1  ;;  %1195 = vst [vmem:[#allocation2 + $0x228] sm:$0xff] %v7882_v25  ;;  %v7893_v40 = vmul.f32 %v7869_v48, %v598_v51  ;;  %1630 = vst [vmem:[#allocation2 + $0x238] sm:$0xff] %v7889_v52  ;;  %v974_v62 = vrot.slane %v920_v56, 7  ;;  %v989_v49 = vsel %vm982_vm1, %v972_v58, %v973_v29  ;;  %2954 = vmatpush1.bf16.msra.mxu1 %v6308_v31 }
 0x11c   : > { %v7900_v1 = vmul.f32 %v7872_v22, %v597_v12  ;;  %v9615_v26 = vrot.slane %v7877_v46, 4  ;;  %v1060_v23 = vpack.c.bf16 %v989_v49, %v990_v32  ;;  %v1300_v8 = vrot.slane %v1224_v15, 4  ;;  %v6309_v15 = vld [vmem:[%s9553_s1 + $0x10] sm:$0xff]   ;;  %2955 = vmatprep.subr.bf16.mxu1 %v7844_v53  ;;  %v7986_v22 = vld [vmem:[#allocation2 + $0x78] sm:$0xff] }
 0x11d   : > { %v1424_v2 = vsel %vm1418_vm2, %v1411_v34, %v1412_v44  ;;  %v9796_v51 = vrot.slane %v7781_v18, 1  ;;  %v9616_v58 = vrot.slane %v7893_v40, 1  ;;  %v9625_v3 = vrot.slane %v7986_v22, 4 }
 0x11e   : > { %v9617_v12 = vrot.slane %v7900_v1, 7  ;;  %v1929_v32 = vsel %vm1091_vm3, %v1920_v50, %v9615_v26  ;;  %v1137_v18 = vrot.slane %v1060_v23, 4  ;;  %v7920_v49 = vsel %vm1091_vm3, %v1298_v16, %v1300_v8 }
 0x11f   : > { %v1425_v48 = vsel %vm1418_vm2, %v9796_v51, %v1411_v34  ;;  %v1225_v34 = vpack.c.bf16 %v7900_v1, %v920_v56  ;;  %v988_v51 = vsel %vm982_vm1, %v973_v29, %v974_v62  ;;  %1359 = vst [vmem:[#allocation2 + $0x248] sm:$0xff] %v7920_v49  ;;  %2350 = vmatmul.mubr.bf16.gmra.mrb[4].mxu1 %v1929_v32  ;;  %v1980_v16 = vrot.slane %v7909_v9, 4  ;;  %v7942_v29 = vld [vmem:[#allocation2 + $0x60] sm:$0xff] }
 0x120   : > { %v1496_v39 = vpack.c.bf16 %v1424_v2, %v1425_v48  ;;  %v1413_v48 = vrot.slane %v7900_v1, 1  ;;  %v1661_v2 = vld [vmem:[#allocation2 + $0x68] sm:$0xff]  ;;  %v987_v31 = vsel %vm982_vm1, %v974_v62, %v9617_v12  ;;  %v7934_v56 = vsel %vm1091_vm3, %v1135_v37, %v1137_v18  ;;  %2956 = vmatpush1.bf16.msra.mxu1 %v6309_v15 }
 0x121   : > { %v1061_v23 = vpack.c.bf16 %v987_v31, %v988_v51  ;;  %v7936_v26 = vrot.slane %v1225_v34, 4  ;;  %1196 = vst [vmem:[#allocation2 + $0x240] sm:$0xff] %v7934_v56  ;;  %v9797_v37 = vrot.slane %v7801_v42, 4  ;;  %v1936_v34 = vrot.slane %v1661_v2, 4  ;;  %v7953_v51 = vld [vmem:[#allocation2 + $0x80] sm:$0xff]  ;;  %v6311_v31 = vld [vmem:[%s9553_s1 + $0x18] sm:$0xff]   ;;  %2957 = vmatprep.subr.bf16.mxu1 %v7844_v53 }
 0x122   : > { %v1572_v50 = vrot.slane %v1496_v39, 4  ;;  %v1422_v39 = vsel %vm1418_vm2, %v1413_v48, %v9616_v58  ;;  %v1423_v9 = vsel %vm1418_vm2, %v1412_v44, %v1413_v48  ;;  %v6352_v48 = vld [vmem:[%s6651_s20 + $0xd0] sm:$0xff]   ;;  %v9798_v15 = vrot.slane %v7803_v21, 4  ;;  %v6353_v12 = vld [vmem:[%s6651_s20 + $0xc8] sm:$0xff]   ;;  %v6354_v21 = vld [vmem:[%s9554_s2] ss:$0 sm:$0xff] }
 0x123   : > { %v1981_v32 = vsel %vm1091_vm3, %v9797_v37, %v1980_v16  ;;  %v7963_v44 = vsel %vm1091_vm3, %v1300_v8, %v7936_v26  ;;  %v1497_v42 = vpack.c.bf16 %v1422_v39, %v1423_v9  ;;  %v5253_v37 = vunpack.c.l.bf16 %v6352_v48  ;;  %v1686_v2 = vld [vmem:[#allocation2 + $0x130] sm:$0xff] }
 0x124   : > { %v7946_v62 = vsel %vm1091_vm3, %v1570_v41, %v1572_v50  ;;  %v7959_v41 = vrot.slane %v1061_v23, 4  ;;  %5600 = vmatmul.mubr.bf16.gmra.mrb[36].mxu0 %v1981_v32  ;;  %1360 = vst [vmem:[#allocation2 + $0x260] sm:$0xff] %v7963_v44  ;;  %v1937_v58 = vsel %vm1091_vm3, %v9798_v15, %v1936_v34  ;;  %v5250_v23 = vunpack.c.h.bf16 %v6353_v12  ;;  %2958 = vmatpush1.bf16.msra.mxu1 %v6311_v31 }
 0x125   : > { %1631 = vst [vmem:[#allocation2 + $0x250] sm:$0xff] %v7946_v62  ;;  %5603 = vmatprep.mubr.msk.bf16.mxu0 %vm6410_vm0, %v9706_v36  ;;  %v1934_v8 = vrot.slane %v7942_v29, 4  ;;  %v7979_v9 = vrot.slane %v1497_v42, 4  ;;  %2357 = vmatprep.mubr.bf16.mxu1 %v1937_v58  ;;  %v485_v32 = vmul.f32 %v6354_v21, %v5253_v37  ;;  %v1942_v48 = vrot.slane %v7953_v51, 4  ;;  %v7999_v37 = vld [vmem:[#allocation2 + $0x148] sm:$0xff] }
 0x126   : > { %v7977_v39 = vsel %vm1091_vm3, %v1137_v18, %v7959_v41  ;;  %v484_v12 = vmul.f32 %v6354_v21, %v5250_v23  ;;  %v1986_v15 = vrot.slane %v1686_v2, 4  ;;  %v6312_v18 = vld [vmem:[%s9553_s1 + $0x20] sm:$0xff]   ;;  %v9799_v42 = vrot.slane %v7877_v46, 4  ;;  %2959 = vmatprep.subr.bf16.mxu1 %v7844_v53  ;;  %v8005_v23 = vpop.permute.xlu1 %864  ;;  %v8009_v46 = vld [vmem:[#allocation2 + $0x98] sm:$0xff] }
 0x127   : > { %1197 = vst [vmem:[#allocation2 + $0x258] sm:$0xff] %v7977_v39  ;;  %v7993_v58 = vsel %vm1091_vm3, %v1572_v50, %v7979_v9  ;;  %v546_v29 = vadd.f32 %v7541_v33, %v485_v32  ;;  %v1417_v31 = vrot.slane %v7577_v17, 1  ;;  %v976_v2 = vrot.slane %v7893_v40, 7  ;;  %9800 = vst [vmem:[#allocation15_spill] sm:$0xff] %v8005_v23 }
 0x128   : > { %v1935_v51 = vsel %vm1091_vm3, %v9799_v42, %v1934_v8  ;;  %1632 = vst [vmem:[#allocation2 + $0x268] sm:$0xff] %v7993_v58  ;;  %v545_v50 = vadd.f32 %v7541_v33, %v484_v12  ;;  %v1943_v21 = vsel %vm1091_vm3, %v1936_v34, %v1942_v48  ;;  %v8011_v42 = vpop.permute.xlu0 %859  ;;  %v1987_v14 = vsel %vm1091_vm3, %v1980_v16, %v1986_v15  ;;  %v6314_v33 = vld [vmem:[%s9553_s1 + $0x28] sm:$0xff]  }
 0x129   : > { %2358 = vmatmul.mubr.bf16.gmra.mrb[8].mxu1 %v1935_v51  ;;  %v600_v32 = vmax.f32 %v546_v29, 0.0  ;;  %9801 = vst [vmem:[#allocation22_spill] sm:$0xff] %v8011_v42  ;;  %v9626_v55 = vrot.slane %v7999_v37, 4  ;;  %v9802_v29 = vrot.slane %v7022_v28, 1  ;;  %v9803_v16 = vrot.slane %v7900_v1, 7 }
 0x12a   : > { %2365 = vmatprep.mubr.bf16.mxu1 %v1943_v21  ;;  %v599_v57 = vmax.f32 %v545_v50, 0.0  ;;  %2960 = vmatpush1.bf16.msra.mxu1 %v6312_v18  ;;  %v1941_v28 = vsel %vm1091_vm3, %v1934_v8, %v9625_v3 }
 0x12b   : > { %v924_v34 = vmul.f32 %v8005_v23, %v600_v32  ;;  %2961 = vmatprep.subr.bf16.mxu1 %v7844_v53  ;;  %v1472_v51 = vsel %vm1418_vm2, %v1417_v31, %v9802_v29  ;;  %v986_v18 = vsel %vm982_vm1, %v9803_v16, %v976_v2  ;;  %v1993_v16 = vsel %vm1091_vm3, %v1986_v15, %v9626_v55 }
 0x12c   : > { %5604 = vmatmul.mubr.bf16.gmra.mrb[40].mxu0 %v1987_v14  ;;  %v923_v50 = vmul.f32 %v8011_v42, %v599_v57  ;;  %v6315_v57 = vld [vmem:[%s9553_s1 + $0x30] sm:$0xff]   ;;  %v9804_v23 = vrot.slane %v7577_v17, 7 }
 0x12d   : > { %5607 = vmatprep.mubr.msk.bf16.mxu0 %vm6410_vm0, %v9706_v36  ;;  %v978_v14 = vrot.slane %v924_v34, 7  ;;  %v1227_v21 = vpack.c.bf16 %v7577_v17, %v924_v34  ;;  %v1416_v32 = vrot.slane %v924_v34, 1 }
 0x12e   : > { %v977_v12 = vrot.slane %v923_v50, 7  ;;  %v1226_v29 = vpack.c.bf16 %v923_v50, %v7893_v40  ;;  %v1415_v1 = vrot.slane %v923_v50, 1  ;;  %2962 = vmatpush1.bf16.msra.mxu1 %v6314_v33  ;;  %v9805_v50 = vrot.slane %v8009_v46, 4  ;;  %v6317_v46 = vld [vmem:[%s9553_s1 + $0x38] sm:$0xff]  }
 0x12f   : > { %v983_v34 = vsel %vm982_vm1, %v978_v14, %v9804_v23  ;;  %v1306_v42 = vrot.slane %v1227_v21, 4  ;;  %v1419_v8 = vsel %vm1418_vm2, %v1416_v32, %v1417_v31  ;;  %2963 = vmatprep.subr.bf16.mxu1 %v7844_v53  ;;  %v8058_v23 = vld [vmem:[#allocation2 + $0x90] sm:$0xff] }
 0x130   : > { %v1949_v3 = vsel %vm1091_vm3, %v1942_v48, %v9805_v50  ;;  %v1499_v15 = vpack.c.bf16 %v1472_v51, %v1419_v8  ;;  %v984_v33 = vsel %vm982_vm1, %v977_v12, %v978_v14  ;;  %v985_v17 = vsel %vm982_vm1, %v976_v2, %v977_v12  ;;  %v8066_v14 = vld [vmem:[#allocation2 + $0xb0] sm:$0xff] }
 0x131   : > { %v1304_v55 = vrot.slane %v1226_v29, 4  ;;  %2366 = vmatmul.mubr.bf16.gmra.mrb[12].mxu1 %v1941_v28  ;;  %1363 = vst [vmem:[#allocation2 + $0x2a8] sm:$0xf] %v1306_v42  ;;  %v1062_v21 = vpack.c.bf16 %v985_v17, %v986_v18  ;;  %v1063_v31 = vpack.c.bf16 %v983_v34, %v984_v33  ;;  %v1420_v35 = vsel %vm1418_vm2, %v1415_v1, %v1416_v32 }
 0x132   : > { %v9806_v48 = vrot.slane %v7893_v40, 1  ;;  %2373 = vmatprep.mubr.bf16.mxu1 %v1949_v3  ;;  %v1578_v8 = vrot.slane %v1499_v15, 4  ;;  %2964 = vmatpush1.bf16.msra.mxu1 %v6315_v57  ;;  %v1946_v24 = vrot.slane %v8058_v23, 4  ;;  %v8078_v3 = vld [vmem:[#allocation2 + $0x160] sm:$0xff]  ;;  %v9808_v57 = vmov %v9805_v50  ;;  %v8111_v50 = vld [vmem:[#allocation2 + $0xc8] sm:$0xff] }
 0x133   : > { %v8070_v2 = vsel %vm1091_vm3, %v7936_v26, %v1304_v55  ;;  %v8073_v12 = vsel %vm1091_vm3, %v1304_v55, %v1306_v42  ;;  %v1141_v28 = vrot.slane %v1062_v21, 4  ;;  %v1143_v32 = vrot.slane %v1063_v31, 4  ;;  %2965 = vmatprep.subr.bf16.mxu1 %v7844_v53 }
 0x134   : > { %v1421_v51 = vsel %vm1418_vm2, %v9806_v48, %v1415_v1  ;;  %1361 = vst [vmem:[#allocation2 + $0x278] sm:$0xff] %v8070_v2  ;;  %1362 = vst [vmem:[#allocation2 + $0x290] sm:$0xff] %v8073_v12  ;;  %5608 = vmatmul.mubr.bf16.gmra.mrb[44].mxu0 %v1993_v16  ;;  %v1998_v1 = vrot.slane %v8078_v3, 4  ;;  %v9809_v15 = vrot.slane %v7999_v37, 4  ;;  %v1960_v21 = vrot.slane %v8111_v50, 4 }
 0x135   : > { %v1498_v18 = vpack.c.bf16 %v1420_v35, %v1421_v51  ;;  %1635 = vst [vmem:[#allocation2 + $0x2b0] sm:$0xf] %v1578_v8  ;;  %5611 = vmatprep.mubr.msk.bf16.mxu0 %vm6410_vm0, %v9706_v36  ;;  %v1954_v35 = vrot.slane %v8066_v14, 4  ;;  %v8086_v55 = vsel %vm1091_vm3, %v7959_v41, %v1141_v28  ;;  %v8089_v26 = vsel %vm1091_vm3, %v1141_v28, %v1143_v32  ;;  %v8129_v51 = vld [vmem:[#allocation2 + $0xc0] sm:$0xff] }
 0x136   : > { %1200 = vst [vmem:[#allocation2 + $0x2a0] sm:$0xf] %v1143_v32  ;;  %1198 = vst [vmem:[#allocation2 + $0x270] sm:$0xff] %v8086_v55  ;;  %v9807_v41 = vrot.slane %v7986_v22, 4  ;;  %v1999_v33 = vsel %vm1091_vm3, %v9809_v15, %v1998_v1  ;;  %v8117_v22 = vld [vmem:[#allocation2 + $0x178] sm:$0xff]  ;;  %2966 = vmatpush1.bf16.msra.mxu1 %v6317_v46  ;;  %v1958_v28 = vrot.slane %v8129_v51, 4 }
 0x137   : > { %v1576_v40 = vrot.slane %v1498_v18, 4  ;;  %1199 = vst [vmem:[#allocation2 + $0x288] sm:$0xff] %v8089_v26  ;;  %v1955_v34 = vsel %vm1091_vm3, %v9808_v57, %v1954_v35  ;;  %v2004_v31 = vrot.slane %v8117_v22, 4  ;;  %2967 = vmatprep.subr.bf16.mxu1 %v7844_v53  ;;  %v1961_v48 = vsel %vm1091_vm3, %v1954_v35, %v1960_v21  ;;  %v8157_v46 = vld [vmem:[#allocation2 + $0xf0] sm:$0xff] }
 0x138   : > { %v1947_v16 = vsel %vm1091_vm3, %v9807_v41, %v1946_v24  ;;  %v8141_v41 = vld [vmem:[#allocation2 + $0xd8] sm:$0xff]  ;;  %v2016_v15 = vrot.slane %v7660_v47, 4 }
 0x139   : > { %v8095_v42 = vsel %vm1091_vm3, %v7979_v9, %v1576_v40  ;;  %v8098_v29 = vsel %vm1091_vm3, %v1576_v40, %v1578_v8  ;;  %2374 = vmatmul.mubr.bf16.gmra.mrb[16].mxu1 %v1947_v16  ;;  %v8109_v9 = vld [vmem:[#allocation2 + $0xa8] sm:$0xff]  ;;  %v8131_v8 = vld [vmem:[#allocation2 + $0xe0] sm:$0xff]  ;;  %v2005_v18 = vsel %vm1091_vm3, %v1998_v1, %v2004_v31  ;;  %v2010_v40 = vrot.slane %v7621_v5, 4  ;;  %v8146_v16 = vld [vmem:[#allocation2 + $0xf8] sm:$0xff] }
 0x13a   : > { %1633 = vst [vmem:[#allocation2 + $0x280] sm:$0xff] %v8095_v42  ;;  %1634 = vst [vmem:[#allocation2 + $0x298] sm:$0xff] %v8098_v29  ;;  %2381 = vmatprep.mubr.bf16.mxu1 %v1955_v34  ;;  %v1952_v17 = vrot.slane %v8109_v9, 4  ;;  %v1966_v32 = vrot.slane %v8131_v8, 4  ;;  %v6319_v1 = vld [vmem:[%s9553_s1 + $0x40] sm:$0xff]   ;;  %v1964_v34 = vrot.slane %v8141_v41, 4 }
 0x13b   : > { %v2011_v57 = vsel %vm1091_vm3, %v2004_v31, %v2010_v40  ;;  %2968 = vmatpush1.bf16.msra.mxu1 %v6319_v1  ;;  %v1972_v5 = vrot.slane %v8146_v16, 4  ;;  %v2017_v31 = vsel %vm1091_vm3, %v2010_v40, %v2016_v15  ;;  %v8175_v40 = vld [vmem:[#allocation2 + $0x128] sm:$0xff] }
 0x13c   : > { %5612 = vmatmul.mubr.bf16.gmra.mrb[48].mxu0 %v1999_v33  ;;  %v1953_v37 = vsel %vm1091_vm3, %v1946_v24, %v1952_v17  ;;  %v1959_v24 = vsel %vm1091_vm3, %v1952_v17, %v1958_v28  ;;  %v1967_v35 = vsel %vm1091_vm3, %v1960_v21, %v1966_v32  ;;  %2969 = vmatprep.subr.bf16.mxu1 %v7844_v53  ;;  %v8159_v21 = vld [vmem:[#allocation2 + $0x110] sm:$0xff] }
 0x13d   : > { %5615 = vmatprep.mubr.msk.bf16.mxu0 %vm6410_vm0, %v9706_v36  ;;  %v1965_v33 = vsel %vm1091_vm3, %v1958_v28, %v1964_v34  ;;  %v1973_v17 = vsel %vm1091_vm3, %v1966_v32, %v1972_v5  ;;  %v1978_v47 = vrot.slane %v8159_v21, 4  ;;  %v1785_v60 = vld [vmem:[#allocation2 + $0x2b0] sm:$0xf] }
 0x13f   : > { %v1979_v32 = vsel %vm1091_vm3, %v1972_v5, %v1978_v47  ;;  %v2028_v5 = vrot.slane %v7726_v0, 4 }
 0x141   : > { %2382 = vmatmul.mubr.bf16.gmra.mrb[20].mxu1 %v1953_v37  ;;  %v1970_v37 = vrot.slane %v8157_v46, 4 }
 0x142   : > { %2389 = vmatprep.mubr.bf16.mxu1 %v1961_v48  ;;  %v6321_v48 = vld [vmem:[%s9553_s1 + $0x48] sm:$0xff]  }
 0x143   : > { %2970 = vmatpush1.bf16.msra.mxu1 %v6321_v48  ;;  %v1971_v28 = vsel %vm1091_vm3, %v1964_v34, %v1970_v37  ;;  %v6324_v34 = vld [vmem:[%s9553_s1 + $0x58] sm:$0xff]  }
 0x144   : > { %5616 = vmatmul.mubr.bf16.gmra.mrb[52].mxu0 %v2005_v18  ;;  %v2022_v18 = vrot.slane %v7704_v7, 4  ;;  %2971 = vmatprep.subr.bf16.mxu1 %v7844_v53  ;;  %v6322_v7 = vld [vmem:[%s9553_s1 + $0x50] sm:$0xff]  }
 0x145   : > { %5619 = vmatprep.mubr.msk.bf16.mxu0 %vm6410_vm0, %v9706_v36 }
 0x146   : > { %v2029_v48 = vsel %vm1091_vm3, %v2022_v18, %v2028_v5 }
 0x147   : > { %2972 = vmatpush1.bf16.msra.mxu1 %v6322_v7  ;;  %v8212_v7 = vld [vmem:[#allocation2 + $0x138] sm:$0xff] }
 0x148   : > { %2973 = vmatprep.subr.bf16.mxu1 %v7844_v53 }
 0x149   : > { %2390 = vmatmul.mubr.bf16.gmra.mrb[24].mxu1 %v1959_v24  ;;  %v8173_v24 = vld [vmem:[#allocation2 + $0x108] sm:$0xff] }
 0x14a   : > { %2397 = vmatprep.mubr.bf16.mxu1 %v1967_v35  ;;  %v2023_v35 = vsel %vm1091_vm3, %v2016_v15, %v2022_v18  ;;  %v1976_v1 = vrot.slane %v8173_v24, 4  ;;  %v2034_v18 = vrot.slane %v7767_v30, 4  ;;  %v1988_v30 = vrot.slane %v8212_v7, 4 }
 0x14b   : > { %2974 = vmatpush1.bf16.msra.mxu1 %v6324_v34  ;;  %v8214_v34 = vld [vmem:[#allocation2 + $0x158] sm:$0xff] }
 0x14c   : > { %5620 = vmatmul.mubr.bf16.gmra.mrb[56].mxu0 %v2011_v57  ;;  %v1984_v57 = vrot.slane %v8175_v40, 4  ;;  %v1977_v15 = vsel %vm1091_vm3, %v1970_v37, %v1976_v1  ;;  %2975 = vmatprep.subr.bf16.mxu1 %v7844_v53  ;;  %v6325_v37 = vld [vmem:[%s9553_s1 + $0x60] sm:$0xff]  }
 0x14d   : > { %5623 = vmatprep.mubr.msk.bf16.mxu0 %vm6410_vm0, %v9706_v36 }
 0x14f   : > { %2976 = vmatpush1.bf16.msra.mxu1 %v6325_v37 }
 0x150   : > { %2977 = vmatprep.subr.bf16.mxu1 %v7844_v53 }
 0x151   : > { %2398 = vmatmul.mubr.bf16.gmra.mrb[28].mxu1 %v1965_v33  ;;  %v1985_v33 = vsel %vm1091_vm3, %v1978_v47, %v1984_v57 }
 0x152   : > { %2405 = vmatprep.mubr.bf16.mxu1 %v1973_v17  ;;  %v8192_v17 = vld [vmem:[#allocation2 + $0x120] sm:$0xff] }
 0x153   : > { %v1982_v0 = vrot.slane %v8192_v17, 4 }
 0x154   : > { %5624 = vmatmul.mubr.bf16.gmra.mrb[60].mxu0 %v2017_v31  ;;  %v8194_v31 = vld [vmem:[#allocation2 + $0x140] sm:$0xff] }
 0x155   : > { %5627 = vmatprep.mubr.msk.bf16.mxu0 %vm6410_vm0, %v9706_v36  ;;  %v1990_v47 = vrot.slane %v8194_v31, 4 }
 0x159   : > { %2406 = vmatmul.mubr.bf16.gmra.mrb[32].mxu1 %v1971_v28  ;;  %v6326_v28 = vld [vmem:[%s9553_s1 + $0x68] sm:$0xff]  }
 0x15a   : > { %2413 = vmatprep.mubr.bf16.mxu1 %v1979_v32  ;;  %v1983_v32 = vsel %vm1091_vm3, %v1976_v1, %v1982_v0  ;;  %2978 = vmatpush1.bf16.msra.mxu1 %v6326_v28  ;;  %v6328_v1 = vld [vmem:[%s9553_s1 + $0x70] sm:$0xff]  }
 0x15b   : > { %2979 = vmatprep.subr.bf16.mxu1 %v7844_v53  ;;  %v8232_v28 = vld [vmem:[#allocation2 + $0x150] sm:$0xff] }
 0x15c   : > { %5628 = vmatmul.mubr.bf16.gmra.mrb[64].mxu0 %v2023_v35  ;;  %v1991_v35 = vsel %vm1091_vm3, %v1984_v57, %v1990_v47  ;;  %v1996_v57 = vrot.slane %v8214_v34, 4 }
 0x15d   : > { %5631 = vmatprep.mubr.msk.bf16.mxu0 %vm6410_vm0, %v9706_v36 }
 0x15e   : > { %2980 = vmatpush1.bf16.msra.mxu1 %v6328_v1  ;;  %v1997_v37 = vsel %vm1091_vm3, %v1990_v47, %v1996_v57  ;;  %v2046_v47 = vrot.slane %v7833_v43, 4 }
 0x15f   : > { %2981 = vmatprep.subr.bf16.mxu1 %v7844_v53 }
 0x161   : > { %2414 = vmatmul.mubr.bf16.gmra.mrb[36].mxu1 %v1977_v15  ;;  %v2035_v15 = vsel %vm1091_vm3, %v2028_v5, %v2034_v18  ;;  %v2040_v5 = vrot.slane %v7795_v63, 4  ;;  %v1994_v63 = vrot.slane %v8232_v28, 4 }
 0x162   : > { %2421 = vmatprep.mubr.bf16.mxu1 %v1985_v33  ;;  %v6329_v33 = vld [vmem:[%s9553_s1 + $0x78] sm:$0xff]  }
 0x163   : > { %2982 = vmatpush1.bf16.msra.mxu1 %v6329_v33  ;;  %v8245_v33 = vld [vmem:[#allocation2 + $0x168] sm:$0xff] }
 0x164   : > { %5632 = vmatmul.mubr.bf16.gmra.mrb[68].mxu0 %v2029_v48  ;;  %v1989_v48 = vsel %vm1091_vm3, %v1982_v0, %v1988_v30  ;;  %5919 = vmatprep.subr.bf16.mxu1 %v9706_v36 }
 0x165   : > { %5635 = vmatprep.mubr.msk.bf16.mxu0 %vm6410_vm0, %v9706_v36 }
 0x169   : > { %2422 = vmatmul.mubr.bf16.gmra.mrb[40].mxu1 %v1983_v32  ;;  %v8234_v32 = vld [vmem:[#allocation2 + $0x170] sm:$0xff] }
 0x16a   : > { %2429 = vmatprep.mubr.bf16.mxu1 %v1991_v35  ;;  %v2041_v35 = vsel %vm1091_vm3, %v2034_v18, %v2040_v5  ;;  %v2002_v0 = vrot.slane %v8234_v32, 4  ;;  %v8247_v18 = vld [vmem:[#allocation2 + $0x188] sm:$0xff] }
 0x16b   : > { %v2008_v43 = vrot.slane %v8247_v18, 4 }
 0x16c   : > { %5636 = vmatmul.mubr.bf16.gmra.mrb[72].mxu0 %v2035_v15  ;;  %v1995_v15 = vsel %vm1091_vm3, %v1988_v30, %v1994_v63  ;;  %v2003_v1 = vsel %vm1091_vm3, %v1996_v57, %v2002_v0  ;;  %v2052_v30 = vrot.slane %v7889_v52, 4 }
 0x16d   : > { %5639 = vmatprep.mubr.msk.bf16.mxu0 %vm6410_vm0, %v9706_v36  ;;  %v2009_v57 = vsel %vm1091_vm3, %v2002_v0, %v2008_v43 }
 0x171   : > { %2430 = vmatmul.mubr.bf16.gmra.mrb[44].mxu1 %v1989_v48  ;;  %v2047_v48 = vsel %vm1091_vm3, %v2040_v5, %v2046_v47  ;;  %v2053_v5 = vsel %vm1091_vm3, %v2046_v47, %v2052_v30 }
 0x172   : > { %2437 = vmatprep.mubr.bf16.mxu1 %v1997_v37  ;;  %v2000_v37 = vrot.slane %v8245_v33, 4 }
 0x174   : > { %5640 = vmatmul.mubr.bf16.gmra.mrb[76].mxu0 %v2041_v35  ;;  %v2001_v35 = vsel %vm1091_vm3, %v1994_v63, %v2000_v37  ;;  %v2058_v63 = vrot.slane %v7946_v62, 4  ;;  %v2020_v62 = vrot.slane %v8271_v20, 4 }
 0x175   : > { %5643 = vmatprep.mubr.msk.bf16.mxu0 %vm6410_vm0, %v9706_v36 }
 0x176   : > { %v2059_v47 = vsel %vm1091_vm3, %v2052_v30, %v2058_v63 }
 0x179   : > { %2438 = vmatmul.mubr.bf16.gmra.mrb[48].mxu1 %v1995_v15  ;;  %v8257_v15 = vld [vmem:[#allocation2 + $0x180] sm:$0xff] }
 0x17a   : > { %2445 = vmatprep.mubr.bf16.mxu1 %v2003_v1  ;;  %v8259_v1 = vld [vmem:[#allocation2 + $0x1a0] sm:$0xff] }
 0x17b   : > { %v2014_v52 = vrot.slane %v8259_v1, 4 }
 0x17c   : > { %5644 = vmatmul.mubr.bf16.gmra.mrb[80].mxu0 %v2047_v48  ;;  %v2006_v48 = vrot.slane %v8257_v15, 4 }
 0x17d   : > { %5647 = vmatprep.mubr.msk.bf16.mxu0 %vm6410_vm0, %v9706_v36  ;;  %v2015_v0 = vsel %vm1091_vm3, %v2008_v43, %v2014_v52  ;;  %v2021_v43 = vsel %vm1091_vm3, %v2014_v52, %v2020_v62 }
 0x181   : > { %2446 = vmatmul.mubr.bf16.gmra.mrb[52].mxu1 %v2001_v35  ;;  %v2007_v35 = vsel %vm1091_vm3, %v2000_v37, %v2006_v48  ;;  %v2064_v37 = vrot.slane %v7993_v58, 4  ;;  %v2026_v58 = vrot.slane %v8283_v45, 4 }
 0x182   : > { %2453 = vmatprep.mubr.bf16.mxu1 %v2009_v57  ;;  %v8269_v57 = vld [vmem:[#allocation2 + $0x198] sm:$0xff] }
 0x183   : > { %v2065_v30 = vsel %vm1091_vm3, %v2058_v63, %v2064_v37  ;;  %v2027_v52 = vsel %vm1091_vm3, %v2020_v62, %v2026_v58  ;;  %v2076_v62 = vrot.slane %v8098_v29, 4 }
 0x184   : > { %5648 = vmatmul.mubr.bf16.gmra.mrb[84].mxu0 %v2053_v5  ;;  %v2012_v5 = vrot.slane %v8269_v57, 4 }
 0x185   : > { %5651 = vmatprep.mubr.msk.bf16.mxu0 %vm6410_vm0, %v9706_v36 }
 0x189   : > { %2454 = vmatmul.mubr.bf16.gmra.mrb[56].mxu1 %v2007_v35  ;;  %v2013_v35 = vsel %vm1091_vm3, %v2006_v48, %v2012_v5  ;;  %v2070_v48 = vrot.slane %v8095_v42, 4  ;;  %v2032_v42 = vrot.slane %v8295_v4, 4 }
 0x18a   : > { %2461 = vmatprep.mubr.bf16.mxu1 %v2015_v0  ;;  %v8281_v0 = vld [vmem:[#allocation2 + $0x1b0] sm:$0xff] }
 0x18c   : > { %5652 = vmatmul.mubr.bf16.gmra.mrb[88].mxu0 %v2059_v47  ;;  %v2018_v47 = vrot.slane %v8281_v0, 4 }
 0x18d   : > { %5655 = vmatprep.mubr.msk.bf16.mxu0 %vm6410_vm0, %v9706_v36  ;;  %v8297_v63 = vpop.f32.mrb[0].mxu0 }
 0x18e   : > { %v5565_v54 = vpop.f32.mrb[1].mxu0 }
 0x18f   : > { %v8301_v11 = vpop.f32.mrb[2].mxu0  ;;  %v2077_v54 = vsel %vm1091_vm3, %v2070_v48, %v2076_v62 }
 0x191   : > { %2462 = vmatmul.mubr.bf16.gmra.mrb[60].mxu1 %v2013_v35  ;;  %v2019_v35 = vsel %vm1091_vm3, %v2012_v5, %v2018_v47  ;;  %v5566_v5 = vpop.f32.mrb[3].mxu0 }
 0x192   : > { %2469 = vmatprep.mubr.bf16.mxu1 %v2021_v43  ;;  %v8293_v43 = vld [vmem:[#allocation2 + $0x1c8] sm:$0xff]  ;;  %v2082_v5 = vrot.slane %v1785_v60, 4  ;;  %v2044_v60 = vrot.slane %v7807_v38, 4  ;;  %v2050_v38 = vrot.slane %v7849_v27, 4  ;;  %v6320_v27 = vld [vmem:[%s9553_s1 + $0x190] sm:$0xff]  }
 0x193   : > { %v2024_v13 = vrot.slane %v8293_v43, 4 }
 0x194   : > { %5656 = vmatmul.mubr.bf16.gmra.mrb[92].mxu0 %v2065_v30  ;;  %v2071_v30 = vsel %vm1091_vm3, %v2064_v37, %v2070_v48  ;;  %v8309_v37 = vld [vmem:[#allocation2 + $0x1e0] sm:$0xff] }
 0x195   : > { %5659 = vmatprep.mubr.msk.bf16.mxu0 %vm6410_vm0, %v9706_v36  ;;  %v2030_v61 = vrot.slane %v8309_v37, 4 }
 0x199   : > { %2470 = vmatmul.mubr.bf16.gmra.mrb[64].mxu1 %v2019_v35  ;;  %v2025_v35 = vsel %vm1091_vm3, %v2018_v47, %v2024_v13 }
 0x19a   : > { %2477 = vmatprep.mubr.bf16.mxu1 %v2027_v52  ;;  %v2033_v52 = vsel %vm1091_vm3, %v2026_v58, %v2032_v42  ;;  %v2038_v58 = vrot.slane %v7770_v6, 4 }
 0x19c   : > { %5660 = vmatmul.mubr.bf16.gmra.mrb[96].mxu0 %v2071_v30  ;;  %v8312_v30 = vpop.f32.mrb[4].mxu0  ;;  %v2039_v48 = vsel %vm1091_vm3, %v2032_v42, %v2038_v58  ;;  %v6316_v42 = vld [vmem:[%s9553_s1 + $0x180] sm:$0xff]  }
 0x19d   : > { %5663 = vmatprep.mubr.msk.bf16.mxu0 %vm6410_vm0, %v9706_v36  ;;  %v5569_v19 = vpop.f32.mrb[5].mxu0 }
 0x19e   : > { %v8317_v29 = vpop.f32.mrb[6].mxu0 }
 0x19f   : > { %v5570_v47 = vpop.f32.mrb[7].mxu0 }
 0x1a1   : > { %2478 = vmatmul.mubr.bf16.gmra.mrb[68].mxu1 %v2025_v35  ;;  %v2031_v35 = vsel %vm1091_vm3, %v2024_v13, %v2030_v61 }
 0x1a2   : > { %2485 = vmatprep.mubr.bf16.mxu1 %v2033_v52  ;;  %v8322_v52 = vld [vmem:[#allocation2 + $0x1f8] sm:$0xff] }
 0x1a3   : > { %9810 = vst [vmem:[#allocation19_spill] sm:$0xff] %v8322_v52  ;;  %v2036_v19 = vrot.slane %v8322_v52, 4 }
 0x1a4   : > { %5664 = vmatmul.mubr.bf16.gmra.mrb[100].mxu0 %v2077_v54  ;;  %v2083_v54 = vsel %vm1091_vm3, %v2076_v62, %v2082_v5  ;;  %v2045_v62 = vsel %vm1091_vm3, %v2038_v58, %v2044_v60 }
 0x1a5   : > { %5667 = vmatprep.mubr.msk.bf16.mxu0 %vm6410_vm0, %v9706_v36  ;;  %v8329_v47 = vpop.f32.mrb[8].mxu0  ;;  %v2037_v13 = vsel %vm1091_vm3, %v2030_v61, %v2036_v19  ;;  %v6318_v61 = vld [vmem:[%s9553_s1 + $0x188] sm:$0xff]  }
 0x1a6   : > { %v5573_v6 = vpop.f32.mrb[9].mxu0 }
 0x1a7   : > { %v2051_v6 = vsel %vm1091_vm3, %v2044_v60, %v2050_v38  ;;  %v2056_v60 = vrot.slane %v7920_v49, 4 }
 0x1a9   : > { %2486 = vmatmul.mubr.bf16.gmra.mrb[72].mxu1 %v2031_v35  ;;  %v8332_v35 = vpop.f32.mrb[10].mxu0 }
 0x1aa   : > { %2493 = vmatprep.mubr.bf16.mxu1 %v2039_v48  ;;  %v5574_v5 = vpop.f32.mrb[11].mxu0  ;;  %v2042_v48 = vrot.slane %v7826_v59, 4  ;;  %v1653_v59 = vld [vmem:[#allocation2 + $0x28] sm:$0xff] }
 0x1ab   : > { %v6323_v5 = vld [vmem:[%s9553_s1 + $0x198] sm:$0xff]  }
 0x1ac   : > { %5668 = vmatmul.mubr.bf16.gmra.mrb[104].mxu0 %v2083_v54  ;;  %v2043_v58 = vsel %vm1091_vm3, %v2036_v19, %v2042_v48  ;;  %v2048_v19 = vrot.slane %v7882_v25, 4  ;;  %v6327_v25 = vld [vmem:[%s9553_s1 + $0x1a0] sm:$0xff]  }
 0x1ad   : > { %5687 = vmatprep.mubr.msk.bf16.mxu0 %vm6410_vm0, %v9706_v36 }
 0x1b1   : > { %2494 = vmatmul.mubr.bf16.gmra.mrb[76].mxu1 %v2037_v13  ;;  %v8348_v54 = vpop.f32.mrb[12].mxu0 }
 0x1b2   : > { %2501 = vmatprep.mubr.bf16.mxu1 %v2045_v62  ;;  %v5577_v13 = vpop.f32.mrb[13].mxu0 }
 0x1b4   : > { %5688 = vmatmul.mubr.bf16.vlgmr.msra.gmra.mrb[108].mxu0 %v7844_v53 }
 0x1b5   : > { %3724 = vmatpush1.bf16.msra.mxu0 %v6316_v42  ;;  %5691 = vmatprep.mubr.msk.bf16.mxu0 %vm6410_vm0, %v9706_v36  ;;  %v8354_v42 = vpop.f32.mrb[14].mxu0 }
 0x1b6   : > { %3725 = vmatprep.subr.bf16.mxu0 %v7844_v53  ;;  %v5578_v62 = vpop.f32.mrb[15].mxu0 }
 0x1b7   : > { %v6330_v62 = vld [vmem:[%s9553_s1 + $0x1a8] sm:$0xff]  }
 0x1b9   : > { %2502 = vmatmul.mubr.bf16.gmra.mrb[80].mxu1 %v2043_v58  ;;  %3726 = vmatpush1.bf16.msra.mxu0 %v6318_v61  ;;  %v2049_v61 = vsel %vm1091_vm3, %v2042_v48, %v2048_v19  ;;  %v2057_v58 = vsel %vm1091_vm3, %v2050_v38, %v2056_v60  ;;  %v2054_v48 = vrot.slane %v7934_v56, 4  ;;  %v2062_v38 = vrot.slane %v7963_v44, 4  ;;  %v6331_v56 = vld [vmem:[%s9553_s1 + $0x1b0] sm:$0xff]   ;;  %v6356_v44 = vld [vmem:[#allocation2 + $0x58] sm:$0xff] }
 0x1ba   : > { %2509 = vmatprep.mubr.bf16.mxu1 %v2051_v6  ;;  %3727 = vmatprep.subr.bf16.mxu0 %v7844_v53  ;;  %v8367_v6 = vpop.f32.mrb[16].mxu0 }
 0x1bb   : > { %v5581_v49 = vpop.f32.mrb[17].mxu0 }
 0x1bc   : > { %5692 = vmatmul.mubr.bf16.gmra.mrb[112].mxu0 %v1653_v59  ;;  %v8373_v13 = vpop.f32.mrb[18].mxu0  ;;  %v6332_v49 = vld [vmem:[%s9553_s1 + $0x1b8] sm:$0xff]  }
 0x1bd   : > { %5695 = vmatprep.mubr.msk.bf16.mxu0 %vm6410_vm0, %v9706_v36  ;;  %3728 = vmatpush1.bf16.msra.mxu0 %v6320_v27  ;;  %v6355_v27 = vld [vmem:[#allocation2 + $0x40] sm:$0xff]  ;;  %v5582_v59 = vpop.f32.mrb[19].mxu0 }
 0x1be   : > { %3729 = vmatprep.subr.bf16.mxu0 %v7844_v53 }
 0x1c1   : > { %2510 = vmatmul.mubr.bf16.gmra.mrb[84].mxu1 %v2049_v61  ;;  %3730 = vmatpush1.bf16.msra.mxu0 %v6323_v5  ;;  %v2055_v5 = vsel %vm1091_vm3, %v2048_v19, %v2054_v48  ;;  %v2063_v61 = vsel %vm1091_vm3, %v2056_v60, %v2062_v38  ;;  %v2068_v19 = vrot.slane %v8070_v2, 4  ;;  %v6333_v2 = vld [vmem:[%s9553_s1 + $0x1c0] sm:$0xff]  }
 0x1c2   : > { %2517 = vmatprep.mubr.bf16.mxu1 %v2057_v58  ;;  %3731 = vmatprep.subr.bf16.mxu0 %v7844_v53  ;;  %v2060_v58 = vrot.slane %v7977_v39, 4 }
 0x1c4   : > { %5696 = vmatmul.mubr.bf16.gmra.mrb[116].mxu0 %v6355_v27  ;;  %v2061_v39 = vsel %vm1091_vm3, %v2054_v48, %v2060_v58  ;;  %v2074_v48 = vrot.slane %v8073_v12, 4  ;;  %v6336_v12 = vld [vmem:[%s9553_s1 + $0x1d0] sm:$0xff]  }
 0x1c5   : > { %5699 = vmatprep.mubr.msk.bf16.mxu0 %vm6410_vm0, %v9706_v36  ;;  %3732 = vmatpush1.bf16.msra.mxu0 %v6327_v25  ;;  %v8390_v25 = vpop.f32.mrb[20].mxu0 }
 0x1c6   : > { %3733 = vmatprep.subr.bf16.mxu0 %v7844_v53  ;;  %v5585_v60 = vpop.f32.mrb[21].mxu0 }
 0x1c7   : > { %v8398_v27 = vpop.f32.mrb[22].mxu0 }
 0x1c8   : > { %v5586_v59 = vpop.f32.mrb[23].mxu0 }
 0x1c9   : > { %2518 = vmatmul.mubr.bf16.gmra.mrb[88].mxu1 %v2055_v5  ;;  %3734 = vmatpush1.bf16.msra.mxu0 %v6330_v62  ;;  %v2069_v62 = vsel %vm1091_vm3, %v2062_v38, %v2068_v19  ;;  %v6357_v5 = vld [vmem:[#allocation2 + $0x70] sm:$0xff]  ;;  %v6334_v38 = vld [vmem:[%s9553_s1 + $0x1c8] sm:$0xff]  }
 0x1ca   : > { %2525 = vmatprep.mubr.bf16.mxu1 %v2063_v61  ;;  %3735 = vmatprep.subr.bf16.mxu0 %v7844_v53  ;;  %v2066_v61 = vrot.slane %v8086_v55, 4  ;;  %v2075_v55 = vsel %vm1091_vm3, %v2068_v19, %v2074_v48  ;;  %v6337_v19 = vld [vmem:[%s9553_s1 + $0x1d8] sm:$0xff]  }
 0x1cc   : > { %5700 = vmatmul.mubr.bf16.gmra.mrb[120].mxu0 %v6356_v44  ;;  %v2067_v60 = vsel %vm1091_vm3, %v2060_v58, %v2066_v61 }
 0x1cd   : > { %5703 = vmatprep.mubr.msk.bf16.mxu0 %vm6410_vm0, %v9706_v36  ;;  %3736 = vmatpush1.bf16.msra.mxu0 %v6331_v56 }
 0x1ce   : > { %3737 = vmatprep.subr.bf16.mxu0 %v7844_v53 }
 0x1d1   : > { %2526 = vmatmul.mubr.bf16.gmra.mrb[92].mxu1 %v2061_v39  ;;  %3738 = vmatpush1.bf16.msra.mxu0 %v6332_v49  ;;  %v8414_v56 = vpop.f32.mrb[24].mxu0  ;;  %v1784_v39 = vld [vmem:[#allocation2 + $0x2a8] sm:$0xf] }
 0x1d2   : > { %2533 = vmatprep.mubr.bf16.mxu1 %v2069_v62  ;;  %3739 = vmatprep.subr.bf16.mxu0 %v7844_v53  ;;  %v5589_v44 = vpop.f32.mrb[25].mxu0  ;;  %v6358_v62 = vld [vmem:[#allocation2 + $0x88] sm:$0xff]  ;;  %v2080_v58 = vrot.slane %v1784_v39, 4  ;;  %v6359_v39 = vld [vmem:[#allocation2] sm:$0xff] }
 0x1d3   : > { %v8418_v49 = vpop.f32.mrb[26].mxu0 }
 0x1d4   : > { %5704 = vmatmul.mubr.bf16.gmra.mrb[124].mxu0 %v6357_v5  ;;  %v5590_v59 = vpop.f32.mrb[27].mxu0 }
 0x1d5   : > { %5707 = vmatprep.mubr.msk.bf16.mxu0 %vm6410_vm0, %v9706_v36  ;;  %3740 = vmatpush1.bf16.msra.mxu0 %v6333_v2  ;;  %v2072_v2 = vrot.slane %v8089_v26, 4  ;;  %v6339_v59 = vld [vmem:[%s9553_s1 + $0x1e0] sm:$0xff]  }
 0x1d6   : > { %3741 = vmatprep.subr.bf16.mxu0 %v7844_v53 }
 0x1d9   : > { %2534 = vmatmul.mubr.bf16.gmra.mrb[96].mxu1 %v2067_v60  ;;  %3742 = vmatpush1.bf16.msra.mxu0 %v6334_v38  ;;  %v2073_v38 = vsel %vm1091_vm3, %v2066_v61, %v2072_v2  ;;  %v2081_v60 = vsel %vm1091_vm3, %v2074_v48, %v2080_v58  ;;  %v6340_v61 = vld [vmem:[%s9553_s1 + $0x1e8] sm:$0xff]   ;;  %v6361_v58 = vld [vmem:[#allocation2 + $0xb8] sm:$0xff] }
 0x1da   : > { %2541 = vmatprep.mubr.bf16.mxu1 %v2075_v55  ;;  %3743 = vmatprep.subr.bf16.mxu0 %v7844_v53  ;;  %v1783_v55 = vld [vmem:[#allocation2 + $0x2a0] sm:$0xf] }
 0x1dc   : > { %5708 = vmatmul.mubr.bf16.gmra.mrb[128].mxu0 %v6358_v62  ;;  %v2078_v62 = vrot.slane %v1783_v55, 4 }
 0x1dd   : > { %5711 = vmatprep.mubr.msk.bf16.mxu0 %vm6410_vm0, %v9706_v36  ;;  %3744 = vmatpush1.bf16.msra.mxu0 %v6336_v12 }
 0x1de   : > { %3745 = vmatprep.subr.bf16.mxu0 %v7844_v53  ;;  %v8432_v5 = vpop.f32.mrb[28].mxu0  ;;  %v6360_v53 = vld [vmem:[#allocation2 + $0xa0] sm:$0xff]  ;;  %v2079_v48 = vsel %vm1091_vm3, %v2072_v2, %v2078_v62 }
 0x1df   : > { %v5593_v44 = vpop.f32.mrb[29].mxu0  ;;  %v8459_v2 = vld [vmem:[%s9553_s1 + $0x200] sm:$0xff]  }
 0x1e0   : > { %v8436_v26 = vpop.f32.mrb[30].mxu0 }
 0x1e1   : > { %2542 = vmatmul.mubr.bf16.gmra.mrb[100].mxu1 %v2073_v38  ;;  %3746 = vmatpush1.bf16.msra.mxu0 %v6337_v19  ;;  %v5594_v12 = vpop.f32.mrb[31].mxu0 }
 0x1e2   : > { %2549 = vmatprep.mubr.bf16.mxu1 %v2081_v60  ;;  %3747 = vmatprep.subr.bf16.mxu0 %v6359_v39 }
 0x1e4   : > { %5712 = vmatmul.mubr.bf16.gmra.mrb[132].mxu0 %v6360_v53 }
 0x1e5   : > { %5715 = vmatprep.mubr.msk.bf16.mxu0 %vm6410_vm0, %v9706_v36  ;;  %3748 = vmatpush1.bf16.msra.mxu0 %v6339_v59 }
 0x1e6   : > { %3749 = vmatprep.subr.bf16.mxu0 %v6359_v39 }
 0x1e9   : > { %2550 = vmatmul.mubr.bf16.gmra.mrb[104].mxu1 %v2079_v48  ;;  %3750 = vmatpush1.bf16.msra.mxu0 %v6340_v61  ;;  %v2343_v19 = vpop.f32.mrb[0].mxu1  ;;  %v1652_v48 = vld [vmem:[#allocation2 + $0x20] sm:$0xff] }
 0x1ea   : > { %2983 = vmatprep.mubr.bf16.mxu1 %v6359_v39  ;;  %3751 = vmatprep.subr.bf16.mxu0 %v6359_v39  ;;  %v2345_v44 = vpop.f32.mrb[1].mxu1  ;;  %v8452_v55 = vadd.f32 %v8297_v63, %v2343_v19  ;;  %v6342_v63 = vld [vmem:[%s9553_s1 + $0x1f0] sm:$0xff]  }
 0x1eb   : > { %v2346_v59 = vpop.f32.mrb[2].mxu1  ;;  %v6362_v19 = vld [vmem:[#allocation2 + $0xd0] sm:$0xff] }
 0x1ec   : > { %5716 = vmatmul.mubr.bf16.gmra.mrb[136].mxu0 %v6361_v58  ;;  %v8447_v38 = vpop.f32.mrb[32].mxu0  ;;  %9811 = vst [vmem:[#allocation16_spill] sm:$0xff] %v8452_v55  ;;  %v2348_v53 = vpop.f32.mrb[3].mxu1  ;;  %v8462_v61 = vadd.f32 %v8301_v11, %v2346_v59  ;;  %v8471_v58 = vld [vmem:[%s9553_s1 + $0x208] sm:$0xff]   ;;  %v6371_v55 = vld [vmem:[#allocation2 + $0x60] sm:$0xff] }
 0x1ed   : > { %v5597_v60 = vpop.f32.mrb[33].mxu0  ;;  %5719 = vmatprep.mubr.msk.bf16.mxu0 %vm6410_vm0, %v9706_v36  ;;  %3752 = vmatpush1.bf16.msra.mxu0 %v6342_v63  ;;  %v8483_v53 = vld [vmem:[%s9553_s1 + $0x210] sm:$0xff]  }
 0x1ee   : > { %v8454_v12 = vpop.f32.mrb[34].mxu0  ;;  %9812 = vst [vmem:[#allocation59_spill] sm:$0xff] %v8462_v61  ;;  %3753 = vmatprep.subr.bf16.mxu0 %v6359_v39 }
 0x1ef   : > { %v5598_v62 = vpop.f32.mrb[35].mxu0 }
 0x1f1   : > { %2984 = vmatmul.mubr.bf16.vlgmr.msra.gmra.mrb[108].mxu1 %v6359_v39 }
 0x1f2   : > { %2991 = vmatprep.mubr.bf16.mxu1 %v1652_v48  ;;  %5927 = vmatpush3.bf16.msra.mxu1 %v8459_v2  ;;  %v2351_v11 = vpop.f32.mrb[4].mxu1 }
 0x1f3   : > { %5920 = vmatprep.subr.bf16.mxu1 %v9706_v36  ;;  %v2353_v44 = vpop.f32.mrb[5].mxu1  ;;  %v8477_v60 = vadd.f32 %v8312_v30, %v2351_v11 }
 0x1f4   : > { %5720 = vmatmul.mubr.bf16.gmra.mrb[140].mxu0 %v6362_v19  ;;  %v2354_v59 = vpop.f32.mrb[6].mxu1  ;;  %v1651_v19 = vld [vmem:[#allocation2 + $0x18] sm:$0xff] }
 0x1f5   : > { %5723 = vmatprep.mubr.msk.bf16.mxu0 %vm6410_vm0, %v9706_v36  ;;  %9813 = vst [vmem:[#allocation60_spill] sm:$0xff] %v8477_v60  ;;  %v2356_v48 = vpop.f32.mrb[7].mxu1  ;;  %v8489_v39 = vadd.f32 %v8317_v29, %v2354_v59  ;;  %v6363_v44 = vld [vmem:[#allocation2 + $0x38] sm:$0xff] }
 0x1f6   : > { %5928 = vmatpush3.bf16.msra.mxu1 %v8471_v58 }
 0x1f7   : > { %v8485_v62 = vpop.f32.mrb[36].mxu0  ;;  %5921 = vmatprep.subr.bf16.mxu1 %v9706_v36  ;;  %9814 = vst [vmem:[#allocation61_spill] sm:$0xff] %v8489_v39 }
 0x1f8   : > { %v5601_v63 = vpop.f32.mrb[37].mxu0 }
 0x1f9   : > { %v8491_v30 = vpop.f32.mrb[38].mxu0  ;;  %2992 = vmatmul.mubr.bf16.gmra.mrb[112].mxu1 %v1651_v19 }
 0x1fa   : > { %v5602_v11 = vpop.f32.mrb[39].mxu0  ;;  %2999 = vmatprep.mubr.bf16.mxu1 %v6363_v44  ;;  %5929 = vmatpush3.bf16.msra.mxu1 %v8483_v53 }
 0x1fb   : > { %5922 = vmatprep.subr.bf16.mxu1 %v9706_v36  ;;  %v6343_v11 = vld [vmem:[%s9553_s1 + $0x1f8] sm:$0xff]  }
 0x1fc   : > { %5724 = vmatmul.mubr.bf16.gmra.mrb[144].mxu0 %v6364_v10  ;;  %v2359_v48 = vpop.f32.mrb[8].mxu1 }
 0x1fd   : > { %v2361_v60 = vpop.f32.mrb[9].mxu1  ;;  %5727 = vmatprep.mubr.msk.bf16.mxu0 %vm6410_vm0, %v9706_v36  ;;  %v8498_v29 = vadd.f32 %v8329_v47, %v2359_v48  ;;  %3754 = vmatpush1.bf16.msra.mxu0 %v6343_v11  ;;  %v6366_v47 = vld [vmem:[#allocation2 + $0x50] sm:$0xff]  ;;  %v6367_v48 = vld [vmem:[#allocation2 + $0x100] sm:$0xff] }
 0x1fe   : > { %v2362_v59 = vpop.f32.mrb[10].mxu1  ;;  %v6365_v60 = vld [vmem:[#allocation2 + $0x30] sm:$0xff]  ;;  %5795 = vmatprep.subr.bf16.mxu0 %v9706_v36 }
 0x1ff   : > { %9815 = vst [vmem:[#allocation62_spill] sm:$0xff] %v8498_v29  ;;  %v8500_v63 = vpop.f32.mrb[40].mxu0  ;;  %v2364_v19 = vpop.f32.mrb[11].mxu1  ;;  %v8506_v44 = vadd.f32 %v8332_v35, %v2362_v59 }
 0x200   : > { %v5605_v10 = vpop.f32.mrb[41].mxu0 }
 0x201   : > { %9816 = vst [vmem:[#allocation63_spill] sm:$0xff] %v8506_v44  ;;  %v8508_v39 = vpop.f32.mrb[42].mxu0  ;;  %3000 = vmatmul.mubr.bf16.gmra.mrb[116].mxu1 %v6365_v60 }
 0x202   : > { %v5606_v61 = vpop.f32.mrb[43].mxu0  ;;  %3007 = vmatprep.mubr.bf16.mxu1 %v6366_v47 }
 0x203   : > { %v8521_v61 = vld [vmem:[%s9553_s1 + $0x218] sm:$0xff]  }
 0x204   : > { %5728 = vmatmul.mubr.bf16.gmra.mrb[148].mxu0 %v6367_v48  ;;  %v2367_v19 = vpop.f32.mrb[12].mxu1  ;;  %9818 = vst [vmem:[#allocation65_spill] sm:$0xff] %v8521_v61  ;;  %v6368_v48 = vld [vmem:[#allocation2 + $0x48] sm:$0xff]  ;;  %5930 = vmatpush3.bf16.msra.mxu1 %v8521_v61  ;;  %v6373_v61 = vld [vmem:[#allocation2 + $0x130] sm:$0xff] }
 0x205   : > { %v2369_v29 = vpop.f32.mrb[13].mxu1  ;;  %5731 = vmatprep.mubr.msk.bf16.mxu0 %vm6410_vm0, %v9706_v36  ;;  %v8514_v35 = vadd.f32 %v8348_v54, %v2367_v19  ;;  %v6369_v54 = vld [vmem:[#allocation2 + $0x68] sm:$0xff]  ;;  %5923 = vmatprep.subr.bf16.mxu1 %v9706_v36  ;;  %v6370_v19 = vld [vmem:[#allocation2 + $0x118] sm:$0xff] }
 0x206   : > { %v2370_v59 = vpop.f32.mrb[14].mxu1 }
 0x207   : > { %9817 = vst [vmem:[#allocation64_spill] sm:$0xff] %v8514_v35  ;;  %v8516_v10 = vpop.f32.mrb[44].mxu0  ;;  %v2372_v60 = vpop.f32.mrb[15].mxu1  ;;  %v8524_v11 = vadd.f32 %v8354_v42, %v2370_v59 }
 0x208   : > { %v5609_v47 = vpop.f32.mrb[45].mxu0 }
 0x209   : > { %9819 = vst [vmem:[#allocation66_spill] sm:$0xff] %v8524_v11  ;;  %v8526_v29 = vpop.f32.mrb[46].mxu0  ;;  %3008 = vmatmul.mubr.bf16.gmra.mrb[120].mxu1 %v6368_v48 }
 0x20a   : > { %v5610_v44 = vpop.f32.mrb[47].mxu0  ;;  %3015 = vmatprep.mubr.bf16.mxu1 %v6369_v54 }
 0x20c   : > { %5732 = vmatmul.mubr.bf16.gmra.mrb[152].mxu0 %v6370_v19  ;;  %v2375_v60 = vpop.f32.mrb[16].mxu1 }
 0x20d   : > { %v2377_v35 = vpop.f32.mrb[17].mxu1  ;;  %5735 = vmatprep.mubr.msk.bf16.mxu0 %vm6410_vm0, %v9706_v36  ;;  %v8533_v42 = vadd.f32 %v8367_v6, %v2375_v60 }
 0x20e   : > { %v2378_v59 = vpop.f32.mrb[18].mxu1  ;;  %v6372_v35 = vld [vmem:[#allocation2 + $0x80] sm:$0xff] }
 0x20f   : > { %9820 = vst [vmem:[#allocation67_spill] sm:$0xff] %v8533_v42  ;;  %v8535_v47 = vpop.f32.mrb[48].mxu0  ;;  %v2380_v44 = vpop.f32.mrb[19].mxu1  ;;  %v8538_v48 = vadd.f32 %v8373_v13, %v2378_v59 }
 0x210   : > { %v5613_v54 = vpop.f32.mrb[49].mxu0 }
 0x211   : > { %9821 = vst [vmem:[#allocation68_spill] sm:$0xff] %v8538_v48  ;;  %v8540_v11 = vpop.f32.mrb[50].mxu0  ;;  %3016 = vmatmul.mubr.bf16.gmra.mrb[124].mxu1 %v6371_v55  ;;  %v6376_v48 = vld [vmem:[#allocation2 + $0x148] sm:$0xff] }
 0x212   : > { %v5614_v19 = vpop.f32.mrb[51].mxu0  ;;  %3023 = vmatprep.mubr.bf16.mxu1 %v6372_v35  ;;  %v6374_v35 = vld [vmem:[#allocation2 + $0x78] sm:$0xff] }
 0x214   : > { %5736 = vmatmul.mubr.bf16.gmra.mrb[156].mxu0 %v6373_v61  ;;  %v2383_v52 = vpop.f32.mrb[20].mxu1 }
 0x215   : > { %v2385_v6 = vpop.f32.mrb[21].mxu1  ;;  %5739 = vmatprep.mubr.msk.bf16.mxu0 %vm6410_vm0, %v9706_v36  ;;  %v8545_v60 = vadd.f32 %v8390_v25, %v2383_v52 }
 0x216   : > { %v2386_v13 = vpop.f32.mrb[22].mxu1  ;;  %v6375_v6 = vld [vmem:[#allocation2 + $0x98] sm:$0xff] }
 0x217   : > { %v8547_v59 = vpop.f32.mrb[52].mxu0  ;;  %v2388_v44 = vpop.f32.mrb[23].mxu1  ;;  %v8550_v54 = vadd.f32 %v8398_v27, %v2386_v13 }
 0x218   : > { %v5617_v55 = vpop.f32.mrb[53].mxu0 }
 0x219   : > { %v8552_v19 = vpop.f32.mrb[54].mxu0  ;;  %3024 = vmatmul.mubr.bf16.gmra.mrb[128].mxu1 %v6374_v35 }
 0x21a   : > { %v5618_v61 = vpop.f32.mrb[55].mxu0  ;;  %3031 = vmatprep.mubr.bf16.mxu1 %v6375_v6 }
 0x21c   : > { %5740 = vmatmul.mubr.bf16.gmra.mrb[160].mxu0 %v6376_v48  ;;  %v2391_v42 = vpop.f32.mrb[24].mxu1 }
 0x21d   : > { %v2393_v52 = vpop.f32.mrb[25].mxu1  ;;  %5743 = vmatprep.mubr.msk.bf16.mxu0 %vm6410_vm0, %v9706_v36  ;;  %v8557_v25 = vadd.f32 %v8414_v56, %v2391_v42  ;;  %v8572_v56 = vld [vmem:[%s9553_s1 + $0x220] sm:$0xff]  }
 0x21e   : > { %v2394_v27 = vpop.f32.mrb[26].mxu1  ;;  %5931 = vmatpush3.bf16.msra.mxu1 %v8572_v56 }
 0x21f   : > { %v8559_v13 = vpop.f32.mrb[56].mxu0  ;;  %v2396_v44 = vpop.f32.mrb[27].mxu1  ;;  %v8562_v55 = vadd.f32 %v8418_v49, %v2394_v27  ;;  %5924 = vmatprep.subr.bf16.mxu1 %v9706_v36 }
 0x220   : > { %v5621_v35 = vpop.f32.mrb[57].mxu0 }
 0x221   : > { %v8564_v61 = vpop.f32.mrb[58].mxu0  ;;  %3032 = vmatmul.mubr.bf16.gmra.mrb[132].mxu1 %v8058_v23 }
 0x222   : > { %v5622_v48 = vpop.f32.mrb[59].mxu0  ;;  %3039 = vmatprep.mubr.bf16.mxu1 %v8066_v14 }
 0x224   : > { %5744 = vmatmul.mubr.bf16.gmra.mrb[164].mxu0 %v8078_v3  ;;  %v2399_v6 = vpop.f32.mrb[28].mxu1 }
 0x225   : > { %v2401_v42 = vpop.f32.mrb[29].mxu1  ;;  %5747 = vmatprep.mubr.msk.bf16.mxu0 %vm6410_vm0, %v9706_v36  ;;  %v8577_v49 = vadd.f32 %v8432_v5, %v2399_v6 }
 0x226   : > { %v2402_v52 = vpop.f32.mrb[30].mxu1 }
 0x227   : > { %v8580_v23 = vpop.f32.mrb[60].mxu0  ;;  %v2404_v14 = vpop.f32.mrb[31].mxu1  ;;  %v8584_v3 = vadd.f32 %v8436_v26, %v2402_v52 }
 0x228   : > { %v5625_v27 = vpop.f32.mrb[61].mxu0 }
 0x229   : > { %v8586_v44 = vpop.f32.mrb[62].mxu0  ;;  %3040 = vmatmul.mubr.bf16.gmra.mrb[136].mxu1 %v8109_v9 }
 0x22a   : > { %v5626_v35 = vpop.f32.mrb[63].mxu0  ;;  %3047 = vmatprep.mubr.bf16.mxu1 %v8111_v50 }
 0x22c   : > { %5748 = vmatmul.mubr.bf16.gmra.mrb[168].mxu0 %v8117_v22  ;;  %v2407_v5 = vpop.f32.mrb[32].mxu1  ;;  %v6377_v22 = vld [vmem:[#allocation2 + $0x190] sm:$0xff] }
 0x22d   : > { %v2409_v48 = vpop.f32.mrb[33].mxu1  ;;  %5751 = vmatprep.mubr.msk.bf16.mxu0 %vm6410_vm0, %v9706_v36  ;;  %v8594_v6 = vadd.f32 %v8447_v38, %v2407_v5 }
 0x22e   : > { %v2410_v26 = vpop.f32.mrb[34].mxu1 }
 0x22f   : > { %v8596_v42 = vpop.f32.mrb[64].mxu0  ;;  %v2412_v52 = vpop.f32.mrb[35].mxu1  ;;  %v8599_v14 = vadd.f32 %v8454_v12, %v2410_v26 }
 0x230   : > { %v5629_v9 = vpop.f32.mrb[65].mxu0 }
 0x231   : > { %v8601_v27 = vpop.f32.mrb[66].mxu0  ;;  %3048 = vmatmul.mubr.bf16.gmra.mrb[140].mxu1 %v8129_v51 }
 0x232   : > { %v5630_v50 = vpop.f32.mrb[67].mxu0  ;;  %3055 = vmatprep.mubr.bf16.mxu1 %v8131_v8 }
 0x233   : > { %v6378_v50 = vld [vmem:[#allocation2 + $0x1a8] sm:$0xff] }
 0x234   : > { %5752 = vmatmul.mubr.bf16.gmra.mrb[172].mxu0 %v6377_v22  ;;  %v2415_v35 = vpop.f32.mrb[36].mxu1 }
 0x235   : > { %v2417_v38 = vpop.f32.mrb[37].mxu1  ;;  %5755 = vmatprep.mubr.msk.bf16.mxu0 %vm6410_vm0, %v9706_v36  ;;  %v8608_v5 = vadd.f32 %v8485_v62, %v2415_v35 }
 0x236   : > { %v2418_v12 = vpop.f32.mrb[38].mxu1 }
 0x237   : > { %v8610_v48 = vpop.f32.mrb[68].mxu0  ;;  %v2420_v26 = vpop.f32.mrb[39].mxu1  ;;  %v8613_v52 = vadd.f32 %v8491_v30, %v2418_v12  ;;  %v8624_v30 = vld [vmem:[%s9553_s1 + $0x228] sm:$0xff]  }
 0x238   : > { %v5633_v51 = vpop.f32.mrb[69].mxu0  ;;  %5932 = vmatpush3.bf16.msra.mxu1 %v8624_v30 }
 0x239   : > { %v8615_v9 = vpop.f32.mrb[70].mxu0  ;;  %3056 = vmatmul.mubr.bf16.gmra.mrb[144].mxu1 %v8141_v41  ;;  %5925 = vmatprep.subr.bf16.mxu1 %v9706_v36 }
 0x23a   : > { %v5634_v8 = vpop.f32.mrb[71].mxu0  ;;  %3063 = vmatprep.mubr.bf16.mxu1 %v8146_v16 }
 0x23c   : > { %5756 = vmatmul.mubr.bf16.gmra.mrb[176].mxu0 %v6378_v50  ;;  %v2423_v22 = vpop.f32.mrb[40].mxu1 }
 0x23d   : > { %v2425_v62 = vpop.f32.mrb[41].mxu1  ;;  %5759 = vmatprep.mubr.msk.bf16.mxu0 %vm6410_vm0, %v9706_v36  ;;  %v8627_v35 = vadd.f32 %v8500_v63, %v2423_v22  ;;  %v6379_v63 = vld [vmem:[#allocation2 + $0x1c0] sm:$0xff] }
 0x23e   : > { %v2426_v38 = vpop.f32.mrb[42].mxu1 }
 0x23f   : > { %v8629_v41 = vpop.f32.mrb[72].mxu0  ;;  %v2428_v12 = vpop.f32.mrb[43].mxu1  ;;  %v8633_v16 = vadd.f32 %v8508_v39, %v2426_v38  ;;  %v8645_v39 = vld [vmem:[%s9553_s1 + $0x230] sm:$0xff]  }
 0x240   : > { %v5637_v26 = vpop.f32.mrb[73].mxu0  ;;  %5933 = vmatpush3.bf16.msra.mxu1 %v8645_v39 }
 0x241   : > { %v8636_v51 = vpop.f32.mrb[74].mxu0  ;;  %3064 = vmatmul.mubr.bf16.gmra.mrb[148].mxu1 %v8157_v46  ;;  %5926 = vmatprep.subr.bf16.mxu1 %v9706_v36 }
 0x242   : > { %v5638_v8 = vpop.f32.mrb[75].mxu0  ;;  %3071 = vmatprep.mubr.bf16.mxu1 %v8159_v21  ;;  %v8656_v21 = vld [vmem:[%s9553_s1 + $0x238] sm:$0xff]  }
 0x244   : > { %5760 = vmatmul.mubr.bf16.gmra.mrb[180].mxu0 %v6379_v63  ;;  %v2431_v50 = vpop.f32.mrb[44].mxu1  ;;  %5934 = vmatpush3.bf16.msra.mxu1 %v8656_v21 }
 0x245   : > { %v2433_v22 = vpop.f32.mrb[45].mxu1  ;;  %5763 = vmatprep.mubr.msk.bf16.mxu0 %vm6410_vm0, %v9706_v36  ;;  %v8648_v62 = vadd.f32 %v8516_v10, %v2431_v50  ;;  %v6380_v50 = vld [vmem:[#allocation2 + $0x1d8] sm:$0xff] }
 0x246   : > { %v2434_v38 = vpop.f32.mrb[46].mxu1 }
 0x247   : > { %9822 = vst [vmem:[#allocation69_spill] sm:$0xff] %v8648_v62  ;;  %v8650_v46 = vpop.f32.mrb[76].mxu0  ;;  %v2436_v12 = vpop.f32.mrb[47].mxu1  ;;  %v8659_v26 = vadd.f32 %v8526_v29, %v2434_v38 }
 0x248   : > { %v5641_v8 = vpop.f32.mrb[77].mxu0 }
 0x249   : > { %9823 = vst [vmem:[#allocation70_spill] sm:$0xff] %v8659_v26  ;;  %v8662_v63 = vpop.f32.mrb[78].mxu0  ;;  %3072 = vmatmul.mubr.bf16.gmra.mrb[152].mxu1 %v8173_v24 }
 0x24a   : > { %v5642_v10 = vpop.f32.mrb[79].mxu0  ;;  %3079 = vmatprep.mubr.bf16.mxu1 %v8175_v40 }
 0x24c   : > { %5764 = vmatmul.mubr.bf16.gmra.mrb[184].mxu0 %v6380_v50  ;;  %v2439_v22 = vpop.f32.mrb[48].mxu1 }
 0x24d   : > { %v2441_v12 = vpop.f32.mrb[49].mxu1  ;;  %5767 = vmatprep.mubr.msk.bf16.mxu0 %vm6410_vm0, %v9706_v36  ;;  %v8670_v29 = vadd.f32 %v8535_v47, %v2439_v22 }
 0x24e   : > { %v2442_v38 = vpop.f32.mrb[50].mxu1  ;;  %v6381_v12 = vld [vmem:[#allocation2 + $0x1f0] sm:$0xff] }
 0x24f   : > { %v8672_v8 = vpop.f32.mrb[80].mxu0  ;;  %v2444_v26 = vpop.f32.mrb[51].mxu1  ;;  %v8675_v24 = vadd.f32 %v8540_v11, %v2442_v38 }
 0x250   : > { %v5645_v40 = vpop.f32.mrb[81].mxu0 }
 0x251   : > { %v8677_v10 = vpop.f32.mrb[82].mxu0  ;;  %3080 = vmatmul.mubr.bf16.gmra.mrb[156].mxu1 %v8192_v17 }
 0x252   : > { %v5646_v50 = vpop.f32.mrb[83].mxu0  ;;  %3087 = vmatprep.mubr.bf16.mxu1 %v8194_v31 }
 0x254   : > { %5768 = vmatmul.mubr.bf16.gmra.mrb[188].mxu0 %v6381_v12  ;;  %v2447_v62 = vpop.f32.mrb[52].mxu1  ;;  %v6382_v12 = vld [vmem:[#allocation2 + $0x208] sm:$0xff] }
 0x255   : > { %v2449_v47 = vpop.f32.mrb[53].mxu1  ;;  %5771 = vmatprep.mubr.msk.bf16.mxu0 %vm6410_vm0, %v9706_v36  ;;  %v8684_v26 = vadd.f32 %v8547_v59, %v2447_v62 }
 0x256   : > { %v2450_v11 = vpop.f32.mrb[54].mxu1 }
 0x257   : > { %v8686_v22 = vpop.f32.mrb[84].mxu0  ;;  %v2452_v38 = vpop.f32.mrb[55].mxu1  ;;  %v8689_v40 = vadd.f32 %v8552_v19, %v2450_v11 }
 0x258   : > { %v5649_v17 = vpop.f32.mrb[85].mxu0 }
 0x259   : > { %v8691_v50 = vpop.f32.mrb[86].mxu0  ;;  %3088 = vmatmul.mubr.bf16.gmra.mrb[160].mxu1 %v8212_v7 }
 0x25a   : > { %v5650_v31 = vpop.f32.mrb[87].mxu0  ;;  %3095 = vmatprep.mubr.bf16.mxu1 %v8214_v34 }
 0x25c   : > { %5772 = vmatmul.mubr.bf16.gmra.mrb[192].mxu0 %v6382_v12  ;;  %v2455_v47 = vpop.f32.mrb[56].mxu1  ;;  %v6383_v12 = vld [vmem:[#allocation2 + $0x220] sm:$0xff] }
 0x25d   : > { %v2457_v59 = vpop.f32.mrb[57].mxu1  ;;  %5775 = vmatprep.mubr.msk.bf16.mxu0 %vm6410_vm0, %v9706_v36  ;;  %v8698_v62 = vadd.f32 %v8559_v13, %v2455_v47 }
 0x25e   : > { %v2458_v19 = vpop.f32.mrb[58].mxu1 }
 0x25f   : > { %v8700_v11 = vpop.f32.mrb[88].mxu0  ;;  %v2460_v38 = vpop.f32.mrb[59].mxu1  ;;  %v8703_v17 = vadd.f32 %v8564_v61, %v2458_v19 }
 0x260   : > { %v5653_v7 = vpop.f32.mrb[89].mxu0 }
 0x261   : > { %v8705_v31 = vpop.f32.mrb[90].mxu0  ;;  %3096 = vmatmul.mubr.bf16.gmra.mrb[164].mxu1 %v8232_v28 }
 0x262   : > { %v5654_v34 = vpop.f32.mrb[91].mxu0  ;;  %3103 = vmatprep.mubr.bf16.mxu1 %v8234_v32 }
 0x264   : > { %5776 = vmatmul.mubr.bf16.gmra.mrb[196].mxu0 %v6383_v12  ;;  %v2463_v59 = vpop.f32.mrb[60].mxu1 }
 0x265   : > { %v8710_v13 = vadd.f32 %v8580_v23, %v2463_v59  ;;  %v2465_v47 = vpop.f32.mrb[61].mxu1  ;;  %5779 = vmatprep.mubr.msk.bf16.mxu0 %vm6410_vm0, %v9706_v36  ;;  %v6384_v23 = vld [vmem:[#allocation2 + $0x238] sm:$0xff] }
 0x266   : > { %v2466_v61 = vpop.f32.mrb[62].mxu1 }
 0x267   : > { %v8714_v19 = vpop.f32.mrb[92].mxu0  ;;  %v8717_v38 = vadd.f32 %v8586_v44, %v2466_v61  ;;  %v2468_v28 = vpop.f32.mrb[63].mxu1 }
 0x268   : > { %v5657_v7 = vpop.f32.mrb[93].mxu0 }
 0x269   : > { %v8719_v34 = vpop.f32.mrb[94].mxu0  ;;  %3104 = vmatmul.mubr.bf16.gmra.mrb[168].mxu1 %v8245_v33 }
 0x26a   : > { %v5658_v32 = vpop.f32.mrb[95].mxu0  ;;  %3111 = vmatprep.mubr.bf16.mxu1 %v8247_v18 }
 0x26c   : > { %5780 = vmatmul.mubr.bf16.gmra.mrb[200].mxu0 %v6384_v23  ;;  %v2471_v12 = vpop.f32.mrb[64].mxu1 }
 0x26d   : > { %v8724_v59 = vadd.f32 %v8596_v42, %v2471_v12  ;;  %v2473_v47 = vpop.f32.mrb[65].mxu1  ;;  %5783 = vmatprep.mubr.msk.bf16.mxu0 %vm6410_vm0, %v9706_v36  ;;  %v6385_v42 = vld [vmem:[#allocation2 + $0x250] sm:$0xff] }
 0x26e   : > { %v2474_v44 = vpop.f32.mrb[66].mxu1 }
 0x26f   : > { %v8728_v61 = vpop.f32.mrb[96].mxu0  ;;  %v8731_v28 = vadd.f32 %v8601_v27, %v2474_v44  ;;  %v2476_v33 = vpop.f32.mrb[67].mxu1 }
 0x270   : > { %v5661_v7 = vpop.f32.mrb[97].mxu0 }
 0x271   : > { %v8733_v32 = vpop.f32.mrb[98].mxu0  ;;  %3112 = vmatmul.mubr.bf16.gmra.mrb[172].mxu1 %v8257_v15 }
 0x272   : > { %v5662_v18 = vpop.f32.mrb[99].mxu0  ;;  %3119 = vmatprep.mubr.bf16.mxu1 %v8259_v1 }
 0x274   : > { %5784 = vmatmul.mubr.bf16.gmra.mrb[204].mxu0 %v6385_v42  ;;  %v2479_v23 = vpop.f32.mrb[68].mxu1 }
 0x275   : > { %v8738_v12 = vadd.f32 %v8610_v48, %v2479_v23  ;;  %v2481_v47 = vpop.f32.mrb[69].mxu1  ;;  %5787 = vmatprep.mubr.msk.bf16.mxu0 %vm6410_vm0, %v9706_v36  ;;  %v6386_v48 = vld [vmem:[#allocation2 + $0x268] sm:$0xff] }
 0x276   : > { %v2482_v27 = vpop.f32.mrb[70].mxu1 }
 0x277   : > { %v8742_v44 = vpop.f32.mrb[100].mxu0  ;;  %v8745_v33 = vadd.f32 %v8615_v9, %v2482_v27  ;;  %v2484_v15 = vpop.f32.mrb[71].mxu1 }
 0x278   : > { %v5665_v7 = vpop.f32.mrb[101].mxu0 }
 0x279   : > { %v8747_v18 = vpop.f32.mrb[102].mxu0  ;;  %3120 = vmatmul.mubr.bf16.gmra.mrb[176].mxu1 %v8269_v57 }
 0x27a   : > { %v5666_v1 = vpop.f32.mrb[103].mxu0  ;;  %3127 = vmatprep.mubr.bf16.mxu1 %v8271_v20 }
 0x27c   : > { %5788 = vmatmul.mubr.bf16.gmra.mrb[208].mxu0 %v6386_v48  ;;  %v2487_v42 = vpop.f32.mrb[72].mxu1  ;;  %v3450_v48 = vld [vmem:[#allocation2 + $0x50] sm:$0xff] }
 0x27d   : > { %v8752_v23 = vadd.f32 %v8629_v41, %v2487_v42  ;;  %v2489_v47 = vpop.f32.mrb[73].mxu1  ;;  %5791 = vmatprep.mubr.msk.bf16.mxu0 %vm6410_vm0, %v9706_v36  ;;  %v6387_v41 = vld [vmem:[#allocation2 + $0x280] sm:$0xff] }
 0x27e   : > { %v2490_v9 = vpop.f32.mrb[74].mxu1 }
 0x27f   : > { %9824 = vst [vmem:[#allocation71_spill] sm:$0xff] %v8752_v23  ;;  %v8756_v27 = vpop.f32.mrb[104].mxu0  ;;  %v8759_v15 = vadd.f32 %v8636_v51, %v2490_v9  ;;  %v2492_v57 = vpop.f32.mrb[75].mxu1 }
 0x280   : > { %v5669_v7 = vpop.f32.mrb[105].mxu0 }
 0x281   : > { %v8761_v1 = vpop.f32.mrb[106].mxu0  ;;  %3128 = vmatmul.mubr.bf16.gmra.mrb[180].mxu1 %v8281_v0  ;;  %v3449_v0 = vld [vmem:[#allocation2 + $0x48] sm:$0xff] }
 0x282   : > { %v5670_v20 = vpop.f32.mrb[107].mxu0  ;;  %3135 = vmatprep.mubr.bf16.mxu1 %v8283_v45  ;;  %v3453_v45 = vld [vmem:[#allocation2 + $0x68] sm:$0xff] }
 0x284   : > { %5792 = vmatmul.mubr.bf16.gmra.mrb[212].mxu0 %v6387_v41  ;;  %v2495_v42 = vpop.f32.mrb[76].mxu1 }
 0x285   : > { %3755 = vmatprep.mubr.bf16.mxu0 %v3450_v48  ;;  %v8766_v47 = vadd.f32 %v8650_v46, %v2495_v42  ;;  %v2497_v23 = vpop.f32.mrb[77].mxu1 }
 0x286   : > { %v2498_v51 = vpop.f32.mrb[78].mxu1 }
 0x287   : > { %v8769_v9 = vadd.f32 %v8662_v63, %v2498_v51  ;;  %v2500_v57 = vpop.f32.mrb[79].mxu1  ;;  %v9825_v51 = vld [vmem:[#allocation19_spill] sm:$0xff] }
 0x288   : > { %v9826_v57 = vld [vmem:[#allocation65_spill] sm:$0xff] }
 0x289   : > { %3136 = vmatmul.mubr.bf16.gmra.mrb[184].mxu1 %v8293_v43 }
 0x28a   : > { %3143 = vmatprep.mubr.bf16.mxu1 %v8295_v4  ;;  %v6388_v4 = vld [vmem:[#allocation2 + $0x200] sm:$0xff] }
 0x28c   : > { %3756 = vmatmul.mubr.bf16.vlgmr.msra.gmra.mrb[108].mxu0 %v3449_v0  ;;  %v2503_v7 = vpop.f32.mrb[80].mxu1  ;;  %v6389_v0 = vld [vmem:[#allocation2 + $0x218] sm:$0xff] }
 0x28d   : > { %5796 = vmatpush3.bf16.msra.mxu0 %v8459_v2  ;;  %3763 = vmatprep.mubr.bf16.mxu0 %v3453_v45  ;;  %v8775_v46 = vadd.f32 %v8672_v8, %v2503_v7  ;;  %v2505_v23 = vpop.f32.mrb[81].mxu1  ;;  %v3452_v2 = vld [vmem:[#allocation2 + $0x60] sm:$0xff]  ;;  %v3459_v45 = vld [vmem:[#allocation2 + $0x98] sm:$0xff] }
 0x28e   : > { %v2506_v20 = vpop.f32.mrb[82].mxu1  ;;  %5797 = vmatprep.subr.bf16.mxu0 %v9706_v36  ;;  %v3456_v8 = vld [vmem:[#allocation2 + $0x80] sm:$0xff] }
 0x28f   : > { %v8779_v63 = vadd.f32 %v8677_v10, %v2506_v20  ;;  %v2508_v43 = vpop.f32.mrb[83].mxu1 }
 0x291   : > { %3144 = vmatmul.mubr.bf16.gmra.mrb[188].mxu1 %v8309_v37  ;;  %5798 = vmatpush3.bf16.msra.mxu0 %v8471_v58 }
 0x292   : > { %3151 = vmatprep.mubr.bf16.mxu1 %v6388_v4  ;;  %5799 = vmatprep.subr.bf16.mxu0 %v9706_v36  ;;  %v6390_v4 = vld [vmem:[#allocation2 + $0x210] sm:$0xff] }
 0x294   : > { %3764 = vmatmul.mubr.bf16.gmra.mrb[112].mxu0 %v3452_v2  ;;  %v2511_v41 = vpop.f32.mrb[84].mxu1  ;;  %v6391_v2 = vld [vmem:[#allocation2 + $0x230] sm:$0xff] }
 0x295   : > { %3771 = vmatprep.mubr.bf16.mxu0 %v3456_v8  ;;  %v8785_v48 = vadd.f32 %v8686_v22, %v2511_v41  ;;  %v2513_v42 = vpop.f32.mrb[85].mxu1  ;;  %5800 = vmatpush3.bf16.msra.mxu0 %v8483_v53  ;;  %v3455_v22 = vld [vmem:[#allocation2 + $0x78] sm:$0xff]  ;;  %v3462_v8 = vld [vmem:[#allocation2 + $0xb0] sm:$0xff] }
 0x296   : > { %v2514_v10 = vpop.f32.mrb[86].mxu1  ;;  %5801 = vmatprep.subr.bf16.mxu0 %v9706_v36 }
 0x297   : > { %v8790_v37 = vadd.f32 %v8691_v50, %v2514_v10  ;;  %v2516_v58 = vpop.f32.mrb[87].mxu1 }
 0x298   : > { %v6392_v58 = vld [vmem:[#allocation2 + $0x228] sm:$0xff] }
 0x299   : > { %3152 = vmatmul.mubr.bf16.gmra.mrb[192].mxu1 %v9825_v51  ;;  %5802 = vmatpush3.bf16.msra.mxu0 %v9826_v57  ;;  %v6393_v51 = vld [vmem:[#allocation2 + $0x248] sm:$0xff] }
 0x29a   : > { %3159 = vmatprep.mubr.bf16.mxu1 %v6389_v0  ;;  %5803 = vmatprep.subr.bf16.mxu0 %v9706_v36  ;;  %v3461_v57 = vld [vmem:[#allocation2 + $0xa8] sm:$0xff] }
 0x29c   : > { %3772 = vmatmul.mubr.bf16.gmra.mrb[116].mxu0 %v3455_v22  ;;  %v2519_v7 = vpop.f32.mrb[88].mxu1 }
 0x29d   : > { %3779 = vmatprep.mubr.bf16.mxu0 %v3459_v45  ;;  %v8796_v53 = vadd.f32 %v8700_v11, %v2519_v7  ;;  %v2521_v23 = vpop.f32.mrb[89].mxu1  ;;  %5804 = vmatpush3.bf16.msra.mxu0 %v8572_v56  ;;  %v3458_v11 = vld [vmem:[#allocation2 + $0x90] sm:$0xff] }
 0x29e   : > { %v2522_v50 = vpop.f32.mrb[90].mxu1  ;;  %5805 = vmatprep.subr.bf16.mxu0 %v9706_v36  ;;  %v6394_v23 = vld [vmem:[#allocation2 + $0x240] sm:$0xff] }
 0x29f   : > { %v8801_v20 = vadd.f32 %v8705_v31, %v2522_v50  ;;  %v2524_v43 = vpop.f32.mrb[91].mxu1  ;;  %v6395_v50 = vld [vmem:[#allocation2 + $0x260] sm:$0xff] }
 0x2a0   : > { %v3468_v43 = vld [vmem:[#allocation2 + $0xe0] sm:$0xff] }
 0x2a1   : > { %3160 = vmatmul.mubr.bf16.gmra.mrb[196].mxu1 %v6390_v4  ;;  %5806 = vmatpush3.bf16.msra.mxu0 %v8624_v30 }
 0x2a2   : > { %3167 = vmatprep.mubr.bf16.mxu1 %v6391_v2  ;;  %5807 = vmatprep.subr.bf16.mxu0 %v9706_v36 }
 0x2a4   : > { %3780 = vmatmul.mubr.bf16.gmra.mrb[120].mxu0 %v3458_v11  ;;  %v2527_v41 = vpop.f32.mrb[92].mxu1 }
 0x2a5   : > { %3787 = vmatprep.mubr.bf16.mxu0 %v3462_v8  ;;  %v8806_v56 = vadd.f32 %v8714_v19, %v2527_v41  ;;  %v2529_v42 = vpop.f32.mrb[93].mxu1  ;;  %5808 = vmatpush3.bf16.msra.mxu0 %v8645_v39  ;;  %v3465_v19 = vld [vmem:[#allocation2 + $0xc8] sm:$0xff]  ;;  %v6396_v41 = vld [vmem:[#allocation2 + $0x258] sm:$0xff] }
 0x2a6   : > { %v2530_v31 = vpop.f32.mrb[94].mxu1  ;;  %5809 = vmatprep.subr.bf16.mxu0 %v9706_v36  ;;  %v6397_v42 = vld [vmem:[#allocation2 + $0x278] sm:$0xff] }
 0x2a7   : > { %v8811_v30 = vadd.f32 %v8719_v34, %v2530_v31  ;;  %v2532_v10 = vpop.f32.mrb[95].mxu1  ;;  %v3467_v31 = vld [vmem:[#allocation2 + $0xd8] sm:$0xff] }
 0x2a8   : > { %v3471_v10 = vld [vmem:[#allocation2 + $0xf8] sm:$0xff] }
 0x2a9   : > { %3168 = vmatmul.mubr.bf16.gmra.mrb[200].mxu1 %v6392_v58  ;;  %5810 = vmatpush3.bf16.msra.mxu0 %v8656_v21  ;;  %v3464_v21 = vld [vmem:[#allocation2 + $0xc0] sm:$0xff] }
 0x2aa   : > { %3175 = vmatprep.mubr.bf16.mxu1 %v6393_v51 }
 0x2ac   : > { %3788 = vmatmul.mubr.bf16.gmra.mrb[124].mxu0 %v3461_v57  ;;  %v2535_v0 = vpop.f32.mrb[96].mxu1 }
 0x2ad   : > { %3795 = vmatprep.mubr.bf16.mxu0 %v3465_v19  ;;  %v8815_v39 = vadd.f32 %v8728_v61, %v2535_v0  ;;  %v2537_v22 = vpop.f32.mrb[97].mxu1  ;;  %v6398_v0 = vld [vmem:[#allocation2 + $0x270] sm:$0xff] }
 0x2ae   : > { %v2538_v45 = vpop.f32.mrb[98].mxu1  ;;  %v3470_v22 = vld [vmem:[#allocation2 + $0xf0] sm:$0xff] }
 0x2af   : > { %v8818_v34 = vadd.f32 %v8733_v32, %v2538_v45  ;;  %v2540_v7 = vpop.f32.mrb[99].mxu1  ;;  %v3474_v45 = vld [vmem:[#allocation2 + $0x110] sm:$0xff] }
 0x2b1   : > { %3176 = vmatmul.mubr.bf16.gmra.mrb[204].mxu1 %v6394_v23  ;;  %v9827_v23 = vld [vmem:[#allocation16_spill] sm:$0xff] }
 0x2b2   : > { %3183 = vmatprep.mubr.bf16.mxu1 %v6395_v50 }
 0x2b4   : > { %3796 = vmatmul.mubr.bf16.gmra.mrb[128].mxu0 %v3464_v21  ;;  %v2543_v4 = vpop.f32.mrb[100].mxu1 }
 0x2b5   : > { %3803 = vmatprep.mubr.bf16.mxu0 %v3468_v43  ;;  %v8821_v2 = vadd.f32 %v8742_v44, %v2543_v4  ;;  %v2545_v61 = vpop.f32.mrb[101].mxu1  ;;  %v9829_v43 = vld [vmem:[#allocation59_spill] sm:$0xff] }
 0x2b6   : > { %v2546_v11 = vpop.f32.mrb[102].mxu1  ;;  %v3457_v61 = vld [vmem:[#allocation2 + $0x88] sm:$0xff] }
 0x2b7   : > { %v8824_v8 = vadd.f32 %v8747_v18, %v2546_v11  ;;  %v2548_v32 = vpop.f32.mrb[103].mxu1  ;;  %v3473_v11 = vld [vmem:[#allocation2 + $0x108] sm:$0xff] }
 0x2b8   : > { %v3477_v32 = vld [vmem:[#allocation2 + $0x128] sm:$0xff] }
 0x2b9   : > { %3184 = vmatmul.mubr.bf16.gmra.mrb[208].mxu1 %v6396_v41 }
 0x2ba   : > { %3191 = vmatprep.mubr.bf16.mxu1 %v6397_v42  ;;  %v9831_v42 = vld [vmem:[#allocation60_spill] sm:$0xff] }
 0x2bc   : > { %3804 = vmatmul.mubr.bf16.gmra.mrb[132].mxu0 %v3467_v31  ;;  %v2551_v58 = vpop.f32.mrb[104].mxu1 }
 0x2bd   : > { %3811 = vmatprep.mubr.bf16.mxu0 %v3471_v10  ;;  %v8827_v51 = vadd.f32 %v8756_v27, %v2551_v58  ;;  %v2553_v44 = vpop.f32.mrb[105].mxu1 }
 0x2be   : > { %v2554_v57 = vpop.f32.mrb[106].mxu1  ;;  %v9833_v44 = vld [vmem:[#allocation61_spill] sm:$0xff] }
 0x2bf   : > { %v8830_v19 = vadd.f32 %v8761_v1, %v2554_v57  ;;  %v2556_v18 = vpop.f32.mrb[107].mxu1 }
 0x2c1   : > { %3192 = vmatmul.mubr.bf16.gmra.mrb[212].mxu1 %v6398_v0  ;;  %v3460_v0 = vld [vmem:[#allocation2 + $0xa0] sm:$0xff] }
 0x2c2   : > { %5819 = vmatprep.mubr.msk.bf16.mxu1 %vm6410_vm0, %v9706_v36 }
 0x2c4   : > { %3812 = vmatmul.mubr.bf16.gmra.mrb[136].mxu0 %v3470_v22  ;;  %v2985_v7 = vpop.f32.mrb[108].mxu1  ;;  %v3476_v22 = vld [vmem:[#allocation2 + $0x120] sm:$0xff] }
 0x2c5   : > { %3819 = vmatprep.mubr.bf16.mxu0 %v3474_v45  ;;  %v8835_v50 = vadd.f32 %v2985_v7, %v9827_v23  ;;  %v2987_v27 = vpop.f32.mrb[109].mxu1  ;;  %v3480_v45 = vld [vmem:[#allocation2 + $0x140] sm:$0xff]  ;;  %v9835_v23 = vld [vmem:[#allocation62_spill] sm:$0xff] }
 0x2c6   : > { %v2988_v21 = vpop.f32.mrb[110].mxu1 }
 0x2c7   : > { %9828 = vst [vmem:[#allocation19_spill] sm:$0xff] %v8835_v50  ;;  %v8838_v4 = vadd.f32 %v2988_v21, %v9829_v43  ;;  %v2990_v1 = vpop.f32.mrb[111].mxu1 }
 0x2c8   : > { %v9836_v1 = vld [vmem:[#allocation63_spill] sm:$0xff] }
 0x2c9   : > { %9830 = vst [vmem:[#allocation65_spill] sm:$0xff] %v8838_v4  ;;  %5820 = vmatmul.mubr.bf16.vlgmr.msra.gmra.mrb[216].mxu1 %v3457_v61 }
 0x2ca   : > { %5823 = vmatprep.mubr.msk.bf16.mxu1 %vm6410_vm0, %v9706_v36 }
 0x2cc   : > { %3820 = vmatmul.mubr.bf16.gmra.mrb[140].mxu0 %v3473_v11  ;;  %v2993_v41 = vpop.f32.mrb[112].mxu1 }
 0x2cd   : > { %3827 = vmatprep.mubr.bf16.mxu0 %v3477_v32  ;;  %v8843_v31 = vadd.f32 %v2993_v41, %v9831_v42  ;;  %v2995_v10 = vpop.f32.mrb[113].mxu1  ;;  %v3463_v32 = vld [vmem:[#allocation2 + $0xb8] sm:$0xff] }
 0x2ce   : > { %v2996_v58 = vpop.f32.mrb[114].mxu1  ;;  %v3479_v41 = vld [vmem:[#allocation2 + $0x138] sm:$0xff] }
 0x2cf   : > { %9832 = vst [vmem:[#allocation16_spill] sm:$0xff] %v8843_v31  ;;  %v8846_v57 = vadd.f32 %v2996_v58, %v9833_v44  ;;  %v2998_v18 = vpop.f32.mrb[115].mxu1  ;;  %v3483_v42 = vld [vmem:[#allocation2 + $0x158] sm:$0xff] }
 0x2d0   : > { %v9837_v58 = vld [vmem:[#allocation64_spill] sm:$0xff] }
 0x2d1   : > { %9834 = vst [vmem:[#allocation59_spill] sm:$0xff] %v8846_v57  ;;  %5824 = vmatmul.mubr.bf16.gmra.mrb[220].mxu1 %v3460_v0 }
 0x2d2   : > { %5827 = vmatprep.mubr.msk.bf16.mxu1 %vm6410_vm0, %v9706_v36 }
 0x2d4   : > { %3828 = vmatmul.mubr.bf16.gmra.mrb[144].mxu0 %v3476_v22  ;;  %v3001_v7 = vpop.f32.mrb[116].mxu1  ;;  %v9838_v22 = vld [vmem:[#allocation66_spill] sm:$0xff] }
 0x2d5   : > { %3835 = vmatprep.mubr.bf16.mxu0 %v3480_v45  ;;  %v8851_v27 = vadd.f32 %v3001_v7, %v9835_v23  ;;  %v3003_v21 = vpop.f32.mrb[117].mxu1  ;;  %v3466_v23 = vld [vmem:[#allocation2 + $0xd0] sm:$0xff] }
 0x2d6   : > { %v3004_v43 = vpop.f32.mrb[118].mxu1  ;;  %v3482_v21 = vld [vmem:[#allocation2 + $0x150] sm:$0xff] }
 0x2d7   : > { %v8854_v61 = vadd.f32 %v3004_v43, %v9836_v1  ;;  %v3006_v11 = vpop.f32.mrb[119].mxu1  ;;  %v3486_v43 = vld [vmem:[#allocation2 + $0x170] sm:$0xff] }
 0x2d8   : > { %v9839_v11 = vld [vmem:[#allocation67_spill] sm:$0xff] }
 0x2d9   : > { %5828 = vmatmul.mubr.bf16.gmra.mrb[224].mxu1 %v3463_v32 }
 0x2da   : > { %5831 = vmatprep.mubr.msk.bf16.mxu1 %vm6410_vm0, %v9706_v36 }
 0x2dc   : > { %3836 = vmatmul.mubr.bf16.gmra.mrb[148].mxu0 %v3479_v41  ;;  %v3009_v10 = vpop.f32.mrb[120].mxu1 }
 0x2dd   : > { %3843 = vmatprep.mubr.bf16.mxu0 %v3483_v42  ;;  %v8859_v44 = vadd.f32 %v3009_v10, %v9837_v58  ;;  %v3011_v18 = vpop.f32.mrb[121].mxu1  ;;  %v9840_v10 = vld [vmem:[#allocation68_spill] sm:$0xff] }
 0x2de   : > { %v3012_v0 = vpop.f32.mrb[122].mxu1 }
 0x2df   : > { %v8862_v45 = vadd.f32 %v3012_v0, %v9838_v22  ;;  %v3014_v7 = vpop.f32.mrb[123].mxu1  ;;  %v3469_v0 = vld [vmem:[#allocation2 + $0xe8] sm:$0xff] }
 0x2e0   : > { %v3485_v22 = vld [vmem:[#allocation2 + $0x168] sm:$0xff] }
 0x2e1   : > { %5832 = vmatmul.mubr.bf16.gmra.mrb[228].mxu1 %v3466_v23  ;;  %v3489_v7 = vld [vmem:[#allocation2 + $0x188] sm:$0xff] }
 0x2e2   : > { %5835 = vmatprep.mubr.msk.bf16.mxu1 %vm6410_vm0, %v9706_v36 }
 0x2e4   : > { %3844 = vmatmul.mubr.bf16.gmra.mrb[152].mxu0 %v3482_v21  ;;  %v3017_v1 = vpop.f32.mrb[124].mxu1 }
 0x2e5   : > { %3851 = vmatprep.mubr.bf16.mxu0 %v3486_v43  ;;  %v8867_v32 = vadd.f32 %v3017_v1, %v9839_v11  ;;  %v3019_v41 = vpop.f32.mrb[125].mxu1 }
 0x2e6   : > { %v3020_v42 = vpop.f32.mrb[126].mxu1 }
 0x2e7   : > { %v8870_v58 = vadd.f32 %v3020_v42, %v9840_v10  ;;  %v3022_v18 = vpop.f32.mrb[127].mxu1  ;;  %v3472_v42 = vld [vmem:[#allocation2 + $0x100] sm:$0xff] }
 0x2e8   : > { %v3488_v10 = vld [vmem:[#allocation2 + $0x180] sm:$0xff] }
 0x2e9   : > { %5836 = vmatmul.mubr.bf16.gmra.mrb[232].mxu1 %v3469_v0  ;;  %v3492_v18 = vld [vmem:[#allocation2 + $0x1a0] sm:$0xff] }
 0x2ea   : > { %5839 = vmatprep.mubr.msk.bf16.mxu1 %vm6410_vm0, %v9706_v36 }
 0x2ec   : > { %3852 = vmatmul.mubr.bf16.gmra.mrb[156].mxu0 %v3485_v22  ;;  %v3025_v23 = vpop.f32.mrb[128].mxu1 }
 0x2ed   : > { %3859 = vmatprep.mubr.bf16.mxu0 %v3489_v7  ;;  %v8875_v21 = vadd.f32 %v3025_v23, %v8545_v60  ;;  %v3027_v43 = vpop.f32.mrb[129].mxu1 }
 0x2ee   : > { %v3028_v1 = vpop.f32.mrb[130].mxu1  ;;  %v3475_v43 = vld [vmem:[#allocation2 + $0x118] sm:$0xff] }
 0x2ef   : > { %v8878_v11 = vadd.f32 %v3028_v1, %v8550_v54  ;;  %v3030_v41 = vpop.f32.mrb[131].mxu1  ;;  %v3491_v1 = vld [vmem:[#allocation2 + $0x198] sm:$0xff] }
 0x2f0   : > { %v3495_v41 = vld [vmem:[#allocation2 + $0x1b8] sm:$0xff] }
 0x2f1   : > { %5840 = vmatmul.mubr.bf16.gmra.mrb[236].mxu1 %v3472_v42 }
 0x2f2   : > { %5843 = vmatprep.mubr.msk.bf16.mxu1 %vm6410_vm0, %v9706_v36 }
 0x2f4   : > { %3860 = vmatmul.mubr.bf16.gmra.mrb[160].mxu0 %v3488_v10  ;;  %v3033_v0 = vpop.f32.mrb[132].mxu1 }
 0x2f5   : > { %3867 = vmatprep.mubr.bf16.mxu0 %v3492_v18  ;;  %v8883_v22 = vadd.f32 %v3033_v0, %v8557_v25  ;;  %v3035_v60 = vpop.f32.mrb[133].mxu1 }
 0x2f6   : > { %v3036_v7 = vpop.f32.mrb[134].mxu1  ;;  %v3478_v60 = vld [vmem:[#allocation2 + $0x130] sm:$0xff] }
 0x2f7   : > { %v8886_v23 = vadd.f32 %v3036_v7, %v8562_v55  ;;  %v3038_v54 = vpop.f32.mrb[135].mxu1  ;;  %v3494_v7 = vld [vmem:[#allocation2 + $0x1b0] sm:$0xff] }
 0x2f8   : > { %v3498_v54 = vld [vmem:[#allocation2 + $0x1d0] sm:$0xff] }
 0x2f9   : > { %5844 = vmatmul.mubr.bf16.gmra.mrb[240].mxu1 %v3475_v43 }
 0x2fa   : > { %5847 = vmatprep.mubr.msk.bf16.mxu1 %vm6410_vm0, %v9706_v36 }
 0x2fc   : > { %3868 = vmatmul.mubr.bf16.gmra.mrb[164].mxu0 %v3491_v1  ;;  %v3041_v42 = vpop.f32.mrb[136].mxu1 }
 0x2fd   : > { %3875 = vmatprep.mubr.bf16.mxu0 %v3495_v41  ;;  %v8891_v10 = vadd.f32 %v3041_v42, %v8577_v49  ;;  %v3043_v25 = vpop.f32.mrb[137].mxu1 }
 0x2fe   : > { %v3044_v18 = vpop.f32.mrb[138].mxu1  ;;  %v3481_v25 = vld [vmem:[#allocation2 + $0x148] sm:$0xff] }
 0x2ff   : > { %v8894_v0 = vadd.f32 %v3044_v18, %v8584_v3  ;;  %v3046_v55 = vpop.f32.mrb[139].mxu1  ;;  %v3497_v18 = vld [vmem:[#allocation2 + $0x1c8] sm:$0xff] }
 0x300   : > { %v3501_v55 = vld [vmem:[#allocation2 + $0x1e8] sm:$0xff] }
 0x301   : > { %5848 = vmatmul.mubr.bf16.gmra.mrb[244].mxu1 %v3478_v60 }
 0x302   : > { %5851 = vmatprep.mubr.msk.bf16.mxu1 %vm6410_vm0, %v9706_v36 }
 0x304   : > { %3876 = vmatmul.mubr.bf16.gmra.mrb[168].mxu0 %v3494_v7  ;;  %v3049_v43 = vpop.f32.mrb[140].mxu1 }
 0x305   : > { %3883 = vmatprep.mubr.bf16.mxu0 %v3498_v54  ;;  %v8899_v1 = vadd.f32 %v3049_v43, %v8594_v6  ;;  %v3051_v49 = vpop.f32.mrb[141].mxu1 }
 0x306   : > { %v3052_v41 = vpop.f32.mrb[142].mxu1  ;;  %v3484_v49 = vld [vmem:[#allocation2 + $0x160] sm:$0xff] }
 0x307   : > { %v8902_v42 = vadd.f32 %v3052_v41, %v8599_v14  ;;  %v3054_v3 = vpop.f32.mrb[143].mxu1  ;;  %v3500_v41 = vld [vmem:[#allocation2 + $0x1e0] sm:$0xff] }
 0x308   : > { %v3504_v3 = vld [vmem:[#allocation2 + $0x200] sm:$0xff] }
 0x309   : > { %5852 = vmatmul.mubr.bf16.gmra.mrb[248].mxu1 %v3481_v25 }
 0x30a   : > { %5855 = vmatprep.mubr.msk.bf16.mxu1 %vm6410_vm0, %v9706_v36 }
 0x30c   : > { %3884 = vmatmul.mubr.bf16.gmra.mrb[172].mxu0 %v3497_v18  ;;  %v3057_v60 = vpop.f32.mrb[144].mxu1 }
 0x30d   : > { %3891 = vmatprep.mubr.bf16.mxu0 %v3501_v55  ;;  %v8907_v7 = vadd.f32 %v3057_v60, %v8608_v5  ;;  %v3059_v6 = vpop.f32.mrb[145].mxu1 }
 0x30e   : > { %v3060_v54 = vpop.f32.mrb[146].mxu1  ;;  %v3487_v6 = vld [vmem:[#allocation2 + $0x178] sm:$0xff] }
 0x30f   : > { %v8910_v43 = vadd.f32 %v3060_v54, %v8613_v52  ;;  %v3062_v14 = vpop.f32.mrb[147].mxu1  ;;  %v3503_v54 = vld [vmem:[#allocation2 + $0x1f8] sm:$0xff] }
 0x310   : > { %v3507_v14 = vld [vmem:[#allocation2 + $0x218] sm:$0xff] }
 0x311   : > { %5856 = vmatmul.mubr.bf16.gmra.mrb[252].mxu1 %v3484_v49 }
 0x312   : > { %5859 = vmatprep.mubr.msk.bf16.mxu1 %vm6410_vm0, %v9706_v36 }
 0x314   : > { %3892 = vmatmul.mubr.bf16.gmra.mrb[176].mxu0 %v3500_v41  ;;  %v3065_v25 = vpop.f32.mrb[148].mxu1  ;;  %v9841_v41 = vld [vmem:[#allocation69_spill] sm:$0xff] }
 0x315   : > { %3899 = vmatprep.mubr.bf16.mxu0 %v3504_v3  ;;  %v8915_v18 = vadd.f32 %v3065_v25, %v8627_v35  ;;  %v3067_v5 = vpop.f32.mrb[149].mxu1 }
 0x316   : > { %v3068_v55 = vpop.f32.mrb[150].mxu1  ;;  %v9842_v5 = vld [vmem:[#allocation70_spill] sm:$0xff] }
 0x317   : > { %v8918_v60 = vadd.f32 %v3068_v55, %v8633_v16  ;;  %v3070_v52 = vpop.f32.mrb[151].mxu1  ;;  %v3490_v55 = vld [vmem:[#allocation2 + $0x190] sm:$0xff] }
 0x318   : > { %v3506_v52 = vld [vmem:[#allocation2 + $0x210] sm:$0xff] }
 0x319   : > { %5860 = vmatmul.mubr.bf16.gmra.mrb[0].mxu1 %v3487_v6  ;;  %v3510_v6 = vld [vmem:[#allocation2 + $0x230] sm:$0xff] }
 0x31a   : > { %5863 = vmatprep.mubr.msk.bf16.mxu1 %vm6410_vm0, %v9706_v36 }
 0x31c   : > { %3900 = vmatmul.mubr.bf16.gmra.mrb[180].mxu0 %v3503_v54  ;;  %v3073_v49 = vpop.f32.mrb[152].mxu1 }
 0x31d   : > { %3907 = vmatprep.mubr.bf16.mxu0 %v3507_v14  ;;  %v8923_v3 = vadd.f32 %v3073_v49, %v9841_v41  ;;  %v3075_v35 = vpop.f32.mrb[153].mxu1 }
 0x31e   : > { %v3076_v25 = vpop.f32.mrb[154].mxu1 }
 0x31f   : > { %v8926_v57 = vadd.f32 %v3076_v25, %v9842_v5  ;;  %v3078_v16 = vpop.f32.mrb[155].mxu1  ;;  %v3493_v5 = vld [vmem:[#allocation2 + $0x1a8] sm:$0xff] }
 0x320   : > { %v3509_v16 = vld [vmem:[#allocation2 + $0x228] sm:$0xff] }
 0x321   : > { %5864 = vmatmul.mubr.bf16.gmra.mrb[4].mxu1 %v3490_v55  ;;  %v3513_v55 = vld [vmem:[#allocation2 + $0x248] sm:$0xff] }
 0x322   : > { %5867 = vmatprep.mubr.msk.bf16.mxu1 %vm6410_vm0, %v9706_v36 }
 0x324   : > { %3908 = vmatmul.mubr.bf16.gmra.mrb[184].mxu0 %v3506_v52  ;;  %v3081_v54 = vpop.f32.mrb[156].mxu1 }
 0x325   : > { %3915 = vmatprep.mubr.bf16.mxu0 %v3510_v6  ;;  %v8931_v14 = vadd.f32 %v3081_v54, %v8670_v29  ;;  %v3083_v49 = vpop.f32.mrb[157].mxu1 }
 0x326   : > { %v3084_v41 = vpop.f32.mrb[158].mxu1 }
 0x327   : > { %v8934_v35 = vadd.f32 %v3084_v41, %v8675_v24  ;;  %v3086_v25 = vpop.f32.mrb[159].mxu1  ;;  %v3496_v41 = vld [vmem:[#allocation2 + $0x1c0] sm:$0xff] }
 0x328   : > { %v3512_v25 = vld [vmem:[#allocation2 + $0x240] sm:$0xff] }
 0x329   : > { %5868 = vmatmul.mubr.bf16.gmra.mrb[8].mxu1 %v3493_v5  ;;  %v3516_v5 = vld [vmem:[#allocation2 + $0x260] sm:$0xff] }
 0x32a   : > { %5871 = vmatprep.mubr.msk.bf16.mxu1 %vm6410_vm0, %v9706_v36 }
 0x32c   : > { %3916 = vmatmul.mubr.bf16.gmra.mrb[188].mxu0 %v3509_v16  ;;  %v3089_v52 = vpop.f32.mrb[160].mxu1 }
 0x32d   : > { %3923 = vmatprep.mubr.bf16.mxu0 %v3513_v55  ;;  %v8939_v6 = vadd.f32 %v3089_v52, %v8684_v26  ;;  %v3091_v29 = vpop.f32.mrb[161].mxu1 }
 0x32e   : > { %v3092_v54 = vpop.f32.mrb[162].mxu1 }
 0x32f   : > { %v8942_v49 = vadd.f32 %v3092_v54, %v8689_v40  ;;  %v3094_v24 = vpop.f32.mrb[163].mxu1  ;;  %v3499_v54 = vld [vmem:[#allocation2 + $0x1d8] sm:$0xff] }
 0x330   : > { %v3515_v24 = vld [vmem:[#allocation2 + $0x258] sm:$0xff] }
 0x331   : > { %5872 = vmatmul.mubr.bf16.gmra.mrb[12].mxu1 %v3496_v41  ;;  %v3519_v41 = vld [vmem:[#allocation2 + $0x278] sm:$0xff] }
 0x332   : > { %5875 = vmatprep.mubr.msk.bf16.mxu1 %vm6410_vm0, %v9706_v36 }
 0x334   : > { %3924 = vmatmul.mubr.bf16.gmra.mrb[192].mxu0 %v3512_v25  ;;  %v3097_v16 = vpop.f32.mrb[164].mxu1 }
 0x335   : > { %3931 = vmatprep.mubr.bf16.mxu0 %v3516_v5  ;;  %v8947_v55 = vadd.f32 %v3097_v16, %v8698_v62  ;;  %v3099_v26 = vpop.f32.mrb[165].mxu1 }
 0x336   : > { %v3100_v52 = vpop.f32.mrb[166].mxu1 }
 0x337   : > { %v8950_v29 = vadd.f32 %v3100_v52, %v8703_v17  ;;  %v3102_v40 = vpop.f32.mrb[167].mxu1  ;;  %v3502_v52 = vld [vmem:[#allocation2 + $0x1f0] sm:$0xff] }
 0x338   : > { %v3518_v40 = vld [vmem:[#allocation2 + $0x270] sm:$0xff] }
 0x339   : > { %5876 = vmatmul.mubr.bf16.gmra.mrb[16].mxu1 %v3499_v54  ;;  %v3522_v54 = vld [vmem:[#allocation2 + $0x290] sm:$0xff] }
 0x33a   : > { %5879 = vmatprep.mubr.msk.bf16.mxu1 %vm6410_vm0, %v9706_v36 }
 0x33c   : > { %3932 = vmatmul.mubr.bf16.gmra.mrb[196].mxu0 %v3515_v24  ;;  %v3105_v25 = vpop.f32.mrb[168].mxu1 }
 0x33d   : > { %3939 = vmatprep.mubr.bf16.mxu0 %v3519_v41  ;;  %v8955_v5 = vadd.f32 %v3105_v25, %v8710_v13  ;;  %v3107_v62 = vpop.f32.mrb[169].mxu1 }
 0x33e   : > { %v3108_v16 = vpop.f32.mrb[170].mxu1 }
 0x33f   : > { %v8958_v26 = vadd.f32 %v3108_v16, %v8717_v38  ;;  %v3110_v17 = vpop.f32.mrb[171].mxu1  ;;  %v3505_v16 = vld [vmem:[#allocation2 + $0x208] sm:$0xff] }
 0x340   : > { %v3521_v17 = vld [vmem:[#allocation2 + $0x288] sm:$0xff] }
 0x341   : > { %5880 = vmatmul.mubr.bf16.gmra.mrb[20].mxu1 %v3502_v52  ;;  %v3525_v52 = vld [vmem:[#allocation2 + $0x2a8] sm:$0xff] }
 0x342   : > { %5883 = vmatprep.mubr.msk.bf16.mxu1 %vm6410_vm0, %v9706_v36 }
 0x344   : > { %3940 = vmatmul.mubr.bf16.gmra.mrb[200].mxu0 %v3518_v40  ;;  %v3113_v24 = vpop.f32.mrb[172].mxu1 }
 0x345   : > { %3947 = vmatprep.mubr.bf16.mxu0 %v3522_v54  ;;  %v8963_v41 = vadd.f32 %v3113_v24, %v8724_v59  ;;  %v3115_v13 = vpop.f32.mrb[173].mxu1 }
 0x346   : > { %v3116_v25 = vpop.f32.mrb[174].mxu1 }
 0x347   : > { %v8966_v62 = vadd.f32 %v3116_v25, %v8731_v28  ;;  %v3118_v38 = vpop.f32.mrb[175].mxu1  ;;  %v3508_v25 = vld [vmem:[#allocation2 + $0x220] sm:$0xff] }
 0x348   : > { %v3524_v38 = vld [vmem:[#allocation2 + $0x2a0] sm:$0xff] }
 0x349   : > { %5884 = vmatmul.mubr.bf16.gmra.mrb[24].mxu1 %v3505_v16 }
 0x34a   : > { %5887 = vmatprep.mubr.msk.bf16.mxu1 %vm6410_vm0, %v9706_v36 }
 0x34c   : > { %3948 = vmatmul.mubr.bf16.gmra.mrb[204].mxu0 %v3521_v17  ;;  %v3121_v40 = vpop.f32.mrb[176].mxu1  ;;  %v9843_v17 = vld [vmem:[#allocation71_spill] sm:$0xff] }
 0x34d   : > { %3955 = vmatprep.mubr.bf16.mxu0 %v3525_v52  ;;  %v8971_v54 = vadd.f32 %v3121_v40, %v8738_v12  ;;  %v3123_v59 = vpop.f32.mrb[177].mxu1  ;;  %v8981_v12 = vld [vmem:[#allocation2] sm:$0xff] }
 0x34e   : > { %v3124_v24 = vpop.f32.mrb[178].mxu1 }
 0x34f   : > { %v8974_v13 = vadd.f32 %v3124_v24, %v8745_v33  ;;  %v3126_v28 = vpop.f32.mrb[179].mxu1  ;;  %v3511_v24 = vld [vmem:[#allocation2 + $0x238] sm:$0xff] }
 0x351   : > { %5888 = vmatmul.mubr.bf16.gmra.mrb[28].mxu1 %v3508_v25 }
 0x352   : > { %5891 = vmatprep.mubr.msk.bf16.mxu1 %vm6410_vm0, %v9706_v36 }
 0x354   : > { %3956 = vmatmul.mubr.bf16.gmra.mrb[208].mxu0 %v3524_v38  ;;  %v3129_v16 = vpop.f32.mrb[180].mxu1 }
 0x355   : > { %v8979_v31 = vadd.f32 %v3129_v16, %v9843_v17  ;;  %v3131_v52 = vpop.f32.mrb[181].mxu1  ;;  %3963 = vmatprep.mubr.bf16.mxu0 %v8981_v12 }
 0x356   : > { %v3132_v40 = vpop.f32.mrb[182].mxu1  ;;  %v3514_v52 = vld [vmem:[#allocation2 + $0x250] sm:$0xff] }
 0x357   : > { %v8985_v33 = vadd.f32 %v3132_v40, %v8759_v15  ;;  %v3134_v59 = vpop.f32.mrb[183].mxu1  ;;  %v3451_v40 = vld [vmem:[#allocation2 + $0x58] sm:$0xff] }
 0x359   : > { %5892 = vmatmul.mubr.bf16.gmra.mrb[32].mxu1 %v3511_v24 }
 0x35a   : > { %5895 = vmatprep.mubr.msk.bf16.mxu1 %vm6410_vm0, %v9706_v36 }
 0x35c   : > { %3964 = vmatmul.mubr.bf16.gmra.mrb[212].mxu0 %v8981_v12  ;;  %v3137_v28 = vpop.f32.mrb[184].mxu1 }
 0x35d   : > { %v8991_v25 = vadd.f32 %v3137_v28, %v8766_v47  ;;  %v3139_v38 = vpop.f32.mrb[185].mxu1  ;;  %5811 = vmatprep.mubr.msk.bf16.mxu0 %vm6410_vm0, %v9706_v36 }
 0x35e   : > { %v3140_v16 = vpop.f32.mrb[186].mxu1 }
 0x35f   : > { %v8996_v15 = vadd.f32 %v3140_v16, %v8769_v9  ;;  %v3142_v17 = vpop.f32.mrb[187].mxu1  ;;  %v3517_v16 = vld [vmem:[#allocation2 + $0x268] sm:$0xff] }
 0x360   : > { %v3454_v17 = vld [vmem:[#allocation2 + $0x70] sm:$0xff] }
 0x361   : > { %5896 = vmatmul.mubr.bf16.gmra.mrb[36].mxu1 %v3514_v52 }
 0x362   : > { %5899 = vmatprep.mubr.msk.bf16.mxu1 %vm6410_vm0, %v9706_v36 }
 0x364   : > { %5812 = vmatmul.mubr.bf16.vlgmr.msra.gmra.mrb[108].mxu0 %v3451_v40  ;;  %v3145_v59 = vpop.f32.mrb[188].mxu1 }
 0x365   : > { %v9001_v47 = vadd.f32 %v3145_v59, %v8775_v46  ;;  %v3147_v24 = vpop.f32.mrb[189].mxu1  ;;  %5815 = vmatprep.mubr.msk.bf16.mxu0 %vm6410_vm0, %v9706_v36 }
 0x366   : > { %v3148_v28 = vpop.f32.mrb[190].mxu1 }
 0x367   : > { %v9006_v9 = vadd.f32 %v3148_v28, %v8779_v63  ;;  %v3150_v38 = vpop.f32.mrb[191].mxu1 }
 0x369   : > { %9844 = vst [vmem:[#allocation60_spill] sm:$0xff] %v9006_v9  ;;  %5900 = vmatmul.mubr.bf16.gmra.mrb[40].mxu1 %v3517_v16  ;;  %v3520_v16 = vld [vmem:[#allocation2 + $0x280] sm:$0xff] }
 0x36a   : > { %5903 = vmatprep.mubr.msk.bf16.mxu1 %vm6410_vm0, %v9706_v36 }
 0x36c   : > { %5816 = vmatmul.mubr.bf16.gmra.mrb[112].mxu0 %v3454_v17  ;;  %v3153_v52 = vpop.f32.mrb[192].mxu1 }
 0x36d   : > { %v9011_v46 = vadd.f32 %v3153_v52, %v8785_v48  ;;  %v3155_v40 = vpop.f32.mrb[193].mxu1 }
 0x36e   : > { %v3156_v59 = vpop.f32.mrb[194].mxu1 }
 0x36f   : > { %v3773_v24 = vpop.f32.mrb[116].mxu0  ;;  %v9014_v4 = vadd.f32 %v3156_v59, %v8790_v37  ;;  %v3158_v63 = vpop.f32.mrb[195].mxu1 }
 0x370   : > { %v9017_v28 = vadd.f32 %v3773_v24, %v8851_v27  ;;  %v3775_v38 = vpop.f32.mrb[117].mxu0 }
 0x371   : > { %v3776_v50 = vpop.f32.mrb[118].mxu0  ;;  %5904 = vmatmul.mubr.bf16.gmra.mrb[44].mxu1 %v3520_v16 }
 0x372   : > { %v9020_v17 = vadd.f32 %v3776_v50, %v8854_v61  ;;  %v3778_v9 = vpop.f32.mrb[119].mxu0  ;;  %5907 = vmatprep.mubr.msk.bf16.mxu1 %vm6410_vm0, %v9706_v36  ;;  %v3523_v61 = vld [vmem:[#allocation2 + $0x298] sm:$0xff] }
 0x374   : > { %v3161_v48 = vpop.f32.mrb[196].mxu1 }
 0x375   : > { %v9025_v52 = vadd.f32 %v3161_v48, %v8796_v53  ;;  %v3163_v37 = vpop.f32.mrb[197].mxu1 }
 0x376   : > { %v3164_v40 = vpop.f32.mrb[198].mxu1 }
 0x377   : > { %v3781_v59 = vpop.f32.mrb[120].mxu0  ;;  %v9028_v27 = vadd.f32 %v3164_v40, %v8801_v20  ;;  %v3166_v24 = vpop.f32.mrb[199].mxu1 }
 0x378   : > { %v9031_v63 = vadd.f32 %v3781_v59, %v8859_v44  ;;  %v3783_v50 = vpop.f32.mrb[121].mxu0 }
 0x379   : > { %v3784_v9 = vpop.f32.mrb[122].mxu0  ;;  %5908 = vmatmul.mubr.bf16.gmra.mrb[48].mxu1 %v3523_v61  ;;  %v3526_v50 = vld [vmem:[#allocation2 + $0x2b0] sm:$0xff] }
 0x37a   : > { %v9034_v38 = vadd.f32 %v3784_v9, %v8862_v45  ;;  %v3786_v16 = vpop.f32.mrb[123].mxu0  ;;  %5911 = vmatprep.mubr.msk.bf16.mxu1 %vm6410_vm0, %v9706_v36 }
 0x37c   : > { %v3169_v53 = vpop.f32.mrb[200].mxu1 }
 0x37d   : > { %v9039_v48 = vadd.f32 %v3169_v53, %v8806_v56  ;;  %v3171_v20 = vpop.f32.mrb[201].mxu1 }
 0x37e   : > { %v3172_v37 = vpop.f32.mrb[202].mxu1 }
 0x37f   : > { %v3789_v40 = vpop.f32.mrb[124].mxu0  ;;  %v9042_v44 = vadd.f32 %v3172_v37, %v8811_v30  ;;  %v3174_v59 = vpop.f32.mrb[203].mxu1 }
 0x380   : > { %v9045_v24 = vadd.f32 %v3789_v40, %v8867_v32  ;;  %v3791_v45 = vpop.f32.mrb[125].mxu0 }
 0x381   : > { %v3792_v61 = vpop.f32.mrb[126].mxu0  ;;  %5912 = vmatmul.mubr.bf16.gmra.mrb[52].mxu1 %v3526_v50 }
 0x382   : > { %v9048_v9 = vadd.f32 %v3792_v61, %v8870_v58  ;;  %v3794_v16 = vpop.f32.mrb[127].mxu0  ;;  %5915 = vmatprep.mubr.msk.bf16.mxu1 %vm6410_vm0, %v9706_v36 }
 0x384   : > { %v3177_v56 = vpop.f32.mrb[204].mxu1 }
 0x385   : > { %v9053_v53 = vadd.f32 %v3177_v56, %v8815_v39  ;;  %v3179_v30 = vpop.f32.mrb[205].mxu1 }
 0x386   : > { %v3180_v20 = vpop.f32.mrb[206].mxu1 }
 0x387   : > { %v3797_v37 = vpop.f32.mrb[128].mxu0  ;;  %v9056_v32 = vadd.f32 %v3180_v20, %v8818_v34  ;;  %v3182_v40 = vpop.f32.mrb[207].mxu1 }
 0x388   : > { %v9059_v59 = vadd.f32 %v3797_v37, %v8875_v21  ;;  %v3799_v58 = vpop.f32.mrb[129].mxu0 }
 0x389   : > { %v3800_v45 = vpop.f32.mrb[130].mxu0  ;;  %5916 = vmatmul.mubr.bf16.gmra.mrb[56].mxu1 %v8981_v12 }
 0x38a   : > { %v9063_v36 = vadd.f32 %v3800_v45, %v8878_v11  ;;  %v3802_v50 = vpop.f32.mrb[131].mxu0 }
 0x38c   : > { %v3185_v39 = vpop.f32.mrb[208].mxu1 }
 0x38d   : > { %v9066_v61 = vadd.f32 %v3185_v39, %v8821_v2  ;;  %v3187_v16 = vpop.f32.mrb[209].mxu1 }
 0x38e   : > { %v3188_v56 = vpop.f32.mrb[210].mxu1 }
 0x38f   : > { %v3805_v34 = vpop.f32.mrb[132].mxu0  ;;  %v9069_v30 = vadd.f32 %v3188_v56, %v8824_v8  ;;  %v3190_v21 = vpop.f32.mrb[211].mxu1 }
 0x390   : > { %v9072_v20 = vadd.f32 %v3805_v34, %v8883_v22  ;;  %v3807_v37 = vpop.f32.mrb[133].mxu0 }
 0x391   : > { %v3808_v12 = vpop.f32.mrb[134].mxu0 }
 0x392   : > { %v9075_v11 = vadd.f32 %v3808_v12, %v8886_v23  ;;  %v3810_v40 = vpop.f32.mrb[135].mxu0 }
 0x394   : > { %v3193_v58 = vpop.f32.mrb[212].mxu1 }
 0x395   : > { %v9078_v2 = vadd.f32 %v3193_v58, %v8827_v51  ;;  %v3195_v45 = vpop.f32.mrb[213].mxu1 }
 0x396   : > { %v3196_v50 = vpop.f32.mrb[214].mxu1 }
 0x397   : > { %v3813_v39 = vpop.f32.mrb[136].mxu0  ;;  %v9081_v8 = vadd.f32 %v3196_v50, %v8830_v19  ;;  %v3198_v16 = vpop.f32.mrb[215].mxu1 }
 0x398   : > { %v9084_v22 = vadd.f32 %v3813_v39, %v8891_v10  ;;  %v3815_v56 = vpop.f32.mrb[137].mxu0 }
 0x399   : > { %v3816_v34 = vpop.f32.mrb[138].mxu0 }
 0x39a   : > { %v9087_v23 = vadd.f32 %v3816_v34, %v8894_v0  ;;  %v3818_v21 = vpop.f32.mrb[139].mxu0 }
 0x39c   : > { %v4022_v37 = vpop.f32.mrb[216].mxu1 }
 0x39d   : > { %v9090_v51 = vadd.f32 %v9017_v28, %v4022_v37  ;;  %v5821_v12 = vpop.f32.mrb[217].mxu1 }
 0x39e   : > { %v4025_v40 = vpop.f32.mrb[218].mxu1 }
 0x39f   : > { %v3821_v58 = vpop.f32.mrb[140].mxu0  ;;  %v9093_v19 = vadd.f32 %v9020_v17, %v4025_v40  ;;  %v5822_v45 = vpop.f32.mrb[219].mxu1 }
 0x3a0   : > { %v9096_v10 = vadd.f32 %v3821_v58, %v8899_v1  ;;  %v3823_v50 = vpop.f32.mrb[141].mxu0 }
 0x3a1   : > { %v3824_v0 = vpop.f32.mrb[142].mxu0  ;;  %v5268_v28 = vpack.c.bf16 %v9093_v19, %v9090_v51 }
 0x3a2   : > { %v9108_v39 = vadd.f32 %v3824_v0, %v8902_v42  ;;  %v3826_v17 = vpop.f32.mrb[143].mxu0 }
 0x3a3   : > { %5417 = vst [vmem:[%s9103_s12 + $0x10] sm:$0xff] %v5268_v28  }
 0x3a4   : > { %v4030_v1 = vpop.f32.mrb[220].mxu1 }
 0x3a5   : > { %v9112_v16 = vadd.f32 %v9031_v63, %v4030_v1  ;;  %v5825_v56 = vpop.f32.mrb[221].mxu1 }
 0x3a6   : > { %v4033_v34 = vpop.f32.mrb[222].mxu1 }
 0x3a7   : > { %v3829_v21 = vpop.f32.mrb[144].mxu0  ;;  %v9115_v37 = vadd.f32 %v9034_v38, %v4033_v34  ;;  %v5826_v12 = vpop.f32.mrb[223].mxu1 }
 0x3a8   : > { %v9118_v40 = vadd.f32 %v3829_v21, %v8907_v7  ;;  %v3831_v58 = vpop.f32.mrb[145].mxu0 }
 0x3a9   : > { %v3832_v42 = vpop.f32.mrb[146].mxu0  ;;  %v5273_v45 = vpack.c.bf16 %v9115_v37, %v9112_v16 }
 0x3aa   : > { %v9123_v50 = vadd.f32 %v3832_v42, %v8910_v43  ;;  %v3834_v63 = vpop.f32.mrb[147].mxu0 }
 0x3ab   : > { %5418 = vst [vmem:[%s9103_s12 + $0x18] sm:$0xff] %v5273_v45  }
 0x3ac   : > { %v4038_v0 = vpop.f32.mrb[224].mxu1 }
 0x3ad   : > { %v9127_v28 = vadd.f32 %v9045_v24, %v4038_v0  ;;  %v5829_v38 = vpop.f32.mrb[225].mxu1 }
 0x3ae   : > { %v4041_v17 = vpop.f32.mrb[226].mxu1 }
 0x3af   : > { %v3837_v1 = vpop.f32.mrb[148].mxu0  ;;  %v9130_v7 = vadd.f32 %v9048_v9, %v4041_v17  ;;  %v5830_v56 = vpop.f32.mrb[227].mxu1 }
 0x3b0   : > { %v9133_v34 = vadd.f32 %v3837_v1, %v8915_v18  ;;  %v3839_v21 = vpop.f32.mrb[149].mxu0 }
 0x3b1   : > { %v3840_v43 = vpop.f32.mrb[150].mxu0  ;;  %v5278_v12 = vpack.c.bf16 %v9130_v7, %v9127_v28 }
 0x3b2   : > { %v9138_v58 = vadd.f32 %v3840_v43, %v8918_v60  ;;  %v3842_v24 = vpop.f32.mrb[151].mxu0 }
 0x3b3   : > { %5419 = vst [vmem:[%s9103_s12 + $0x20] sm:$0xff] %v5278_v12  }
 0x3b4   : > { %v4046_v42 = vpop.f32.mrb[228].mxu1 }
 0x3b5   : > { %v9142_v45 = vadd.f32 %v9059_v59, %v4046_v42  ;;  %v5833_v9 = vpop.f32.mrb[229].mxu1 }
 0x3b6   : > { %v4049_v63 = vpop.f32.mrb[230].mxu1 }
 0x3b7   : > { %v3845_v0 = vpop.f32.mrb[152].mxu0  ;;  %v9145_v18 = vadd.f32 %v9063_v36, %v4049_v63  ;;  %v5834_v38 = vpop.f32.mrb[231].mxu1 }
 0x3b8   : > { %v9148_v17 = vadd.f32 %v3845_v0, %v8923_v3  ;;  %v3847_v1 = vpop.f32.mrb[153].mxu0 }
 0x3b9   : > { %v3848_v60 = vpop.f32.mrb[154].mxu0  ;;  %v5283_v56 = vpack.c.bf16 %v9145_v18, %v9142_v45 }
 0x3ba   : > { %v9153_v21 = vadd.f32 %v3848_v60, %v8926_v57  ;;  %v3850_v59 = vpop.f32.mrb[155].mxu0 }
 0x3bb   : > { %5420 = vst [vmem:[%s9103_s12 + $0x28] sm:$0xff] %v5283_v56  }
 0x3bc   : > { %v4054_v43 = vpop.f32.mrb[232].mxu1 }
 0x3bd   : > { %v9157_v12 = vadd.f32 %v9072_v20, %v4054_v43  ;;  %v5837_v36 = vpop.f32.mrb[233].mxu1 }
 0x3be   : > { %v4057_v24 = vpop.f32.mrb[234].mxu1 }
 0x3bf   : > { %v3853_v42 = vpop.f32.mrb[156].mxu0  ;;  %v9160_v3 = vadd.f32 %v9075_v11, %v4057_v24  ;;  %v5838_v9 = vpop.f32.mrb[235].mxu1 }
 0x3c0   : > { %v9163_v63 = vadd.f32 %v3853_v42, %v8931_v14  ;;  %v3855_v0 = vpop.f32.mrb[157].mxu0 }
 0x3c1   : > { %v3856_v57 = vpop.f32.mrb[158].mxu0  ;;  %v5288_v38 = vpack.c.bf16 %v9160_v3, %v9157_v12 }
 0x3c2   : > { %v9168_v1 = vadd.f32 %v3856_v57, %v8934_v35  ;;  %v3858_v20 = vpop.f32.mrb[159].mxu0 }
 0x3c3   : > { %5421 = vst [vmem:[%s9103_s12 + $0x30] sm:$0xff] %v5288_v38  }
 0x3c4   : > { %v4062_v60 = vpop.f32.mrb[236].mxu1 }
 0x3c5   : > { %v9172_v56 = vadd.f32 %v9084_v22, %v4062_v60  ;;  %v5841_v11 = vpop.f32.mrb[237].mxu1 }
 0x3c6   : > { %v4065_v59 = vpop.f32.mrb[238].mxu1 }
 0x3c7   : > { %v3861_v43 = vpop.f32.mrb[160].mxu0  ;;  %v9175_v14 = vadd.f32 %v9087_v23, %v4065_v59  ;;  %v5842_v36 = vpop.f32.mrb[239].mxu1 }
 0x3c8   : > { %v9178_v24 = vadd.f32 %v3861_v43, %v8939_v6  ;;  %v3863_v42 = vpop.f32.mrb[161].mxu0 }
 0x3c9   : > { %v3864_v35 = vpop.f32.mrb[162].mxu0  ;;  %v5293_v9 = vpack.c.bf16 %v9175_v14, %v9172_v56 }
 0x3ca   : > { %v9183_v0 = vadd.f32 %v3864_v35, %v8942_v49  ;;  %v3866_v22 = vpop.f32.mrb[163].mxu0 }
 0x3cb   : > { %5422 = vst [vmem:[%s9103_s12 + $0x38] sm:$0xff] %v5293_v9  }
 0x3cc   : > { %v4070_v57 = vpop.f32.mrb[240].mxu1 }
 0x3cd   : > { %v9187_v38 = vadd.f32 %v9096_v10, %v4070_v57  ;;  %v5845_v23 = vpop.f32.mrb[241].mxu1 }
 0x3ce   : > { %v4073_v20 = vpop.f32.mrb[242].mxu1 }
 0x3cf   : > { %v3869_v60 = vpop.f32.mrb[164].mxu0  ;;  %v9190_v6 = vadd.f32 %v9108_v39, %v4073_v20  ;;  %v5846_v11 = vpop.f32.mrb[243].mxu1 }
 0x3d0   : > { %v9193_v59 = vadd.f32 %v3869_v60, %v8947_v55  ;;  %v3871_v43 = vpop.f32.mrb[165].mxu0 }
 0x3d1   : > { %v3872_v49 = vpop.f32.mrb[166].mxu0  ;;  %v5298_v36 = vpack.c.bf16 %v9190_v6, %v9187_v38 }
 0x3d2   : > { %v9198_v42 = vadd.f32 %v3872_v49, %v8950_v29  ;;  %v3874_v10 = vpop.f32.mrb[167].mxu0 }
 0x3d3   : > { %5423 = vst [vmem:[%s9103_s12 + $0x40] sm:$0xff] %v5298_v36  }
 0x3d4   : > { %v4078_v35 = vpop.f32.mrb[244].mxu1 }
 0x3d5   : > { %v9202_v9 = vadd.f32 %v9118_v40, %v4078_v35  ;;  %v5849_v39 = vpop.f32.mrb[245].mxu1 }
 0x3d6   : > { %v4081_v22 = vpop.f32.mrb[246].mxu1 }
 0x3d7   : > { %v3877_v57 = vpop.f32.mrb[168].mxu0  ;;  %v9205_v55 = vadd.f32 %v9123_v50, %v4081_v22  ;;  %v5850_v23 = vpop.f32.mrb[247].mxu1 }
 0x3d8   : > { %v9208_v20 = vadd.f32 %v3877_v57, %v8955_v5  ;;  %v3879_v60 = vpop.f32.mrb[169].mxu0 }
 0x3d9   : > { %v3880_v29 = vpop.f32.mrb[170].mxu0  ;;  %v5303_v11 = vpack.c.bf16 %v9205_v55, %v9202_v9 }
 0x3da   : > { %v9213_v43 = vadd.f32 %v3880_v29, %v8958_v26  ;;  %v3882_v40 = vpop.f32.mrb[171].mxu0 }
 0x3db   : > { %5424 = vst [vmem:[%s9103_s12 + $0x48] sm:$0xff] %v5303_v11  }
 0x3dc   : > { %v4086_v49 = vpop.f32.mrb[248].mxu1 }
 0x3dd   : > { %v9217_v36 = vadd.f32 %v9133_v34, %v4086_v49  ;;  %v5853_v50 = vpop.f32.mrb[249].mxu1 }
 0x3de   : > { %v4089_v10 = vpop.f32.mrb[250].mxu1 }
 0x3df   : > { %v3885_v35 = vpop.f32.mrb[172].mxu0  ;;  %v9220_v5 = vadd.f32 %v9138_v58, %v4089_v10  ;;  %v5854_v39 = vpop.f32.mrb[251].mxu1 }
 0x3e0   : > { %v9223_v22 = vadd.f32 %v3885_v35, %v8963_v41  ;;  %v3887_v57 = vpop.f32.mrb[173].mxu0 }
 0x3e1   : > { %v3888_v26 = vpop.f32.mrb[174].mxu0  ;;  %v5308_v23 = vpack.c.bf16 %v9220_v5, %v9217_v36 }
 0x3e2   : > { %v9228_v60 = vadd.f32 %v3888_v26, %v8966_v62  ;;  %v3890_v34 = vpop.f32.mrb[175].mxu0 }
 0x3e3   : > { %5425 = vst [vmem:[%s9103_s12 + $0x50] sm:$0xff] %v5308_v23  }
 0x3e4   : > { %v4094_v29 = vpop.f32.mrb[252].mxu1 }
 0x3e5   : > { %v9232_v11 = vadd.f32 %v9148_v17, %v4094_v29  ;;  %v5857_v58 = vpop.f32.mrb[253].mxu1 }
 0x3e6   : > { %v4097_v40 = vpop.f32.mrb[254].mxu1 }
 0x3e7   : > { %v3893_v49 = vpop.f32.mrb[176].mxu0  ;;  %v9235_v41 = vadd.f32 %v9153_v21, %v4097_v40  ;;  %v5858_v50 = vpop.f32.mrb[255].mxu1 }
 0x3e8   : > { %v9238_v10 = vadd.f32 %v3893_v49, %v8971_v54  ;;  %v3895_v35 = vpop.f32.mrb[177].mxu0 }
 0x3e9   : > { %v3896_v62 = vpop.f32.mrb[178].mxu0  ;;  %v5313_v39 = vpack.c.bf16 %v9235_v41, %v9232_v11 }
 0x3ea   : > { %v9243_v57 = vadd.f32 %v3896_v62, %v8974_v13  ;;  %v3898_v17 = vpop.f32.mrb[179].mxu0 }
 0x3eb   : > { %5426 = vst [vmem:[%s9103_s12 + $0x58] sm:$0xff] %v5313_v39  }
 0x3ec   : > { %v4102_v26 = vpop.f32.mrb[0].mxu1 }
 0x3ed   : > { %v9247_v23 = vadd.f32 %v9163_v63, %v4102_v26  ;;  %v5861_v21 = vpop.f32.mrb[1].mxu1 }
 0x3ee   : > { %v4105_v34 = vpop.f32.mrb[2].mxu1 }
 0x3ef   : > { %v3901_v29 = vpop.f32.mrb[180].mxu0  ;;  %v9250_v54 = vadd.f32 %v9168_v1, %v4105_v34  ;;  %v5862_v58 = vpop.f32.mrb[3].mxu1 }
 0x3f0   : > { %v9253_v40 = vadd.f32 %v3901_v29, %v8979_v31  ;;  %v3903_v49 = vpop.f32.mrb[181].mxu0 }
 0x3f1   : > { %v3904_v13 = vpop.f32.mrb[182].mxu0  ;;  %v5318_v50 = vpack.c.bf16 %v9250_v54, %v9247_v23 }
 0x3f2   : > { %v9258_v35 = vadd.f32 %v3904_v13, %v8985_v33  ;;  %v3906_v63 = vpop.f32.mrb[183].mxu0 }
 0x3f3   : > { %5427 = vst [vmem:[%s9103_s12 + $0x60] sm:$0xff] %v5318_v50  }
 0x3f4   : > { %v4110_v62 = vpop.f32.mrb[4].mxu1 }
 0x3f5   : > { %v9262_v39 = vadd.f32 %v9178_v24, %v4110_v62  ;;  %v5865_v1 = vpop.f32.mrb[5].mxu1 }
 0x3f6   : > { %v4113_v17 = vpop.f32.mrb[6].mxu1 }
 0x3f7   : > { %v3909_v26 = vpop.f32.mrb[184].mxu0  ;;  %v9265_v31 = vadd.f32 %v9183_v0, %v4113_v17  ;;  %v5866_v21 = vpop.f32.mrb[7].mxu1 }
 0x3f8   : > { %v9268_v34 = vadd.f32 %v3909_v26, %v8991_v25  ;;  %v3911_v29 = vpop.f32.mrb[185].mxu0 }
 0x3f9   : > { %v3912_v33 = vpop.f32.mrb[186].mxu0  ;;  %v5323_v58 = vpack.c.bf16 %v9265_v31, %v9262_v39  ;;  %v9845_v29 = vld [vmem:[#allocation60_spill] sm:$0xff] }
 0x3fa   : > { %v9273_v49 = vadd.f32 %v3912_v33, %v8996_v15  ;;  %v3914_v24 = vpop.f32.mrb[187].mxu0 }
 0x3fb   : > { %5428 = vst [vmem:[%s9103_s12 + $0x68] sm:$0xff] %v5323_v58  }
 0x3fc   : > { %v4118_v13 = vpop.f32.mrb[8].mxu1 }
 0x3fd   : > { %v9277_v50 = vadd.f32 %v9193_v59, %v4118_v13  ;;  %v5869_v0 = vpop.f32.mrb[9].mxu1 }
 0x3fe   : > { %v4121_v63 = vpop.f32.mrb[10].mxu1 }
 0x3ff   : > { %v3917_v62 = vpop.f32.mrb[188].mxu0  ;;  %v9280_v25 = vadd.f32 %v9198_v42, %v4121_v63  ;;  %v5870_v1 = vpop.f32.mrb[11].mxu1 }
 0x400   : > { %v9283_v17 = vadd.f32 %v3917_v62, %v9001_v47  ;;  %v3919_v26 = vpop.f32.mrb[189].mxu0 }
 0x401   : > { %v3920_v15 = vpop.f32.mrb[190].mxu0  ;;  %v5328_v21 = vpack.c.bf16 %v9280_v25, %v9277_v50 }
 0x402   : > { %v9288_v33 = vadd.f32 %v3920_v15, %v9845_v29  ;;  %v3922_v59 = vpop.f32.mrb[191].mxu0 }
 0x403   : > { %5429 = vst [vmem:[%s9103_s12 + $0x70] sm:$0xff] %v5328_v21  }
 0x404   : > { %v4126_v58 = vpop.f32.mrb[12].mxu1 }
 0x405   : > { %v9292_v24 = vadd.f32 %v9208_v20, %v4126_v58  ;;  %v5873_v42 = vpop.f32.mrb[13].mxu1 }
 0x406   : > { %v4129_v13 = vpop.f32.mrb[14].mxu1 }
 0x407   : > { %v3925_v0 = vpop.f32.mrb[192].mxu0  ;;  %v9295_v47 = vadd.f32 %v9213_v43, %v4129_v13  ;;  %v5874_v63 = vpop.f32.mrb[15].mxu1 }
 0x408   : > { %v9298_v62 = vadd.f32 %v3925_v0, %v9011_v46  ;;  %v3927_v1 = vpop.f32.mrb[193].mxu0 }
 0x409   : > { %v3928_v26 = vpop.f32.mrb[194].mxu0  ;;  %v5333_v15 = vpack.c.bf16 %v9295_v47, %v9292_v24 }
 0x40a   : > { %v9303_v21 = vadd.f32 %v3928_v26, %v9014_v4  ;;  %v3930_v20 = vpop.f32.mrb[195].mxu0 }
 0x40b   : > { %5430 = vst [vmem:[%s9103_s12 + $0x78] sm:$0xff] %v5333_v15  }
 0x40c   : > { %v4134_v29 = vpop.f32.mrb[16].mxu1 }
 0x40d   : > { %v9307_v59 = vadd.f32 %v9223_v22, %v4134_v29  ;;  %v5877_v43 = vpop.f32.mrb[17].mxu1 }
 0x40e   : > { %v4137_v58 = vpop.f32.mrb[18].mxu1 }
 0x40f   : > { %v3933_v42 = vpop.f32.mrb[196].mxu0  ;;  %v9310_v46 = vadd.f32 %v9228_v60, %v4137_v58  ;;  %v5878_v13 = vpop.f32.mrb[19].mxu1 }
 0x410   : > { %v9313_v0 = vadd.f32 %v3933_v42, %v9025_v52  ;;  %v3935_v63 = vpop.f32.mrb[197].mxu0 }
 0x411   : > { %v3936_v4 = vpop.f32.mrb[198].mxu0  ;;  %v5338_v1 = vpack.c.bf16 %v9310_v46, %v9307_v59 }
 0x412   : > { %v9318_v26 = vadd.f32 %v3936_v4, %v9028_v27  ;;  %v3938_v22 = vpop.f32.mrb[199].mxu0 }
 0x413   : > { %5431 = vst [vmem:[%s9103_s12 + $0x80] sm:$0xff] %v5338_v1  }
 0x414   : > { %v4142_v15 = vpop.f32.mrb[20].mxu1 }
 0x415   : > { %v9322_v20 = vadd.f32 %v9238_v10, %v4142_v15  ;;  %v5881_v60 = vpop.f32.mrb[21].mxu1 }
 0x416   : > { %v4145_v29 = vpop.f32.mrb[22].mxu1 }
 0x417   : > { %v3941_v43 = vpop.f32.mrb[200].mxu0  ;;  %v9325_v52 = vadd.f32 %v9243_v57, %v4145_v29  ;;  %v5882_v58 = vpop.f32.mrb[23].mxu1 }
 0x418   : > { %v9328_v42 = vadd.f32 %v3941_v43, %v9039_v48  ;;  %v3943_v13 = vpop.f32.mrb[201].mxu0 }
 0x419   : > { %v3944_v27 = vpop.f32.mrb[202].mxu0  ;;  %v5343_v63 = vpack.c.bf16 %v9325_v52, %v9322_v20 }
 0x41a   : > { %v9333_v4 = vadd.f32 %v3944_v27, %v9042_v44  ;;  %v3946_v10 = vpop.f32.mrb[203].mxu0 }
 0x41b   : > { %5432 = vst [vmem:[%s9103_s12 + $0x88] sm:$0xff] %v5343_v63  }
 0x41c   : > { %v4150_v1 = vpop.f32.mrb[24].mxu1 }
 0x41d   : > { %v9337_v22 = vadd.f32 %v9253_v40, %v4150_v1  ;;  %v5885_v57 = vpop.f32.mrb[25].mxu1 }
 0x41e   : > { %v4153_v15 = vpop.f32.mrb[26].mxu1 }
 0x41f   : > { %v3949_v60 = vpop.f32.mrb[204].mxu0  ;;  %v9340_v48 = vadd.f32 %v9258_v35, %v4153_v15  ;;  %v5886_v29 = vpop.f32.mrb[27].mxu1 }
 0x420   : > { %v9343_v43 = vadd.f32 %v3949_v60, %v9053_v53  ;;  %v3951_v58 = vpop.f32.mrb[205].mxu0 }
 0x421   : > { %v3952_v44 = vpop.f32.mrb[206].mxu0  ;;  %v5348_v13 = vpack.c.bf16 %v9340_v48, %v9337_v22 }
 0x422   : > { %v9348_v27 = vadd.f32 %v3952_v44, %v9056_v32  ;;  %v3954_v40 = vpop.f32.mrb[207].mxu0 }
 0x423   : > { %5433 = vst [vmem:[%s9103_s12 + $0x90] sm:$0xff] %v5348_v13  }
 0x424   : > { %v4158_v63 = vpop.f32.mrb[28].mxu1 }
 0x425   : > { %v9352_v10 = vadd.f32 %v9268_v34, %v4158_v63  ;;  %v5889_v35 = vpop.f32.mrb[29].mxu1 }
 0x426   : > { %v4161_v1 = vpop.f32.mrb[30].mxu1 }
 0x427   : > { %9846 = vst [vmem:[#allocation61_spill] sm:$0xff] %v9352_v10  ;;  %v3957_v57 = vpop.f32.mrb[208].mxu0  ;;  %v9355_v53 = vadd.f32 %v9273_v49, %v4161_v1  ;;  %v5890_v15 = vpop.f32.mrb[31].mxu1 }
 0x428   : > { %v9358_v60 = vadd.f32 %v3957_v57, %v9066_v61  ;;  %v3959_v29 = vpop.f32.mrb[209].mxu0 }
 0x429   : > { %9847 = vst [vmem:[#allocation62_spill] sm:$0xff] %v9355_v53  ;;  %v3960_v32 = vpop.f32.mrb[210].mxu0  ;;  %v5353_v58 = vpack.c.bf16 %v9355_v53, %v9352_v10 }
 0x42a   : > { %v9363_v44 = vadd.f32 %v3960_v32, %v9069_v30  ;;  %v3962_v34 = vpop.f32.mrb[211].mxu0 }
 0x42b   : > { %5434 = vst [vmem:[%s9103_s12 + $0x98] sm:$0xff] %v5353_v58  }
 0x42c   : > { %v4166_v13 = vpop.f32.mrb[32].mxu1 }
 0x42d   : > { %v9367_v40 = vadd.f32 %v9283_v17, %v4166_v13  ;;  %v5893_v49 = vpop.f32.mrb[33].mxu1 }
 0x42e   : > { %v4169_v63 = vpop.f32.mrb[34].mxu1 }
 0x42f   : > { %9848 = vst [vmem:[#allocation63_spill] sm:$0xff] %v9367_v40  ;;  %v3965_v35 = vpop.f32.mrb[212].mxu0  ;;  %v9370_v61 = vadd.f32 %v9288_v33, %v4169_v63  ;;  %v5894_v1 = vpop.f32.mrb[35].mxu1 }
 0x430   : > { %v9373_v57 = vadd.f32 %v3965_v35, %v9078_v2  ;;  %v3967_v15 = vpop.f32.mrb[213].mxu0  ;;  %v9852_v35 = vld [vmem:[#allocation19_spill] sm:$0xff] }
 0x431   : > { %9849 = vst [vmem:[#allocation64_spill] sm:$0xff] %v9370_v61  ;;  %v3968_v30 = vpop.f32.mrb[214].mxu0  ;;  %v5358_v29 = vpack.c.bf16 %v9370_v61, %v9367_v40  ;;  %v9854_v61 = vld [vmem:[#allocation65_spill] sm:$0xff]  ;;  %v9855_v40 = vld [vmem:[#allocation18_spill] sm:$0xff] }
 0x432   : > { %v9378_v32 = vadd.f32 %v3968_v30, %v9081_v8  ;;  %v3970_v17 = vpop.f32.mrb[215].mxu0 }
 0x433   : > { %5435 = vst [vmem:[%s9103_s12 + $0xa0] sm:$0xff] %v5358_v29   ;;  %v9853_v29 = vld [vmem:[#allocation12_spill] sm:$0xff] }
 0x434   : > { %v4174_v58 = vpop.f32.mrb[36].mxu1 }
 0x435   : > { %v9382_v34 = vadd.f32 %v9298_v62, %v4174_v58  ;;  %v5897_v33 = vpop.f32.mrb[37].mxu1 }
 0x436   : > { %v4177_v13 = vpop.f32.mrb[38].mxu1 }
 0x437   : > { %9850 = vst [vmem:[#allocation66_spill] sm:$0xff] %v9382_v34  ;;  %v4006_v49 = vpop.f32.mrb[108].mxu0  ;;  %v9385_v2 = vadd.f32 %v9303_v21, %v4177_v13  ;;  %v5898_v63 = vpop.f32.mrb[39].mxu1 }
 0x438   : > { %v5937_v1 = vadd.f32 %v4006_v49, %v9852_v35  ;;  %v5813_v15 = vpop.f32.mrb[109].mxu0 }
 0x439   : > { %9851 = vst [vmem:[#allocation67_spill] sm:$0xff] %v9385_v2  ;;  %v4009_v8 = vpop.f32.mrb[110].mxu0  ;;  %v5363_v30 = vpack.c.bf16 %v9385_v2, %v9382_v34 }
 0x43a   : > { %v4545_v17 = vmul.f32 %v5937_v1, %v9853_v29  ;;  %v5940_v62 = vadd.f32 %v4009_v8, %v9854_v61  ;;  %v5814_v58 = vpop.f32.mrb[111].mxu0 }
 0x43b   : > { %5436 = vst [vmem:[%s9103_s12 + $0xa8] sm:$0xff] %v5363_v30   ;;  %v9859_v58 = vld [vmem:[#allocation11_spill] sm:$0xff] }
 0x43c   : > { %v5258_v33 = vpack.c.bf16 %v5940_v62, %v5937_v1  ;;  %v4546_v53 = vmul.f32 %v5940_v62, %v9855_v40  ;;  %v4182_v21 = vpop.f32.mrb[40].mxu1  ;;  %v4659_v49 = vmul.f32 %v4545_v17, %v4545_v17  ;;  %v9858_v1 = vld [vmem:[#allocation16_spill] sm:$0xff] }
 0x43d   : > { %v9395_v13 = vadd.f32 %v9313_v0, %v4182_v21  ;;  %v5901_v63 = vpop.f32.mrb[41].mxu1  ;;  %v9860_v21 = vld [vmem:[#allocation59_spill] sm:$0xff] }
 0x43e   : > { %5259 = vst [vmem:[%s9103_s12] sm:$0xff] %v5258_v33   ;;  %v4599_v35 = vadd.f32 %v4546_v53, %v4545_v17  ;;  %v4660_v15 = vmul.f32 %v4546_v53, %v4546_v53  ;;  %v4185_v2 = vpop.f32.mrb[42].mxu1  ;;  %v9861_v63 = vld [vmem:[#allocation21_spill] sm:$0xff] }
 0x43f   : > { %9856 = vst [vmem:[#allocation68_spill] sm:$0xff] %v9395_v13  ;;  %v4014_v34 = vpop.f32.mrb[112].mxu0  ;;  %v9399_v29 = vadd.f32 %v9318_v26, %v4185_v2  ;;  %v5902_v61 = vpop.f32.mrb[43].mxu1  ;;  %v4549_v10 = vmul.f32 %v9090_v51, %v9861_v63 }
 0x440   : > { %v4713_v8 = vadd.f32 %v4660_v15, %v4659_v49  ;;  %v5943_v30 = vadd.f32 %v4014_v34, %v9858_v1  ;;  %v5817_v40 = vpop.f32.mrb[113].mxu0  ;;  %v9862_v15 = vld [vmem:[#allocation17_spill] sm:$0xff] }
 0x441   : > { %9857 = vst [vmem:[#allocation69_spill] sm:$0xff] %v9399_v29  ;;  %v4017_v62 = vpop.f32.mrb[114].mxu0  ;;  %v5368_v0 = vpack.c.bf16 %v9399_v29, %v9395_v13  ;;  %v9863_v29 = vld [vmem:[#allocation20_spill] sm:$0xff] }
 0x442   : > { %v4547_v33 = vmul.f32 %v5943_v30, %v9859_v58  ;;  %v5946_v17 = vadd.f32 %v4017_v62, %v9860_v21  ;;  %v5818_v53 = vpop.f32.mrb[115].mxu0  ;;  %v4550_v58 = vmul.f32 %v9093_v19, %v9863_v29  ;;  %v9865_v29 = vld [vmem:[#allocation23_spill] sm:$0xff] }
 0x443   : > { %5437 = vst [vmem:[%s9103_s12 + $0xb0] sm:$0xff] %v5368_v0   ;;  %v4663_v0 = vmul.f32 %v4549_v10, %v4549_v10 }
 0x444   : > { %v4600_v26 = vadd.f32 %v4599_v35, %v4547_v33  ;;  %v4661_v2 = vmul.f32 %v4547_v33, %v4547_v33  ;;  %v5263_v49 = vpack.c.bf16 %v5946_v17, %v5943_v30  ;;  %v4548_v34 = vmul.f32 %v5946_v17, %v9862_v15  ;;  %v4190_v61 = vpop.f32.mrb[44].mxu1  ;;  %v9864_v33 = vld [vmem:[#allocation24_spill] sm:$0xff] }
 0x445   : > { %v9411_v1 = vadd.f32 %v9328_v42, %v4190_v61  ;;  %v5905_v40 = vpop.f32.mrb[45].mxu1  ;;  %v4551_v17 = vmul.f32 %v9112_v16, %v9864_v33  ;;  %v4664_v19 = vmul.f32 %v4550_v58, %v4550_v58  ;;  %v9868_v33 = vld [vmem:[#allocation29_spill] sm:$0xff] }
 0x446   : > { %v4714_v13 = vadd.f32 %v4713_v8, %v4661_v2  ;;  %5416 = vst [vmem:[%s9103_s12 + $0x8] sm:$0xff] %v5263_v49   ;;  %v4601_v62 = vadd.f32 %v4600_v26, %v4548_v34  ;;  %v4662_v21 = vmul.f32 %v4548_v34, %v4548_v34  ;;  %v4193_v51 = vpop.f32.mrb[46].mxu1  ;;  %v4552_v8 = vmul.f32 %v9115_v37, %v9865_v29 }
 0x447   : > { %v9417_v35 = vadd.f32 %v9333_v4, %v4193_v51  ;;  %v5906_v30 = vpop.f32.mrb[47].mxu1  ;;  %v4665_v49 = vmul.f32 %v4551_v17, %v4551_v17  ;;  %v9866_v4 = vld [vmem:[#allocation27_spill] sm:$0xff] }
 0x448   : > { %v4602_v42 = vadd.f32 %v4601_v62, %v4549_v10  ;;  %v4715_v53 = vadd.f32 %v4714_v13, %v4662_v21  ;;  %v4553_v15 = vmul.f32 %v9127_v28, %v9866_v4  ;;  %v4666_v13 = vmul.f32 %v4552_v8, %v4552_v8  ;;  %v9867_v62 = vld [vmem:[#allocation26_spill] sm:$0xff] }
 0x449   : > { %v5373_v63 = vpack.c.bf16 %v9417_v35, %v9411_v1  ;;  %v4554_v21 = vmul.f32 %v9130_v7, %v9867_v62 }
 0x44a   : > { %v4603_v26 = vadd.f32 %v4602_v42, %v4550_v58  ;;  %v4716_v2 = vadd.f32 %v4715_v53, %v4663_v0  ;;  %v4667_v28 = vmul.f32 %v4553_v15, %v4553_v15 }
 0x44b   : > { %5438 = vst [vmem:[%s9103_s12 + $0xb8] sm:$0xff] %v5373_v63   ;;  %v4668_v63 = vmul.f32 %v4554_v21, %v4554_v21 }
 0x44c   : > { %v4604_v34 = vadd.f32 %v4603_v26, %v4551_v17  ;;  %v4717_v61 = vadd.f32 %v4716_v2, %v4664_v19  ;;  %v4198_v40 = vpop.f32.mrb[48].mxu1  ;;  %v4555_v17 = vmul.f32 %v9142_v45, %v9868_v33  ;;  %v9869_v19 = vld [vmem:[#allocation28_spill] sm:$0xff] }
 0x44d   : > { %v9429_v16 = vadd.f32 %v9343_v43, %v4198_v40  ;;  %v5909_v10 = vpop.f32.mrb[49].mxu1  ;;  %v4556_v7 = vmul.f32 %v9145_v18, %v9869_v19  ;;  %v9871_v40 = vld [vmem:[#allocation30_spill] sm:$0xff] }
 0x44e   : > { %v4605_v37 = vadd.f32 %v4604_v34, %v4552_v8  ;;  %v4718_v58 = vadd.f32 %v4717_v61, %v4665_v49  ;;  %v4201_v51 = vpop.f32.mrb[50].mxu1  ;;  %v4669_v26 = vmul.f32 %v4555_v17, %v4555_v17  ;;  %v4558_v10 = vmul.f32 %v9160_v3, %v9871_v40 }
 0x44f   : > { %v9434_v30 = vadd.f32 %v9348_v27, %v4201_v51  ;;  %v5910_v0 = vpop.f32.mrb[51].mxu1  ;;  %v9870_v27 = vld [vmem:[#allocation31_spill] sm:$0xff]  ;;  %v4670_v61 = vmul.f32 %v4556_v7, %v4556_v7 }
 0x450   : > { %v4606_v42 = vadd.f32 %v4605_v37, %v4553_v15  ;;  %v4719_v43 = vadd.f32 %v4718_v58, %v4666_v13  ;;  %v4557_v2 = vmul.f32 %v9157_v12, %v9870_v27  ;;  %v9872_v58 = vld [vmem:[#allocation33_spill] sm:$0xff]  ;;  %v4672_v33 = vmul.f32 %v4558_v10, %v4558_v10  ;;  %v9875_v27 = vld [vmem:[#allocation34_spill] sm:$0xff] }
 0x451   : > { %v5378_v53 = vpack.c.bf16 %v9434_v30, %v9429_v16  ;;  %v4559_v51 = vmul.f32 %v9172_v56, %v9872_v58 }
 0x452   : > { %v4607_v29 = vadd.f32 %v4606_v42, %v4554_v21  ;;  %v4720_v8 = vadd.f32 %v4719_v43, %v4667_v28  ;;  %v4671_v12 = vmul.f32 %v4557_v2, %v4557_v2 }
 0x453   : > { %5439 = vst [vmem:[%s9103_s12 + $0xc0] sm:$0xff] %v5378_v53   ;;  %v4673_v53 = vmul.f32 %v4559_v51, %v4559_v51 }
 0x454   : > { %v4608_v49 = vadd.f32 %v4607_v29, %v4555_v17  ;;  %v4721_v4 = vadd.f32 %v4720_v8, %v4668_v63  ;;  %v4206_v34 = vpop.f32.mrb[52].mxu1  ;;  %v9873_v17 = vld [vmem:[#allocation32_spill] sm:$0xff] }
 0x455   : > { %v9446_v45 = vadd.f32 %v9358_v60, %v4206_v34  ;;  %v5913_v15 = vpop.f32.mrb[53].mxu1  ;;  %v4560_v3 = vmul.f32 %v9175_v14, %v9873_v17 }
 0x456   : > { %v4609_v18 = vadd.f32 %v4608_v49, %v4556_v7  ;;  %v4722_v13 = vadd.f32 %v4721_v4, %v4669_v26  ;;  %v4209_v62 = vpop.f32.mrb[54].mxu1 }
 0x457   : > { %v9451_v21 = vadd.f32 %v9363_v44, %v4209_v62  ;;  %v5914_v37 = vpop.f32.mrb[55].mxu1  ;;  %v9874_v44 = vld [vmem:[#allocation35_spill] sm:$0xff]  ;;  %v4674_v26 = vmul.f32 %v4560_v3, %v4560_v3  ;;  %v9877_v62 = vld [vmem:[#allocation36_spill] sm:$0xff] }
 0x458   : > { %v4610_v0 = vadd.f32 %v4609_v18, %v4557_v2  ;;  %v4723_v60 = vadd.f32 %v4722_v13, %v4670_v61  ;;  %v4561_v63 = vmul.f32 %v9187_v38, %v9874_v44  ;;  %v4562_v2 = vmul.f32 %v9190_v6, %v9875_v27  ;;  %v9876_v61 = vld [vmem:[#allocation37_spill] sm:$0xff] }
 0x459   : > { %v5383_v28 = vpack.c.bf16 %v9451_v21, %v9446_v45  ;;  %v4563_v40 = vmul.f32 %v9202_v9, %v9876_v61  ;;  %v4564_v6 = vmul.f32 %v9205_v55, %v9877_v62  ;;  %v9879_v9 = vld [vmem:[#allocation38_spill] sm:$0xff]  ;;  %v9884_v61 = vld [vmem:[#allocation45_spill] sm:$0xff] }
 0x45a   : > { %v4611_v42 = vadd.f32 %v4610_v0, %v4558_v10  ;;  %v4724_v43 = vadd.f32 %v4723_v60, %v4671_v12  ;;  %v4675_v38 = vmul.f32 %v4561_v63, %v4561_v63  ;;  %v4676_v13 = vmul.f32 %v4562_v2, %v4562_v2 }
 0x45b   : > { %5440 = vst [vmem:[%s9103_s12 + $0xc8] sm:$0xff] %v5383_v28   ;;  %v4677_v58 = vmul.f32 %v4563_v40, %v4563_v40  ;;  %v4678_v28 = vmul.f32 %v4564_v6, %v4564_v6 }
 0x45c   : > { %v4612_v19 = vadd.f32 %v4611_v42, %v4559_v51  ;;  %v4725_v7 = vadd.f32 %v4724_v43, %v4672_v33  ;;  %v4214_v29 = vpop.f32.mrb[56].mxu1  ;;  %v4566_v33 = vmul.f32 %v9220_v5, %v9879_v9  ;;  %v9880_v43 = vld [vmem:[#allocation41_spill] sm:$0xff] }
 0x45d   : > { %v9463_v56 = vadd.f32 %v9373_v57, %v4214_v29  ;;  %v5917_v8 = vpop.f32.mrb[57].mxu1  ;;  %v9888_v9 = vld [vmem:[#allocation49_spill] sm:$0xff] }
 0x45e   : > { %v4613_v14 = vadd.f32 %v4612_v19, %v4560_v3  ;;  %v4726_v49 = vadd.f32 %v4725_v7, %v4673_v53  ;;  %v4217_v4 = vpop.f32.mrb[58].mxu1  ;;  %v4567_v53 = vmul.f32 %v9232_v11, %v9880_v43  ;;  %v9881_v19 = vld [vmem:[#allocation40_spill] sm:$0xff] }
 0x45f   : > { %v9468_v34 = vadd.f32 %v9378_v32, %v4217_v4  ;;  %v5918_v15 = vpop.f32.mrb[59].mxu1  ;;  %v9878_v32 = vld [vmem:[#allocation39_spill] sm:$0xff]  ;;  %v4568_v7 = vmul.f32 %v9235_v41, %v9881_v19 }
 0x460   : > { %v4614_v10 = vadd.f32 %v4613_v14, %v4561_v63  ;;  %v4727_v57 = vadd.f32 %v4726_v49, %v4674_v26  ;;  %v4565_v51 = vmul.f32 %v9217_v36, %v9878_v32  ;;  %v4680_v63 = vmul.f32 %v4566_v33, %v4566_v33  ;;  %v9882_v26 = vld [vmem:[#allocation43_spill] sm:$0xff]  ;;  %v9883_v49 = vld [vmem:[#allocation42_spill] sm:$0xff] }
 0x461   : > { %v5388_v18 = vpack.c.bf16 %v9468_v34, %v9463_v56  ;;  %v4681_v8 = vmul.f32 %v4567_v53, %v4567_v53  ;;  %v4569_v27 = vmul.f32 %v9247_v23, %v9882_v26  ;;  %v4682_v14 = vmul.f32 %v4568_v7, %v4568_v7 }
 0x462   : > { %v4615_v37 = vadd.f32 %v4614_v10, %v4562_v2  ;;  %v4728_v12 = vadd.f32 %v4727_v57, %v4675_v38  ;;  %v4679_v42 = vmul.f32 %v4565_v51, %v4565_v51  ;;  %v4570_v4 = vmul.f32 %v9250_v54, %v9883_v49  ;;  %v9893_v49 = vld [vmem:[#allocation52_spill] sm:$0xff] }
 0x463   : > { %5441 = vst [vmem:[%s9103_s12 + $0xd0] sm:$0xff] %v5388_v18   ;;  %v4683_v38 = vmul.f32 %v4569_v27, %v4569_v27  ;;  %v9885_v18 = vld [vmem:[#allocation44_spill] sm:$0xff] }
 0x464   : > { %v4616_v0 = vadd.f32 %v4615_v37, %v4563_v40  ;;  %v4729_v60 = vadd.f32 %v4728_v12, %v4676_v13  ;;  %v4571_v40 = vmul.f32 %v9262_v39, %v9884_v61  ;;  %v4684_v57 = vmul.f32 %v4570_v4, %v4570_v4  ;;  %v9886_v37 = vld [vmem:[#allocation47_spill] sm:$0xff] }
 0x465   : > { %v4572_v13 = vmul.f32 %v9265_v31, %v9885_v18  ;;  %v4573_v12 = vmul.f32 %v9277_v50, %v9886_v37 }
 0x466   : > { %v4617_v17 = vadd.f32 %v4616_v0, %v4564_v6  ;;  %v4730_v3 = vadd.f32 %v4729_v60, %v4677_v58  ;;  %v4685_v6 = vmul.f32 %v4571_v40, %v4571_v40 }
 0x467   : > { %v4686_v32 = vmul.f32 %v4572_v13, %v4572_v13 }
 0x468   : > { %v4618_v55 = vadd.f32 %v4617_v17, %v4565_v51  ;;  %v4731_v44 = vadd.f32 %v4730_v3, %v4678_v28  ;;  %v9887_v51 = vld [vmem:[#allocation46_spill] sm:$0xff]  ;;  %v4687_v28 = vmul.f32 %v4573_v12, %v4573_v12 }
 0x469   : > { %v4574_v0 = vmul.f32 %v9280_v25, %v9887_v51 }
 0x46a   : > { %v4619_v29 = vadd.f32 %v4618_v55, %v4566_v33  ;;  %v4732_v36 = vadd.f32 %v4731_v44, %v4679_v42  ;;  %v4575_v33 = vmul.f32 %v9292_v24, %v9888_v9  ;;  %v9889_v42 = vld [vmem:[#allocation48_spill] sm:$0xff]  ;;  %v9890_v44 = vld [vmem:[#allocation51_spill] sm:$0xff] }
 0x46b   : > { %v4688_v3 = vmul.f32 %v4574_v0, %v4574_v0  ;;  %v4576_v43 = vmul.f32 %v9295_v47, %v9889_v42 }
 0x46c   : > { %v4620_v2 = vadd.f32 %v4619_v29, %v4567_v53  ;;  %v4733_v5 = vadd.f32 %v4732_v36, %v4680_v63  ;;  %v4689_v55 = vmul.f32 %v4575_v33, %v4575_v33  ;;  %v4577_v63 = vmul.f32 %v9307_v59, %v9890_v44  ;;  %v9891_v29 = vld [vmem:[#allocation50_spill] sm:$0xff] }
 0x46d   : > { %v4578_v36 = vmul.f32 %v9310_v46, %v9891_v29  ;;  %v9907_v29 = vld [vmem:[#allocation67_spill] sm:$0xff] }
 0x46e   : > { %v4621_v15 = vadd.f32 %v4620_v2, %v4568_v7  ;;  %v4734_v11 = vadd.f32 %v4733_v5, %v4681_v8  ;;  %v4690_v7 = vmul.f32 %v4576_v43, %v4576_v43  ;;  %v4691_v26 = vmul.f32 %v4577_v63, %v4577_v63 }
 0x470   : > { %v4735_v10 = vadd.f32 %v4734_v11, %v4682_v14  ;;  %v4622_v41 = vadd.f32 %v4621_v15, %v4569_v27  ;;  %v9892_v27 = vld [vmem:[#allocation53_spill] sm:$0xff]  ;;  %v4692_v14 = vmul.f32 %v4578_v36, %v4578_v36 }
 0x471   : > { %v4579_v2 = vmul.f32 %v9322_v20, %v9892_v27  ;;  %v9908_v27 = vld [vmem:[#allocation6_spill] sm:$0xff] }
 0x472   : > { %v4623_v62 = vadd.f32 %v4622_v41, %v4570_v4  ;;  %v4736_v23 = vadd.f32 %v4735_v10, %v4683_v38  ;;  %v4580_v4 = vmul.f32 %v9325_v52, %v9893_v49  ;;  %v9894_v38 = vld [vmem:[#allocation55_spill] sm:$0xff]  ;;  %v9895_v41 = vld [vmem:[#allocation56_spill] sm:$0xff] }
 0x473   : > { %v4693_v11 = vmul.f32 %v4579_v2, %v4579_v2  ;;  %v4581_v61 = vmul.f32 %v9337_v22, %v9894_v38 }
 0x474   : > { %v4624_v58 = vadd.f32 %v4623_v62, %v4571_v40  ;;  %v4737_v54 = vadd.f32 %v4736_v23, %v4684_v57  ;;  %v4694_v10 = vmul.f32 %v4580_v4, %v4580_v4  ;;  %v4582_v57 = vmul.f32 %v9340_v48, %v9895_v41  ;;  %v9896_v62 = vld [vmem:[#allocation3_spill] sm:$0xff]  ;;  %v9897_v23 = vld [vmem:[#allocation61_spill] sm:$0xff] }
 0x476   : > { %v4625_v60 = vadd.f32 %v4624_v58, %v4572_v13  ;;  %v4738_v39 = vadd.f32 %v4737_v54, %v4685_v6  ;;  %v4695_v13 = vmul.f32 %v4581_v61, %v4581_v61  ;;  %v4583_v6 = vmul.f32 %v9897_v23, %v9896_v62  ;;  %v9898_v58 = vld [vmem:[#allocation58_spill] sm:$0xff] }
 0x477   : > { %v9899_v54 = vld [vmem:[#allocation62_spill] sm:$0xff] }
 0x478   : > { %v4626_v17 = vadd.f32 %v4625_v60, %v4573_v12  ;;  %v4739_v31 = vadd.f32 %v4738_v39, %v4686_v32  ;;  %v4696_v12 = vmul.f32 %v4582_v57, %v4582_v57  ;;  %v4584_v32 = vmul.f32 %v9899_v54, %v9898_v58  ;;  %v9900_v60 = vld [vmem:[#allocation57_spill] sm:$0xff]  ;;  %v9901_v39 = vld [vmem:[#allocation63_spill] sm:$0xff] }
 0x47a   : > { %v4627_v53 = vadd.f32 %v4626_v17, %v4574_v0  ;;  %v4740_v50 = vadd.f32 %v4739_v31, %v4687_v28  ;;  %v4697_v0 = vmul.f32 %v4583_v6, %v4583_v6  ;;  %v4585_v28 = vmul.f32 %v9901_v39, %v9900_v60  ;;  %v9902_v17 = vld [vmem:[#allocation4_spill] sm:$0xff]  ;;  %v9916_v39 = vld [vmem:[#allocation10_spill] sm:$0xff] }
 0x47b   : > { %v9903_v31 = vld [vmem:[#allocation64_spill] sm:$0xff] }
 0x47c   : > { %v4628_v19 = vadd.f32 %v4627_v53, %v4575_v33  ;;  %v4741_v25 = vadd.f32 %v4740_v50, %v4688_v3  ;;  %v4698_v33 = vmul.f32 %v4584_v32, %v4584_v32  ;;  %v4586_v3 = vmul.f32 %v9903_v31, %v9902_v17  ;;  %v9904_v50 = vld [vmem:[#allocation5_spill] sm:$0xff] }
 0x47d   : > { %v4699_v53 = vmul.f32 %v4585_v28, %v4585_v28 }
 0x47e   : > { %v4629_v8 = vadd.f32 %v4628_v19, %v4576_v43  ;;  %v4742_v24 = vadd.f32 %v4741_v25, %v4689_v55  ;;  %v9905_v55 = vld [vmem:[#allocation66_spill] sm:$0xff]  ;;  %v4700_v25 = vmul.f32 %v4586_v3, %v4586_v3 }
 0x47f   : > { %v4587_v44 = vmul.f32 %v9905_v55, %v9904_v50  ;;  %v9919_v55 = vld [vmem:[#allocation54_spill] sm:$0xff] }
 0x480   : > { %v4630_v5 = vadd.f32 %v4629_v8, %v4577_v63  ;;  %v4743_v47 = vadd.f32 %v4742_v24, %v4690_v7  ;;  %v9906_v7 = vld [vmem:[#allocation25_spill] sm:$0xff] }
 0x482   : > { %v4631_v15 = vadd.f32 %v4630_v5, %v4578_v36  ;;  %v4744_v59 = vadd.f32 %v4743_v47, %v4691_v26  ;;  %v4588_v36 = vmul.f32 %v9907_v29, %v9906_v7  ;;  %v4701_v26 = vmul.f32 %v4587_v44, %v4587_v44 }
 0x484   : > { %v4632_v40 = vadd.f32 %v4631_v15, %v4579_v2  ;;  %v4745_v46 = vadd.f32 %v4744_v59, %v4692_v14  ;;  %v9909_v2 = vld [vmem:[#allocation68_spill] sm:$0xff]  ;;  %v4702_v49 = vmul.f32 %v4588_v36, %v4588_v36  ;;  %v9911_v15 = vld [vmem:[#allocation69_spill] sm:$0xff] }
 0x485   : > { %v4589_v5 = vmul.f32 %v9909_v2, %v9908_v27 }
 0x486   : > { %v4633_v18 = vadd.f32 %v4632_v40, %v4580_v4  ;;  %v4746_v20 = vadd.f32 %v4745_v46, %v4693_v11  ;;  %v9910_v4 = vld [vmem:[#allocation8_spill] sm:$0xff] }
 0x487   : > { %v4590_v59 = vmul.f32 %v9911_v15, %v9910_v4 }
 0x488   : > { %v4634_v37 = vadd.f32 %v4633_v18, %v4581_v61  ;;  %v4747_v52 = vadd.f32 %v4746_v20, %v4694_v10  ;;  %v4703_v61 = vmul.f32 %v4589_v5, %v4589_v5  ;;  %v9912_v10 = vld [vmem:[#allocation7_spill] sm:$0xff] }
 0x489   : > { %v4591_v41 = vmul.f32 %v9411_v1, %v9912_v10  ;;  %v4704_v18 = vmul.f32 %v4590_v59, %v4590_v59 }
 0x48a   : > { %v4635_v51 = vadd.f32 %v4634_v37, %v4582_v57  ;;  %v4748_v22 = vadd.f32 %v4747_v52, %v4695_v13  ;;  %v9913_v13 = vld [vmem:[#allocation13_spill] sm:$0xff] }
 0x48b   : > { %v4592_v62 = vmul.f32 %v9417_v35, %v9913_v13  ;;  %v4705_v37 = vmul.f32 %v4591_v41, %v4591_v41  ;;  %v9914_v52 = vld [vmem:[#allocation9_spill] sm:$0xff] }
 0x48c   : > { %v4636_v9 = vadd.f32 %v4635_v51, %v4583_v6  ;;  %v4749_v48 = vadd.f32 %v4748_v22, %v4696_v12  ;;  %v4593_v12 = vmul.f32 %v9429_v16, %v9914_v52  ;;  %v9915_v51 = vld [vmem:[#allocation14_spill] sm:$0xff] }
 0x48d   : > { %v4594_v22 = vmul.f32 %v9434_v30, %v9915_v51 }
 0x48e   : > { %v4637_v42 = vadd.f32 %v4636_v9, %v4584_v32  ;;  %v4750_v43 = vadd.f32 %v4749_v48, %v4697_v0  ;;  %v4706_v32 = vmul.f32 %v4592_v62, %v4592_v62  ;;  %v4707_v60 = vmul.f32 %v4593_v12, %v4593_v12 }
 0x48f   : > { %v4708_v48 = vmul.f32 %v4594_v22, %v4594_v22 }
 0x490   : > { %v4638_v63 = vadd.f32 %v4637_v42, %v4585_v28  ;;  %v4751_v19 = vadd.f32 %v4750_v43, %v4698_v33  ;;  %v4595_v28 = vmul.f32 %v9446_v45, %v9916_v39  ;;  %v9917_v33 = vld [vmem:[#allocation22_spill] sm:$0xff]  ;;  %v9918_v42 = vld [vmem:[#allocation15_spill] sm:$0xff] }
 0x491   : > { %v4596_v17 = vmul.f32 %v9451_v21, %v9917_v33  ;;  %v4597_v43 = vmul.f32 %v9463_v56, %v9918_v42 }
 0x492   : > { %v4639_v8 = vadd.f32 %v4638_v63, %v4586_v3  ;;  %v4752_v24 = vadd.f32 %v4751_v19, %v4699_v53  ;;  %v4709_v3 = vmul.f32 %v4595_v28, %v4595_v28 }
 0x493   : > { %v4710_v50 = vmul.f32 %v4596_v17, %v4596_v17  ;;  %v4711_v19 = vmul.f32 %v4597_v43, %v4597_v43 }
 0x494   : > { %v4640_v47 = vadd.f32 %v4639_v8, %v4587_v44  ;;  %v4753_v14 = vadd.f32 %v4752_v24, %v4700_v25  ;;  %v4598_v44 = vmul.f32 %v9468_v34, %v9919_v55 }
 0x496   : > { %v4641_v11 = vadd.f32 %v4640_v47, %v4588_v36  ;;  %v4754_v38 = vadd.f32 %v4753_v14, %v4701_v26  ;;  %v4712_v29 = vmul.f32 %v4598_v44, %v4598_v44 }
 0x498   : > { %v4642_v40 = vadd.f32 %v4641_v11, %v4589_v5  ;;  %v4755_v46 = vadd.f32 %v4754_v38, %v4702_v49 }
 0x49a   : > { %v4643_v57 = vadd.f32 %v4642_v40, %v4590_v59  ;;  %v4756_v20 = vadd.f32 %v4755_v46, %v4703_v61 }
 0x49c   : > { %v4757_v23 = vadd.f32 %v4756_v20, %v4704_v18  ;;  %v4644_v6 = vadd.f32 %v4643_v57, %v4591_v41 }
 0x49e   : > { %v4758_v58 = vadd.f32 %v4757_v23, %v4705_v37  ;;  %v4645_v54 = vadd.f32 %v4644_v6, %v4592_v62 }
 0x4a0   : > { %v4759_v0 = vadd.f32 %v4758_v58, %v4706_v32  ;;  %v4646_v1 = vadd.f32 %v4645_v54, %v4593_v12 }
 0x4a2   : > { %v4760_v9 = vadd.f32 %v4759_v0, %v4707_v60  ;;  %v4647_v35 = vadd.f32 %v4646_v1, %v4594_v22 }
 0x4a4   : > { %v4761_v31 = vadd.f32 %v4760_v9, %v4708_v48  ;;  %v4648_v16 = vadd.f32 %v4647_v35, %v4595_v28 }
 0x4a6   : > { %v4762_v53 = vadd.f32 %v4761_v31, %v4709_v3  ;;  %v4649_v30 = vadd.f32 %v4648_v16, %v4596_v17 }
 0x4a8   : > { %v4763_v45 = vadd.f32 %v4762_v53, %v4710_v50  ;;  %v4650_v63 = vadd.f32 %v4649_v30, %v4597_v43 }
 0x4aa   : > { %v4764_v25 = vadd.f32 %v4763_v45, %v4711_v19  ;;  %v4651_v7 = vadd.f32 %v4650_v63, %v4598_v44 }
 0x4ac   : > { %v4652_v21 = vrot.slane %v4651_v7, 4  ;;  %v4765_v36 = vadd.f32 %v4764_v25, %v4712_v29 }
 0x4ae   : > { %v4653_v8 = vadd.f32 %v4652_v21, %v4651_v7  ;;  %v4766_v24 = vrot.slane %v4765_v36, 4 }
 0x4b0   : > { %v4654_v26 = vrot.slane %v4653_v8, 2  ;;  %v4767_v27 = vadd.f32 %v4766_v24, %v4765_v36 }
 0x4b2   : > { %v4655_v56 = vadd.f32 %v4654_v26, %v4653_v8  ;;  %v4768_v2 = vrot.slane %v4767_v27, 2 }
 0x4b4   : > { %v4656_v5 = vrot.slane %v4655_v56, 1  ;;  %v4769_v47 = vadd.f32 %v4768_v2, %v4767_v27 }
 0x4b6   : > { %v4657_v34 = vadd.f32 %v4656_v5, %v4655_v56  ;;  %v4770_v14 = vrot.slane %v4769_v47, 1 }
 0x4b8   : > { %4658 = vst [vmem:[%s262_s15] sm:$0x1] %v4657_v34  ;;  %v4771_v49 = vadd.f32 %v4770_v14, %v4769_v47 }
 0x4ba   : > { %4772 = vst [vmem:[%s262_s15 + $0x1] sm:$0x1] %v4771_v49 }
 0x4bb PF: > { %s17_s21 = sadd.s32 1, %s6406_s21  }
 0x4bc   : > { %p14_p4 = scmp.ge.s32.totalorder %s17_s21, 4  }
 0x4be   :  { %16 = sbr.rel (!%p14_p4) target bundleno = 1 (0x1), region = 84 }

</bundles_post_ra>
